<compile_context>
chip_gen: v5e
topology: v5e:2x2
jax: 0.10.0
libtpu: 0.0.40
codegen_flags: <defaults>
</compile_context>

<pallas_src>
import math

import numpy as np
import jax
import jax.numpy as jnp
from jax.experimental import pallas as pl
from jax.experimental.pallas import tpu as pltpu

LN_EPS = 1e-5
NEG_INF = -1e30


def _layer_norm(x, g, b):
    m = jnp.mean(x, axis=-1, keepdims=True)
    c = x - m
    v = jnp.mean(c * c, axis=-1, keepdims=True)
    return c * jax.lax.rsqrt(v + LN_EPS) * g + b


def _make_vae_kernel(TB, T, d_num, n_cat, C_total, D, H, L):
    """Builds the kernel body for one batch tile of TB examples (R = TB*T rows)."""
    inv_sqrt_d = 1.0 / math.sqrt(D)

    def transformer(x, stack, attn_bias,
                    wqkv_ref, bqkv_ref, w0_ref, b0_ref, w1_ref, b1_ref,
                    ln0g_ref, ln0b_ref, ln1g_ref, ln1b_ref):
        for l in range(L):
            idx = stack * L + l
            # ---- attention block (pre-norm; layer 0 has no norm0) ----
            xr = x if l == 0 else _layer_norm(x, ln0g_ref[idx], ln0b_ref[idx])
            qkv = jnp.dot(xr, wqkv_ref[idx],
                          preferred_element_type=jnp.float32) + bqkv_ref[idx]
            q = qkv[:, 0:D]
            k = qkv[:, D:2 * D]
            v = qkv[:, 2 * D:3 * D]
            # scores[i, j] = q_i . k_j  (NT matmul), block-diagonal masked.
            s = jax.lax.dot_general(q, k, (((1,), (1,)), ((), ())),
                                    preferred_element_type=jnp.float32) * inv_sqrt_d
            s = s + attn_bias
            s = s - jnp.max(s, axis=-1, keepdims=True)
            e = jnp.exp(s)
            p = e / jnp.sum(e, axis=-1, keepdims=True)
            x = x + jnp.dot(p, v, preferred_element_type=jnp.float32)
            # ---- feed-forward block ----
            xr = _layer_norm(x, ln1g_ref[idx], ln1b_ref[idx])
            ff = jnp.maximum(
                jnp.dot(xr, w0_ref[idx], preferred_element_type=jnp.float32)
                + b0_ref[idx], 0.0)
            ff = jnp.dot(ff, w1_ref[idx],
                         preferred_element_type=jnp.float32) + b1_ref[idx]
            x = x + ff
        return x

    def kernel(x_num_ref, onehot_ref, eps_ref,
               rep_ref, num_sel_ref, cat_sel_ref, tok_sel_ref,
               enc_bias_ref, dec_bias_ref,
               tok_w_ref, tok_bias_ref, cat_tab_ref,
               wqkv_ref, bqkv_ref, w0_ref, b0_ref, w1_ref, b1_ref,
               ln0g_ref, ln0b_ref, ln1g_ref, ln1b_ref,
               h_ref, mu_ref, lv_ref):
        f32 = jnp.float32

        # ---------------- Tokenizer (all 2-D, driven by the MXU) ----------------
        # numeric tokens (incl. CLS): expand per-example numeric row to every
        # token row (rep), keep only the matching token column (num_sel), then
        # scale the corresponding tokenizer weight rows.
        x_exp = jnp.dot(rep_ref[...], x_num_ref[...], preferred_element_type=f32)
        x_tok = jnp.dot(x_exp * num_sel_ref[...], tok_w_ref[...],
                        preferred_element_type=f32)                       # [R, D]
        # categorical tokens: one-hot @ embedding table, scattered to their rows.
        cat_emb = jnp.dot(onehot_ref[...], cat_tab_ref[...],
                          preferred_element_type=f32)                     # [TB*n_cat, D]
        x_tok = x_tok + jnp.dot(cat_sel_ref[...], cat_emb,
                                preferred_element_type=f32)
        # per-token bias (row 0 of tok_bias is the zero CLS row).
        x_tok = x_tok + jnp.dot(tok_sel_ref[...], tok_bias_ref[...],
                                preferred_element_type=f32)

        enc_bias = enc_bias_ref[...]
        dec_bias = dec_bias_ref[...]
        tparams = (wqkv_ref, bqkv_ref, w0_ref, b0_ref, w1_ref, b1_ref,
                   ln0g_ref, ln0b_ref, ln1g_ref, ln1b_ref)

        # ---------------- encoders, reparameterize, decoder ----------------
        mu = transformer(x_tok, 0, enc_bias, *tparams)
        lv = transformer(x_tok, 1, enc_bias, *tparams)
        z = mu + eps_ref[...] * jnp.exp(0.5 * lv)
        # decoder: CLS token kept as a row but masked out of every softmax,
        # exactly equivalent to running on z[:, 1:]; its output row is discarded.
        h = transformer(z, 2, dec_bias, *tparams)

        h_ref[...] = h
        mu_ref[...] = mu
        lv_ref[...] = lv

    return kernel


def _const_spec(shape):
    if len(shape) == 2:
        return pl.BlockSpec(shape, lambda i: (0, 0))
    assert len(shape) == 3
    return pl.BlockSpec(shape, lambda i: (0, 0, 0))


def vae_forward(x_num, x_cat, eps, params, categories, *, TB=8):
    B, d_num = x_num.shape
    n_cat = len(categories)
    C_total = int(sum(categories))
    T = 1 + d_num + n_cat
    D = params["tok_w"].shape[1]
    H = params["w_ffn0"].shape[-1]
    L = params["w_qkv"].shape[0] // 3
    # TODO(synk): mask edge tiles to support B % TB != 0.
    assert B % TB == 0, "batch must be a multiple of the batch tile"
    R = TB * T
    grid = (B // TB,)

    # ---- wrapper glue: ones-column prepend + category ids -> one-hot ----
    x_num_ext = jnp.concatenate(
        [jnp.ones((B, 1), jnp.float32), x_num.astype(jnp.float32)], axis=1)
    offsets = jnp.asarray(
        np.concatenate([[0], np.cumsum(categories)[:-1]]), jnp.int32)
    onehot = jax.nn.one_hot(x_cat + offsets[None, :], C_total, dtype=jnp.float32)
    onehot_flat = onehot.reshape(B * n_cat, C_total)
    eps_flat = eps.reshape(B * T, D).astype(jnp.float32)

    # ---- compile-time structural matrices (identical for every tile) ----
    rt = np.tile(np.arange(T, dtype=np.int32), TB)        # token id per flat row
    rb = np.repeat(np.arange(TB, dtype=np.int32), T)      # example id per flat row
    rep = (rb[:, None] == np.arange(TB)[None, :]).astype(np.float32)
    num_sel = (rt[:, None] == np.arange(d_num + 1)[None, :]).astype(np.float32)
    mcol = np.arange(TB * n_cat)
    cat_sel = ((rb[:, None] == (mcol // n_cat)[None, :]) &
               (rt[:, None] == (d_num + 1 + mcol % n_cat)[None, :])).astype(np.float32)
    tok_sel = (rt[:, None] == np.arange(T)[None, :]).astype(np.float32)
    same = rb[:, None] == rb[None, :]
    enc_bias = np.where(same, 0.0, NEG_INF).astype(np.float32)
    dec_bias = np.where(same & (rt[None, :] != 0), 0.0, NEG_INF).astype(np.float32)

    kernel = _make_vae_kernel(TB, T, d_num, n_cat, C_total, D, H, L)

    in_specs = [
        pl.BlockSpec((TB, d_num + 1), lambda i: (i, 0)),          # x_num (+ones)
        pl.BlockSpec((TB * n_cat, C_total), lambda i: (i, 0)),    # one-hot cats
        pl.BlockSpec((R, D), lambda i: (i, 0)),                   # eps
        _const_spec(rep.shape),
        _const_spec(num_sel.shape),
        _const_spec(cat_sel.shape),
        _const_spec(tok_sel.shape),
        _const_spec(enc_bias.shape),
        _const_spec(dec_bias.shape),
        _const_spec(params["tok_w"].shape),
        _const_spec(params["tok_bias"].shape),
        _const_spec(params["cat_table"].shape),
        _const_spec(params["w_qkv"].shape),
        _const_spec(params["b_qkv"].shape),
        _const_spec(params["w_ffn0"].shape),
        _const_spec(params["b_ffn0"].shape),
        _const_spec(params["w_ffn1"].shape),
        _const_spec(params["b_ffn1"].shape),
        _const_spec(params["ln0_g"].shape),
        _const_spec(params["ln0_b"].shape),
        _const_spec(params["ln1_g"].shape),
        _const_spec(params["ln1_b"].shape),
    ]
    out_specs = [
        pl.BlockSpec((R, D), lambda i: (i, 0)),   # h (all T tokens, CLS dropped later)
        pl.BlockSpec((R, D), lambda i: (i, 0)),   # mu
        pl.BlockSpec((R, D), lambda i: (i, 0)),   # logvar
    ]
    out_shape = [
        jax.ShapeDtypeStruct((B * T, D), jnp.float32),
        jax.ShapeDtypeStruct((B * T, D), jnp.float32),
        jax.ShapeDtypeStruct((B * T, D), jnp.float32),
    ]

    h_flat, mu_flat, lv_flat = pl.pallas_call(
        kernel,
        grid=grid,
        in_specs=in_specs,
        out_specs=out_specs,
        out_shape=out_shape,
        compiler_params=pltpu.CompilerParams(
            dimension_semantics=("parallel",),
            vmem_limit_bytes=32 * 1024 * 1024,
        ),
    )(
        x_num_ext, onehot_flat, eps_flat,
        jnp.asarray(rep), jnp.asarray(num_sel), jnp.asarray(cat_sel),
        jnp.asarray(tok_sel), jnp.asarray(enc_bias), jnp.asarray(dec_bias),
        params["tok_w"], params["tok_bias"], params["cat_table"],
        params["w_qkv"], params["b_qkv"],
        params["w_ffn0"], params["b_ffn0"],
        params["w_ffn1"], params["b_ffn1"],
        params["ln0_g"], params["ln0_b"],
        params["ln1_g"], params["ln1_b"],
    )

    mu = mu_flat.reshape(B, T, D)
    logvar = lv_flat.reshape(B, T, D)
    h = h_flat.reshape(B, T, D)[:, 1:, :]
    return h, mu, logvar


# ----------------------------- pure-JAX reference -----------------------------
def reference_forward(x_num, x_cat, eps, params, categories):
    B, _ = x_num.shape
    D = params["tok_w"].shape[1]
    L = params["w_qkv"].shape[0] // 3
    hp = jax.lax.Precision.HIGHEST

    offsets = jnp.asarray(
        np.concatenate([[0], np.cumsum(categories)[:-1]]), jnp.int32)
    ones = jnp.ones((B, 1), jnp.float32)
    x_full = jnp.concatenate([ones, x_num], axis=1)
    x = params["tok_w"][None, :, :] * x_full[:, :, None]
    cat_emb = params["cat_table"][x_cat + offsets[None, :]]
    x = jnp.concatenate([x, cat_emb], axis=1)
    x = x + params["tok_bias"][None, :, :]

    def layer_norm(h, g, b):
        m = h.mean(-1, keepdims=True)
        c = h - m
        v = (c * c).mean(-1, keepdims=True)
        return c / jnp.sqrt(v + LN_EPS) * g + b

    def transformer(h, s):
        for l in range(L):
            idx = s * L + l
            hr = h if l == 0 else layer_norm(
                h, params["ln0_g"][idx, 0], params["ln0_b"][idx, 0])
            qkv = jnp.einsum("btd,df->btf", hr, params["w_qkv"][idx],
                             precision=hp) + params["b_qkv"][idx, 0]
            q, k, v = qkv[..., :D], qkv[..., D:2 * D], qkv[..., 2 * D:]
            a = jnp.einsum("btd,bsd->bts", q, k, precision=hp) / math.sqrt(D)
            p = jax.nn.softmax(a, axis=-1)
            h = h + jnp.einsum("bts,bsd->btd", p, v, precision=hp)
            hr = layer_norm(h, params["ln1_g"][idx, 0], params["ln1_b"][idx, 0])
            ff = jnp.maximum(
                jnp.einsum("btd,df->btf", hr, params["w_ffn0"][idx], precision=hp)
                + params["b_ffn0"][idx, 0], 0.0)
            ff = jnp.einsum("btf,fd->btd", ff, params["w_ffn1"][idx],
                            precision=hp) + params["b_ffn1"][idx, 0]
            h = h + ff
        return h

    mu = transformer(x, 0)
    logvar = transformer(x, 1)
    z = mu + eps * jnp.exp(0.5 * logvar)
    h = transformer(z[:, 1:, :], 2)
    return h, mu, logvar


def init_params(key, d_numerical, categories, hid_dim, num_layers, factor):
    D = hid_dim
    H = int(D * factor)
    L = num_layers
    n_cat = len(categories)
    C_total = int(sum(categories))
    ks = jax.random.split(key, 8)

    def normal(k, shape, scale):
        return scale * jax.random.normal(k, shape, jnp.float32)

    tok_w = normal(ks[0], (d_numerical + 1, D), 1.0 / math.sqrt(D))
    bias_rows = normal(ks[1], (d_numerical + n_cat, D), 1.0 / math.sqrt(D))
    tok_bias = jnp.concatenate([jnp.zeros((1, D), jnp.float32), bias_rows], axis=0)
    cat_table = normal(ks[2], (C_total, D), 1.0 / math.sqrt(D))

    SL = 3 * L   # encoder_mu, encoder_logvar, decoder stacked
    w_qkv = normal(ks[3], (SL, D, 3 * D), 1.0 / math.sqrt(D))
    b_qkv = jnp.zeros((SL, 1, 3 * D), jnp.float32)        # torch zeros_ on qkv bias
    w_ffn0 = normal(ks[4], (SL, D, H), 1.0 / math.sqrt(D))
    b_ffn0 = normal(ks[5], (SL, 1, H), 0.01)
    w_ffn1 = normal(ks[6], (SL, H, D), 1.0 / math.sqrt(H))
    b_ffn1 = normal(ks[7], (SL, 1, D), 0.01)
    ln0_g = jnp.ones((SL, 1, D), jnp.float32)
    ln0_b = jnp.zeros((SL, 1, D), jnp.float32)
    ln1_g = jnp.ones((SL, 1, D), jnp.float32)
    ln1_b = jnp.zeros((SL, 1, D), jnp.float32)
    return dict(tok_w=tok_w, tok_bias=tok_bias, cat_table=cat_table,
                w_qkv=w_qkv, b_qkv=b_qkv, w_ffn0=w_ffn0, b_ffn0=b_ffn0,
                w_ffn1=w_ffn1, b_ffn1=b_ffn1,
                ln0_g=ln0_g, ln0_b=ln0_b, ln1_g=ln1_g, ln1_b=ln1_b)


if __name__ == "__main__":
    B = 16           # batch (tiled by TB across the grid)
    TB = 8           # batch tile; raise so TB*T >= 128/256 rows in production
    D_NUMERICAL = 4
    CATEGORIES = [3, 5]
    NUM_LAYERS = 2
    HID_DIM = 32
    FACTOR = 4
    N_HEAD = 1       # VAE default; multi-head path not implemented (see TODO)
    n_cat = len(CATEGORIES)
    T = 1 + D_NUMERICAL + n_cat

    key = jax.random.PRNGKey(0)
    k_num, k_cat, k_eps, k_par = jax.random.split(key, 4)

    x_num = jax.random.normal(k_num, (B, D_NUMERICAL), jnp.float32)
    x_cat = jnp.stack(
        [jax.random.randint(jax.random.fold_in(k_cat, j), (B,), 0, CATEGORIES[j])
         for j in range(n_cat)], axis=1).astype(jnp.int32)
    # torch.randn_like(std) inside reparameterize, reproduced deterministically.
    eps = jax.random.normal(k_eps, (B, T, HID_DIM), jnp.float32)

    params = init_params(k_par, D_NUMERICAL, CATEGORIES, HID_DIM, NUM_LAYERS, FACTOR)

    h, mu, logvar = vae_forward(x_num, x_cat, eps, params, CATEGORIES, TB=TB)
    jax.block_until_ready((h, mu, logvar))

    h_r, mu_r, lv_r = reference_forward(x_num, x_cat, eps, params, CATEGORIES)
    np.testing.assert_allclose(np.asarray(mu), np.asarray(mu_r), rtol=2e-2, atol=2e-3)
    np.testing.assert_allclose(np.asarray(logvar), np.asarray(lv_r), rtol=2e-2, atol=2e-3)
    np.testing.assert_allclose(np.asarray(h), np.asarray(h_r), rtol=2e-2, atol=2e-3)

    print("KERNEL_OK")
</pallas_src>

<mosaic_0001>
module attributes {stable_mosaic.version = 11 : i64} {
  func.func @kernel(%arg0: i32, %arg1: memref<8x5xf32, #tpu.memory_space<vmem>>, %arg2: memref<16x8xf32, #tpu.memory_space<vmem>>, %arg3: memref<56x32xf32, #tpu.memory_space<vmem>>, %arg4: memref<56x8xf32, #tpu.memory_space<vmem>>, %arg5: memref<56x5xf32, #tpu.memory_space<vmem>>, %arg6: memref<56x16xf32, #tpu.memory_space<vmem>>, %arg7: memref<56x7xf32, #tpu.memory_space<vmem>>, %arg8: memref<56x56xf32, #tpu.memory_space<vmem>>, %arg9: memref<56x56xf32, #tpu.memory_space<vmem>>, %arg10: memref<5x32xf32, #tpu.memory_space<vmem>>, %arg11: memref<7x32xf32, #tpu.memory_space<vmem>>, %arg12: memref<8x32xf32, #tpu.memory_space<vmem>>, %arg13: memref<6x32x96xf32, #tpu.memory_space<vmem>>, %arg14: memref<6x1x96xf32, #tpu.memory_space<vmem>>, %arg15: memref<6x32x128xf32, #tpu.memory_space<vmem>>, %arg16: memref<6x1x128xf32, #tpu.memory_space<vmem>>, %arg17: memref<6x128x32xf32, #tpu.memory_space<vmem>>, %arg18: memref<6x1x32xf32, #tpu.memory_space<vmem>>, %arg19: memref<6x1x32xf32, #tpu.memory_space<vmem>>, %arg20: memref<6x1x32xf32, #tpu.memory_space<vmem>>, %arg21: memref<6x1x32xf32, #tpu.memory_space<vmem>>, %arg22: memref<6x1x32xf32, #tpu.memory_space<vmem>>, %arg23: memref<56x32xf32, #tpu.memory_space<vmem>>, %arg24: memref<56x32xf32, #tpu.memory_space<vmem>>, %arg25: memref<56x32xf32, #tpu.memory_space<vmem>>) attributes {dimension_semantics = [#tpu.dimension_semantics<parallel>], iteration_bounds = array<i64: 2>, scalar_prefetch = 0 : i64, scratch_operands = 0 : i64, tpu.core_type = #tpu.core_type<tc>, window_params = [{transform_indices = @transform_0, window_bounds = array<i64: 8, 5>}, {transform_indices = @transform_1, window_bounds = array<i64: 16, 8>}, {transform_indices = @transform_2, window_bounds = array<i64: 56, 32>}, {pipeline_mode = #tpu.pipeline_mode<synchronous>, transform_indices = @transform_3, window_bounds = array<i64: 56, 8>}, {pipeline_mode = #tpu.pipeline_mode<synchronous>, transform_indices = @transform_4, window_bounds = array<i64: 56, 5>}, {pipeline_mode = #tpu.pipeline_mode<synchronous>, transform_indices = @transform_5, window_bounds = array<i64: 56, 16>}, {pipeline_mode = #tpu.pipeline_mode<synchronous>, transform_indices = @transform_6, window_bounds = array<i64: 56, 7>}, {pipeline_mode = #tpu.pipeline_mode<synchronous>, transform_indices = @transform_7, window_bounds = array<i64: 56, 56>}, {pipeline_mode = #tpu.pipeline_mode<synchronous>, transform_indices = @transform_8, window_bounds = array<i64: 56, 56>}, {pipeline_mode = #tpu.pipeline_mode<synchronous>, transform_indices = @transform_9, window_bounds = array<i64: 5, 32>}, {pipeline_mode = #tpu.pipeline_mode<synchronous>, transform_indices = @transform_10, window_bounds = array<i64: 7, 32>}, {pipeline_mode = #tpu.pipeline_mode<synchronous>, transform_indices = @transform_11, window_bounds = array<i64: 8, 32>}, {pipeline_mode = #tpu.pipeline_mode<synchronous>, transform_indices = @transform_12, window_bounds = array<i64: 6, 32, 96>}, {pipeline_mode = #tpu.pipeline_mode<synchronous>, transform_indices = @transform_13, window_bounds = array<i64: 6, 1, 96>}, {pipeline_mode = #tpu.pipeline_mode<synchronous>, transform_indices = @transform_14, window_bounds = array<i64: 6, 32, 128>}, {pipeline_mode = #tpu.pipeline_mode<synchronous>, transform_indices = @transform_15, window_bounds = array<i64: 6, 1, 128>}, {pipeline_mode = #tpu.pipeline_mode<synchronous>, transform_indices = @transform_16, window_bounds = array<i64: 6, 128, 32>}, {pipeline_mode = #tpu.pipeline_mode<synchronous>, transform_indices = @transform_17, window_bounds = array<i64: 6, 1, 32>}, {pipeline_mode = #tpu.pipeline_mode<synchronous>, transform_indices = @transform_18, window_bounds = array<i64: 6, 1, 32>}, {pipeline_mode = #tpu.pipeline_mode<synchronous>, transform_indices = @transform_19, window_bounds = array<i64: 6, 1, 32>}, {pipeline_mode = #tpu.pipeline_mode<synchronous>, transform_indices = @transform_20, window_bounds = array<i64: 6, 1, 32>}, {pipeline_mode = #tpu.pipeline_mode<synchronous>, transform_indices = @transform_21, window_bounds = array<i64: 6, 1, 32>}, {transform_indices = @transform_22, window_bounds = array<i64: 56, 32>}, {transform_indices = @transform_23, window_bounds = array<i64: 56, 32>}, {transform_indices = @transform_24, window_bounds = array<i64: 56, 32>}]} {
    %c0 = arith.constant 0 : index
    %c0_0 = arith.constant 0 : index
    %0 = vector.load %arg4[%c0, %c0_0] : memref<56x8xf32, #tpu.memory_space<vmem>>, vector<56x8xf32>
    %c0_1 = arith.constant 0 : index
    %c0_2 = arith.constant 0 : index
    %1 = vector.load %arg1[%c0_1, %c0_2] : memref<8x5xf32, #tpu.memory_space<vmem>>, vector<8x5xf32>
    %cst = arith.constant dense<0.000000e+00> : vector<56x5xf32>
    %2 = tpu.matmul %0, %1, %cst {dimension_numbers = #tpu.dot_dimension_numbers<[1], [0], [0], [1], [0, 0, 1, 1], [], []>} : vector<56x8xf32>, vector<8x5xf32>, vector<56x5xf32> -> vector<56x5xf32>
    %c0_3 = arith.constant 0 : index
    %c0_4 = arith.constant 0 : index
    %3 = vector.load %arg5[%c0_3, %c0_4] : memref<56x5xf32, #tpu.memory_space<vmem>>, vector<56x5xf32>
    %4 = arith.mulf %2, %3 : vector<56x5xf32>
    %c0_5 = arith.constant 0 : index
    %c0_6 = arith.constant 0 : index
    %5 = vector.load %arg10[%c0_5, %c0_6] : memref<5x32xf32, #tpu.memory_space<vmem>>, vector<5x32xf32>
    %cst_7 = arith.constant dense<0.000000e+00> : vector<56x32xf32>
    %6 = tpu.matmul %4, %5, %cst_7 {dimension_numbers = #tpu.dot_dimension_numbers<[1], [0], [0], [1], [0, 0, 1, 1], [], []>} : vector<56x5xf32>, vector<5x32xf32>, vector<56x32xf32> -> vector<56x32xf32>
    %c0_8 = arith.constant 0 : index
    %c0_9 = arith.constant 0 : index
    %7 = vector.load %arg2[%c0_8, %c0_9] : memref<16x8xf32, #tpu.memory_space<vmem>>, vector<16x8xf32>
    %c0_10 = arith.constant 0 : index
    %c0_11 = arith.constant 0 : index
    %8 = vector.load %arg12[%c0_10, %c0_11] : memref<8x32xf32, #tpu.memory_space<vmem>>, vector<8x32xf32>
    %cst_12 = arith.constant dense<0.000000e+00> : vector<16x32xf32>
    %9 = tpu.matmul %7, %8, %cst_12 {dimension_numbers = #tpu.dot_dimension_numbers<[1], [0], [0], [1], [0, 0, 1, 1], [], []>} : vector<16x8xf32>, vector<8x32xf32>, vector<16x32xf32> -> vector<16x32xf32>
    %c0_13 = arith.constant 0 : index
    %c0_14 = arith.constant 0 : index
    %10 = vector.load %arg6[%c0_13, %c0_14] : memref<56x16xf32, #tpu.memory_space<vmem>>, vector<56x16xf32>
    %cst_15 = arith.constant dense<0.000000e+00> : vector<56x32xf32>
    %11 = tpu.matmul %10, %9, %cst_15 {dimension_numbers = #tpu.dot_dimension_numbers<[1], [0], [0], [1], [0, 0, 1, 1], [], []>} : vector<56x16xf32>, vector<16x32xf32>, vector<56x32xf32> -> vector<56x32xf32>
    %12 = arith.addf %6, %11 : vector<56x32xf32>
    %c0_16 = arith.constant 0 : index
    %c0_17 = arith.constant 0 : index
    %13 = vector.load %arg7[%c0_16, %c0_17] : memref<56x7xf32, #tpu.memory_space<vmem>>, vector<56x7xf32>
    %c0_18 = arith.constant 0 : index
    %c0_19 = arith.constant 0 : index
    %14 = vector.load %arg11[%c0_18, %c0_19] : memref<7x32xf32, #tpu.memory_space<vmem>>, vector<7x32xf32>
    %cst_20 = arith.constant dense<0.000000e+00> : vector<56x32xf32>
    %15 = tpu.matmul %13, %14, %cst_20 {dimension_numbers = #tpu.dot_dimension_numbers<[1], [0], [0], [1], [0, 0, 1, 1], [], []>} : vector<56x7xf32>, vector<7x32xf32>, vector<56x32xf32> -> vector<56x32xf32>
    %16 = arith.addf %12, %15 : vector<56x32xf32>
    %c0_21 = arith.constant 0 : index
    %c0_22 = arith.constant 0 : index
    %17 = vector.load %arg8[%c0_21, %c0_22] : memref<56x56xf32, #tpu.memory_space<vmem>>, vector<56x56xf32>
    %c0_23 = arith.constant 0 : index
    %c0_24 = arith.constant 0 : index
    %18 = vector.load %arg9[%c0_23, %c0_24] : memref<56x56xf32, #tpu.memory_space<vmem>>, vector<56x56xf32>
    %c0_25 = arith.constant 0 : index
    %c0_26 = arith.constant 0 : index
    %c0_27 = arith.constant 0 : index
    %19 = vector.load %arg13[%c0_25, %c0_26, %c0_27] : memref<6x32x96xf32, #tpu.memory_space<vmem>>, vector<1x32x96xf32>
    %20 = vector.shape_cast %19 : vector<1x32x96xf32> to vector<32x96xf32>
    %cst_28 = arith.constant dense<0.000000e+00> : vector<56x96xf32>
    %21 = tpu.matmul %16, %20, %cst_28 {dimension_numbers = #tpu.dot_dimension_numbers<[1], [0], [0], [1], [0, 0, 1, 1], [], []>} : vector<56x32xf32>, vector<32x96xf32>, vector<56x96xf32> -> vector<56x96xf32>
    %c0_29 = arith.constant 0 : index
    %c0_30 = arith.constant 0 : index
    %c0_31 = arith.constant 0 : index
    %22 = vector.load %arg14[%c0_29, %c0_30, %c0_31] : memref<6x1x96xf32, #tpu.memory_space<vmem>>, vector<1x1x96xf32>
    %23 = vector.shape_cast %22 : vector<1x1x96xf32> to vector<1x96xf32>
    %24 = vector.broadcast %23 : vector<1x96xf32> to vector<56x96xf32>
    %25 = arith.addf %21, %24 : vector<56x96xf32>
    %26 = vector.extract_strided_slice %25 {offsets = [0, 0], sizes = [56, 32], strides = [1, 1]} : vector<56x96xf32> to vector<56x32xf32>
    %27 = vector.extract_strided_slice %25 {offsets = [0, 32], sizes = [56, 32], strides = [1, 1]} : vector<56x96xf32> to vector<56x32xf32>
    %28 = vector.extract_strided_slice %25 {offsets = [0, 64], sizes = [56, 32], strides = [1, 1]} : vector<56x96xf32> to vector<56x32xf32>
    %cst_32 = arith.constant dense<0.000000e+00> : vector<56x56xf32>
    %29 = tpu.matmul %26, %27, %cst_32 {dimension_numbers = #tpu.dot_dimension_numbers<[1], [1], [0], [0], [0, 0, 1, 0], [], []>} : vector<56x32xf32>, vector<56x32xf32>, vector<56x56xf32> -> vector<56x56xf32>
    %cst_33 = arith.constant 0.176776692 : f32
    %30 = vector.broadcast %cst_33 : f32 to vector<56x56xf32>
    %31 = arith.mulf %29, %30 : vector<56x56xf32>
    %32 = arith.addf %31, %17 : vector<56x56xf32>
    %cst_34 = arith.constant dense<0xFF800000> : vector<56xf32>
    %33 = vector.multi_reduction <maximumf>, %32, %cst_34 [1] : vector<56x56xf32> to vector<56xf32>
    %34 = vector.shape_cast %33 : vector<56xf32> to vector<56x1xf32>
    %35 = vector.broadcast %34 : vector<56x1xf32> to vector<56x56xf32>
    %36 = arith.subf %32, %35 : vector<56x56xf32>
    %37 = math.exp %36 : vector<56x56xf32>
    %cst_35 = arith.constant dense<0.000000e+00> : vector<56xf32>
    %38 = vector.multi_reduction <add>, %37, %cst_35 [1] : vector<56x56xf32> to vector<56xf32>
    %39 = vector.shape_cast %38 : vector<56xf32> to vector<56x1xf32>
    %40 = vector.broadcast %39 : vector<56x1xf32> to vector<56x56xf32>
    %41 = arith.divf %37, %40 : vector<56x56xf32>
    %cst_36 = arith.constant dense<0.000000e+00> : vector<56x32xf32>
    %42 = tpu.matmul %41, %28, %cst_36 {dimension_numbers = #tpu.dot_dimension_numbers<[1], [0], [0], [1], [0, 0, 1, 1], [], []>} : vector<56x56xf32>, vector<56x32xf32>, vector<56x32xf32> -> vector<56x32xf32>
    %43 = arith.addf %16, %42 : vector<56x32xf32>
    %c0_37 = arith.constant 0 : index
    %c0_38 = arith.constant 0 : index
    %c0_39 = arith.constant 0 : index
    %44 = vector.load %arg21[%c0_37, %c0_38, %c0_39] : memref<6x1x32xf32, #tpu.memory_space<vmem>>, vector<1x1x32xf32>
    %45 = vector.shape_cast %44 : vector<1x1x32xf32> to vector<1x32xf32>
    %c0_40 = arith.constant 0 : index
    %c0_41 = arith.constant 0 : index
    %c0_42 = arith.constant 0 : index
    %46 = vector.load %arg22[%c0_40, %c0_41, %c0_42] : memref<6x1x32xf32, #tpu.memory_space<vmem>>, vector<1x1x32xf32>
    %47 = vector.shape_cast %46 : vector<1x1x32xf32> to vector<1x32xf32>
    %cst_43 = arith.constant dense<0.000000e+00> : vector<56xf32>
    %48 = vector.multi_reduction <add>, %43, %cst_43 [1] : vector<56x32xf32> to vector<56xf32>
    %49 = vector.shape_cast %48 : vector<56xf32> to vector<56x1xf32>
    %cst_44 = arith.constant 3.200000e+01 : f32
    %50 = vector.broadcast %cst_44 : f32 to vector<56x1xf32>
    %51 = arith.divf %49, %50 : vector<56x1xf32>
    %52 = vector.broadcast %51 : vector<56x1xf32> to vector<56x32xf32>
    %53 = arith.subf %43, %52 : vector<56x32xf32>
    %54 = arith.mulf %53, %53 : vector<56x32xf32>
    %cst_45 = arith.constant dense<0.000000e+00> : vector<56xf32>
    %55 = vector.multi_reduction <add>, %54, %cst_45 [1] : vector<56x32xf32> to vector<56xf32>
    %56 = vector.shape_cast %55 : vector<56xf32> to vector<56x1xf32>
    %cst_46 = arith.constant 3.200000e+01 : f32
    %57 = vector.broadcast %cst_46 : f32 to vector<56x1xf32>
    %58 = arith.divf %56, %57 : vector<56x1xf32>
    %cst_47 = arith.constant 9.99999974E-6 : f32
    %59 = vector.broadcast %cst_47 : f32 to vector<56x1xf32>
    %60 = arith.addf %58, %59 : vector<56x1xf32>
    %61 = math.rsqrt %60 : vector<56x1xf32>
    %62 = vector.broadcast %61 : vector<56x1xf32> to vector<56x32xf32>
    %63 = arith.mulf %53, %62 : vector<56x32xf32>
    %64 = vector.broadcast %45 : vector<1x32xf32> to vector<56x32xf32>
    %65 = arith.mulf %63, %64 : vector<56x32xf32>
    %66 = vector.broadcast %47 : vector<1x32xf32> to vector<56x32xf32>
    %67 = arith.addf %65, %66 : vector<56x32xf32>
    %c0_48 = arith.constant 0 : index
    %c0_49 = arith.constant 0 : index
    %c0_50 = arith.constant 0 : index
    %68 = vector.load %arg15[%c0_48, %c0_49, %c0_50] : memref<6x32x128xf32, #tpu.memory_space<vmem>>, vector<1x32x128xf32>
    %69 = vector.shape_cast %68 : vector<1x32x128xf32> to vector<32x128xf32>
    %cst_51 = arith.constant dense<0.000000e+00> : vector<56x128xf32>
    %70 = tpu.matmul %67, %69, %cst_51 {dimension_numbers = #tpu.dot_dimension_numbers<[1], [0], [0], [1], [0, 0, 1, 1], [], []>} : vector<56x32xf32>, vector<32x128xf32>, vector<56x128xf32> -> vector<56x128xf32>
    %c0_52 = arith.constant 0 : index
    %c0_53 = arith.constant 0 : index
    %c0_54 = arith.constant 0 : index
    %71 = vector.load %arg16[%c0_52, %c0_53, %c0_54] : memref<6x1x128xf32, #tpu.memory_space<vmem>>, vector<1x1x128xf32>
    %72 = vector.shape_cast %71 : vector<1x1x128xf32> to vector<1x128xf32>
    %73 = vector.broadcast %72 : vector<1x128xf32> to vector<56x128xf32>
    %74 = arith.addf %70, %73 : vector<56x128xf32>
    %cst_55 = arith.constant 0.000000e+00 : f32
    %75 = vector.broadcast %cst_55 : f32 to vector<56x128xf32>
    %76 = arith.maximumf %74, %75 : vector<56x128xf32>
    %c0_56 = arith.constant 0 : index
    %c0_57 = arith.constant 0 : index
    %c0_58 = arith.constant 0 : index
    %77 = vector.load %arg17[%c0_56, %c0_57, %c0_58] : memref<6x128x32xf32, #tpu.memory_space<vmem>>, vector<1x128x32xf32>
    %78 = vector.shape_cast %77 : vector<1x128x32xf32> to vector<128x32xf32>
    %cst_59 = arith.constant dense<0.000000e+00> : vector<56x32xf32>
    %79 = tpu.matmul %76, %78, %cst_59 {dimension_numbers = #tpu.dot_dimension_numbers<[1], [0], [0], [1], [0, 0, 1, 1], [], []>} : vector<56x128xf32>, vector<128x32xf32>, vector<56x32xf32> -> vector<56x32xf32>
    %c0_60 = arith.constant 0 : index
    %c0_61 = arith.constant 0 : index
    %c0_62 = arith.constant 0 : index
    %80 = vector.load %arg18[%c0_60, %c0_61, %c0_62] : memref<6x1x32xf32, #tpu.memory_space<vmem>>, vector<1x1x32xf32>
    %81 = vector.shape_cast %80 : vector<1x1x32xf32> to vector<1x32xf32>
    %82 = vector.broadcast %81 : vector<1x32xf32> to vector<56x32xf32>
    %83 = arith.addf %79, %82 : vector<56x32xf32>
    %84 = arith.addf %43, %83 : vector<56x32xf32>
    %c1 = arith.constant 1 : index
    %c0_63 = arith.constant 0 : index
    %c0_64 = arith.constant 0 : index
    %85 = vector.load %arg19[%c1, %c0_63, %c0_64] : memref<6x1x32xf32, #tpu.memory_space<vmem>>, vector<1x1x32xf32>
    %86 = vector.shape_cast %85 : vector<1x1x32xf32> to vector<1x32xf32>
    %c1_65 = arith.constant 1 : index
    %c0_66 = arith.constant 0 : index
    %c0_67 = arith.constant 0 : index
    %87 = vector.load %arg20[%c1_65, %c0_66, %c0_67] : memref<6x1x32xf32, #tpu.memory_space<vmem>>, vector<1x1x32xf32>
    %88 = vector.shape_cast %87 : vector<1x1x32xf32> to vector<1x32xf32>
    %cst_68 = arith.constant dense<0.000000e+00> : vector<56xf32>
    %89 = vector.multi_reduction <add>, %84, %cst_68 [1] : vector<56x32xf32> to vector<56xf32>
    %90 = vector.shape_cast %89 : vector<56xf32> to vector<56x1xf32>
    %cst_69 = arith.constant 3.200000e+01 : f32
    %91 = vector.broadcast %cst_69 : f32 to vector<56x1xf32>
    %92 = arith.divf %90, %91 : vector<56x1xf32>
    %93 = vector.broadcast %92 : vector<56x1xf32> to vector<56x32xf32>
    %94 = arith.subf %84, %93 : vector<56x32xf32>
    %95 = arith.mulf %94, %94 : vector<56x32xf32>
    %cst_70 = arith.constant dense<0.000000e+00> : vector<56xf32>
    %96 = vector.multi_reduction <add>, %95, %cst_70 [1] : vector<56x32xf32> to vector<56xf32>
    %97 = vector.shape_cast %96 : vector<56xf32> to vector<56x1xf32>
    %cst_71 = arith.constant 3.200000e+01 : f32
    %98 = vector.broadcast %cst_71 : f32 to vector<56x1xf32>
    %99 = arith.divf %97, %98 : vector<56x1xf32>
    %cst_72 = arith.constant 9.99999974E-6 : f32
    %100 = vector.broadcast %cst_72 : f32 to vector<56x1xf32>
    %101 = arith.addf %99, %100 : vector<56x1xf32>
    %102 = math.rsqrt %101 : vector<56x1xf32>
    %103 = vector.broadcast %102 : vector<56x1xf32> to vector<56x32xf32>
    %104 = arith.mulf %94, %103 : vector<56x32xf32>
    %105 = vector.broadcast %86 : vector<1x32xf32> to vector<56x32xf32>
    %106 = arith.mulf %104, %105 : vector<56x32xf32>
    %107 = vector.broadcast %88 : vector<1x32xf32> to vector<56x32xf32>
    %108 = arith.addf %106, %107 : vector<56x32xf32>
    %c1_73 = arith.constant 1 : index
    %c0_74 = arith.constant 0 : index
    %c0_75 = arith.constant 0 : index
    %109 = vector.load %arg13[%c1_73, %c0_74, %c0_75] : memref<6x32x96xf32, #tpu.memory_space<vmem>>, vector<1x32x96xf32>
    %110 = vector.shape_cast %109 : vector<1x32x96xf32> to vector<32x96xf32>
    %cst_76 = arith.constant dense<0.000000e+00> : vector<56x96xf32>
    %111 = tpu.matmul %108, %110, %cst_76 {dimension_numbers = #tpu.dot_dimension_numbers<[1], [0], [0], [1], [0, 0, 1, 1], [], []>} : vector<56x32xf32>, vector<32x96xf32>, vector<56x96xf32> -> vector<56x96xf32>
    %c1_77 = arith.constant 1 : index
    %c0_78 = arith.constant 0 : index
    %c0_79 = arith.constant 0 : index
    %112 = vector.load %arg14[%c1_77, %c0_78, %c0_79] : memref<6x1x96xf32, #tpu.memory_space<vmem>>, vector<1x1x96xf32>
    %113 = vector.shape_cast %112 : vector<1x1x96xf32> to vector<1x96xf32>
    %114 = vector.broadcast %113 : vector<1x96xf32> to vector<56x96xf32>
    %115 = arith.addf %111, %114 : vector<56x96xf32>
    %116 = vector.extract_strided_slice %115 {offsets = [0, 0], sizes = [56, 32], strides = [1, 1]} : vector<56x96xf32> to vector<56x32xf32>
    %117 = vector.extract_strided_slice %115 {offsets = [0, 32], sizes = [56, 32], strides = [1, 1]} : vector<56x96xf32> to vector<56x32xf32>
    %118 = vector.extract_strided_slice %115 {offsets = [0, 64], sizes = [56, 32], strides = [1, 1]} : vector<56x96xf32> to vector<56x32xf32>
    %cst_80 = arith.constant dense<0.000000e+00> : vector<56x56xf32>
    %119 = tpu.matmul %116, %117, %cst_80 {dimension_numbers = #tpu.dot_dimension_numbers<[1], [1], [0], [0], [0, 0, 1, 0], [], []>} : vector<56x32xf32>, vector<56x32xf32>, vector<56x56xf32> -> vector<56x56xf32>
    %cst_81 = arith.constant 0.176776692 : f32
    %120 = vector.broadcast %cst_81 : f32 to vector<56x56xf32>
    %121 = arith.mulf %119, %120 : vector<56x56xf32>
    %122 = arith.addf %121, %17 : vector<56x56xf32>
    %cst_82 = arith.constant dense<0xFF800000> : vector<56xf32>
    %123 = vector.multi_reduction <maximumf>, %122, %cst_82 [1] : vector<56x56xf32> to vector<56xf32>
    %124 = vector.shape_cast %123 : vector<56xf32> to vector<56x1xf32>
    %125 = vector.broadcast %124 : vector<56x1xf32> to vector<56x56xf32>
    %126 = arith.subf %122, %125 : vector<56x56xf32>
    %127 = math.exp %126 : vector<56x56xf32>
    %cst_83 = arith.constant dense<0.000000e+00> : vector<56xf32>
    %128 = vector.multi_reduction <add>, %127, %cst_83 [1] : vector<56x56xf32> to vector<56xf32>
    %129 = vector.shape_cast %128 : vector<56xf32> to vector<56x1xf32>
    %130 = vector.broadcast %129 : vector<56x1xf32> to vector<56x56xf32>
    %131 = arith.divf %127, %130 : vector<56x56xf32>
    %cst_84 = arith.constant dense<0.000000e+00> : vector<56x32xf32>
    %132 = tpu.matmul %131, %118, %cst_84 {dimension_numbers = #tpu.dot_dimension_numbers<[1], [0], [0], [1], [0, 0, 1, 1], [], []>} : vector<56x56xf32>, vector<56x32xf32>, vector<56x32xf32> -> vector<56x32xf32>
    %133 = arith.addf %84, %132 : vector<56x32xf32>
    %c1_85 = arith.constant 1 : index
    %c0_86 = arith.constant 0 : index
    %c0_87 = arith.constant 0 : index
    %134 = vector.load %arg21[%c1_85, %c0_86, %c0_87] : memref<6x1x32xf32, #tpu.memory_space<vmem>>, vector<1x1x32xf32>
    %135 = vector.shape_cast %134 : vector<1x1x32xf32> to vector<1x32xf32>
    %c1_88 = arith.constant 1 : index
    %c0_89 = arith.constant 0 : index
    %c0_90 = arith.constant 0 : index
    %136 = vector.load %arg22[%c1_88, %c0_89, %c0_90] : memref<6x1x32xf32, #tpu.memory_space<vmem>>, vector<1x1x32xf32>
    %137 = vector.shape_cast %136 : vector<1x1x32xf32> to vector<1x32xf32>
    %cst_91 = arith.constant dense<0.000000e+00> : vector<56xf32>
    %138 = vector.multi_reduction <add>, %133, %cst_91 [1] : vector<56x32xf32> to vector<56xf32>
    %139 = vector.shape_cast %138 : vector<56xf32> to vector<56x1xf32>
    %cst_92 = arith.constant 3.200000e+01 : f32
    %140 = vector.broadcast %cst_92 : f32 to vector<56x1xf32>
    %141 = arith.divf %139, %140 : vector<56x1xf32>
    %142 = vector.broadcast %141 : vector<56x1xf32> to vector<56x32xf32>
    %143 = arith.subf %133, %142 : vector<56x32xf32>
    %144 = arith.mulf %143, %143 : vector<56x32xf32>
    %cst_93 = arith.constant dense<0.000000e+00> : vector<56xf32>
    %145 = vector.multi_reduction <add>, %144, %cst_93 [1] : vector<56x32xf32> to vector<56xf32>
    %146 = vector.shape_cast %145 : vector<56xf32> to vector<56x1xf32>
    %cst_94 = arith.constant 3.200000e+01 : f32
    %147 = vector.broadcast %cst_94 : f32 to vector<56x1xf32>
    %148 = arith.divf %146, %147 : vector<56x1xf32>
    %cst_95 = arith.constant 9.99999974E-6 : f32
    %149 = vector.broadcast %cst_95 : f32 to vector<56x1xf32>
    %150 = arith.addf %148, %149 : vector<56x1xf32>
    %151 = math.rsqrt %150 : vector<56x1xf32>
    %152 = vector.broadcast %151 : vector<56x1xf32> to vector<56x32xf32>
    %153 = arith.mulf %143, %152 : vector<56x32xf32>
    %154 = vector.broadcast %135 : vector<1x32xf32> to vector<56x32xf32>
    %155 = arith.mulf %153, %154 : vector<56x32xf32>
    %156 = vector.broadcast %137 : vector<1x32xf32> to vector<56x32xf32>
    %157 = arith.addf %155, %156 : vector<56x32xf32>
    %c1_96 = arith.constant 1 : index
    %c0_97 = arith.constant 0 : index
    %c0_98 = arith.constant 0 : index
    %158 = vector.load %arg15[%c1_96, %c0_97, %c0_98] : memref<6x32x128xf32, #tpu.memory_space<vmem>>, vector<1x32x128xf32>
    %159 = vector.shape_cast %158 : vector<1x32x128xf32> to vector<32x128xf32>
    %cst_99 = arith.constant dense<0.000000e+00> : vector<56x128xf32>
    %160 = tpu.matmul %157, %159, %cst_99 {dimension_numbers = #tpu.dot_dimension_numbers<[1], [0], [0], [1], [0, 0, 1, 1], [], []>} : vector<56x32xf32>, vector<32x128xf32>, vector<56x128xf32> -> vector<56x128xf32>
    %c1_100 = arith.constant 1 : index
    %c0_101 = arith.constant 0 : index
    %c0_102 = arith.constant 0 : index
    %161 = vector.load %arg16[%c1_100, %c0_101, %c0_102] : memref<6x1x128xf32, #tpu.memory_space<vmem>>, vector<1x1x128xf32>
    %162 = vector.shape_cast %161 : vector<1x1x128xf32> to vector<1x128xf32>
    %163 = vector.broadcast %162 : vector<1x128xf32> to vector<56x128xf32>
    %164 = arith.addf %160, %163 : vector<56x128xf32>
    %cst_103 = arith.constant 0.000000e+00 : f32
    %165 = vector.broadcast %cst_103 : f32 to vector<56x128xf32>
    %166 = arith.maximumf %164, %165 : vector<56x128xf32>
    %c1_104 = arith.constant 1 : index
    %c0_105 = arith.constant 0 : index
    %c0_106 = arith.constant 0 : index
    %167 = vector.load %arg17[%c1_104, %c0_105, %c0_106] : memref<6x128x32xf32, #tpu.memory_space<vmem>>, vector<1x128x32xf32>
    %168 = vector.shape_cast %167 : vector<1x128x32xf32> to vector<128x32xf32>
    %cst_107 = arith.constant dense<0.000000e+00> : vector<56x32xf32>
    %169 = tpu.matmul %166, %168, %cst_107 {dimension_numbers = #tpu.dot_dimension_numbers<[1], [0], [0], [1], [0, 0, 1, 1], [], []>} : vector<56x128xf32>, vector<128x32xf32>, vector<56x32xf32> -> vector<56x32xf32>
    %c1_108 = arith.constant 1 : index
    %c0_109 = arith.constant 0 : index
    %c0_110 = arith.constant 0 : index
    %170 = vector.load %arg18[%c1_108, %c0_109, %c0_110] : memref<6x1x32xf32, #tpu.memory_space<vmem>>, vector<1x1x32xf32>
    %171 = vector.shape_cast %170 : vector<1x1x32xf32> to vector<1x32xf32>
    %172 = vector.broadcast %171 : vector<1x32xf32> to vector<56x32xf32>
    %173 = arith.addf %169, %172 : vector<56x32xf32>
    %174 = arith.addf %133, %173 : vector<56x32xf32>
    %c2 = arith.constant 2 : index
    %c0_111 = arith.constant 0 : index
    %c0_112 = arith.constant 0 : index
    %175 = vector.load %arg13[%c2, %c0_111, %c0_112] : memref<6x32x96xf32, #tpu.memory_space<vmem>>, vector<1x32x96xf32>
    %176 = vector.shape_cast %175 : vector<1x32x96xf32> to vector<32x96xf32>
    %cst_113 = arith.constant dense<0.000000e+00> : vector<56x96xf32>
    %177 = tpu.matmul %16, %176, %cst_113 {dimension_numbers = #tpu.dot_dimension_numbers<[1], [0], [0], [1], [0, 0, 1, 1], [], []>} : vector<56x32xf32>, vector<32x96xf32>, vector<56x96xf32> -> vector<56x96xf32>
    %c2_114 = arith.constant 2 : index
    %c0_115 = arith.constant 0 : index
    %c0_116 = arith.constant 0 : index
    %178 = vector.load %arg14[%c2_114, %c0_115, %c0_116] : memref<6x1x96xf32, #tpu.memory_space<vmem>>, vector<1x1x96xf32>
    %179 = vector.shape_cast %178 : vector<1x1x96xf32> to vector<1x96xf32>
    %180 = vector.broadcast %179 : vector<1x96xf32> to vector<56x96xf32>
    %181 = arith.addf %177, %180 : vector<56x96xf32>
    %182 = vector.extract_strided_slice %181 {offsets = [0, 0], sizes = [56, 32], strides = [1, 1]} : vector<56x96xf32> to vector<56x32xf32>
    %183 = vector.extract_strided_slice %181 {offsets = [0, 32], sizes = [56, 32], strides = [1, 1]} : vector<56x96xf32> to vector<56x32xf32>
    %184 = vector.extract_strided_slice %181 {offsets = [0, 64], sizes = [56, 32], strides = [1, 1]} : vector<56x96xf32> to vector<56x32xf32>
    %cst_117 = arith.constant dense<0.000000e+00> : vector<56x56xf32>
    %185 = tpu.matmul %182, %183, %cst_117 {dimension_numbers = #tpu.dot_dimension_numbers<[1], [1], [0], [0], [0, 0, 1, 0], [], []>} : vector<56x32xf32>, vector<56x32xf32>, vector<56x56xf32> -> vector<56x56xf32>
    %cst_118 = arith.constant 0.176776692 : f32
    %186 = vector.broadcast %cst_118 : f32 to vector<56x56xf32>
    %187 = arith.mulf %185, %186 : vector<56x56xf32>
    %188 = arith.addf %187, %17 : vector<56x56xf32>
    %cst_119 = arith.constant dense<0xFF800000> : vector<56xf32>
    %189 = vector.multi_reduction <maximumf>, %188, %cst_119 [1] : vector<56x56xf32> to vector<56xf32>
    %190 = vector.shape_cast %189 : vector<56xf32> to vector<56x1xf32>
    %191 = vector.broadcast %190 : vector<56x1xf32> to vector<56x56xf32>
    %192 = arith.subf %188, %191 : vector<56x56xf32>
    %193 = math.exp %192 : vector<56x56xf32>
    %cst_120 = arith.constant dense<0.000000e+00> : vector<56xf32>
    %194 = vector.multi_reduction <add>, %193, %cst_120 [1] : vector<56x56xf32> to vector<56xf32>
    %195 = vector.shape_cast %194 : vector<56xf32> to vector<56x1xf32>
    %196 = vector.broadcast %195 : vector<56x1xf32> to vector<56x56xf32>
    %197 = arith.divf %193, %196 : vector<56x56xf32>
    %cst_121 = arith.constant dense<0.000000e+00> : vector<56x32xf32>
    %198 = tpu.matmul %197, %184, %cst_121 {dimension_numbers = #tpu.dot_dimension_numbers<[1], [0], [0], [1], [0, 0, 1, 1], [], []>} : vector<56x56xf32>, vector<56x32xf32>, vector<56x32xf32> -> vector<56x32xf32>
    %199 = arith.addf %16, %198 : vector<56x32xf32>
    %c2_122 = arith.constant 2 : index
    %c0_123 = arith.constant 0 : index
    %c0_124 = arith.constant 0 : index
    %200 = vector.load %arg21[%c2_122, %c0_123, %c0_124] : memref<6x1x32xf32, #tpu.memory_space<vmem>>, vector<1x1x32xf32>
    %201 = vector.shape_cast %200 : vector<1x1x32xf32> to vector<1x32xf32>
    %c2_125 = arith.constant 2 : index
    %c0_126 = arith.constant 0 : index
    %c0_127 = arith.constant 0 : index
    %202 = vector.load %arg22[%c2_125, %c0_126, %c0_127] : memref<6x1x32xf32, #tpu.memory_space<vmem>>, vector<1x1x32xf32>
    %203 = vector.shape_cast %202 : vector<1x1x32xf32> to vector<1x32xf32>
    %cst_128 = arith.constant dense<0.000000e+00> : vector<56xf32>
    %204 = vector.multi_reduction <add>, %199, %cst_128 [1] : vector<56x32xf32> to vector<56xf32>
    %205 = vector.shape_cast %204 : vector<56xf32> to vector<56x1xf32>
    %cst_129 = arith.constant 3.200000e+01 : f32
    %206 = vector.broadcast %cst_129 : f32 to vector<56x1xf32>
    %207 = arith.divf %205, %206 : vector<56x1xf32>
    %208 = vector.broadcast %207 : vector<56x1xf32> to vector<56x32xf32>
    %209 = arith.subf %199, %208 : vector<56x32xf32>
    %210 = arith.mulf %209, %209 : vector<56x32xf32>
    %cst_130 = arith.constant dense<0.000000e+00> : vector<56xf32>
    %211 = vector.multi_reduction <add>, %210, %cst_130 [1] : vector<56x32xf32> to vector<56xf32>
    %212 = vector.shape_cast %211 : vector<56xf32> to vector<56x1xf32>
    %cst_131 = arith.constant 3.200000e+01 : f32
    %213 = vector.broadcast %cst_131 : f32 to vector<56x1xf32>
    %214 = arith.divf %212, %213 : vector<56x1xf32>
    %cst_132 = arith.constant 9.99999974E-6 : f32
    %215 = vector.broadcast %cst_132 : f32 to vector<56x1xf32>
    %216 = arith.addf %214, %215 : vector<56x1xf32>
    %217 = math.rsqrt %216 : vector<56x1xf32>
    %218 = vector.broadcast %217 : vector<56x1xf32> to vector<56x32xf32>
    %219 = arith.mulf %209, %218 : vector<56x32xf32>
    %220 = vector.broadcast %201 : vector<1x32xf32> to vector<56x32xf32>
    %221 = arith.mulf %219, %220 : vector<56x32xf32>
    %222 = vector.broadcast %203 : vector<1x32xf32> to vector<56x32xf32>
    %223 = arith.addf %221, %222 : vector<56x32xf32>
    %c2_133 = arith.constant 2 : index
    %c0_134 = arith.constant 0 : index
    %c0_135 = arith.constant 0 : index
    %224 = vector.load %arg15[%c2_133, %c0_134, %c0_135] : memref<6x32x128xf32, #tpu.memory_space<vmem>>, vector<1x32x128xf32>
    %225 = vector.shape_cast %224 : vector<1x32x128xf32> to vector<32x128xf32>
    %cst_136 = arith.constant dense<0.000000e+00> : vector<56x128xf32>
    %226 = tpu.matmul %223, %225, %cst_136 {dimension_numbers = #tpu.dot_dimension_numbers<[1], [0], [0], [1], [0, 0, 1, 1], [], []>} : vector<56x32xf32>, vector<32x128xf32>, vector<56x128xf32> -> vector<56x128xf32>
    %c2_137 = arith.constant 2 : index
    %c0_138 = arith.constant 0 : index
    %c0_139 = arith.constant 0 : index
    %227 = vector.load %arg16[%c2_137, %c0_138, %c0_139] : memref<6x1x128xf32, #tpu.memory_space<vmem>>, vector<1x1x128xf32>
    %228 = vector.shape_cast %227 : vector<1x1x128xf32> to vector<1x128xf32>
    %229 = vector.broadcast %228 : vector<1x128xf32> to vector<56x128xf32>
    %230 = arith.addf %226, %229 : vector<56x128xf32>
    %cst_140 = arith.constant 0.000000e+00 : f32
    %231 = vector.broadcast %cst_140 : f32 to vector<56x128xf32>
    %232 = arith.maximumf %230, %231 : vector<56x128xf32>
    %c2_141 = arith.constant 2 : index
    %c0_142 = arith.constant 0 : index
    %c0_143 = arith.constant 0 : index
    %233 = vector.load %arg17[%c2_141, %c0_142, %c0_143] : memref<6x128x32xf32, #tpu.memory_space<vmem>>, vector<1x128x32xf32>
    %234 = vector.shape_cast %233 : vector<1x128x32xf32> to vector<128x32xf32>
    %cst_144 = arith.constant dense<0.000000e+00> : vector<56x32xf32>
    %235 = tpu.matmul %232, %234, %cst_144 {dimension_numbers = #tpu.dot_dimension_numbers<[1], [0], [0], [1], [0, 0, 1, 1], [], []>} : vector<56x128xf32>, vector<128x32xf32>, vector<56x32xf32> -> vector<56x32xf32>
    %c2_145 = arith.constant 2 : index
    %c0_146 = arith.constant 0 : index
    %c0_147 = arith.constant 0 : index
    %236 = vector.load %arg18[%c2_145, %c0_146, %c0_147] : memref<6x1x32xf32, #tpu.memory_space<vmem>>, vector<1x1x32xf32>
    %237 = vector.shape_cast %236 : vector<1x1x32xf32> to vector<1x32xf32>
    %238 = vector.broadcast %237 : vector<1x32xf32> to vector<56x32xf32>
    %239 = arith.addf %235, %238 : vector<56x32xf32>
    %240 = arith.addf %199, %239 : vector<56x32xf32>
    %c3 = arith.constant 3 : index
    %c0_148 = arith.constant 0 : index
    %c0_149 = arith.constant 0 : index
    %241 = vector.load %arg19[%c3, %c0_148, %c0_149] : memref<6x1x32xf32, #tpu.memory_space<vmem>>, vector<1x1x32xf32>
    %242 = vector.shape_cast %241 : vector<1x1x32xf32> to vector<1x32xf32>
    %c3_150 = arith.constant 3 : index
    %c0_151 = arith.constant 0 : index
    %c0_152 = arith.constant 0 : index
    %243 = vector.load %arg20[%c3_150, %c0_151, %c0_152] : memref<6x1x32xf32, #tpu.memory_space<vmem>>, vector<1x1x32xf32>
    %244 = vector.shape_cast %243 : vector<1x1x32xf32> to vector<1x32xf32>
    %cst_153 = arith.constant dense<0.000000e+00> : vector<56xf32>
    %245 = vector.multi_reduction <add>, %240, %cst_153 [1] : vector<56x32xf32> to vector<56xf32>
    %246 = vector.shape_cast %245 : vector<56xf32> to vector<56x1xf32>
    %cst_154 = arith.constant 3.200000e+01 : f32
    %247 = vector.broadcast %cst_154 : f32 to vector<56x1xf32>
    %248 = arith.divf %246, %247 : vector<56x1xf32>
    %249 = vector.broadcast %248 : vector<56x1xf32> to vector<56x32xf32>
    %250 = arith.subf %240, %249 : vector<56x32xf32>
    %251 = arith.mulf %250, %250 : vector<56x32xf32>
    %cst_155 = arith.constant dense<0.000000e+00> : vector<56xf32>
    %252 = vector.multi_reduction <add>, %251, %cst_155 [1] : vector<56x32xf32> to vector<56xf32>
    %253 = vector.shape_cast %252 : vector<56xf32> to vector<56x1xf32>
    %cst_156 = arith.constant 3.200000e+01 : f32
    %254 = vector.broadcast %cst_156 : f32 to vector<56x1xf32>
    %255 = arith.divf %253, %254 : vector<56x1xf32>
    %cst_157 = arith.constant 9.99999974E-6 : f32
    %256 = vector.broadcast %cst_157 : f32 to vector<56x1xf32>
    %257 = arith.addf %255, %256 : vector<56x1xf32>
    %258 = math.rsqrt %257 : vector<56x1xf32>
    %259 = vector.broadcast %258 : vector<56x1xf32> to vector<56x32xf32>
    %260 = arith.mulf %250, %259 : vector<56x32xf32>
    %261 = vector.broadcast %242 : vector<1x32xf32> to vector<56x32xf32>
    %262 = arith.mulf %260, %261 : vector<56x32xf32>
    %263 = vector.broadcast %244 : vector<1x32xf32> to vector<56x32xf32>
    %264 = arith.addf %262, %263 : vector<56x32xf32>
    %c3_158 = arith.constant 3 : index
    %c0_159 = arith.constant 0 : index
    %c0_160 = arith.constant 0 : index
    %265 = vector.load %arg13[%c3_158, %c0_159, %c0_160] : memref<6x32x96xf32, #tpu.memory_space<vmem>>, vector<1x32x96xf32>
    %266 = vector.shape_cast %265 : vector<1x32x96xf32> to vector<32x96xf32>
    %cst_161 = arith.constant dense<0.000000e+00> : vector<56x96xf32>
    %267 = tpu.matmul %264, %266, %cst_161 {dimension_numbers = #tpu.dot_dimension_numbers<[1], [0], [0], [1], [0, 0, 1, 1], [], []>} : vector<56x32xf32>, vector<32x96xf32>, vector<56x96xf32> -> vector<56x96xf32>
    %c3_162 = arith.constant 3 : index
    %c0_163 = arith.constant 0 : index
    %c0_164 = arith.constant 0 : index
    %268 = vector.load %arg14[%c3_162, %c0_163, %c0_164] : memref<6x1x96xf32, #tpu.memory_space<vmem>>, vector<1x1x96xf32>
    %269 = vector.shape_cast %268 : vector<1x1x96xf32> to vector<1x96xf32>
    %270 = vector.broadcast %269 : vector<1x96xf32> to vector<56x96xf32>
    %271 = arith.addf %267, %270 : vector<56x96xf32>
    %272 = vector.extract_strided_slice %271 {offsets = [0, 0], sizes = [56, 32], strides = [1, 1]} : vector<56x96xf32> to vector<56x32xf32>
    %273 = vector.extract_strided_slice %271 {offsets = [0, 32], sizes = [56, 32], strides = [1, 1]} : vector<56x96xf32> to vector<56x32xf32>
    %274 = vector.extract_strided_slice %271 {offsets = [0, 64], sizes = [56, 32], strides = [1, 1]} : vector<56x96xf32> to vector<56x32xf32>
    %cst_165 = arith.constant dense<0.000000e+00> : vector<56x56xf32>
    %275 = tpu.matmul %272, %273, %cst_165 {dimension_numbers = #tpu.dot_dimension_numbers<[1], [1], [0], [0], [0, 0, 1, 0], [], []>} : vector<56x32xf32>, vector<56x32xf32>, vector<56x56xf32> -> vector<56x56xf32>
    %cst_166 = arith.constant 0.176776692 : f32
    %276 = vector.broadcast %cst_166 : f32 to vector<56x56xf32>
    %277 = arith.mulf %275, %276 : vector<56x56xf32>
    %278 = arith.addf %277, %17 : vector<56x56xf32>
    %cst_167 = arith.constant dense<0xFF800000> : vector<56xf32>
    %279 = vector.multi_reduction <maximumf>, %278, %cst_167 [1] : vector<56x56xf32> to vector<56xf32>
    %280 = vector.shape_cast %279 : vector<56xf32> to vector<56x1xf32>
    %281 = vector.broadcast %280 : vector<56x1xf32> to vector<56x56xf32>
    %282 = arith.subf %278, %281 : vector<56x56xf32>
    %283 = math.exp %282 : vector<56x56xf32>
    %cst_168 = arith.constant dense<0.000000e+00> : vector<56xf32>
    %284 = vector.multi_reduction <add>, %283, %cst_168 [1] : vector<56x56xf32> to vector<56xf32>
    %285 = vector.shape_cast %284 : vector<56xf32> to vector<56x1xf32>
    %286 = vector.broadcast %285 : vector<56x1xf32> to vector<56x56xf32>
    %287 = arith.divf %283, %286 : vector<56x56xf32>
    %cst_169 = arith.constant dense<0.000000e+00> : vector<56x32xf32>
    %288 = tpu.matmul %287, %274, %cst_169 {dimension_numbers = #tpu.dot_dimension_numbers<[1], [0], [0], [1], [0, 0, 1, 1], [], []>} : vector<56x56xf32>, vector<56x32xf32>, vector<56x32xf32> -> vector<56x32xf32>
    %289 = arith.addf %240, %288 : vector<56x32xf32>
    %c3_170 = arith.constant 3 : index
    %c0_171 = arith.constant 0 : index
    %c0_172 = arith.constant 0 : index
    %290 = vector.load %arg21[%c3_170, %c0_171, %c0_172] : memref<6x1x32xf32, #tpu.memory_space<vmem>>, vector<1x1x32xf32>
    %291 = vector.shape_cast %290 : vector<1x1x32xf32> to vector<1x32xf32>
    %c3_173 = arith.constant 3 : index
    %c0_174 = arith.constant 0 : index
    %c0_175 = arith.constant 0 : index
    %292 = vector.load %arg22[%c3_173, %c0_174, %c0_175] : memref<6x1x32xf32, #tpu.memory_space<vmem>>, vector<1x1x32xf32>
    %293 = vector.shape_cast %292 : vector<1x1x32xf32> to vector<1x32xf32>
    %cst_176 = arith.constant dense<0.000000e+00> : vector<56xf32>
    %294 = vector.multi_reduction <add>, %289, %cst_176 [1] : vector<56x32xf32> to vector<56xf32>
    %295 = vector.shape_cast %294 : vector<56xf32> to vector<56x1xf32>
    %cst_177 = arith.constant 3.200000e+01 : f32
    %296 = vector.broadcast %cst_177 : f32 to vector<56x1xf32>
    %297 = arith.divf %295, %296 : vector<56x1xf32>
    %298 = vector.broadcast %297 : vector<56x1xf32> to vector<56x32xf32>
    %299 = arith.subf %289, %298 : vector<56x32xf32>
    %300 = arith.mulf %299, %299 : vector<56x32xf32>
    %cst_178 = arith.constant dense<0.000000e+00> : vector<56xf32>
    %301 = vector.multi_reduction <add>, %300, %cst_178 [1] : vector<56x32xf32> to vector<56xf32>
    %302 = vector.shape_cast %301 : vector<56xf32> to vector<56x1xf32>
    %cst_179 = arith.constant 3.200000e+01 : f32
    %303 = vector.broadcast %cst_179 : f32 to vector<56x1xf32>
    %304 = arith.divf %302, %303 : vector<56x1xf32>
    %cst_180 = arith.constant 9.99999974E-6 : f32
    %305 = vector.broadcast %cst_180 : f32 to vector<56x1xf32>
    %306 = arith.addf %304, %305 : vector<56x1xf32>
    %307 = math.rsqrt %306 : vector<56x1xf32>
    %308 = vector.broadcast %307 : vector<56x1xf32> to vector<56x32xf32>
    %309 = arith.mulf %299, %308 : vector<56x32xf32>
    %310 = vector.broadcast %291 : vector<1x32xf32> to vector<56x32xf32>
    %311 = arith.mulf %309, %310 : vector<56x32xf32>
    %312 = vector.broadcast %293 : vector<1x32xf32> to vector<56x32xf32>
    %313 = arith.addf %311, %312 : vector<56x32xf32>
    %c3_181 = arith.constant 3 : index
    %c0_182 = arith.constant 0 : index
    %c0_183 = arith.constant 0 : index
    %314 = vector.load %arg15[%c3_181, %c0_182, %c0_183] : memref<6x32x128xf32, #tpu.memory_space<vmem>>, vector<1x32x128xf32>
    %315 = vector.shape_cast %314 : vector<1x32x128xf32> to vector<32x128xf32>
    %cst_184 = arith.constant dense<0.000000e+00> : vector<56x128xf32>
    %316 = tpu.matmul %313, %315, %cst_184 {dimension_numbers = #tpu.dot_dimension_numbers<[1], [0], [0], [1], [0, 0, 1, 1], [], []>} : vector<56x32xf32>, vector<32x128xf32>, vector<56x128xf32> -> vector<56x128xf32>
    %c3_185 = arith.constant 3 : index
    %c0_186 = arith.constant 0 : index
    %c0_187 = arith.constant 0 : index
    %317 = vector.load %arg16[%c3_185, %c0_186, %c0_187] : memref<6x1x128xf32, #tpu.memory_space<vmem>>, vector<1x1x128xf32>
    %318 = vector.shape_cast %317 : vector<1x1x128xf32> to vector<1x128xf32>
    %319 = vector.broadcast %318 : vector<1x128xf32> to vector<56x128xf32>
    %320 = arith.addf %316, %319 : vector<56x128xf32>
    %cst_188 = arith.constant 0.000000e+00 : f32
    %321 = vector.broadcast %cst_188 : f32 to vector<56x128xf32>
    %322 = arith.maximumf %320, %321 : vector<56x128xf32>
    %c3_189 = arith.constant 3 : index
    %c0_190 = arith.constant 0 : index
    %c0_191 = arith.constant 0 : index
    %323 = vector.load %arg17[%c3_189, %c0_190, %c0_191] : memref<6x128x32xf32, #tpu.memory_space<vmem>>, vector<1x128x32xf32>
    %324 = vector.shape_cast %323 : vector<1x128x32xf32> to vector<128x32xf32>
    %cst_192 = arith.constant dense<0.000000e+00> : vector<56x32xf32>
    %325 = tpu.matmul %322, %324, %cst_192 {dimension_numbers = #tpu.dot_dimension_numbers<[1], [0], [0], [1], [0, 0, 1, 1], [], []>} : vector<56x128xf32>, vector<128x32xf32>, vector<56x32xf32> -> vector<56x32xf32>
    %c3_193 = arith.constant 3 : index
    %c0_194 = arith.constant 0 : index
    %c0_195 = arith.constant 0 : index
    %326 = vector.load %arg18[%c3_193, %c0_194, %c0_195] : memref<6x1x32xf32, #tpu.memory_space<vmem>>, vector<1x1x32xf32>
    %327 = vector.shape_cast %326 : vector<1x1x32xf32> to vector<1x32xf32>
    %328 = vector.broadcast %327 : vector<1x32xf32> to vector<56x32xf32>
    %329 = arith.addf %325, %328 : vector<56x32xf32>
    %330 = arith.addf %289, %329 : vector<56x32xf32>
    %c0_196 = arith.constant 0 : index
    %c0_197 = arith.constant 0 : index
    %331 = vector.load %arg3[%c0_196, %c0_197] : memref<56x32xf32, #tpu.memory_space<vmem>>, vector<56x32xf32>
    %cst_198 = arith.constant 5.000000e-01 : f32
    %332 = vector.broadcast %cst_198 : f32 to vector<56x32xf32>
    %333 = arith.mulf %332, %330 : vector<56x32xf32>
    %334 = math.exp %333 : vector<56x32xf32>
    %335 = arith.mulf %331, %334 : vector<56x32xf32>
    %336 = arith.addf %174, %335 : vector<56x32xf32>
    %c4 = arith.constant 4 : index
    %c0_199 = arith.constant 0 : index
    %c0_200 = arith.constant 0 : index
    %337 = vector.load %arg13[%c4, %c0_199, %c0_200] : memref<6x32x96xf32, #tpu.memory_space<vmem>>, vector<1x32x96xf32>
    %338 = vector.shape_cast %337 : vector<1x32x96xf32> to vector<32x96xf32>
    %cst_201 = arith.constant dense<0.000000e+00> : vector<56x96xf32>
    %339 = tpu.matmul %336, %338, %cst_201 {dimension_numbers = #tpu.dot_dimension_numbers<[1], [0], [0], [1], [0, 0, 1, 1], [], []>} : vector<56x32xf32>, vector<32x96xf32>, vector<56x96xf32> -> vector<56x96xf32>
    %c4_202 = arith.constant 4 : index
    %c0_203 = arith.constant 0 : index
    %c0_204 = arith.constant 0 : index
    %340 = vector.load %arg14[%c4_202, %c0_203, %c0_204] : memref<6x1x96xf32, #tpu.memory_space<vmem>>, vector<1x1x96xf32>
    %341 = vector.shape_cast %340 : vector<1x1x96xf32> to vector<1x96xf32>
    %342 = vector.broadcast %341 : vector<1x96xf32> to vector<56x96xf32>
    %343 = arith.addf %339, %342 : vector<56x96xf32>
    %344 = vector.extract_strided_slice %343 {offsets = [0, 0], sizes = [56, 32], strides = [1, 1]} : vector<56x96xf32> to vector<56x32xf32>
    %345 = vector.extract_strided_slice %343 {offsets = [0, 32], sizes = [56, 32], strides = [1, 1]} : vector<56x96xf32> to vector<56x32xf32>
    %346 = vector.extract_strided_slice %343 {offsets = [0, 64], sizes = [56, 32], strides = [1, 1]} : vector<56x96xf32> to vector<56x32xf32>
    %cst_205 = arith.constant dense<0.000000e+00> : vector<56x56xf32>
    %347 = tpu.matmul %344, %345, %cst_205 {dimension_numbers = #tpu.dot_dimension_numbers<[1], [1], [0], [0], [0, 0, 1, 0], [], []>} : vector<56x32xf32>, vector<56x32xf32>, vector<56x56xf32> -> vector<56x56xf32>
    %cst_206 = arith.constant 0.176776692 : f32
    %348 = vector.broadcast %cst_206 : f32 to vector<56x56xf32>
    %349 = arith.mulf %347, %348 : vector<56x56xf32>
    %350 = arith.addf %349, %18 : vector<56x56xf32>
    %cst_207 = arith.constant dense<0xFF800000> : vector<56xf32>
    %351 = vector.multi_reduction <maximumf>, %350, %cst_207 [1] : vector<56x56xf32> to vector<56xf32>
    %352 = vector.shape_cast %351 : vector<56xf32> to vector<56x1xf32>
    %353 = vector.broadcast %352 : vector<56x1xf32> to vector<56x56xf32>
    %354 = arith.subf %350, %353 : vector<56x56xf32>
    %355 = math.exp %354 : vector<56x56xf32>
    %cst_208 = arith.constant dense<0.000000e+00> : vector<56xf32>
    %356 = vector.multi_reduction <add>, %355, %cst_208 [1] : vector<56x56xf32> to vector<56xf32>
    %357 = vector.shape_cast %356 : vector<56xf32> to vector<56x1xf32>
    %358 = vector.broadcast %357 : vector<56x1xf32> to vector<56x56xf32>
    %359 = arith.divf %355, %358 : vector<56x56xf32>
    %cst_209 = arith.constant dense<0.000000e+00> : vector<56x32xf32>
    %360 = tpu.matmul %359, %346, %cst_209 {dimension_numbers = #tpu.dot_dimension_numbers<[1], [0], [0], [1], [0, 0, 1, 1], [], []>} : vector<56x56xf32>, vector<56x32xf32>, vector<56x32xf32> -> vector<56x32xf32>
    %361 = arith.addf %336, %360 : vector<56x32xf32>
    %c4_210 = arith.constant 4 : index
    %c0_211 = arith.constant 0 : index
    %c0_212 = arith.constant 0 : index
    %362 = vector.load %arg21[%c4_210, %c0_211, %c0_212] : memref<6x1x32xf32, #tpu.memory_space<vmem>>, vector<1x1x32xf32>
    %363 = vector.shape_cast %362 : vector<1x1x32xf32> to vector<1x32xf32>
    %c4_213 = arith.constant 4 : index
    %c0_214 = arith.constant 0 : index
    %c0_215 = arith.constant 0 : index
    %364 = vector.load %arg22[%c4_213, %c0_214, %c0_215] : memref<6x1x32xf32, #tpu.memory_space<vmem>>, vector<1x1x32xf32>
    %365 = vector.shape_cast %364 : vector<1x1x32xf32> to vector<1x32xf32>
    %cst_216 = arith.constant dense<0.000000e+00> : vector<56xf32>
    %366 = vector.multi_reduction <add>, %361, %cst_216 [1] : vector<56x32xf32> to vector<56xf32>
    %367 = vector.shape_cast %366 : vector<56xf32> to vector<56x1xf32>
    %cst_217 = arith.constant 3.200000e+01 : f32
    %368 = vector.broadcast %cst_217 : f32 to vector<56x1xf32>
    %369 = arith.divf %367, %368 : vector<56x1xf32>
    %370 = vector.broadcast %369 : vector<56x1xf32> to vector<56x32xf32>
    %371 = arith.subf %361, %370 : vector<56x32xf32>
    %372 = arith.mulf %371, %371 : vector<56x32xf32>
    %cst_218 = arith.constant dense<0.000000e+00> : vector<56xf32>
    %373 = vector.multi_reduction <add>, %372, %cst_218 [1] : vector<56x32xf32> to vector<56xf32>
    %374 = vector.shape_cast %373 : vector<56xf32> to vector<56x1xf32>
    %cst_219 = arith.constant 3.200000e+01 : f32
    %375 = vector.broadcast %cst_219 : f32 to vector<56x1xf32>
    %376 = arith.divf %374, %375 : vector<56x1xf32>
    %cst_220 = arith.constant 9.99999974E-6 : f32
    %377 = vector.broadcast %cst_220 : f32 to vector<56x1xf32>
    %378 = arith.addf %376, %377 : vector<56x1xf32>
    %379 = math.rsqrt %378 : vector<56x1xf32>
    %380 = vector.broadcast %379 : vector<56x1xf32> to vector<56x32xf32>
    %381 = arith.mulf %371, %380 : vector<56x32xf32>
    %382 = vector.broadcast %363 : vector<1x32xf32> to vector<56x32xf32>
    %383 = arith.mulf %381, %382 : vector<56x32xf32>
    %384 = vector.broadcast %365 : vector<1x32xf32> to vector<56x32xf32>
    %385 = arith.addf %383, %384 : vector<56x32xf32>
    %c4_221 = arith.constant 4 : index
    %c0_222 = arith.constant 0 : index
    %c0_223 = arith.constant 0 : index
    %386 = vector.load %arg15[%c4_221, %c0_222, %c0_223] : memref<6x32x128xf32, #tpu.memory_space<vmem>>, vector<1x32x128xf32>
    %387 = vector.shape_cast %386 : vector<1x32x128xf32> to vector<32x128xf32>
    %cst_224 = arith.constant dense<0.000000e+00> : vector<56x128xf32>
    %388 = tpu.matmul %385, %387, %cst_224 {dimension_numbers = #tpu.dot_dimension_numbers<[1], [0], [0], [1], [0, 0, 1, 1], [], []>} : vector<56x32xf32>, vector<32x128xf32>, vector<56x128xf32> -> vector<56x128xf32>
    %c4_225 = arith.constant 4 : index
    %c0_226 = arith.constant 0 : index
    %c0_227 = arith.constant 0 : index
    %389 = vector.load %arg16[%c4_225, %c0_226, %c0_227] : memref<6x1x128xf32, #tpu.memory_space<vmem>>, vector<1x1x128xf32>
    %390 = vector.shape_cast %389 : vector<1x1x128xf32> to vector<1x128xf32>
    %391 = vector.broadcast %390 : vector<1x128xf32> to vector<56x128xf32>
    %392 = arith.addf %388, %391 : vector<56x128xf32>
    %cst_228 = arith.constant 0.000000e+00 : f32
    %393 = vector.broadcast %cst_228 : f32 to vector<56x128xf32>
    %394 = arith.maximumf %392, %393 : vector<56x128xf32>
    %c4_229 = arith.constant 4 : index
    %c0_230 = arith.constant 0 : index
    %c0_231 = arith.constant 0 : index
    %395 = vector.load %arg17[%c4_229, %c0_230, %c0_231] : memref<6x128x32xf32, #tpu.memory_space<vmem>>, vector<1x128x32xf32>
    %396 = vector.shape_cast %395 : vector<1x128x32xf32> to vector<128x32xf32>
    %cst_232 = arith.constant dense<0.000000e+00> : vector<56x32xf32>
    %397 = tpu.matmul %394, %396, %cst_232 {dimension_numbers = #tpu.dot_dimension_numbers<[1], [0], [0], [1], [0, 0, 1, 1], [], []>} : vector<56x128xf32>, vector<128x32xf32>, vector<56x32xf32> -> vector<56x32xf32>
    %c4_233 = arith.constant 4 : index
    %c0_234 = arith.constant 0 : index
    %c0_235 = arith.constant 0 : index
    %398 = vector.load %arg18[%c4_233, %c0_234, %c0_235] : memref<6x1x32xf32, #tpu.memory_space<vmem>>, vector<1x1x32xf32>
    %399 = vector.shape_cast %398 : vector<1x1x32xf32> to vector<1x32xf32>
    %400 = vector.broadcast %399 : vector<1x32xf32> to vector<56x32xf32>
    %401 = arith.addf %397, %400 : vector<56x32xf32>
    %402 = arith.addf %361, %401 : vector<56x32xf32>
    %c5 = arith.constant 5 : index
    %c0_236 = arith.constant 0 : index
    %c0_237 = arith.constant 0 : index
    %403 = vector.load %arg19[%c5, %c0_236, %c0_237] : memref<6x1x32xf32, #tpu.memory_space<vmem>>, vector<1x1x32xf32>
    %404 = vector.shape_cast %403 : vector<1x1x32xf32> to vector<1x32xf32>
    %c5_238 = arith.constant 5 : index
    %c0_239 = arith.constant 0 : index
    %c0_240 = arith.constant 0 : index
    %405 = vector.load %arg20[%c5_238, %c0_239, %c0_240] : memref<6x1x32xf32, #tpu.memory_space<vmem>>, vector<1x1x32xf32>
    %406 = vector.shape_cast %405 : vector<1x1x32xf32> to vector<1x32xf32>
    %cst_241 = arith.constant dense<0.000000e+00> : vector<56xf32>
    %407 = vector.multi_reduction <add>, %402, %cst_241 [1] : vector<56x32xf32> to vector<56xf32>
    %408 = vector.shape_cast %407 : vector<56xf32> to vector<56x1xf32>
    %cst_242 = arith.constant 3.200000e+01 : f32
    %409 = vector.broadcast %cst_242 : f32 to vector<56x1xf32>
    %410 = arith.divf %408, %409 : vector<56x1xf32>
    %411 = vector.broadcast %410 : vector<56x1xf32> to vector<56x32xf32>
    %412 = arith.subf %402, %411 : vector<56x32xf32>
    %413 = arith.mulf %412, %412 : vector<56x32xf32>
    %cst_243 = arith.constant dense<0.000000e+00> : vector<56xf32>
    %414 = vector.multi_reduction <add>, %413, %cst_243 [1] : vector<56x32xf32> to vector<56xf32>
    %415 = vector.shape_cast %414 : vector<56xf32> to vector<56x1xf32>
    %cst_244 = arith.constant 3.200000e+01 : f32
    %416 = vector.broadcast %cst_244 : f32 to vector<56x1xf32>
    %417 = arith.divf %415, %416 : vector<56x1xf32>
    %cst_245 = arith.constant 9.99999974E-6 : f32
    %418 = vector.broadcast %cst_245 : f32 to vector<56x1xf32>
    %419 = arith.addf %417, %418 : vector<56x1xf32>
    %420 = math.rsqrt %419 : vector<56x1xf32>
    %421 = vector.broadcast %420 : vector<56x1xf32> to vector<56x32xf32>
    %422 = arith.mulf %412, %421 : vector<56x32xf32>
    %423 = vector.broadcast %404 : vector<1x32xf32> to vector<56x32xf32>
    %424 = arith.mulf %422, %423 : vector<56x32xf32>
    %425 = vector.broadcast %406 : vector<1x32xf32> to vector<56x32xf32>
    %426 = arith.addf %424, %425 : vector<56x32xf32>
    %c5_246 = arith.constant 5 : index
    %c0_247 = arith.constant 0 : index
    %c0_248 = arith.constant 0 : index
    %427 = vector.load %arg13[%c5_246, %c0_247, %c0_248] : memref<6x32x96xf32, #tpu.memory_space<vmem>>, vector<1x32x96xf32>
    %428 = vector.shape_cast %427 : vector<1x32x96xf32> to vector<32x96xf32>
    %cst_249 = arith.constant dense<0.000000e+00> : vector<56x96xf32>
    %429 = tpu.matmul %426, %428, %cst_249 {dimension_numbers = #tpu.dot_dimension_numbers<[1], [0], [0], [1], [0, 0, 1, 1], [], []>} : vector<56x32xf32>, vector<32x96xf32>, vector<56x96xf32> -> vector<56x96xf32>
    %c5_250 = arith.constant 5 : index
    %c0_251 = arith.constant 0 : index
    %c0_252 = arith.constant 0 : index
    %430 = vector.load %arg14[%c5_250, %c0_251, %c0_252] : memref<6x1x96xf32, #tpu.memory_space<vmem>>, vector<1x1x96xf32>
    %431 = vector.shape_cast %430 : vector<1x1x96xf32> to vector<1x96xf32>
    %432 = vector.broadcast %431 : vector<1x96xf32> to vector<56x96xf32>
    %433 = arith.addf %429, %432 : vector<56x96xf32>
    %434 = vector.extract_strided_slice %433 {offsets = [0, 0], sizes = [56, 32], strides = [1, 1]} : vector<56x96xf32> to vector<56x32xf32>
    %435 = vector.extract_strided_slice %433 {offsets = [0, 32], sizes = [56, 32], strides = [1, 1]} : vector<56x96xf32> to vector<56x32xf32>
    %436 = vector.extract_strided_slice %433 {offsets = [0, 64], sizes = [56, 32], strides = [1, 1]} : vector<56x96xf32> to vector<56x32xf32>
    %cst_253 = arith.constant dense<0.000000e+00> : vector<56x56xf32>
    %437 = tpu.matmul %434, %435, %cst_253 {dimension_numbers = #tpu.dot_dimension_numbers<[1], [1], [0], [0], [0, 0, 1, 0], [], []>} : vector<56x32xf32>, vector<56x32xf32>, vector<56x56xf32> -> vector<56x56xf32>
    %cst_254 = arith.constant 0.176776692 : f32
    %438 = vector.broadcast %cst_254 : f32 to vector<56x56xf32>
    %439 = arith.mulf %437, %438 : vector<56x56xf32>
    %440 = arith.addf %439, %18 : vector<56x56xf32>
    %cst_255 = arith.constant dense<0xFF800000> : vector<56xf32>
    %441 = vector.multi_reduction <maximumf>, %440, %cst_255 [1] : vector<56x56xf32> to vector<56xf32>
    %442 = vector.shape_cast %441 : vector<56xf32> to vector<56x1xf32>
    %443 = vector.broadcast %442 : vector<56x1xf32> to vector<56x56xf32>
    %444 = arith.subf %440, %443 : vector<56x56xf32>
    %445 = math.exp %444 : vector<56x56xf32>
    %cst_256 = arith.constant dense<0.000000e+00> : vector<56xf32>
    %446 = vector.multi_reduction <add>, %445, %cst_256 [1] : vector<56x56xf32> to vector<56xf32>
    %447 = vector.shape_cast %446 : vector<56xf32> to vector<56x1xf32>
    %448 = vector.broadcast %447 : vector<56x1xf32> to vector<56x56xf32>
    %449 = arith.divf %445, %448 : vector<56x56xf32>
    %cst_257 = arith.constant dense<0.000000e+00> : vector<56x32xf32>
    %450 = tpu.matmul %449, %436, %cst_257 {dimension_numbers = #tpu.dot_dimension_numbers<[1], [0], [0], [1], [0, 0, 1, 1], [], []>} : vector<56x56xf32>, vector<56x32xf32>, vector<56x32xf32> -> vector<56x32xf32>
    %451 = arith.addf %402, %450 : vector<56x32xf32>
    %c5_258 = arith.constant 5 : index
    %c0_259 = arith.constant 0 : index
    %c0_260 = arith.constant 0 : index
    %452 = vector.load %arg21[%c5_258, %c0_259, %c0_260] : memref<6x1x32xf32, #tpu.memory_space<vmem>>, vector<1x1x32xf32>
    %453 = vector.shape_cast %452 : vector<1x1x32xf32> to vector<1x32xf32>
    %c5_261 = arith.constant 5 : index
    %c0_262 = arith.constant 0 : index
    %c0_263 = arith.constant 0 : index
    %454 = vector.load %arg22[%c5_261, %c0_262, %c0_263] : memref<6x1x32xf32, #tpu.memory_space<vmem>>, vector<1x1x32xf32>
    %455 = vector.shape_cast %454 : vector<1x1x32xf32> to vector<1x32xf32>
    %cst_264 = arith.constant dense<0.000000e+00> : vector<56xf32>
    %456 = vector.multi_reduction <add>, %451, %cst_264 [1] : vector<56x32xf32> to vector<56xf32>
    %457 = vector.shape_cast %456 : vector<56xf32> to vector<56x1xf32>
    %cst_265 = arith.constant 3.200000e+01 : f32
    %458 = vector.broadcast %cst_265 : f32 to vector<56x1xf32>
    %459 = arith.divf %457, %458 : vector<56x1xf32>
    %460 = vector.broadcast %459 : vector<56x1xf32> to vector<56x32xf32>
    %461 = arith.subf %451, %460 : vector<56x32xf32>
    %462 = arith.mulf %461, %461 : vector<56x32xf32>
    %cst_266 = arith.constant dense<0.000000e+00> : vector<56xf32>
    %463 = vector.multi_reduction <add>, %462, %cst_266 [1] : vector<56x32xf32> to vector<56xf32>
    %464 = vector.shape_cast %463 : vector<56xf32> to vector<56x1xf32>
    %cst_267 = arith.constant 3.200000e+01 : f32
    %465 = vector.broadcast %cst_267 : f32 to vector<56x1xf32>
    %466 = arith.divf %464, %465 : vector<56x1xf32>
    %cst_268 = arith.constant 9.99999974E-6 : f32
    %467 = vector.broadcast %cst_268 : f32 to vector<56x1xf32>
    %468 = arith.addf %466, %467 : vector<56x1xf32>
    %469 = math.rsqrt %468 : vector<56x1xf32>
    %470 = vector.broadcast %469 : vector<56x1xf32> to vector<56x32xf32>
    %471 = arith.mulf %461, %470 : vector<56x32xf32>
    %472 = vector.broadcast %453 : vector<1x32xf32> to vector<56x32xf32>
    %473 = arith.mulf %471, %472 : vector<56x32xf32>
    %474 = vector.broadcast %455 : vector<1x32xf32> to vector<56x32xf32>
    %475 = arith.addf %473, %474 : vector<56x32xf32>
    %c5_269 = arith.constant 5 : index
    %c0_270 = arith.constant 0 : index
    %c0_271 = arith.constant 0 : index
    %476 = vector.load %arg15[%c5_269, %c0_270, %c0_271] : memref<6x32x128xf32, #tpu.memory_space<vmem>>, vector<1x32x128xf32>
    %477 = vector.shape_cast %476 : vector<1x32x128xf32> to vector<32x128xf32>
    %cst_272 = arith.constant dense<0.000000e+00> : vector<56x128xf32>
    %478 = tpu.matmul %475, %477, %cst_272 {dimension_numbers = #tpu.dot_dimension_numbers<[1], [0], [0], [1], [0, 0, 1, 1], [], []>} : vector<56x32xf32>, vector<32x128xf32>, vector<56x128xf32> -> vector<56x128xf32>
    %c5_273 = arith.constant 5 : index
    %c0_274 = arith.constant 0 : index
    %c0_275 = arith.constant 0 : index
    %479 = vector.load %arg16[%c5_273, %c0_274, %c0_275] : memref<6x1x128xf32, #tpu.memory_space<vmem>>, vector<1x1x128xf32>
    %480 = vector.shape_cast %479 : vector<1x1x128xf32> to vector<1x128xf32>
    %481 = vector.broadcast %480 : vector<1x128xf32> to vector<56x128xf32>
    %482 = arith.addf %478, %481 : vector<56x128xf32>
    %cst_276 = arith.constant 0.000000e+00 : f32
    %483 = vector.broadcast %cst_276 : f32 to vector<56x128xf32>
    %484 = arith.maximumf %482, %483 : vector<56x128xf32>
    %c5_277 = arith.constant 5 : index
    %c0_278 = arith.constant 0 : index
    %c0_279 = arith.constant 0 : index
    %485 = vector.load %arg17[%c5_277, %c0_278, %c0_279] : memref<6x128x32xf32, #tpu.memory_space<vmem>>, vector<1x128x32xf32>
    %486 = vector.shape_cast %485 : vector<1x128x32xf32> to vector<128x32xf32>
    %cst_280 = arith.constant dense<0.000000e+00> : vector<56x32xf32>
    %487 = tpu.matmul %484, %486, %cst_280 {dimension_numbers = #tpu.dot_dimension_numbers<[1], [0], [0], [1], [0, 0, 1, 1], [], []>} : vector<56x128xf32>, vector<128x32xf32>, vector<56x32xf32> -> vector<56x32xf32>
    %c5_281 = arith.constant 5 : index
    %c0_282 = arith.constant 0 : index
    %c0_283 = arith.constant 0 : index
    %488 = vector.load %arg18[%c5_281, %c0_282, %c0_283] : memref<6x1x32xf32, #tpu.memory_space<vmem>>, vector<1x1x32xf32>
    %489 = vector.shape_cast %488 : vector<1x1x32xf32> to vector<1x32xf32>
    %490 = vector.broadcast %489 : vector<1x32xf32> to vector<56x32xf32>
    %491 = arith.addf %487, %490 : vector<56x32xf32>
    %492 = arith.addf %451, %491 : vector<56x32xf32>
    %c0_284 = arith.constant 0 : index
    %c0_285 = arith.constant 0 : index
    %493 = vector.load %arg23[%c0_284, %c0_285] : memref<56x32xf32, #tpu.memory_space<vmem>>, vector<56x32xf32>
    tpu.vector_store %arg23[%c0_284, %c0_285], %492 {strides = array<i32>} : memref<56x32xf32, #tpu.memory_space<vmem>>, vector<56x32xf32>,
    %c0_286 = arith.constant 0 : index
    %c0_287 = arith.constant 0 : index
    %494 = vector.load %arg24[%c0_286, %c0_287] : memref<56x32xf32, #tpu.memory_space<vmem>>, vector<56x32xf32>
    tpu.vector_store %arg24[%c0_286, %c0_287], %174 {strides = array<i32>} : memref<56x32xf32, #tpu.memory_space<vmem>>, vector<56x32xf32>,
    %c0_288 = arith.constant 0 : index
    %c0_289 = arith.constant 0 : index
    %495 = vector.load %arg25[%c0_288, %c0_289] : memref<56x32xf32, #tpu.memory_space<vmem>>, vector<56x32xf32>
    tpu.vector_store %arg25[%c0_288, %c0_289], %330 {strides = array<i32>} : memref<56x32xf32, #tpu.memory_space<vmem>>, vector<56x32xf32>,
    return
  }
  func.func @transform_0(%arg0: i32) -> (i32, i32) {
    %c0_i32 = arith.constant 0 : i32
    %c0_i32_0 = arith.constant 0 : i32
    return %arg0, %c0_i32 : i32, i32
  }
  func.func @transform_1(%arg0: i32) -> (i32, i32) {
    %c0_i32 = arith.constant 0 : i32
    %c0_i32_0 = arith.constant 0 : i32
    return %arg0, %c0_i32 : i32, i32
  }
  func.func @transform_2(%arg0: i32) -> (i32, i32) {
    %c0_i32 = arith.constant 0 : i32
    %c0_i32_0 = arith.constant 0 : i32
    return %arg0, %c0_i32 : i32, i32
  }
  func.func @transform_3(%arg0: i32) -> (i32, i32) {
    %c0_i32 = arith.constant 0 : i32
    %c0_i32_0 = arith.constant 0 : i32
    %c0_i32_1 = arith.constant 0 : i32
    return %c0_i32, %c0_i32_0 : i32, i32
  }
  func.func @transform_4(%arg0: i32) -> (i32, i32) {
    %c0_i32 = arith.constant 0 : i32
    %c0_i32_0 = arith.constant 0 : i32
    %c0_i32_1 = arith.constant 0 : i32
    return %c0_i32, %c0_i32_0 : i32, i32
  }
  func.func @transform_5(%arg0: i32) -> (i32, i32) {
    %c0_i32 = arith.constant 0 : i32
    %c0_i32_0 = arith.constant 0 : i32
    %c0_i32_1 = arith.constant 0 : i32
    return %c0_i32, %c0_i32_0 : i32, i32
  }
  func.func @transform_6(%arg0: i32) -> (i32, i32) {
    %c0_i32 = arith.constant 0 : i32
    %c0_i32_0 = arith.constant 0 : i32
    %c0_i32_1 = arith.constant 0 : i32
    return %c0_i32, %c0_i32_0 : i32, i32
  }
  func.func @transform_7(%arg0: i32) -> (i32, i32) {
    %c0_i32 = arith.constant 0 : i32
    %c0_i32_0 = arith.constant 0 : i32
    %c0_i32_1 = arith.constant 0 : i32
    return %c0_i32, %c0_i32_0 : i32, i32
  }
  func.func @transform_8(%arg0: i32) -> (i32, i32) {
    %c0_i32 = arith.constant 0 : i32
    %c0_i32_0 = arith.constant 0 : i32
    %c0_i32_1 = arith.constant 0 : i32
    return %c0_i32, %c0_i32_0 : i32, i32
  }
  func.func @transform_9(%arg0: i32) -> (i32, i32) {
    %c0_i32 = arith.constant 0 : i32
    %c0_i32_0 = arith.constant 0 : i32
    %c0_i32_1 = arith.constant 0 : i32
    return %c0_i32, %c0_i32_0 : i32, i32
  }
  func.func @transform_10(%arg0: i32) -> (i32, i32) {
    %c0_i32 = arith.constant 0 : i32
    %c0_i32_0 = arith.constant 0 : i32
    %c0_i32_1 = arith.constant 0 : i32
    return %c0_i32, %c0_i32_0 : i32, i32
  }
  func.func @transform_11(%arg0: i32) -> (i32, i32) {
    %c0_i32 = arith.constant 0 : i32
    %c0_i32_0 = arith.constant 0 : i32
    %c0_i32_1 = arith.constant 0 : i32
    return %c0_i32, %c0_i32_0 : i32, i32
  }
  func.func @transform_12(%arg0: i32) -> (i32, i32, i32) {
    %c0_i32 = arith.constant 0 : i32
    %c0_i32_0 = arith.constant 0 : i32
    %c0_i32_1 = arith.constant 0 : i32
    %c0_i32_2 = arith.constant 0 : i32
    return %c0_i32, %c0_i32_0, %c0_i32_1 : i32, i32, i32
  }
  func.func @transform_13(%arg0: i32) -> (i32, i32, i32) {
    %c0_i32 = arith.constant 0 : i32
    %c0_i32_0 = arith.constant 0 : i32
    %c0_i32_1 = arith.constant 0 : i32
    %c0_i32_2 = arith.constant 0 : i32
    return %c0_i32, %c0_i32_0, %c0_i32_1 : i32, i32, i32
  }
  func.func @transform_14(%arg0: i32) -> (i32, i32, i32) {
    %c0_i32 = arith.constant 0 : i32
    %c0_i32_0 = arith.constant 0 : i32
    %c0_i32_1 = arith.constant 0 : i32
    %c0_i32_2 = arith.constant 0 : i32
    return %c0_i32, %c0_i32_0, %c0_i32_1 : i32, i32, i32
  }
  func.func @transform_15(%arg0: i32) -> (i32, i32, i32) {
    %c0_i32 = arith.constant 0 : i32
    %c0_i32_0 = arith.constant 0 : i32
    %c0_i32_1 = arith.constant 0 : i32
    %c0_i32_2 = arith.constant 0 : i32
    return %c0_i32, %c0_i32_0, %c0_i32_1 : i32, i32, i32
  }
  func.func @transform_16(%arg0: i32) -> (i32, i32, i32) {
    %c0_i32 = arith.constant 0 : i32
    %c0_i32_0 = arith.constant 0 : i32
    %c0_i32_1 = arith.constant 0 : i32
    %c0_i32_2 = arith.constant 0 : i32
    return %c0_i32, %c0_i32_0, %c0_i32_1 : i32, i32, i32
  }
  func.func @transform_17(%arg0: i32) -> (i32, i32, i32) {
    %c0_i32 = arith.constant 0 : i32
    %c0_i32_0 = arith.constant 0 : i32
    %c0_i32_1 = arith.constant 0 : i32
    %c0_i32_2 = arith.constant 0 : i32
    return %c0_i32, %c0_i32_0, %c0_i32_1 : i32, i32, i32
  }
  func.func @transform_18(%arg0: i32) -> (i32, i32, i32) {
    %c0_i32 = arith.constant 0 : i32
    %c0_i32_0 = arith.constant 0 : i32
    %c0_i32_1 = arith.constant 0 : i32
    %c0_i32_2 = arith.constant 0 : i32
    return %c0_i32, %c0_i32_0, %c0_i32_1 : i32, i32, i32
  }
  func.func @transform_19(%arg0: i32) -> (i32, i32, i32) {
    %c0_i32 = arith.constant 0 : i32
    %c0_i32_0 = arith.constant 0 : i32
    %c0_i32_1 = arith.constant 0 : i32
    %c0_i32_2 = arith.constant 0 : i32
    return %c0_i32, %c0_i32_0, %c0_i32_1 : i32, i32, i32
  }
  func.func @transform_20(%arg0: i32) -> (i32, i32, i32) {
    %c0_i32 = arith.constant 0 : i32
    %c0_i32_0 = arith.constant 0 : i32
    %c0_i32_1 = arith.constant 0 : i32
    %c0_i32_2 = arith.constant 0 : i32
    return %c0_i32, %c0_i32_0, %c0_i32_1 : i32, i32, i32
  }
  func.func @transform_21(%arg0: i32) -> (i32, i32, i32) {
    %c0_i32 = arith.constant 0 : i32
    %c0_i32_0 = arith.constant 0 : i32
    %c0_i32_1 = arith.constant 0 : i32
    %c0_i32_2 = arith.constant 0 : i32
    return %c0_i32, %c0_i32_0, %c0_i32_1 : i32, i32, i32
  }
  func.func @transform_22(%arg0: i32) -> (i32, i32) {
    %c0_i32 = arith.constant 0 : i32
    %c0_i32_0 = arith.constant 0 : i32
    return %arg0, %c0_i32 : i32, i32
  }
  func.func @transform_23(%arg0: i32) -> (i32, i32) {
    %c0_i32 = arith.constant 0 : i32
    %c0_i32_0 = arith.constant 0 : i32
    return %arg0, %c0_i32 : i32, i32
  }
  func.func @transform_24(%arg0: i32) -> (i32, i32) {
    %c0_i32 = arith.constant 0 : i32
    %c0_i32_0 = arith.constant 0 : i32
    return %arg0, %c0_i32 : i32, i32
  }
}

</mosaic_0001>

<bundles_post_ra>
// kernel: tpu_custom_call.1
= control target key start
LH: loop header
LB: loop body
LE: loop exit
PB: predicated region body
PF: predicated region fallthrough
CT: control target
= control target key end

     0   :  { %s10240_s0 = inlined_call_operand.vmem [shape: f32[16,5], index: 0, kind: input, shape index: {}]   ;;  %s10241_s1 = inlined_call_operand.vmem [shape: f32[32,8], index: 1, kind: input, shape index: {}]   ;;  %s10242_s2 = inlined_call_operand.vmem [shape: f32[112,32], index: 2, kind: input, shape index: {}]   ;;  %s10243_s3 = inlined_call_operand.vmem [shape: f32[56,8], index: 3, kind: input, shape index: {}]   ;;  %s10244_s4 = inlined_call_operand.vmem [shape: f32[56,5], index: 4, kind: input, shape index: {}]   ;;  %s10245_s5 = inlined_call_operand.vmem [shape: f32[56,16], index: 5, kind: input, shape index: {}]   ;;  %s10246_s6 = inlined_call_operand.vmem [shape: f32[56,7], index: 6, kind: input, shape index: {}]   ;;  %s10247_s7 = inlined_call_operand.vmem [shape: f32[56,56], index: 7, kind: input, shape index: {}]   ;;  %s10248_s8 = inlined_call_operand.vmem [shape: f32[56,56], index: 8, kind: input, shape index: {}]   ;;  %s10249_s9 = inlined_call_operand.vmem [shape: f32[5,32], index: 9, kind: input, shape index: {}]   ;;  %s10250_s10 = inlined_call_operand.vmem [shape: f32[7,32], index: 10, kind: input, shape index: {}]   ;;  %s10251_s11 = inlined_call_operand.vmem [shape: f32[8,32], index: 11, kind: input, shape index: {}]   ;;  %s10252_s12 = inlined_call_operand.vmem [shape: f32[6,32,96], index: 12, kind: input, shape index: {}]   ;;  %s10253_s13 = inlined_call_operand.vmem [shape: f32[6,1,96], index: 13, kind: input, shape index: {}]   ;;  %s10254_s14 = inlined_call_operand.vmem [shape: f32[6,32,128], index: 14, kind: input, shape index: {}]   ;;  %s10255_s15 = inlined_call_operand.vmem [shape: f32[6,1,128], index: 15, kind: input, shape index: {}]   ;;  %s10256_s16 = inlined_call_operand.vmem [shape: f32[6,128,32], index: 16, kind: input, shape index: {}]   ;;  %s10257_s17 = inlined_call_operand.vmem [shape: f32[6,1,32], index: 17, kind: input, shape index: {}]   ;;  %s10258_s18 = inlined_call_operand.vmem [shape: f32[6,1,32], index: 18, kind: input, shape index: {}]   ;;  %s10259_s19 = inlined_call_operand.vmem [shape: f32[6,1,32], index: 19, kind: input, shape index: {}]   ;;  %s10260_s20 = inlined_call_operand.vmem [shape: f32[6,1,32], index: 20, kind: input, shape index: {}]   ;;  %s10261_s21 = inlined_call_operand.vmem [shape: f32[6,1,32], index: 21, kind: input, shape index: {}]   ;;  %s10262_s22 = inlined_call_operand.vmem [shape: f32[112,32], index: 22, kind: output, shape index: {0}]   ;;  %s10263_s23 = inlined_call_operand.vmem [shape: f32[112,32], index: 23, kind: output, shape index: {1}]   ;;  %s10264_s24 = inlined_call_operand.vmem [shape: f32[112,32], index: 24, kind: output, shape index: {2}]  }
   0x1   :  { %10272 = sst [smem:[#allocation3_spill]] %s10240_s0 }
   0x2   :  { %10273 = sst [smem:[#allocation4_spill]] %s10241_s1 }
   0x3   :  { %10274 = sst [smem:[#allocation5_spill]] %s10242_s2 }
   0x4   :  { %10275 = sst [smem:[#allocation6_spill]] %s10243_s3 }
   0x5   :  { %10276 = sst [smem:[#allocation7_spill]] %s10244_s4 }
   0x6   :  { %10277 = sst [smem:[#allocation8_spill]] %s10245_s5  ;;  %s7361_s5 = smov 0  }
   0x7   :  { %10278 = sst [smem:[#allocation9_spill]] %s10246_s6 }
   0x8   :  { %10279 = sst [smem:[#allocation10_spill]] %s10247_s7 }
   0x9   :  { %10280 = sst [smem:[#allocation11_spill]] %s10248_s8 }
   0xa   :  { %10281 = sst [smem:[#allocation12_spill]] %s10251_s11 }
   0xb   :  { %10282 = sst [smem:[#allocation13_spill]] %s10262_s22 }
   0xc   :  { %10283 = sst [smem:[#allocation14_spill]] %s10264_s24 }
   0xd LB: > { %10284 = sst [smem:[#allocation2_spill]] %s7231_s5  ;;  %s7367_s26 = sadd.s32 4294967295, %s7231_s5   ;;  %s7231_s5 = sphi %s7361_s5, %s35_s5  }
   0xe   : > { %p6351_p0 = scmp.ge.s32.totalorder %s7231_s5, 1  ;;  %p688_p1 = scmp.lt.s32.totalorder %s7231_s5, 3 }
  0x10   : > { %p689_p2 = pnand %p6351_p0, %p688_p1 }
  0x11   : > { %p773_p3 = scmp.lt.s32.totalorder (!%p689_p2), %s7367_s26, 1  ;;  %s6353_s27 = sshll.u32 (!%p689_p2), %s7367_s26, 1 }
  0x12   : > { %692 = sbr.rel (%p689_p2) target bundleno = 8838 (0x2286), region = 108  ;;  %p778_p4 = scmp.lt.s32.totalorder (!%p689_p2), %s6353_s27, 3 }
  0x13   : > { %s10285_s11 = sld [smem:[#allocation12_spill]] (!%p689_p2)  ;;  %s7233_s6 = smov (!%p689_p2), 96  }
  0x14   : > { %s10286_s7 = sld [smem:[#allocation6_spill]] (!%p689_p2)  ;;  %s783_s3 = smul.u32 (!%p689_p2), 7, %s7367_s26 }
  0x15   : > { %s10287_s8 = sld [smem:[#allocation3_spill]] (!%p689_p2) }
  0x16   : > { %s10289_s2 = sld [smem:[#allocation7_spill]] (!%p689_p2)  ;;  %p784_p5 = scmp.lt.s32.totalorder (!%p689_p2), %s783_s3, 13 }
  0x17   : > { %s774_s28 = scalar_select %p773_p3, %s7367_s26, 1  ;;  %vm815_vm0 = vcmask 64512   ;;  %v889_v11 = vld [vmem:[%s10249_s9] sm:$0x1f]  ;;  %vm1011_vm1 = vcmask 1044480   ;;  %vm989_vm2 = vcmask 39936  }
  0x18   : > { %s10300_s27 = smov (!%p778_p4, %s6353_s27), 3  ;;  %6756 = vmatpush.msk.msra.mxu3 %vm1011_vm1, %v889_v11  ;;  %v1060_v15 = vld [vmem:[%s10250_s10] sm:$0x7f]  ;;  %vm1083_vm3 = vcmask 1046528   ;;  %s10290_s25 = sld [smem:[#allocation9_spill]]  ;;  %vm1061_vm4 = vcmask 56320  }
  0x19   : > { %v892_v0 = vld [vmem:[%s10285_s11] sm:$0xff]  ;;  %s6352_s30 = sshll.u32 %s774_s28, 3  ;;  %s6354_s22 = sshll.u32 %s10300_s27, 3  ;;  %vm929_vm5 = vcmask 130048   ;;  %v1149_v50 = vld [vmem:[%s10252_s12 + $0x18] sm:$0xff]  ;;  %v1148_v52 = vld [vmem:[%s10252_s12 + $0x10] sm:$0xff] }
  0x1a   : > { %v807_v1 = vld [vmem:[%s10286_s7] sm:$0xff]  ;;  %914 = vmatpush.msra.mxu1 %v892_v0  ;;  %s10288_s11 = sld [smem:[#allocation4_spill]]  ;;  %v808_v5 = vld [vmem:[%s10286_s7 + $0x8] sm:$0xff]  ;;  %v809_v7 = vld [vmem:[%s10286_s7 + $0x10] sm:$0xff]  ;;  %vm1154_vm6 = vcmask 261120   ;;  %vm1315_vm7 = vcmask 457728  }
  0x1b   : > { %s776_s4 = scalar_lea.vmem %s10287_s8, %s6352_s30  ;;  %v811_v2 = vld [vmem:[%s10286_s7 + $0x20] sm:$0xff]  ;;  %v812_v6 = vld [vmem:[%s10286_s7 + $0x28] sm:$0xff]  ;;  %v813_v8 = vld [vmem:[%s10286_s7 + $0x30] sm:$0xff]  ;;  %s10292_s5 = sld [smem:[#allocation10_spill]] }
  0x1c   : > { %v814_v3 = vld [vmem:[%s776_s4] sm:$0xff]  ;;  %v810_v9 = vld [vmem:[%s10286_s7 + $0x18] sm:$0xff]  ;;  %6375 = vmatpush.msk.msrb.mxu1 %vm1011_vm1, %v889_v11  ;;  %v876_v17 = vld [vmem:[%s10289_s2 + $0x8] sm:$0xff]  ;;  %s10302_s3 = smov (!%p784_p5, %s783_s3), 13  ;;  %s10295_s28 = sld [smem:[#allocation5_spill]] }
  0x1d   : > { %852 = vmatpush.msra.mxu0 %v814_v3  ;;  %6754 = vmatpush.msra.mxu2 %v814_v3  ;;  %v875_v12 = vld [vmem:[%s10289_s2] sm:$0xff]  ;;  %v877_v21 = vld [vmem:[%s10289_s2 + $0x10] sm:$0xff]  ;;  %v878_v25 = vld [vmem:[%s10289_s2 + $0x18] sm:$0xff]  ;;  %s8603_s1 = sshll.u32 %s10302_s3, 3  ;;  %s10294_s3 = sld [smem:[#allocation14_spill]] }
  0x1e   : > { %6359 = vmatmul.msk.f32.vlgmr.msra.gmra.mxu0 %vm815_vm0, %v807_v1  ;;  %6363 = vmatmul.msk.f32.vlgmr.msra.gmra.mxu2 %vm815_vm0, %v811_v2  ;;  %v1053_v27 = vld [vmem:[%s10290_s25] sm:$0xff]  ;;  %v1054_v33 = vld [vmem:[%s10290_s25 + $0x8] sm:$0xff]  ;;  %v1055_v37 = vld [vmem:[%s10290_s25 + $0x10] sm:$0xff]  ;;  %s8609_s29 = scalar_lea.vmem %s10263_s23, %s8603_s1  ;;  %s10297_s4 = sld [smem:[#allocation13_spill]] }
  0x1f   : > { %6755 = vmatpush.msrb.mxu2 %v892_v0  ;;  %v879_v29 = vld [vmem:[%s10289_s2 + $0x20] sm:$0xff]  ;;  %v880_v35 = vld [vmem:[%s10289_s2 + $0x28] sm:$0xff]  ;;  %v881_v39 = vld [vmem:[%s10289_s2 + $0x30] sm:$0xff]  ;;  %1188 = vmatpush.msrb.mxu0 %v1149_v50 }
  0x20   : > { %s781_s24 = scalar_lea.vmem %s10288_s11, %s6354_s22  ;;  %v1056_v41 = vld [vmem:[%s10290_s25 + $0x18] sm:$0xff]  ;;  %v1057_v44 = vld [vmem:[%s10290_s25 + $0x20] sm:$0xff]  ;;  %v1058_v46 = vld [vmem:[%s10290_s25 + $0x28] sm:$0xff]  ;;  %s7234_s22 = smov 64  }
  0x21   : > { %v890_v4 = vld [vmem:[%s781_s24] sm:$0xff]  ;;  %v891_v10 = vld [vmem:[%s781_s24 + $0x8] sm:$0xff]  ;;  %s10291_s24 = sld [smem:[#allocation8_spill]]  ;;  %v1059_v48 = vld [vmem:[%s10290_s25 + $0x30] sm:$0xff]  ;;  %1189 = vmatpush.msrb.mxu0 %v1148_v52  ;;  %s10293_s27 = smov %s10292_s5 }
  0x22   : > { %6366 = vmatmul.msk.f32.vlgmr.msra.gmra.mxu1 %vm815_vm0, %v890_v4  ;;  %v1147_v53 = vld [vmem:[%s10252_s12 + $0x8] sm:$0xff]  ;;  %v1146_v55 = vld [vmem:[%s10252_s12] sm:$0xff] }
  0x23   : > { %6383 = vmatpush.msk.msra.mxu1 %vm1083_vm3, %v1060_v15  ;;  %1190 = vmatpush.msrb.mxu0 %v1147_v53  ;;  %v1133_v53 = vld [vmem:[%s10293_s27 + $0x8] sm:$0xff]  ;;  %s9329_s8 = scalar_lea.vmem %s10294_s3, %s8603_s1  ;;  %s10296_s3 = sld [smem:[#allocation11_spill]] }
  0x25   : > { %1191 = vmatpush.msrb.mxu0 %v1146_v55 }
  0x26   : > { %6360 = vmatmul.msk.f32.gmra.mxu0 %vm815_vm0, %v808_v5  ;;  %6364 = vmatmul.msk.f32.gmra.mxu2 %vm815_vm0, %v812_v6 }
  0x27   : > { %v922_v32 = vld [vmem:[%s10291_s24] sm:$0xff]  ;;  %v923_v36 = vld [vmem:[%s10291_s24 + $0x8] sm:$0xff]  ;;  %v924_v40 = vld [vmem:[%s10291_s24 + $0x10] sm:$0xff] }
  0x28   : > { %v925_v43 = vld [vmem:[%s10291_s24 + $0x18] sm:$0xff]  ;;  %v926_v45 = vld [vmem:[%s10291_s24 + $0x20] sm:$0xff]  ;;  %v927_v47 = vld [vmem:[%s10291_s24 + $0x28] sm:$0xff] }
  0x29   : > { %v928_v49 = vld [vmem:[%s10291_s24 + $0x30] sm:$0xff] }
  0x2e   : > { %6361 = vmatmul.msk.f32.gmra.mxu0 %vm815_vm0, %v809_v7  ;;  %6365 = vmatmul.msk.f32.gmra.mxu2 %vm815_vm0, %v813_v8 }
  0x36   : > { %6362 = vmatmul.msk.f32.gmra.mxu0 %vm815_vm0, %v810_v9  ;;  %6367 = vmatmul.msk.f32.vlgmr.msrb.gmra.mxu2 %vm815_vm0, %v891_v10 }
  0x9b   : > { %v854_v13 = vpop.f32.mrf.mxu0 }
  0x9c   : > { %v882_v14 = vmul.f32 %v875_v12, %v854_v13 }
  0x9e   : > { %6376 = vmatmul.msk.f32.vlgmr.msrb.gmra.mxu1 %vm989_vm2, %v882_v14 }
  0x9f   : > { %v916_v31 = vpop.f32.mrf.mxu1 }
  0xa1   : > { %v866_v16 = vpop.f32.mrf.mxu2 }
  0xa2   : > { %v886_v34 = vmul.f32 %v879_v29, %v866_v16 }
  0xa3   : > { %v857_v18 = vpop.f32.mrf.mxu0 }
  0xa4   : > { %v883_v19 = vmul.f32 %v876_v17, %v857_v18 }
  0xa6   : > { %6377 = vmatmul.msk.f32.gmra.mxu1 %vm989_vm2, %v883_v19 }
  0xa9   : > { %v869_v20 = vpop.f32.mrf.mxu2 }
  0xaa   : > { %v887_v38 = vmul.f32 %v880_v35, %v869_v20 }
  0xab   : > { %v860_v22 = vpop.f32.mrf.mxu0 }
  0xac   : > { %v884_v23 = vmul.f32 %v877_v21, %v860_v22 }
  0xae   : > { %6378 = vmatmul.msk.f32.gmra.mxu1 %vm989_vm2, %v884_v23 }
  0xb1   : > { %v872_v24 = vpop.f32.mrf.mxu2 }
  0xb2   : > { %v888_v42 = vmul.f32 %v881_v39, %v872_v24 }
  0xb3   : > { %v863_v26 = vpop.f32.mrf.mxu0 }
  0xb4   : > { %v885_v28 = vmul.f32 %v878_v25, %v863_v26 }
  0xb6   : > { %6379 = vmatmul.msk.f32.vlgmr.msra.gmra.mxu3 %vm989_vm2, %v885_v28  ;;  %6384 = vmatmul.msk.f32.vlgmr.msra.gmra.mxu1 %vm1061_vm4, %v1053_v27  ;;  %v6858_v27 = vld [vmem:[%s10253_s13] ss:$0 sm:$0xff] }
  0xb9   : > { %v919_v30 = vpop.f32.mrf.mxu2 }
  0xba   : > { %965 = vmatpush.msra.mxu2 %v919_v30 }
  0xbc   : > { %966 = vmatpush.msra.mxu2 %v916_v31 }
  0xbd   : > { %6368 = vmatmul.msk.f32.vlgmr.msra.gmra.mxu2 %vm929_vm5, %v922_v32 }
  0xbe   : > { %6380 = vmatmul.msk.f32.gmra.mxu3 %vm989_vm2, %v886_v34  ;;  %6385 = vmatmul.msk.f32.gmra.mxu1 %vm1061_vm4, %v1054_v33 }
  0xc5   : > { %6369 = vmatmul.msk.f32.gmra.mxu2 %vm929_vm5, %v923_v36 }
  0xc6   : > { %6381 = vmatmul.msk.f32.gmra.mxu3 %vm989_vm2, %v887_v38  ;;  %6386 = vmatmul.msk.f32.gmra.mxu1 %vm1061_vm4, %v1055_v37 }
  0xcd   : > { %6370 = vmatmul.msk.f32.gmra.mxu2 %vm929_vm5, %v924_v40 }
  0xce   : > { %6382 = vmatmul.msk.f32.gmra.mxu3 %vm989_vm2, %v888_v42  ;;  %6387 = vmatmul.msk.f32.gmra.mxu1 %vm1061_vm4, %v1056_v41 }
  0xd5   : > { %6371 = vmatmul.msk.f32.gmra.mxu2 %vm929_vm5, %v925_v43 }
  0xd6   : > { %6388 = vmatmul.msk.f32.gmra.mxu1 %vm1061_vm4, %v1057_v44 }
  0xdd   : > { %6372 = vmatmul.msk.f32.gmra.mxu2 %vm929_vm5, %v926_v45 }
  0xde   : > { %6389 = vmatmul.msk.f32.gmra.mxu1 %vm1061_vm4, %v1058_v46 }
  0xe5   : > { %6373 = vmatmul.msk.f32.gmra.mxu2 %vm929_vm5, %v927_v47 }
  0xe6   : > { %6390 = vmatmul.msk.f32.gmra.mxu1 %vm1061_vm4, %v1059_v48  ;;  %v1132_v48 = vld [vmem:[%s10292_s5] sm:$0xff] }
  0xed   : > { %6374 = vmatmul.msk.f32.gmra.mxu2 %vm929_vm5, %v928_v49 }
 0x11b   : > { %v1032_v51 = vpop.f32.mrf.mxu1 }
 0x123   : > { %v1035_v54 = vpop.f32.mrf.mxu1 }
 0x12b   : > { %v1038_v56 = vpop.f32.mrf.mxu1 }
 0x133   : > { %v1104_v57 = vpop.f32.mrf.mxu1 }
 0x139   : > { %v1041_v3 = vpop.f32.mrf.mxu3 }
 0x13b   : > { %v1107_v58 = vpop.f32.mrf.mxu1 }
 0x140   : > { %v968_v59 = vpop.f32.mrf.mxu2 }
 0x141   : > { %v1033_v60 = vadd.f32 %v1032_v51, %v968_v59  ;;  %v1044_v9 = vpop.f32.mrf.mxu3 }
 0x143   : > { %v7515_v61 = vadd.f32 %v1104_v57, %v1033_v60  ;;  %v1110_v63 = vpop.f32.mrf.mxu1 }
 0x145   : > { %6391 = vmatmul.msk.f32.vlgmr.msrb.gmra.mxu0 %vm1154_vm6, %v7515_v61 }
 0x148   : > { %v971_v62 = vpop.f32.mrf.mxu2 }
 0x149   : > { %v1036_v0 = vadd.f32 %v1035_v54, %v971_v62  ;;  %v1047_v15 = vpop.f32.mrf.mxu3 }
 0x14b   : > { %v7519_v1 = vadd.f32 %v1107_v58, %v1036_v0  ;;  %v1113_v5 = vpop.f32.mrf.mxu1  ;;  %v1134_v58 = vld [vmem:[%s10293_s27 + $0x10] sm:$0xff]  ;;  %v1135_v0 = vld [vmem:[%s10293_s27 + $0x18] sm:$0xff] }
 0x14d   : > { %6392 = vmatmul.msk.f32.gmra.mxu0 %vm1154_vm6, %v7519_v1 }
 0x150   : > { %v974_v2 = vpop.f32.mrf.mxu2 }
 0x151   : > { %v1039_v4 = vadd.f32 %v1038_v56, %v974_v2  ;;  %v1050_v20 = vpop.f32.mrf.mxu3 }
 0x153   : > { %v7523_v6 = vadd.f32 %v1110_v63, %v1039_v4  ;;  %v1116_v11 = vpop.f32.mrf.mxu1 }
 0x155   : > { %6393 = vmatmul.msk.f32.gmra.mxu0 %vm1154_vm6, %v7523_v6 }
 0x158   : > { %v977_v7 = vpop.f32.mrf.mxu2 }
 0x159   : > { %v1042_v8 = vadd.f32 %v1041_v3, %v977_v7  ;;  %v1136_v7 = vld [vmem:[%s10293_s27 + $0x20] sm:$0xff] }
 0x15b   : > { %v7527_v10 = vadd.f32 %v1113_v5, %v1042_v8  ;;  %v1119_v16 = vpop.f32.mrf.mxu1 }
 0x15d   : > { %6394 = vmatmul.msk.f32.gmra.mxu0 %vm1154_vm6, %v7527_v10 }
 0x160   : > { %v980_v12 = vpop.f32.mrf.mxu2 }
 0x161   : > { %v1045_v13 = vadd.f32 %v1044_v9, %v980_v12 }
 0x163   : > { %v7531_v14 = vadd.f32 %v1116_v11, %v1045_v13  ;;  %v1122_v22 = vpop.f32.mrf.mxu1  ;;  %v1137_v13 = vld [vmem:[%s10293_s27 + $0x28] sm:$0xff] }
 0x165   : > { %6395 = vmatmul.msk.f32.gmra.mxu0 %vm1154_vm6, %v7531_v14 }
 0x168   : > { %v983_v17 = vpop.f32.mrf.mxu2 }
 0x169   : > { %v1048_v18 = vadd.f32 %v1047_v15, %v983_v17 }
 0x16b   : > { %v7535_v19 = vadd.f32 %v1119_v16, %v1048_v18 }
 0x16d   : > { %6396 = vmatmul.msk.f32.gmra.mxu0 %vm1154_vm6, %v7535_v19 }
 0x170   : > { %v986_v21 = vpop.f32.mrf.mxu2 }
 0x171   : > { %v1051_v23 = vadd.f32 %v1050_v20, %v986_v21  ;;  %v1138_v20 = vld [vmem:[%s10293_s27 + $0x30] sm:$0xff] }
 0x173   : > { %v7539_v24 = vadd.f32 %v1122_v22, %v1051_v23 }
 0x175   : > { %6397 = vmatmul.msk.f32.gmra.mxu0 %vm1154_vm6, %v7539_v24 }
 0x1c2   : > { %v1193_v25 = vpop.f32.mrf.mxu0 }
 0x1c3   : > { %v7570_v39 = vadd.f32 %v6858_v27, %v1193_v25 }
 0x1ca   : > { %v1196_v26 = vpop.f32.mrf.mxu0 }
 0x1cb   : > { %v7550_v31 = vadd.f32 %v6858_v27, %v1196_v26 }
 0x1d2   : > { %v1199_v28 = vpop.f32.mrf.mxu0 }
 0x1d3   : > { %v7546_v29 = vadd.f32 %v6858_v27, %v1199_v28 }
 0x1d5   : > { %1225 = vrot.lane.b32.xlu2 %v7546_v29, %s7233_s6 }
 0x1da   : > { %v1202_v30 = vpop.f32.mrf.mxu0 }
 0x1db   : > { %v7558_v35 = vadd.f32 %v6858_v27, %v1202_v30 }
 0x1dd   : > { %1223 = vrot.lane.b32.xlu2 %v7550_v31, %s7233_s6 }
 0x1e2   : > { %v1205_v32 = vpop.f32.mrf.mxu0 }
 0x1e3   : > { %v7554_v33 = vadd.f32 %v6858_v27, %v1205_v32 }
 0x1e5   : > { %1229 = vrot.lane.b32.xlu1 %v7554_v33, %s7233_s6  ;;  %v6773_v25 = vpack.i.bf16 %v7558_v35, %v7554_v33 }
 0x1ea   : > { %v1208_v34 = vpop.f32.mrf.mxu0 }
 0x1eb   : > { %v7566_v38 = vadd.f32 %v6858_v27, %v1208_v34 }
 0x1ed   : > { %1227 = vrot.lane.b32.xlu1 %v7558_v35, %s7233_s6 }
 0x1f2   : > { %v1211_v36 = vpop.f32.mrf.mxu0 }
 0x1f3   : > { %v7562_v37 = vadd.f32 %v6858_v27, %v1211_v36 }
 0x1f5   : > { %1233 = vrot.lane.b32.xlu0 %v7562_v37, %s7233_s6  ;;  %v6768_v26 = vpack.i.bf16 %v7566_v38, %v7562_v37 }
 0x1fd   : > { %1231 = vrot.lane.b32.xlu0 %v7566_v38, %s7233_s6 }
 0x205   : > { %1221 = vrot.lane.b32.xlu0 %v7570_v39, %s7233_s6 }
 0x22f   : > { %v1226_v43 = vpop.permute.xlu2 %1225 }
 0x237   : > { %v1224_v45 = vpop.permute.xlu2 %1223 }
 0x257   : > { %v1230_v41 = vpop.permute.xlu1 %1229 }
 0x25f   : > { %v1228_v44 = vpop.permute.xlu1 %1227 }
 0x267   : > { %v1234_v40 = vpop.permute.xlu0 %1233 }
 0x268   : > { %6398 = vmatpush.xpose.msk.msrb.mxu3 %vm1154_vm6, %v1234_v40 }
 0x26f   : > { %v1232_v42 = vpop.permute.xlu0 %1231 }
 0x270   : > { %6399 = vmatpush.xpose.msk.msrb.mxu3 %vm1154_vm6, %v1232_v42 }
 0x274   : > { %6400 = vmatpush.xpose.msk.msrb.mxu3 %vm1154_vm6, %v1230_v41 }
 0x277   : > { %v1222_v46 = vpop.permute.xlu0 %1221 }
 0x278   : > { %6401 = vmatpush.xpose.msk.msrb.mxu3 %vm1154_vm6, %v1228_v44 }
 0x27c   : > { %6402 = vmatpush.xpose.msk.msrb.mxu3 %vm1154_vm6, %v1226_v43 }
 0x280   : > { %6403 = vmatpush.xpose.msk.msrb.mxu3 %vm1154_vm6, %v1224_v45 }
 0x284   : > { %6404 = vmatpush.xpose.msk.msrb.mxu3 %vm1154_vm6, %v1222_v46  ;;  %v6778_v46 = vpack.i.bf16 %v7550_v31, %v7546_v29 }
 0x287   : > { %6405 = vmatmul.msk.f32.vlgmr.msrb.gmra.mxu3 %vm1154_vm6, %v7570_v39 }
 0x28f   : > { %6406 = vmatmul.msk.f32.gmra.mxu3 %vm1154_vm6, %v7550_v31 }
 0x297   : > { %6407 = vmatmul.msk.f32.gmra.mxu3 %vm1154_vm6, %v7546_v29 }
 0x29f   : > { %6408 = vmatmul.msk.f32.gmra.mxu3 %vm1154_vm6, %v7558_v35 }
 0x2a7   : > { %6409 = vmatmul.msk.f32.gmra.mxu3 %vm1154_vm6, %v7554_v33 }
 0x2af   : > { %6410 = vmatmul.msk.f32.gmra.mxu3 %vm1154_vm6, %v7566_v38 }
 0x2b7   : > { %6411 = vmatmul.msk.f32.gmra.mxu3 %vm1154_vm6, %v7562_v37 }
 0x30a   : > { %v1280_v47 = vpop.f32.mrf.mxu3 }
 0x30b   : > { %v1301_v49 = vmul.f32 0.17677669, %v1280_v47 }
 0x30d   : > { %v1308_v50 = vadd.f32 %v1301_v49, %v1132_v48 }
 0x30f   : > { %v1316_v51 = vsel %vm1315_vm7, %v1308_v50, -inf }
 0x310   : > { %1317 = vmax.xlane.f32.xlu1 %v1316_v51 }
 0x312   : > { %v1283_v52 = vpop.f32.mrf.mxu3 }
 0x313   : > { %v1302_v54 = vmul.f32 0.17677669, %v1283_v52 }
 0x315   : > { %v1309_v55 = vadd.f32 %v1302_v54, %v1133_v53 }
 0x317   : > { %v1319_v56 = vsel %vm1315_vm7, %v1309_v55, -inf }
 0x318   : > { %1320 = vmax.xlane.f32.xlu2 %v1319_v56 }
 0x31a   : > { %v1286_v57 = vpop.f32.mrf.mxu3 }
 0x31b   : > { %v1303_v59 = vmul.f32 0.17677669, %v1286_v57 }
 0x31d   : > { %v1310_v60 = vadd.f32 %v1303_v59, %v1134_v58 }
 0x31f   : > { %v1322_v62 = vsel %vm1315_vm7, %v1310_v60, -inf }
 0x320   : > { %1323 = vmax.xlane.f32.xlu0 %v1322_v62 }
 0x322   : > { %v1289_v63 = vpop.f32.mrf.mxu3 }
 0x323   : > { %v1304_v2 = vmul.f32 0.17677669, %v1289_v63 }
 0x325   : > { %v7610_v3 = vadd.f32 %v1304_v2, %v1135_v0 }
 0x327   : > { %v1325_v4 = vsel %vm1315_vm7, %v7610_v3, -inf }
 0x328   : > { %1326 = vmax.xlane.f32.xlu2 %v1325_v4 }
 0x32a   : > { %v1292_v5 = vpop.f32.mrf.mxu3 }
 0x32b   : > { %v1305_v8 = vmul.f32 0.17677669, %v1292_v5 }
 0x32d   : > { %v7617_v9 = vadd.f32 %v1305_v8, %v1136_v7 }
 0x32f   : > { %v1328_v11 = vsel %vm1315_vm7, %v7617_v9, -inf }
 0x330   : > { %1329 = vmax.xlane.f32.xlu1 %v1328_v11 }
 0x332   : > { %v1295_v12 = vpop.f32.mrf.mxu3 }
 0x333   : > { %v1306_v15 = vmul.f32 0.17677669, %v1295_v12 }
 0x335   : > { %v1313_v16 = vadd.f32 %v1306_v15, %v1137_v13 }
 0x337   : > { %v1331_v17 = vsel %vm1315_vm7, %v1313_v16, -inf }
 0x338   : > { %1332 = vmax.xlane.f32.xlu2 %v1331_v17 }
 0x33a   : > { %v1298_v18 = vpop.f32.mrf.mxu3 }
 0x33b   : > { %v1307_v21 = vmul.f32 0.17677669, %v1298_v18 }
 0x33d   : > { %v1314_v22 = vadd.f32 %v1307_v21, %v1138_v20 }
 0x33f   : > { %v1334_v23 = vsel %vm1315_vm7, %v1314_v22, -inf }
 0x340   : > { %1335 = vmax.xlane.f32.xlu0 %v1334_v23 }
 0x349   : > { %6774 = vrot.lane.b32.xlu1 %v6773_v25, %s7234_s22 }
 0x350   : > { %6769 = vrot.lane.b32.xlu2 %v6768_v26, %s7234_s22 }
 0x383   : > { %v1318_v27 = vpop.xlane.xlu1 %1317 }
 0x384   : > { %v1337_v28 = vsub.f32 %v1308_v50, %v1318_v27 }
 0x386   : > { %v1344_v30 = vmul.f32 1.442695, %v1337_v28 }
 0x388   : > { %6894 = vpow2.f32 %v1344_v30 }
 0x38b   : > { %v1321_v32 = vpop.xlane.xlu2 %1320 }
 0x38c   : > { %v1338_v34 = vsub.f32 %v1309_v55, %v1321_v32 }
 0x38e   : > { %v7635_v36 = vpop.eup %6894  ;;  %v1346_v40 = vmul.f32 1.442695, %v1338_v34 }
 0x38f   : > { %v1358_v33 = vsel %vm1315_vm7, %v7635_v36, 0.0 }
 0x390   : > { %6896 = vpow2.f32 %v1346_v40  ;;  %1359 = vadd.xlane.f32.xlu1 %v1358_v33 }
 0x393   : > { %v1324_v35 = vpop.xlane.xlu0 %1323 }
 0x394   : > { %v1339_v41 = vsub.f32 %v1310_v60, %v1324_v35 }
 0x396   : > { %v7639_v42 = vpop.eup %6896  ;;  %v1348_v37 = vmul.f32 1.442695, %v1339_v41 }
 0x397   : > { %v1361_v38 = vsel %vm1315_vm7, %v7639_v42, 0.0 }
 0x398   : > { %6898 = vpow2.f32 %v1348_v37  ;;  %1362 = vadd.xlane.f32.xlu0 %v1361_v38 }
 0x39b   : > { %v1327_v45 = vpop.xlane.xlu2 %1326 }
 0x39c   : > { %v1340_v57 = vsub.f32 %v7610_v3, %v1327_v45 }
 0x39e   : > { %v7643_v43 = vpop.eup %6898  ;;  %v1350_v59 = vmul.f32 1.442695, %v1340_v57 }
 0x39f   : > { %v1364_v44 = vsel %vm1315_vm7, %v7643_v43, 0.0 }
 0x3a0   : > { %1365 = vadd.xlane.f32.xlu2 %v1364_v44 }
 0x3a3   : > { %v1330_v50 = vpop.xlane.xlu1 %1329 }
 0x3a4   : > { %v1341_v56 = vsub.f32 %v7617_v9, %v1330_v50 }
 0x3a6   : > { %v1352_v58 = vmul.f32 1.442695, %v1341_v56 }
 0x3a9   : > { %1484 = vrot.lane.b32.xlu1 %v7570_v39, %s7234_s22 }
 0x3ab   : > { %v1333_v47 = vpop.xlane.xlu2 %1332 }
 0x3ac   : > { %v1342_v48 = vsub.f32 %v1313_v16, %v1333_v47  ;;  %6779 = vrot.lane.b32.xlu0 %v6778_v46, %s7234_s22 }
 0x3ae   : > { %v1354_v49 = vmul.f32 1.442695, %v1342_v48 }
 0x3b0   : > { %6900 = vpow2.f32 %v1354_v49 }
 0x3b1   : > { %6902 = vpow2.f32 %v1352_v58 }
 0x3b2   : > { %6904 = vpow2.f32 %v1350_v59 }
 0x3b3   : > { %v6770_v51 = vpop.permute.xlu2 %6769  ;;  %v1336_v60 = vpop.xlane.xlu0 %1335 }
 0x3b4   : > { %v6771_v52 = vunpack.i.l.bf16 %v6770_v51  ;;  %v6772_v54 = vunpack.i.h.bf16 %v6770_v51  ;;  %v1343_v62 = vsub.f32 %v1314_v22, %v1336_v60 }
 0x3b6   : > { %v7652_v53 = vpop.eup %6900  ;;  %1535 = vmatpush.msrb.mxu2 %v6771_v52  ;;  %v1356_v0 = vmul.f32 1.442695, %v1343_v62 }
 0x3b7   : > { %v1373_v55 = vsel %vm1315_vm7, %v7652_v53, 0.0  ;;  %v7658_v63 = vpop.eup %6902 }
 0x3b8   : > { %1374 = vadd.xlane.f32.xlu2 %v1373_v55  ;;  %1536 = vmatpush.msrb.mxu2 %v6772_v54  ;;  %v7660_v2 = vpop.eup %6904  ;;  %v1370_v4 = vsel %vm1315_vm7, %v7658_v63, 0.0  ;;  %6906 = vpow2.f32 %v1356_v0 }
 0x3b9   : > { %v1367_v5 = vsel %vm1315_vm7, %v7660_v2, 0.0 }
 0x3bb   : > { %v6775_v39 = vpop.permute.xlu1 %6774 }
 0x3bc   : > { %v6776_v29 = vunpack.i.l.bf16 %v6775_v39  ;;  %v6777_v31 = vunpack.i.h.bf16 %v6775_v39 }
 0x3be   : > { %1537 = vmatpush.msrb.mxu2 %v6776_v29  ;;  %v7666_v3 = vpop.eup %6906 }
 0x3bf   : > { %v1376_v7 = vsel %vm1315_vm7, %v7666_v3, 0.0 }
 0x3c0   : > { %1538 = vmatpush.msrb.mxu2 %v6777_v31 }
 0x3d3   : > { %1371 = vadd.xlane.f32.xlu1 %v1370_v4 }
 0x3d6   : > { %1368 = vadd.xlane.f32.xlu0 %v1367_v5 }
 0x3de   : > { %1377 = vadd.xlane.f32.xlu0 %v1376_v7 }
 0x403   : > { %v1360_v8 = vpop.xlane.xlu1 %1359 }
 0x404   : > { %6908 = vrcp.f32 %v1360_v8  ;;  %v1390_v23 = vand.u32 2147483648, %v1360_v8  ;;  %vm1384_vm9 = vweird.f32 %v1360_v8  ;;  %v1388_v25 = vand.u32 2147483647, %v1360_v8 }
 0x406   : > { %v1391_v32 = vor.u32 1.1754944e-38, %v1390_v23  ;;  %vm1389_vm11 = vcmp.eq.f32.partialorder %v1388_v25, 8.507059e+37 }
 0x40a   : > { %v6909_v9 = vpop.eup %6908 }
 0x40b   : > { %v1363_v11 = vpop.xlane.xlu0 %1362  ;;  %v1380_v12 = vmul.f32 %v6909_v9, %v1360_v8  ;;  %vm1385_vm8 = vweird.f32 %v6909_v9 }
 0x40c   : > { %6910 = vrcp.f32 %v1363_v11  ;;  %vm1386_vm10 = vmor %vm1384_vm9, %vm1385_vm8  ;;  %v1405_v37 = vand.u32 2147483648, %v1363_v11  ;;  %vm1399_vm13 = vweird.f32 %v1363_v11  ;;  %v1403_v45 = vand.u32 2147483647, %v1363_v11 }
 0x40d   : > { %v1381_v13 = vsub.f32 1.0, %v1380_v12 }
 0x40e   : > { %v1406_v48 = vor.u32 1.1754944e-38, %v1405_v37  ;;  %vm1404_vm15 = vcmp.eq.f32.partialorder %v1403_v45, 8.507059e+37 }
 0x40f   : > { %v1382_v17 = vmul.f32 %v6909_v9, %v1381_v13 }
 0x411   : > { %v1383_v20 = vadd.f32 %v6909_v9, %v1382_v17 }
 0x412   : > { %v6911_v15 = vpop.eup %6910 }
 0x413   : > { %v1366_v16 = vpop.xlane.xlu2 %1365  ;;  %v1395_v18 = vmul.f32 %v6911_v15, %v1363_v11  ;;  %v1387_v26 = vsel %vm1386_vm10, %v6909_v9, %v1383_v20  ;;  %vm1400_vm12 = vweird.f32 %v6911_v15 }
 0x414   : > { %6912 = vrcp.f32 %v1366_v16  ;;  %v1392_v33 = vsel %vm1389_vm11, %v1391_v32, %v1387_v26  ;;  %vm1401_vm14 = vmor %vm1399_vm13, %vm1400_vm12  ;;  %v1420_v51 = vand.u32 2147483648, %v1366_v16  ;;  %vm1414_vm1 = vweird.f32 %v1366_v16 }
 0x415   : > { %v1396_v21 = vsub.f32 1.0, %v1395_v18  ;;  %v1393_v44 = vmul.f32 %v7635_v36, %v1392_v33  ;;  %v1418_v54 = vand.u32 2147483647, %v1366_v16 }
 0x416   : > { %v1421_v55 = vor.u32 1.1754944e-38, %v1420_v51 }
 0x417   : > { %v1397_v30 = vmul.f32 %v6911_v15, %v1396_v21  ;;  %vm1419_vm3 = vcmp.eq.f32.partialorder %v1418_v54, 8.507059e+37 }
 0x419   : > { %v1398_v41 = vadd.f32 %v6911_v15, %v1397_v30 }
 0x41a   : > { %v6913_v22 = vpop.eup %6912 }
 0x41b   : > { %v1410_v27 = vmul.f32 %v6913_v22, %v1366_v16  ;;  %v1485_v38 = vpop.permute.xlu1 %1484  ;;  %v1402_v46 = vsel %vm1401_vm14, %v6911_v15, %v1398_v41  ;;  %vm1415_vm0 = vweird.f32 %v6913_v22 }
 0x41c   : > { %v1407_v49 = vsel %vm1404_vm15, %v1406_v48, %v1402_v46  ;;  %vm1416_vm2 = vmor %vm1414_vm1, %vm1415_vm0 }
 0x41d   : > { %v1411_v35 = vsub.f32 1.0, %v1410_v27  ;;  %v1408_v52 = vmul.f32 %v7639_v42, %v1407_v49 }
 0x41e   : > { %v6780_v28 = vpop.permute.xlu0 %6779 }
 0x41f   : > { %v6781_v34 = vunpack.i.l.bf16 %v6780_v28  ;;  %v6782_v40 = vunpack.i.h.bf16 %v6780_v28  ;;  %v1412_v47 = vmul.f32 %v6913_v22, %v1411_v35 }
 0x421   : > { %1539 = vmatpush.msrb.mxu2 %v6781_v34  ;;  %v1413_v50 = vadd.f32 %v6913_v22, %v1412_v47 }
 0x423   : > { %1540 = vmatpush.msrb.mxu2 %v6782_v40  ;;  %v1417_v36 = vsel %vm1416_vm2, %v6913_v22, %v1413_v50 }
 0x424   : > { %v1422_v39 = vsel %vm1419_vm3, %v1421_v55, %v1417_v36 }
 0x425   : > { %1541 = vmatpush.msrb.mxu2 %v1485_v38  ;;  %v1423_v29 = vmul.f32 %v7643_v43, %v1422_v39 }
 0x426   : > { %6412 = vmatmul.msk.f32.vlgmr.msrb.gmra.mxu2 %vm1315_vm7, %v1393_v44 }
 0x42b   : > { %v1375_v56 = vpop.xlane.xlu2 %1374 }
 0x42c   : > { %v1465_v40 = vand.u32 2147483648, %v1375_v56  ;;  %vm1459_vm15 = vweird.f32 %v1375_v56  ;;  %v1463_v35 = vand.u32 2147483647, %v1375_v56 }
 0x42e   : > { %6413 = vmatmul.msk.f32.gmra.mxu2 %vm1315_vm7, %v1408_v52  ;;  %v1466_v37 = vor.u32 1.1754944e-38, %v1465_v40  ;;  %vm1464_vm1 = vcmp.eq.f32.partialorder %v1463_v35, 8.507059e+37 }
 0x436   : > { %6414 = vmatmul.msk.f32.gmra.mxu2 %vm1315_vm7, %v1423_v29 }
 0x446   : > { %v1372_v31 = vpop.xlane.xlu1 %1371 }
 0x447   : > { %6914 = vrcp.f32 %v1372_v31  ;;  %v1450_v21 = vand.u32 2147483648, %v1372_v31  ;;  %vm1444_vm11 = vweird.f32 %v1372_v31  ;;  %v1448_v23 = vand.u32 2147483647, %v1372_v31 }
 0x449   : > { %v1369_v57 = vpop.xlane.xlu0 %1368  ;;  %v1451_v28 = vor.u32 1.1754944e-38, %v1450_v21  ;;  %vm1449_vm13 = vcmp.eq.f32.partialorder %v1448_v23, 8.507059e+37 }
 0x44a   : > { %6916 = vrcp.f32 %v1369_v57  ;;  %v1435_v8 = vand.u32 2147483648, %v1369_v57  ;;  %v1433_v9 = vand.u32 2147483647, %v1369_v57  ;;  %vm1429_vm5 = vweird.f32 %v1369_v57 }
 0x44b   : > { %6918 = vrcp.f32 %v1375_v56 }
 0x44c   : > { %v1436_v15 = vor.u32 1.1754944e-38, %v1435_v8  ;;  %vm1434_vm9 = vcmp.eq.f32.partialorder %v1433_v9, 8.507059e+37  ;;  %v7235_v8 = vmov 32.0  }
 0x44d   : > { %v6915_v42 = vpop.eup %6914 }
 0x44e   : > { %v1440_v58 = vmul.f32 %v6915_v42, %v1372_v31  ;;  %vm1445_vm10 = vweird.f32 %v6915_v42 }
 0x44f   : > { %vm1446_vm12 = vmor %vm1444_vm11, %vm1445_vm10 }
 0x450   : > { %v6917_v59 = vpop.eup %6916  ;;  %v1441_v62 = vsub.f32 1.0, %v1440_v58 }
 0x451   : > { %v6919_v60 = vpop.eup %6918  ;;  %v1425_v0 = vmul.f32 %v6917_v59, %v1369_v57  ;;  %v1378_v4 = vpop.xlane.xlu0 %1377  ;;  %vm1430_vm4 = vweird.f32 %v6917_v59 }
 0x452   : > { %v1455_v7 = vmul.f32 %v6919_v60, %v1375_v56  ;;  %6920 = vrcp.f32 %v1378_v4  ;;  %v1442_v11 = vmul.f32 %v6915_v42, %v1441_v62  ;;  %vm1431_vm8 = vmor %vm1429_vm5, %vm1430_vm4  ;;  %vm1460_vm14 = vweird.f32 %v6919_v60 }
 0x453   : > { %v1426_v5 = vsub.f32 1.0, %v1425_v0  ;;  %vm1461_vm0 = vmor %vm1459_vm15, %vm1460_vm14  ;;  %v1480_v45 = vand.u32 2147483648, %v1378_v4  ;;  %vm1474_vm3 = vweird.f32 %v1378_v4  ;;  %v1478_v47 = vand.u32 2147483647, %v1378_v4 }
 0x454   : > { %v1456_v13 = vsub.f32 1.0, %v1455_v7  ;;  %v1443_v17 = vadd.f32 %v6915_v42, %v1442_v11  ;;  %6922 = vrcp.f32 %v7235_v8 }
 0x455   : > { %v1427_v43 = vmul.f32 %v6917_v59, %v1426_v5  ;;  %v1481_v48 = vor.u32 1.1754944e-38, %v1480_v45  ;;  %vm1479_vm5 = vcmp.eq.f32.partialorder %v1478_v47, 8.507059e+37 }
 0x456   : > { %v1447_v26 = vsel %vm1446_vm12, %v6915_v42, %v1443_v17  ;;  %v1457_v27 = vmul.f32 %v6919_v60, %v1456_v13 }
 0x457   : > { %v1428_v12 = vadd.f32 %v6917_v59, %v1427_v43  ;;  %v1452_v30 = vsel %vm1449_vm13, %v1451_v28, %v1447_v26 }
 0x458   : > { %v6921_v18 = vpop.eup %6920  ;;  %v1458_v34 = vadd.f32 %v6919_v60, %v1457_v27  ;;  %v1453_v33 = vmul.f32 %v7658_v63, %v1452_v30 }
 0x459   : > { %v1432_v16 = vsel %vm1431_vm8, %v6917_v59, %v1428_v12  ;;  %v1470_v25 = vmul.f32 %v6921_v18, %v1378_v4  ;;  %vm1475_vm2 = vweird.f32 %v6921_v18 }
 0x45a   : > { %v1437_v20 = vsel %vm1434_vm9, %v1436_v15, %v1432_v16  ;;  %vm1476_vm4 = vmor %vm1474_vm3, %vm1475_vm2  ;;  %v6923_v43 = vpop.eup %6922 }
 0x45b   : > { %v1438_v22 = vmul.f32 %v7660_v2, %v1437_v20  ;;  %v1471_v32 = vsub.f32 1.0, %v1470_v25  ;;  %v1462_v2 = vsel %vm1461_vm0, %v6919_v60, %v1458_v34  ;;  %v1595_v9 = vmul.f32 32.0, %v6923_v43 }
 0x45c   : > { %v1467_v38 = vsel %vm1464_vm1, %v1466_v37, %v1462_v2  ;;  %vm1599_vm8 = vweird.f32 %v6923_v43 }
 0x45d   : > { %6415 = vmatmul.msk.f32.gmra.mxu2 %vm1315_vm7, %v1438_v22  ;;  %v1472_v41 = vmul.f32 %v6921_v18, %v1471_v32  ;;  %v1468_v46 = vmul.f32 %v7652_v53, %v1467_v38  ;;  %v1596_v11 = vsub.f32 1.0, %v1595_v9 }
 0x45f   : > { %v1473_v44 = vadd.f32 %v6921_v18, %v1472_v41  ;;  %v1597_v12 = vmul.f32 %v6923_v43, %v1596_v11 }
 0x461   : > { %v1477_v63 = vsel %vm1476_vm4, %v6921_v18, %v1473_v44  ;;  %v1598_v13 = vadd.f32 %v6923_v43, %v1597_v12 }
 0x462   : > { %v1482_v49 = vsel %vm1479_vm5, %v1481_v48, %v1477_v63 }
 0x463   : > { %v1483_v50 = vmul.f32 %v7666_v3, %v1482_v49  ;;  %v7719_v15 = vsel %vm1599_vm8, %v6923_v43, %v1598_v13 }
 0x465   : > { %6416 = vmatmul.msk.f32.gmra.mxu2 %vm1315_vm7, %v1453_v33 }
 0x46d   : > { %6417 = vmatmul.msk.f32.gmra.mxu2 %vm1315_vm7, %v1468_v46 }
 0x475   : > { %6418 = vmatmul.msk.f32.gmra.mxu2 %vm1315_vm7, %v1483_v50 }
 0x4a9   : > { %v1543_v51 = vpop.f32.mrf.mxu2 }
 0x4aa   : > { %v7685_v52 = vadd.f32 %v1543_v51, %v7515_v61 }
 0x4ac   : > { %v1573_v53 = vsel %vm1154_vm6, %v7685_v52, 0.0 }
 0x4ad   : > { %1574 = vadd.xlane.f32.xlu2 %v1573_v53 }
 0x4b1   : > { %v1546_v54 = vpop.f32.mrf.mxu2 }
 0x4b2   : > { %v7690_v36 = vadd.f32 %v1546_v54, %v7519_v1 }
 0x4b4   : > { %v1576_v55 = vsel %vm1154_vm6, %v7690_v36, 0.0 }
 0x4b5   : > { %1577 = vadd.xlane.f32.xlu1 %v1576_v55 }
 0x4b9   : > { %v1549_v39 = vpop.f32.mrf.mxu2 }
 0x4ba   : > { %v7695_v3 = vadd.f32 %v1549_v39, %v7523_v6 }
 0x4bc   : > { %v1579_v29 = vsel %vm1154_vm6, %v7695_v3, 0.0 }
 0x4bd   : > { %1580 = vadd.xlane.f32.xlu0 %v1579_v29 }
 0x4e0   : > { %v1552_v31 = vpop.f32.mrf.mxu2 }
 0x4e1   : > { %v7700_v56 = vadd.f32 %v1552_v31, %v7527_v10  ;;  %v1757_v31 = vld [vmem:[%s10254_s14 + $0x18] sm:$0xff] }
 0x4e2   : > { %1795 = vmatpush.msrb.mxu1 %v1757_v31 }
 0x4e3   : > { %v1582_v57 = vsel %vm1154_vm6, %v7700_v56, 0.0 }
 0x4e4   : > { %1583 = vadd.xlane.f32.xlu2 %v1582_v57  ;;  %v1756_v57 = vld [vmem:[%s10254_s14 + $0x10] sm:$0xff] }
 0x4e5   : > { %1796 = vmatpush.msrb.mxu1 %v1756_v57 }
 0x4e8   : > { %v1555_v42 = vpop.f32.mrf.mxu2 }
 0x4e9   : > { %v7705_v58 = vadd.f32 %v1555_v42, %v7531_v14  ;;  %v1755_v42 = vld [vmem:[%s10254_s14 + $0x8] sm:$0xff] }
 0x4ea   : > { %1797 = vmatpush.msrb.mxu1 %v1755_v42 }
 0x4eb   : > { %v1585_v59 = vsel %vm1154_vm6, %v7705_v58, 0.0 }
 0x4ec   : > { %1586 = vadd.xlane.f32.xlu1 %v1585_v59  ;;  %v1754_v59 = vld [vmem:[%s10254_s14] sm:$0xff] }
 0x4ed   : > { %1798 = vmatpush.msrb.mxu1 %v1754_v59 }
 0x4f0   : > { %v1558_v60 = vpop.f32.mrf.mxu2 }
 0x4f1   : > { %v7710_v62 = vadd.f32 %v1558_v60, %v7535_v19 }
 0x4f3   : > { %v1588_v0 = vsel %vm1154_vm6, %v7710_v62, 0.0 }
 0x4f4   : > { %1589 = vadd.xlane.f32.xlu0 %v1588_v0 }
 0x4f8   : > { %v1561_v4 = vpop.f32.mrf.mxu2 }
 0x4f9   : > { %v7715_v5 = vadd.f32 %v1561_v4, %v7539_v24 }
 0x4fb   : > { %v1591_v7 = vsel %vm1154_vm6, %v7715_v5, 0.0 }
 0x4fc   : > { %1592 = vadd.xlane.f32.xlu1 %v1591_v7 }
 0x520   : > { %v1575_v16 = vpop.xlane.xlu2 %1574 }
 0x521   : > { %v1601_v17 = vmul.f32 %v7719_v15, %v1575_v16 }
 0x523   : > { %v7723_v18 = vsub.f32 %v7685_v52, %v1601_v17 }
 0x525   : > { %v1615_v20 = vmul.f32 %v7723_v18, %v7723_v18 }
 0x527   : > { %v1622_v21 = vsel %vm1154_vm6, %v1615_v20, 0.0 }
 0x528   : > { %v1578_v22 = vpop.xlane.xlu1 %1577  ;;  %1623 = vadd.xlane.f32.xlu2 %v1622_v21 }
 0x529   : > { %v1602_v23 = vmul.f32 %v7719_v15, %v1578_v22 }
 0x52b   : > { %v7730_v25 = vsub.f32 %v7690_v36, %v1602_v23 }
 0x52d   : > { %v1616_v26 = vmul.f32 %v7730_v25, %v7730_v25 }
 0x52f   : > { %v1625_v27 = vsel %vm1154_vm6, %v1616_v26, 0.0 }
 0x530   : > { %v1581_v28 = vpop.xlane.xlu0 %1580  ;;  %1626 = vadd.xlane.f32.xlu0 %v1625_v27  ;;  %v7788_v27 = vld [vmem:[%s10260_s20] ss:$0 sm:$0xff] }
 0x531   : > { %v1603_v30 = vmul.f32 %v7719_v15, %v1581_v28 }
 0x533   : > { %v7737_v32 = vsub.f32 %v7695_v3, %v1603_v30 }
 0x535   : > { %v1617_v34 = vmul.f32 %v7737_v32, %v7737_v32 }
 0x537   : > { %v1628_v40 = vsel %vm1154_vm6, %v1617_v34, 0.0 }
 0x538   : > { %1629 = vadd.xlane.f32.xlu2 %v1628_v40  ;;  %v7794_v40 = vld [vmem:[%s10261_s21] ss:$0 sm:$0xff] }
 0x557   : > { %v1584_v33 = vpop.xlane.xlu2 %1583 }
 0x558   : > { %v1604_v35 = vmul.f32 %v7719_v15, %v1584_v33 }
 0x55a   : > { %v7744_v2 = vsub.f32 %v7700_v56, %v1604_v35 }
 0x55c   : > { %v1618_v41 = vmul.f32 %v7744_v2, %v7744_v2 }
 0x55e   : > { %v1631_v37 = vsel %vm1154_vm6, %v1618_v41, 0.0 }
 0x55f   : > { %v1587_v38 = vpop.xlane.xlu1 %1586  ;;  %1632 = vadd.xlane.f32.xlu1 %v1631_v37 }
 0x560   : > { %v1605_v44 = vmul.f32 %v7719_v15, %v1587_v38 }
 0x562   : > { %v7751_v45 = vsub.f32 %v7705_v58, %v1605_v44 }
 0x564   : > { %v1619_v46 = vmul.f32 %v7751_v45, %v7751_v45 }
 0x566   : > { %v1634_v47 = vsel %vm1154_vm6, %v1619_v46, 0.0 }
 0x567   : > { %1635 = vadd.xlane.f32.xlu0 %v1634_v47  ;;  %v1590_v63 = vpop.xlane.xlu0 %1589 }
 0x568   : > { %v1606_v48 = vmul.f32 %v7719_v15, %v1590_v63 }
 0x56a   : > { %v7758_v49 = vsub.f32 %v7710_v62, %v1606_v48 }
 0x56c   : > { %v1620_v50 = vmul.f32 %v7758_v49, %v7758_v49 }
 0x56e   : > { %v1637_v51 = vsel %vm1154_vm6, %v1620_v50, 0.0 }
 0x56f   : > { %1638 = vadd.xlane.f32.xlu2 %v1637_v51  ;;  %v1593_v53 = vpop.xlane.xlu1 %1592 }
 0x570   : > { %v1607_v54 = vmul.f32 %v7719_v15, %v1593_v53 }
 0x572   : > { %v7765_v55 = vsub.f32 %v7715_v5, %v1607_v54 }
 0x574   : > { %v1621_v39 = vmul.f32 %v7765_v55, %v7765_v55 }
 0x576   : > { %v1640_v29 = vsel %vm1154_vm6, %v1621_v39, 0.0 }
 0x577   : > { %1641 = vadd.xlane.f32.xlu1 %v1640_v29 }
 0x59b   : > { %v1624_v60 = vpop.xlane.xlu2 %1623 }
 0x59c   : > { %v1643_v0 = vmul.f32 %v1624_v60, %v7719_v15 }
 0x59e   : > { %v1650_v4 = vadd.f32 1e-05, %v1643_v0 }
 0x5a0   : > { %6924 = vrsqrt.f32 %v1650_v4  ;;  %vm1663_vm10 = vweird.f32 %v1650_v4 }
 0x5a3   : > { %v1627_v7 = vpop.xlane.xlu0 %1626 }
 0x5a4   : > { %v1644_v8 = vmul.f32 %v1627_v7, %v7719_v15 }
 0x5a6   : > { %v6925_v43 = vpop.eup %6924  ;;  %v1651_v9 = vadd.f32 1e-05, %v1644_v8 }
 0x5a7   : > { %v1658_v11 = vmul.f32 %v6925_v43, %v1650_v4  ;;  %vm1664_vm9 = vweird.f32 %v6925_v43 }
 0x5a8   : > { %6926 = vrsqrt.f32 %v1651_v9  ;;  %vm1665_vm11 = vmor %vm1663_vm10, %vm1664_vm9  ;;  %vm1673_vm13 = vweird.f32 %v1651_v9 }
 0x5a9   : > { %v1659_v12 = vmul.f32 %v6925_v43, %v1658_v11 }
 0x5ab   : > { %v1660_v13 = vmul.f32 0.5, %v1659_v12  ;;  %v1630_v16 = vpop.xlane.xlu2 %1629 }
 0x5ac   : > { %v1645_v17 = vmul.f32 %v1630_v16, %v7719_v15 }
 0x5ad   : > { %v1661_v20 = vsub.f32 1.5, %v1660_v13 }
 0x5ae   : > { %v6927_v21 = vpop.eup %6926  ;;  %v1652_v22 = vadd.f32 1e-05, %v1645_v17 }
 0x5af   : > { %v1662_v23 = vmul.f32 %v6925_v43, %v1661_v20  ;;  %v1668_v26 = vmul.f32 %v6927_v21, %v1651_v9  ;;  %vm1674_vm12 = vweird.f32 %v6927_v21 }
 0x5b0   : > { %6928 = vrsqrt.f32 %v1652_v22  ;;  %vm1675_vm14 = vmor %vm1673_vm13, %vm1674_vm12  ;;  %vm1683_vm0 = vweird.f32 %v1652_v22 }
 0x5b1   : > { %v1666_v28 = vsel %vm1665_vm11, %v6925_v43, %v1662_v23  ;;  %v1669_v30 = vmul.f32 %v6927_v21, %v1668_v26 }
 0x5b2   : > { %v1727_v34 = vmul.f32 %v1666_v28, %v7723_v18 }
 0x5b3   : > { %v1670_v33 = vmul.f32 0.5, %v1669_v30  ;;  %v1841_v30 = vld [vmem:[%s10256_s16 + $0x68] sm:$0xff] }
 0x5b4   : > { %v1737_v35 = vmul.f32 %v7788_v27, %v1727_v34 }
 0x5b5   : > { %v1671_v41 = vsub.f32 1.5, %v1670_v33 }
 0x5b6   : > { %v6929_v37 = vpop.eup %6928  ;;  %v1747_v38 = vadd.f32 %v7794_v40, %v1737_v35 }
 0x5b7   : > { %v1672_v44 = vmul.f32 %v6927_v21, %v1671_v41  ;;  %v1678_v46 = vmul.f32 %v6929_v37, %v1652_v22  ;;  %vm1684_vm15 = vweird.f32 %v6929_v37  ;;  %v1842_v22 = vld [vmem:[%s10256_s16 + $0x70] sm:$0xff] }
 0x5b8   : > { %6419 = vmatmul.msk.f32.vlgmr.msrb.gmra.mxu1 %vm1154_vm6, %v1747_v38  ;;  %vm1685_vm1 = vmor %vm1683_vm0, %vm1684_vm15 }
 0x5b9   : > { %v1679_v18 = vmul.f32 %v6929_v37, %v1678_v46  ;;  %v1676_v47 = vsel %vm1675_vm14, %v6927_v21, %v1672_v44  ;;  %v1843_v21 = vld [vmem:[%s10256_s16 + $0x78] sm:$0xff] }
 0x5ba   : > { %v1728_v63 = vmul.f32 %v1676_v47, %v7730_v25  ;;  %1848 = vmatpush.msra.mxu0 %v1843_v21 }
 0x5bb   : > { %v1680_v48 = vmul.f32 0.5, %v1679_v18  ;;  %v1839_v18 = vld [vmem:[%s10256_s16 + $0x58] sm:$0xff] }
 0x5bc   : > { %v1738_v50 = vmul.f32 %v7788_v27, %v1728_v63  ;;  %1849 = vmatpush.msra.mxu0 %v1842_v22 }
 0x5bd   : > { %v1681_v51 = vsub.f32 1.5, %v1680_v48  ;;  %v1838_v48 = vld [vmem:[%s10256_s16 + $0x50] sm:$0xff] }
 0x5be   : > { %v1748_v53 = vadd.f32 %v7794_v40, %v1738_v50  ;;  %1850 = vmatpush.msra.mxu0 %v1841_v30 }
 0x5bf   : > { %v1682_v54 = vmul.f32 %v6929_v37, %v1681_v51 }
 0x5c0   : > { %6420 = vmatmul.msk.f32.gmra.mxu1 %vm1154_vm6, %v1748_v53 }
 0x5c1   : > { %v1686_v39 = vsel %vm1685_vm1, %v6929_v37, %v1682_v54  ;;  %v1840_v37 = vld [vmem:[%s10256_s16 + $0x60] sm:$0xff]  ;;  %v1837_v54 = vld [vmem:[%s10256_s16 + $0x48] sm:$0xff] }
 0x5c2   : > { %v1729_v29 = vmul.f32 %v1686_v39, %v7737_v32  ;;  %1851 = vmatpush.msra.mxu0 %v1840_v37 }
 0x5c4   : > { %v1739_v31 = vmul.f32 %v7788_v27, %v1729_v29  ;;  %1852 = vmatpush.msra.mxu0 %v1839_v18 }
 0x5c6   : > { %v1749_v57 = vadd.f32 %v7794_v40, %v1739_v31  ;;  %1853 = vmatpush.msra.mxu0 %v1838_v48  ;;  %v1836_v31 = vld [vmem:[%s10256_s16 + $0x40] sm:$0xff] }
 0x5c8   : > { %6421 = vmatmul.msk.f32.gmra.mxu1 %vm1154_vm6, %v1749_v57  ;;  %1854 = vmatpush.msra.mxu0 %v1837_v54 }
 0x5ca   : > { %1855 = vmatpush.msra.mxu0 %v1836_v31 }
 0x5d2   : > { %v1633_v25 = vpop.xlane.xlu1 %1632 }
 0x5d3   : > { %v1646_v42 = vmul.f32 %v1633_v25, %v7719_v15 }
 0x5d5   : > { %v1653_v59 = vadd.f32 1e-05, %v1646_v42 }
 0x5d7   : > { %6930 = vrsqrt.f32 %v1653_v59  ;;  %vm1693_vm3 = vweird.f32 %v1653_v59 }
 0x5da   : > { %v1636_v60 = vpop.xlane.xlu0 %1635 }
 0x5db   : > { %v1647_v0 = vmul.f32 %v1636_v60, %v7719_v15 }
 0x5dd   : > { %v6931_v4 = vpop.eup %6930  ;;  %v1654_v7 = vadd.f32 1e-05, %v1647_v0  ;;  %v1834_v0 = vld [vmem:[%s10256_s16 + $0x30] sm:$0xff] }
 0x5de   : > { %v1688_v8 = vmul.f32 %v6931_v4, %v1653_v59  ;;  %vm1694_vm2 = vweird.f32 %v6931_v4 }
 0x5df   : > { %6932 = vrsqrt.f32 %v1654_v7  ;;  %vm1695_vm4 = vmor %vm1693_vm3, %vm1694_vm2  ;;  %vm1703_vm8 = vweird.f32 %v1654_v7 }
 0x5e0   : > { %v1689_v43 = vmul.f32 %v6931_v4, %v1688_v8 }
 0x5e2   : > { %v1690_v32 = vmul.f32 0.5, %v1689_v43  ;;  %v1639_v9 = vpop.xlane.xlu2 %1638  ;;  %v1833_v43 = vld [vmem:[%s10256_s16 + $0x28] sm:$0xff] }
 0x5e3   : > { %v1648_v11 = vmul.f32 %v1639_v9, %v7719_v15 }
 0x5e4   : > { %v1691_v12 = vsub.f32 1.5, %v1690_v32 }
 0x5e5   : > { %v6933_v13 = vpop.eup %6932  ;;  %v1655_v16 = vadd.f32 1e-05, %v1648_v11  ;;  %v1832_v11 = vld [vmem:[%s10256_s16 + $0x20] sm:$0xff] }
 0x5e6   : > { %v1692_v17 = vmul.f32 %v6931_v4, %v1691_v12  ;;  %v1698_v20 = vmul.f32 %v6933_v13, %v1654_v7  ;;  %vm1704_vm5 = vweird.f32 %v6933_v13 }
 0x5e7   : > { %6934 = vrsqrt.f32 %v1655_v16  ;;  %vm1705_vm9 = vmor %vm1703_vm8, %vm1704_vm5  ;;  %vm1713_vm11 = vweird.f32 %v1655_v16 }
 0x5e8   : > { %v1699_v23 = vmul.f32 %v6933_v13, %v1698_v20  ;;  %v1696_v26 = vsel %vm1695_vm4, %v6931_v4, %v1692_v17 }
 0x5e9   : > { %v1730_v28 = vmul.f32 %v1696_v26, %v7744_v2  ;;  %v1829_v26 = vld [vmem:[%s10256_s16 + $0x8] sm:$0xff] }
 0x5ea   : > { %v1700_v34 = vmul.f32 0.5, %v1699_v23  ;;  %v1642_v33 = vpop.xlane.xlu1 %1641  ;;  %v1830_v23 = vld [vmem:[%s10256_s16 + $0x10] sm:$0xff] }
 0x5eb   : > { %v1649_v35 = vmul.f32 %v1642_v33, %v7719_v15  ;;  %v1740_v41 = vmul.f32 %v7788_v27, %v1730_v28 }
 0x5ec   : > { %v1701_v38 = vsub.f32 1.5, %v1700_v34 }
 0x5ed   : > { %v6935_v44 = vpop.eup %6934  ;;  %v1656_v2 = vadd.f32 1e-05, %v1649_v35  ;;  %v1750_v46 = vadd.f32 %v7794_v40, %v1740_v41 }
 0x5ee   : > { %v1702_v47 = vmul.f32 %v6933_v13, %v1701_v38  ;;  %v1708_v63 = vmul.f32 %v6935_v44, %v1655_v16  ;;  %vm1714_vm10 = vweird.f32 %v6935_v44 }
 0x5ef   : > { %6936 = vrsqrt.f32 %v1656_v2  ;;  %6422 = vmatmul.msk.f32.gmra.mxu1 %vm1154_vm6, %v1750_v46  ;;  %vm1715_vm12 = vmor %vm1713_vm11, %vm1714_vm10  ;;  %vm1723_vm14 = vweird.f32 %v1656_v2 }
 0x5f0   : > { %v1709_v50 = vmul.f32 %v6935_v44, %v1708_v63  ;;  %v1706_v51 = vsel %vm1705_vm9, %v6933_v13, %v1702_v47 }
 0x5f1   : > { %v1731_v53 = vmul.f32 %v1706_v51, %v7751_v45  ;;  %v1835_v45 = vld [vmem:[%s10256_s16 + $0x38] sm:$0xff] }
 0x5f2   : > { %v1710_v39 = vmul.f32 0.5, %v1709_v50  ;;  %1856 = vmatpush.msra.mxu0 %v1835_v45 }
 0x5f3   : > { %v1741_v29 = vmul.f32 %v7788_v27, %v1731_v53 }
 0x5f4   : > { %v1711_v57 = vsub.f32 1.5, %v1710_v39  ;;  %1857 = vmatpush.msra.mxu0 %v1834_v0 }
 0x5f5   : > { %v6937_v25 = vpop.eup %6936  ;;  %v1751_v42 = vadd.f32 %v7794_v40, %v1741_v29  ;;  %v6862_v29 = vld [vmem:[%s10257_s17] ss:$0 sm:$0xff] }
 0x5f6   : > { %v1712_v59 = vmul.f32 %v6935_v44, %v1711_v57  ;;  %v1718_v60 = vmul.f32 %v6937_v25, %v1656_v2  ;;  %vm1724_vm13 = vweird.f32 %v6937_v25  ;;  %1858 = vmatpush.msra.mxu0 %v1833_v43 }
 0x5f7   : > { %6423 = vmatmul.msk.f32.gmra.mxu1 %vm1154_vm6, %v1751_v42  ;;  %vm1725_vm15 = vmor %vm1723_vm14, %vm1724_vm13 }
 0x5f8   : > { %v1719_v4 = vmul.f32 %v6937_v25, %v1718_v60  ;;  %v1716_v7 = vsel %vm1715_vm12, %v6935_v44, %v1712_v59  ;;  %1859 = vmatpush.msra.mxu0 %v1832_v11 }
 0x5f9   : > { %v1732_v8 = vmul.f32 %v1716_v7, %v7758_v49  ;;  %v1831_v49 = vld [vmem:[%s10256_s16 + $0x18] sm:$0xff] }
 0x5fa   : > { %v1720_v32 = vmul.f32 0.5, %v1719_v4  ;;  %1860 = vmatpush.msra.mxu0 %v1831_v49 }
 0x5fb   : > { %v1742_v9 = vmul.f32 %v7788_v27, %v1732_v8 }
 0x5fc   : > { %v1721_v12 = vsub.f32 1.5, %v1720_v32  ;;  %1861 = vmatpush.msra.mxu0 %v1830_v23 }
 0x5fd   : > { %v1752_v13 = vadd.f32 %v7794_v40, %v1742_v9 }
 0x5fe   : > { %v1722_v16 = vmul.f32 %v6937_v25, %v1721_v12  ;;  %1862 = vmatpush.msra.mxu0 %v1829_v26 }
 0x5ff   : > { %6424 = vmatmul.msk.f32.gmra.mxu1 %vm1154_vm6, %v1752_v13 }
 0x600   : > { %v1726_v17 = vsel %vm1725_vm15, %v6937_v25, %v1722_v16 }
 0x601   : > { %v1733_v20 = vmul.f32 %v1726_v17, %v7765_v55  ;;  %v1828_v55 = vld [vmem:[%s10256_s16] sm:$0xff] }
 0x602   : > { %1863 = vmatpush.msra.mxu0 %v1828_v55 }
 0x603   : > { %v1743_v21 = vmul.f32 %v7788_v27, %v1733_v20  ;;  %v6861_v27 = vld [vmem:[%s10255_s15] ss:$0 sm:$0xff] }
 0x605   : > { %v1753_v22 = vadd.f32 %v7794_v40, %v1743_v21 }
 0x607   : > { %6425 = vmatmul.msk.f32.gmra.mxu1 %vm1154_vm6, %v1753_v22 }
 0x635   : > { %v1800_v40 = vpop.f32.mrf.mxu1 }
 0x636   : > { %v1801_v28 = vadd.f32 %v6861_v27, %v1800_v40 }
 0x638   : > { %v1821_v30 = vmax.f32 %v1801_v28, 0.0 }
 0x63a   : > { %1864 = vmatmul.f32.vlgmr.msra.gmra.mxu0 %v1821_v30 }
 0x63d   : > { %v1803_v34 = vpop.f32.mrf.mxu1 }
 0x63e   : > { %v1804_v33 = vadd.f32 %v6861_v27, %v1803_v34 }
 0x640   : > { %v1822_v35 = vmax.f32 %v1804_v33, 0.0 }
 0x642   : > { %1867 = vmatmul.f32.gmra.mxu0 %v1822_v35 }
 0x645   : > { %v1806_v41 = vpop.f32.mrf.mxu1 }
 0x646   : > { %v1807_v37 = vadd.f32 %v6861_v27, %v1806_v41 }
 0x648   : > { %v1823_v38 = vmax.f32 %v1807_v37, 0.0 }
 0x64a   : > { %1870 = vmatmul.f32.gmra.mxu0 %v1823_v38 }
 0x66c   : > { %v1809_v44 = vpop.f32.mrf.mxu1 }
 0x66d   : > { %v1810_v2 = vadd.f32 %v6861_v27, %v1809_v44 }
 0x66f   : > { %v1824_v46 = vmax.f32 %v1810_v2, 0.0 }
 0x671   : > { %1873 = vmatmul.f32.gmra.mxu0 %v1824_v46 }
 0x674   : > { %v1812_v18 = vpop.f32.mrf.mxu1 }
 0x675   : > { %v1813_v47 = vadd.f32 %v6861_v27, %v1812_v18 }
 0x677   : > { %v1825_v63 = vmax.f32 %v1813_v47, 0.0 }
 0x679   : > { %1876 = vmatmul.f32.gmra.mxu0 %v1825_v63 }
 0x67c   : > { %v1815_v48 = vpop.f32.mrf.mxu1 }
 0x67d   : > { %v1816_v50 = vadd.f32 %v6861_v27, %v1815_v48 }
 0x67f   : > { %v1826_v51 = vmax.f32 %v1816_v50, 0.0 }
 0x681   : > { %1879 = vmatmul.f32.gmra.mxu0 %v1826_v51 }
 0x684   : > { %v1818_v53 = vpop.f32.mrf.mxu1 }
 0x685   : > { %v1819_v54 = vadd.f32 %v6861_v27, %v1818_v53 }
 0x687   : > { %v1827_v39 = vmax.f32 %v1819_v54, 0.0 }
 0x689   : > { %1882 = vmatmul.f32.gmra.mxu0 %v1827_v39 }
 0x6b7   : > { %v1865_v31 = vpop.f32.mrf.mxu0 }
 0x6b8   : > { %v1866_v57 = vadd.f32 %v6862_v29, %v1865_v31 }
 0x6ba   : > { %v7882_v25 = vadd.f32 %v1866_v57, %v7685_v52 }
 0x6bc   : > { %v1897_v42 = vsel %vm1154_vm6, %v7882_v25, 0.0 }
 0x6bd   : > { %1898 = vadd.xlane.f32.xlu0 %v1897_v42 }
 0x6bf   : > { %v1868_v45 = vpop.f32.mrf.mxu0 }
 0x6c0   : > { %v1869_v59 = vadd.f32 %v6862_v29, %v1868_v45 }
 0x6c2   : > { %v7887_v60 = vadd.f32 %v1869_v59, %v7690_v36 }
 0x6c4   : > { %v1900_v0 = vsel %vm1154_vm6, %v7887_v60, 0.0 }
 0x6c5   : > { %1901 = vadd.xlane.f32.xlu2 %v1900_v0 }
 0x6c7   : > { %v1871_v4 = vpop.f32.mrf.mxu0 }
 0x6c8   : > { %v1872_v7 = vadd.f32 %v6862_v29, %v1871_v4 }
 0x6ca   : > { %v7892_v8 = vadd.f32 %v1872_v7, %v7695_v3  ;;  %v6431_v7 = vld [vmem:[%s10252_s12 + $0x38] sm:$0xff] }
 0x6cb   : > { %2114 = vmatpush.msra.mxu3 %v6431_v7 }
 0x6cc   : > { %v1903_v52 = vsel %vm1154_vm6, %v7892_v8, 0.0 }
 0x6cd   : > { %1904 = vadd.xlane.f32.xlu1 %v1903_v52  ;;  %v6430_v52 = vld [vmem:[%s10252_s12 + $0x30] sm:$0xff] }
 0x6ce   : > { %2115 = vmatpush.msra.mxu3 %v6430_v52 }
 0x6ee   : > { %v1874_v43 = vpop.f32.mrf.mxu0 }
 0x6ef   : > { %v1875_v32 = vadd.f32 %v6862_v29, %v1874_v43  ;;  %v6429_v43 = vld [vmem:[%s10252_s12 + $0x28] sm:$0xff] }
 0x6f0   : > { %2116 = vmatpush.msra.mxu3 %v6429_v43 }
 0x6f1   : > { %v7897_v9 = vadd.f32 %v1875_v32, %v7700_v56  ;;  %v6428_v32 = vld [vmem:[%s10252_s12 + $0x20] sm:$0xff] }
 0x6f2   : > { %2117 = vmatpush.msra.mxu3 %v6428_v32 }
 0x6f3   : > { %v1906_v36 = vsel %vm1154_vm6, %v7897_v9, 0.0 }
 0x6f4   : > { %1907 = vadd.xlane.f32.xlu0 %v1906_v36 }
 0x6f6   : > { %v1877_v11 = vpop.f32.mrf.mxu0 }
 0x6f7   : > { %v1878_v12 = vadd.f32 %v6862_v29, %v1877_v11 }
 0x6f9   : > { %v7902_v13 = vadd.f32 %v1878_v12, %v7705_v58 }
 0x6fb   : > { %v1909_v3 = vsel %vm1154_vm6, %v7902_v13, 0.0 }
 0x6fc   : > { %1910 = vadd.xlane.f32.xlu2 %v1909_v3 }
 0x6fe   : > { %v1880_v49 = vpop.f32.mrf.mxu0 }
 0x6ff   : > { %v1881_v16 = vadd.f32 %v6862_v29, %v1880_v49 }
 0x701   : > { %v7907_v17 = vadd.f32 %v1881_v16, %v7710_v62 }
 0x703   : > { %v1912_v56 = vsel %vm1154_vm6, %v7907_v17, 0.0 }
 0x704   : > { %1913 = vadd.xlane.f32.xlu1 %v1912_v56 }
 0x706   : > { %v1883_v20 = vpop.f32.mrf.mxu0 }
 0x707   : > { %v1884_v21 = vadd.f32 %v6862_v29, %v1883_v20 }
 0x709   : > { %v7912_v22 = vadd.f32 %v1884_v21, %v7715_v5 }
 0x70b   : > { %v1915_v58 = vsel %vm1154_vm6, %v7912_v22, 0.0 }
 0x70c   : > { %1916 = vadd.xlane.f32.xlu2 %v1915_v58 }
 0x730   : > { %v1899_v23 = vpop.xlane.xlu0 %1898 }
 0x731   : > { %v1918_v26 = vmul.f32 %v1899_v23, %v7719_v15 }
 0x733   : > { %v7918_v55 = vsub.f32 %v7882_v25, %v1918_v26 }
 0x735   : > { %v1932_v62 = vmul.f32 %v7918_v55, %v7918_v55 }
 0x737   : > { %v1939_v27 = vsel %vm1154_vm6, %v1932_v62, 0.0 }
 0x738   : > { %v1902_v40 = vpop.xlane.xlu2 %1901  ;;  %1940 = vadd.xlane.f32.xlu0 %v1939_v27 }
 0x739   : > { %v1919_v5 = vmul.f32 %v1902_v40, %v7719_v15 }
 0x73b   : > { %v7925_v28 = vsub.f32 %v7887_v60, %v1919_v5 }
 0x73d   : > { %v1933_v30 = vmul.f32 %v7925_v28, %v7925_v28 }
 0x73f   : > { %v1942_v34 = vsel %vm1154_vm6, %v1933_v30, 0.0 }
 0x740   : > { %1943 = vadd.xlane.f32.xlu1 %v1942_v34  ;;  %v1905_v33 = vpop.xlane.xlu1 %1904  ;;  %v7983_v34 = vld [vmem:[%s10258_s18 + $0x1] ss:$0 sm:$0xff] }
 0x741   : > { %v1920_v35 = vmul.f32 %v1905_v33, %v7719_v15 }
 0x743   : > { %v7932_v41 = vsub.f32 %v7892_v8, %v1920_v35 }
 0x745   : > { %v1934_v37 = vmul.f32 %v7932_v41, %v7932_v41 }
 0x747   : > { %v1945_v38 = vsel %vm1154_vm6, %v1934_v37, 0.0 }
 0x748   : > { %1946 = vadd.xlane.f32.xlu0 %v1945_v38  ;;  %v7989_v38 = vld [vmem:[%s10259_s19 + $0x1] ss:$0 sm:$0xff] }
 0x767   : > { %v1908_v44 = vpop.xlane.xlu0 %1907 }
 0x768   : > { %v1921_v2 = vmul.f32 %v1908_v44, %v7719_v15 }
 0x76a   : > { %v7939_v46 = vsub.f32 %v7897_v9, %v1921_v2 }
 0x76c   : > { %v1935_v18 = vmul.f32 %v7939_v46, %v7939_v46 }
 0x76e   : > { %v1948_v47 = vsel %vm1154_vm6, %v1935_v18, 0.0 }
 0x76f   : > { %v1911_v63 = vpop.xlane.xlu2 %1910  ;;  %1949 = vadd.xlane.f32.xlu2 %v1948_v47 }
 0x770   : > { %v1922_v48 = vmul.f32 %v1911_v63, %v7719_v15 }
 0x772   : > { %v7946_v50 = vsub.f32 %v7902_v13, %v1922_v48 }
 0x774   : > { %v1936_v51 = vmul.f32 %v7946_v50, %v7946_v50 }
 0x776   : > { %v1951_v53 = vsel %vm1154_vm6, %v1936_v51, 0.0 }
 0x777   : > { %1952 = vadd.xlane.f32.xlu1 %v1951_v53  ;;  %v1914_v54 = vpop.xlane.xlu1 %1913 }
 0x778   : > { %v1923_v39 = vmul.f32 %v1914_v54, %v7719_v15 }
 0x77a   : > { %v7953_v29 = vsub.f32 %v7907_v17, %v1923_v39 }
 0x77c   : > { %v1937_v31 = vmul.f32 %v7953_v29, %v7953_v29 }
 0x77e   : > { %v1954_v57 = vsel %vm1154_vm6, %v1937_v31, 0.0 }
 0x77f   : > { %v1917_v42 = vpop.xlane.xlu2 %1916  ;;  %1955 = vadd.xlane.f32.xlu0 %v1954_v57 }
 0x780   : > { %v1924_v45 = vmul.f32 %v1917_v42, %v7719_v15 }
 0x782   : > { %v7960_v59 = vsub.f32 %v7912_v22, %v1924_v45 }
 0x784   : > { %v1938_v0 = vmul.f32 %v7960_v59, %v7960_v59 }
 0x786   : > { %v1957_v4 = vsel %vm1154_vm6, %v1938_v0, 0.0 }
 0x787   : > { %1958 = vadd.xlane.f32.xlu2 %v1957_v4 }
 0x7ab   : > { %v1941_v36 = vpop.xlane.xlu0 %1940 }
 0x7ac   : > { %v1960_v11 = vmul.f32 %v1941_v36, %v7719_v15 }
 0x7ae   : > { %v1967_v12 = vadd.f32 1e-05, %v1960_v11 }
 0x7b0   : > { %6938 = vrsqrt.f32 %v1967_v12  ;;  %vm1980_vm1 = vweird.f32 %v1967_v12 }
 0x7b3   : > { %v1944_v3 = vpop.xlane.xlu1 %1943 }
 0x7b4   : > { %v1961_v49 = vmul.f32 %v1944_v3, %v7719_v15 }
 0x7b6   : > { %v6939_v16 = vpop.eup %6938  ;;  %v1968_v56 = vadd.f32 1e-05, %v1961_v49 }
 0x7b7   : > { %v1975_v20 = vmul.f32 %v6939_v16, %v1967_v12  ;;  %vm1981_vm0 = vweird.f32 %v6939_v16 }
 0x7b8   : > { %6940 = vrsqrt.f32 %v1968_v56  ;;  %vm1982_vm2 = vmor %vm1980_vm1, %vm1981_vm0  ;;  %vm1990_vm4 = vweird.f32 %v1968_v56 }
 0x7b9   : > { %v1976_v21 = vmul.f32 %v6939_v16, %v1975_v20 }
 0x7bb   : > { %v1977_v58 = vmul.f32 0.5, %v1976_v21  ;;  %v1947_v23 = vpop.xlane.xlu0 %1946 }
 0x7bc   : > { %v1962_v26 = vmul.f32 %v1947_v23, %v7719_v15 }
 0x7bd   : > { %v1978_v62 = vsub.f32 1.5, %v1977_v58 }
 0x7be   : > { %v6941_v27 = vpop.eup %6940  ;;  %v1969_v40 = vadd.f32 1e-05, %v1962_v26 }
 0x7bf   : > { %v1979_v5 = vmul.f32 %v6939_v16, %v1978_v62  ;;  %v1985_v30 = vmul.f32 %v6941_v27, %v1968_v56  ;;  %vm1991_vm3 = vweird.f32 %v6941_v27 }
 0x7c0   : > { %6942 = vrsqrt.f32 %v1969_v40  ;;  %vm1992_vm5 = vmor %vm1990_vm4, %vm1991_vm3  ;;  %vm2000_vm9 = vweird.f32 %v1969_v40 }
 0x7c1   : > { %v1983_v33 = vsel %vm1982_vm2, %v6939_v16, %v1979_v5  ;;  %v1986_v35 = vmul.f32 %v6941_v27, %v1985_v30 }
 0x7c2   : > { %v2044_v37 = vmul.f32 %v1983_v33, %v7918_v55 }
 0x7c3   : > { %v1987_v44 = vmul.f32 0.5, %v1986_v35 }
 0x7c4   : > { %v2054_v2 = vmul.f32 %v7983_v34, %v2044_v37 }
 0x7c5   : > { %v1988_v18 = vsub.f32 1.5, %v1987_v44 }
 0x7c6   : > { %v6943_v47 = vpop.eup %6942  ;;  %v2064_v63 = vadd.f32 %v7989_v38, %v2054_v2 }
 0x7c7   : > { %v1989_v48 = vmul.f32 %v6941_v27, %v1988_v18  ;;  %v1995_v51 = vmul.f32 %v6943_v47, %v1969_v40  ;;  %vm2001_vm8 = vweird.f32 %v6943_v47 }
 0x7c8   : > { %6433 = vmatmul.msk.f32.vlgmr.msra.gmra.mxu3 %vm1154_vm6, %v2064_v63  ;;  %vm2002_vm10 = vmor %vm2000_vm9, %vm2001_vm8 }
 0x7c9   : > { %v1996_v55 = vmul.f32 %v6943_v47, %v1995_v51  ;;  %v1993_v53 = vsel %vm1992_vm5, %v6941_v27, %v1989_v48 }
 0x7ca   : > { %v2045_v54 = vmul.f32 %v1993_v53, %v7925_v28 }
 0x7cb   : > { %v1997_v39 = vmul.f32 0.5, %v1996_v55 }
 0x7cc   : > { %v2055_v31 = vmul.f32 %v7983_v34, %v2045_v54 }
 0x7cd   : > { %v1998_v57 = vsub.f32 1.5, %v1997_v39 }
 0x7ce   : > { %v2065_v42 = vadd.f32 %v7989_v38, %v2055_v31 }
 0x7cf   : > { %v1999_v45 = vmul.f32 %v6943_v47, %v1998_v57 }
 0x7d0   : > { %6434 = vmatmul.msk.f32.gmra.mxu3 %vm1154_vm6, %v2065_v42 }
 0x7d1   : > { %v2003_v0 = vsel %vm2002_vm10, %v6943_v47, %v1999_v45 }
 0x7d2   : > { %v2046_v4 = vmul.f32 %v2003_v0, %v7932_v41 }
 0x7d4   : > { %v2056_v7 = vmul.f32 %v7983_v34, %v2046_v4 }
 0x7d6   : > { %v2066_v52 = vadd.f32 %v7989_v38, %v2056_v7 }
 0x7d8   : > { %6435 = vmatmul.msk.f32.gmra.mxu3 %vm1154_vm6, %v2066_v52 }
 0x7e2   : > { %v1950_v28 = vpop.xlane.xlu2 %1949 }
 0x7e3   : > { %v1963_v43 = vmul.f32 %v1950_v28, %v7719_v15 }
 0x7e5   : > { %v1970_v32 = vadd.f32 1e-05, %v1963_v43 }
 0x7e7   : > { %6944 = vrsqrt.f32 %v1970_v32  ;;  %vm2010_vm12 = vweird.f32 %v1970_v32 }
 0x7ea   : > { %v1953_v36 = vpop.xlane.xlu1 %1952 }
 0x7eb   : > { %v1964_v11 = vmul.f32 %v1953_v36, %v7719_v15 }
 0x7ed   : > { %v6945_v12 = vpop.eup %6944  ;;  %v1971_v3 = vadd.f32 1e-05, %v1964_v11 }
 0x7ee   : > { %v2005_v49 = vmul.f32 %v6945_v12, %v1970_v32  ;;  %vm2011_vm11 = vweird.f32 %v6945_v12 }
 0x7ef   : > { %6946 = vrsqrt.f32 %v1971_v3  ;;  %vm2012_vm13 = vmor %vm2010_vm12, %vm2011_vm11  ;;  %vm2020_vm15 = vweird.f32 %v1971_v3 }
 0x7f0   : > { %v2006_v16 = vmul.f32 %v6945_v12, %v2005_v49 }
 0x7f2   : > { %v2007_v41 = vmul.f32 0.5, %v2006_v16  ;;  %v1956_v56 = vpop.xlane.xlu0 %1955 }
 0x7f3   : > { %v1965_v20 = vmul.f32 %v1956_v56, %v7719_v15  ;;  %v6865_v56 = vld [vmem:[%s10253_s13 + $0x1] ss:$0 sm:$0xff] }
 0x7f4   : > { %v2008_v21 = vsub.f32 1.5, %v2007_v41 }
 0x7f5   : > { %v6947_v58 = vpop.eup %6946  ;;  %v1972_v23 = vadd.f32 1e-05, %v1965_v20 }
 0x7f6   : > { %v2009_v26 = vmul.f32 %v6945_v12, %v2008_v21  ;;  %v2015_v62 = vmul.f32 %v6947_v58, %v1971_v3  ;;  %vm2021_vm14 = vweird.f32 %v6947_v58 }
 0x7f7   : > { %6948 = vrsqrt.f32 %v1972_v23  ;;  %vm2022_vm0 = vmor %vm2020_vm15, %vm2021_vm14  ;;  %vm2030_vm2 = vweird.f32 %v1972_v23 }
 0x7f8   : > { %v2016_v27 = vmul.f32 %v6947_v58, %v2015_v62  ;;  %v2013_v40 = vsel %vm2012_vm13, %v6945_v12, %v2009_v26 }
 0x7f9   : > { %v2047_v5 = vmul.f32 %v2013_v40, %v7939_v46 }
 0x7fa   : > { %v2017_v30 = vmul.f32 0.5, %v2016_v27  ;;  %v1959_v33 = vpop.xlane.xlu2 %1958 }
 0x7fb   : > { %v1966_v35 = vmul.f32 %v1959_v33, %v7719_v15  ;;  %v2057_v37 = vmul.f32 %v7983_v34, %v2047_v5 }
 0x7fc   : > { %v2018_v44 = vsub.f32 1.5, %v2017_v30 }
 0x7fd   : > { %v6949_v2 = vpop.eup %6948  ;;  %v1973_v18 = vadd.f32 1e-05, %v1966_v35  ;;  %v2067_v47 = vadd.f32 %v7989_v38, %v2057_v37 }
 0x7fe   : > { %v2019_v63 = vmul.f32 %v6947_v58, %v2018_v44  ;;  %v2025_v48 = vmul.f32 %v6949_v2, %v1972_v23  ;;  %vm2031_vm1 = vweird.f32 %v6949_v2 }
 0x7ff   : > { %6950 = vrsqrt.f32 %v1973_v18  ;;  %6436 = vmatmul.msk.f32.gmra.mxu3 %vm1154_vm6, %v2067_v47  ;;  %vm2032_vm3 = vmor %vm2030_vm2, %vm2031_vm1  ;;  %vm2040_vm5 = vweird.f32 %v1973_v18 }
 0x800   : > { %v2026_v46 = vmul.f32 %v6949_v2, %v2025_v48  ;;  %v2023_v51 = vsel %vm2022_vm0, %v6947_v58, %v2019_v63 }
 0x801   : > { %v2048_v55 = vmul.f32 %v2023_v51, %v7946_v50 }
 0x802   : > { %v2027_v53 = vmul.f32 0.5, %v2026_v46 }
 0x803   : > { %v2058_v54 = vmul.f32 %v7983_v34, %v2048_v55 }
 0x804   : > { %v2028_v39 = vsub.f32 1.5, %v2027_v53  ;;  %v6495_v53 = vld [vmem:[%s10252_s12 + $0x58] sm:$0xff] }
 0x805   : > { %v6951_v31 = vpop.eup %6950  ;;  %v2068_v57 = vadd.f32 %v7989_v38, %v2058_v54  ;;  %v6494_v54 = vld [vmem:[%s10252_s12 + $0x50] sm:$0xff] }
 0x806   : > { %v2029_v42 = vmul.f32 %v6949_v2, %v2028_v39  ;;  %v2035_v45 = vmul.f32 %v6951_v31, %v1973_v18  ;;  %vm2041_vm4 = vweird.f32 %v6951_v31  ;;  %v6493_v39 = vld [vmem:[%s10252_s12 + $0x48] sm:$0xff] }
 0x807   : > { %6437 = vmatmul.msk.f32.gmra.mxu3 %vm1154_vm6, %v2068_v57  ;;  %vm2042_vm8 = vmor %vm2040_vm5, %vm2041_vm4 }
 0x808   : > { %v2036_v0 = vmul.f32 %v6951_v31, %v2035_v45  ;;  %v2033_v4 = vsel %vm2032_vm3, %v6949_v2, %v2029_v42  ;;  %v8089_v45 = vld [vmem:[%s10293_s27] sm:$0xff] }
 0x809   : > { %v2049_v7 = vmul.f32 %v2033_v4, %v7953_v29 }
 0x80a   : > { %v2037_v52 = vmul.f32 0.5, %v2036_v0 }
 0x80b   : > { %v2059_v50 = vmul.f32 %v7983_v34, %v2049_v7 }
 0x80c   : > { %v2038_v28 = vsub.f32 1.5, %v2037_v52 }
 0x80d   : > { %v2069_v43 = vadd.f32 %v7989_v38, %v2059_v50  ;;  %v8096_v50 = vld [vmem:[%s10293_s27 + $0x8] sm:$0xff] }
 0x80e   : > { %v2039_v32 = vmul.f32 %v6951_v31, %v2038_v28 }
 0x80f   : > { %6438 = vmatmul.msk.f32.gmra.mxu3 %vm1154_vm6, %v2069_v43 }
 0x810   : > { %v2043_v36 = vsel %vm2042_vm8, %v6951_v31, %v2039_v32  ;;  %v6492_v31 = vld [vmem:[%s10252_s12 + $0x40] sm:$0xff] }
 0x811   : > { %v2050_v11 = vmul.f32 %v2043_v36, %v7960_v59 }
 0x813   : > { %v2060_v12 = vmul.f32 %v7983_v34, %v2050_v11  ;;  %v8103_v11 = vld [vmem:[%s10293_s27 + $0x10] sm:$0xff] }
 0x815   : > { %v2070_v3 = vadd.f32 %v7989_v38, %v2060_v12 }
 0x817   : > { %6439 = vmatmul.msk.f32.gmra.mxu3 %vm1154_vm6, %v2070_v3 }
 0x84b   : > { %v2119_v29 = vpop.f32.mrf.mxu3 }
 0x84c   : > { %v8034_v27 = vadd.f32 %v6865_v56, %v2119_v29 }
 0x853   : > { %v2122_v49 = vpop.f32.mrf.mxu3 }
 0x854   : > { %v8026_v59 = vadd.f32 %v6865_v56, %v2122_v49 }
 0x85b   : > { %v2125_v16 = vpop.f32.mrf.mxu3 }
 0x85c   : > { %v8036_v40 = vadd.f32 %v6865_v56, %v2125_v16  ;;  %v8110_v16 = vld [vmem:[%s10293_s27 + $0x18] sm:$0xff] }
 0x882   : > { %v2128_v41 = vpop.f32.mrf.mxu3 }
 0x883   : > { %v2129_v38 = vadd.f32 %v6865_v56, %v2128_v41 }
 0x88a   : > { %v2131_v20 = vpop.f32.mrf.mxu3 }
 0x88b   : > { %v2132_v21 = vadd.f32 %v6865_v56, %v2131_v20 }
 0x88d   : > { %2155 = vrot.lane.b32.xlu2 %v2132_v21, %s7233_s6  ;;  %v6783_v62 = vpack.i.bf16 %v2129_v38, %v2132_v21 }
 0x892   : > { %v2134_v58 = vpop.f32.mrf.mxu3 }
 0x893   : > { %v2135_v34 = vadd.f32 %v6865_v56, %v2134_v58 }
 0x895   : > { %2157 = vrot.lane.b32.xlu0 %v2135_v34, %s7233_s6  ;;  %2149 = vrot.lane.b32.xlu2 %v8026_v59, %s7233_s6 }
 0x89a   : > { %v2137_v23 = vpop.f32.mrf.mxu3 }
 0x89b   : > { %v2138_v26 = vadd.f32 %v6865_v56, %v2137_v23 }
 0x89d   : > { %2159 = vrot.lane.b32.xlu1 %v2138_v26, %s7233_s6  ;;  %2153 = vrot.lane.b32.xlu0 %v2129_v38, %s7233_s6  ;;  %v6788_v5 = vpack.i.bf16 %v2135_v34, %v2138_v26 }
 0x89e   : > { %6784 = vrot.lane.b32.xlu2 %v6783_v62, %s7234_s22 }
 0x8a5   : > { %2151 = vrot.lane.b32.xlu1 %v8036_v40, %s7233_s6  ;;  %2147 = vrot.lane.b32.xlu0 %v8034_v27, %s7233_s6 }
 0x8ad   : > { %6789 = vrot.lane.b32.xlu0 %v6788_v5, %s7234_s22 }
 0x8e7   : > { %v2156_v33 = vpop.permute.xlu2 %2155 }
 0x8ef   : > { %v2150_v44 = vpop.permute.xlu2 %2149 }
 0x8f8   : > { %v6785_v48 = vpop.permute.xlu2 %6784 }
 0x8f9   : > { %v6786_v51 = vunpack.i.l.bf16 %v6785_v48  ;;  %v6787_v55 = vunpack.i.h.bf16 %v6785_v48 }
 0x907   : > { %v2158_v30 = vpop.permute.xlu0 %2157 }
 0x90f   : > { %v2160_v35 = vpop.permute.xlu1 %2159  ;;  %v2154_v37 = vpop.permute.xlu0 %2153 }
 0x910   : > { %6440 = vmatpush.xpose.msk.msra.mxu2 %vm1154_vm6, %v2160_v35 }
 0x914   : > { %6441 = vmatpush.xpose.msk.msra.mxu2 %vm1154_vm6, %v2158_v30 }
 0x917   : > { %v2148_v2 = vpop.permute.xlu0 %2147  ;;  %v2152_v18 = vpop.permute.xlu1 %2151 }
 0x918   : > { %6442 = vmatpush.xpose.msk.msra.mxu2 %vm1154_vm6, %v2156_v33 }
 0x91c   : > { %6443 = vmatpush.xpose.msk.msra.mxu2 %vm1154_vm6, %v2154_v37 }
 0x91f   : > { %v6790_v47 = vpop.permute.xlu0 %6789 }
 0x920   : > { %v6791_v63 = vunpack.i.l.bf16 %v6790_v47  ;;  %6444 = vmatpush.xpose.msk.msra.mxu2 %vm1154_vm6, %v2152_v18  ;;  %v6792_v46 = vunpack.i.h.bf16 %v6790_v47 }
 0x922   : > { %2460 = vmatpush.msra.mxu1 %v6791_v63 }
 0x924   : > { %6445 = vmatpush.xpose.msk.msra.mxu2 %vm1154_vm6, %v2150_v44  ;;  %2461 = vmatpush.msra.mxu1 %v6792_v46 }
 0x926   : > { %2462 = vmatpush.msra.mxu1 %v6786_v51 }
 0x928   : > { %6446 = vmatpush.xpose.msk.msra.mxu2 %vm1154_vm6, %v2148_v2  ;;  %2463 = vmatpush.msra.mxu1 %v6787_v55 }
 0x92b   : > { %6447 = vmatmul.msk.f32.vlgmr.msra.gmra.mxu2 %vm1154_vm6, %v8034_v27 }
 0x92c   : > { %2839 = vmatpush.msrb.mxu2 %v6495_v53 }
 0x92e   : > { %2840 = vmatpush.msrb.mxu2 %v6494_v54 }
 0x930   : > { %2841 = vmatpush.msrb.mxu2 %v6493_v39 }
 0x932   : > { %2842 = vmatpush.msrb.mxu2 %v6492_v31 }
 0x933   : > { %6448 = vmatmul.msk.f32.gmra.mxu2 %vm1154_vm6, %v8026_v59 }
 0x93b   : > { %6449 = vmatmul.msk.f32.gmra.mxu2 %vm1154_vm6, %v8036_v40 }
 0x943   : > { %6450 = vmatmul.msk.f32.gmra.mxu2 %vm1154_vm6, %v2129_v38 }
 0x94b   : > { %6451 = vmatmul.msk.f32.gmra.mxu2 %vm1154_vm6, %v2132_v21 }
 0x953   : > { %6452 = vmatmul.msk.f32.gmra.mxu2 %vm1154_vm6, %v2135_v34  ;;  %v8119_v34 = vld [vmem:[%s10293_s27 + $0x28] sm:$0xff] }
 0x95b   : > { %6453 = vmatmul.msk.f32.gmra.mxu2 %vm1154_vm6, %v2138_v26  ;;  %v6793_v26 = vpack.i.bf16 %v8026_v59, %v8036_v40  ;;  %v8142_v59 = vld [vmem:[%s10293_s27 + $0x30] sm:$0xff] }
 0x963   : > { %6497 = vmatmul.msk.f32.vlgmr.msrb.gmra.mxu2 %vm1154_vm6, %v7515_v61 }
 0x96b   : > { %6498 = vmatmul.msk.f32.gmra.mxu2 %vm1154_vm6, %v7519_v1 }
 0x973   : > { %6499 = vmatmul.msk.f32.gmra.mxu2 %vm1154_vm6, %v7523_v6 }
 0x97b   : > { %6500 = vmatmul.msk.f32.gmra.mxu2 %vm1154_vm6, %v7527_v10 }
 0x983   : > { %6501 = vmatmul.msk.f32.gmra.mxu2 %vm1154_vm6, %v7531_v14 }
 0x98b   : > { %6502 = vmatmul.msk.f32.gmra.mxu2 %vm1154_vm6, %v7535_v19 }
 0x993   : > { %6503 = vmatmul.msk.f32.gmra.mxu2 %vm1154_vm6, %v7539_v24 }
 0x9ae   : > { %v2206_v57 = vpop.f32.mrf.mxu2 }
 0x9af   : > { %v2227_v42 = vmul.f32 0.17677669, %v2206_v57 }
 0x9b1   : > { %v2234_v0 = vadd.f32 %v8089_v45, %v2227_v42 }
 0x9b3   : > { %v2241_v4 = vsel %vm1315_vm7, %v2234_v0, -inf }
 0x9b4   : > { %2242 = vmax.xlane.f32.xlu1 %v2241_v4 }
 0x9b6   : > { %v2209_v7 = vpop.f32.mrf.mxu2 }
 0x9b7   : > { %v2228_v52 = vmul.f32 0.17677669, %v2209_v7 }
 0x9b9   : > { %v2235_v28 = vadd.f32 %v8096_v50, %v2228_v52 }
 0x9bb   : > { %v2244_v43 = vsel %vm1315_vm7, %v2235_v28, -inf }
 0x9bc   : > { %2245 = vmax.xlane.f32.xlu2 %v2244_v43 }
 0x9be   : > { %v2212_v32 = vpop.f32.mrf.mxu2 }
 0x9bf   : > { %v2229_v36 = vmul.f32 0.17677669, %v2212_v32 }
 0x9c1   : > { %v2236_v12 = vadd.f32 %v8103_v11, %v2229_v36 }
 0x9c3   : > { %v2247_v3 = vsel %vm1315_vm7, %v2236_v12, -inf }
 0x9c4   : > { %2248 = vmax.xlane.f32.xlu0 %v2247_v3 }
 0x9c6   : > { %v2215_v29 = vpop.f32.mrf.mxu2 }
 0x9c7   : > { %v2230_v49 = vmul.f32 0.17677669, %v2215_v29 }
 0x9c9   : > { %v2237_v41 = vadd.f32 %v8110_v16, %v2230_v49 }
 0x9cb   : > { %v2250_v56 = vsel %vm1315_vm7, %v2237_v41, -inf }
 0x9cc   : > { %2251 = vmax.xlane.f32.xlu1 %v2250_v56 }
 0x9ce   : > { %v2218_v20 = vpop.f32.mrf.mxu2 }
 0x9cf   : > { %v2231_v62 = vmul.f32 0.17677669, %v2218_v20 }
 0x9d4   : > { %2409 = vrot.lane.b32.xlu2 %v8034_v27, %s7234_s22  ;;  %v8132_v27 = vld [vmem:[%s10293_s27 + $0x20] sm:$0xff] }
 0x9d5   : > { %v8135_v5 = vadd.f32 %v8132_v27, %v2231_v62 }
 0x9d6   : > { %v2221_v21 = vpop.f32.mrf.mxu2 }
 0x9d7   : > { %v2232_v58 = vmul.f32 0.17677669, %v2221_v21  ;;  %v2253_v30 = vsel %vm1315_vm7, %v8135_v5, -inf }
 0x9d9   : > { %v8122_v38 = vadd.f32 %v8119_v34, %v2232_v58 }
 0x9db   : > { %v2256_v23 = vsel %vm1315_vm7, %v8122_v38, -inf }
 0x9dc   : > { %2257 = vmax.xlane.f32.xlu0 %v2256_v23 }
 0x9de   : > { %v2224_v33 = vpop.f32.mrf.mxu2 }
 0x9df   : > { %v2233_v35 = vmul.f32 0.17677669, %v2224_v33 }
 0x9e1   : > { %v8145_v40 = vadd.f32 %v8142_v59, %v2233_v35 }
 0x9e3   : > { %v2259_v37 = vsel %vm1315_vm7, %v8145_v40, -inf }
 0x9e5   : > { %6794 = vrot.lane.b32.xlu1 %v6793_v26, %s7234_s22 }
 0x9e6   : > { %v8149_v44 = vpop.f32.mrf.mxu2 }
 0x9ee   : > { %v8151_v47 = vpop.f32.mrf.mxu2 }
 0x9f6   : > { %v2850_v53 = vpop.f32.mrf.mxu2 }
 0x9fd   : > { %2254 = vmax.xlane.f32.xlu2 %v2253_v30 }
 0x9fe   : > { %v2853_v4 = vpop.f32.mrf.mxu2 }
 0xa06   : > { %v2856_v36 = vpop.f32.mrf.mxu2 }
 0xa0f   : > { %2260 = vmax.xlane.f32.xlu1 %v2259_v37 }
 0xa27   : > { %v2243_v2 = vpop.xlane.xlu1 %2242 }
 0xa28   : > { %v2262_v18 = vsub.f32 %v2234_v0, %v2243_v2 }
 0xa2a   : > { %v2269_v63 = vmul.f32 1.442695, %v2262_v18 }
 0xa2c   : > { %6952 = vpow2.f32 %v2269_v63 }
 0xa2f   : > { %v2246_v48 = vpop.xlane.xlu2 %2245 }
 0xa30   : > { %v2263_v46 = vsub.f32 %v2235_v28, %v2246_v48 }
 0xa32   : > { %v8153_v51 = vpop.eup %6952  ;;  %v2271_v55 = vmul.f32 1.442695, %v2263_v46 }
 0xa33   : > { %v2283_v54 = vsel %vm1315_vm7, %v8153_v51, 0.0 }
 0xa34   : > { %6954 = vpow2.f32 %v2271_v55  ;;  %2284 = vadd.xlane.f32.xlu2 %v2283_v54 }
 0xa37   : > { %v2249_v39 = vpop.xlane.xlu0 %2248  ;;  %v2410_v23 = vpop.permute.xlu2 %2409 }
 0xa38   : > { %v2264_v31 = vsub.f32 %v2236_v12, %v2249_v39  ;;  %v6866_v12 = vld [vmem:[%s10253_s13 + $0x2] ss:$0 sm:$0xff] }
 0xa39   : > { %v8170_v29 = vadd.f32 %v6866_v12, %v2856_v36  ;;  %v8180_v26 = vadd.f32 %v6866_v12, %v2853_v4  ;;  %v8188_v33 = vadd.f32 %v6866_v12, %v2850_v53 }
 0xa3a   : > { %v8157_v57 = vpop.eup %6954  ;;  %v2273_v42 = vmul.f32 1.442695, %v2264_v31 }
 0xa3b   : > { %v2286_v0 = vsel %vm1315_vm7, %v8157_v57, 0.0 }
 0xa3c   : > { %6956 = vpow2.f32 %v2273_v42  ;;  %2287 = vadd.xlane.f32.xlu1 %v2286_v0  ;;  %v8208_v0 = vadd.f32 %v6866_v12, %v8151_v47 }
 0xa3f   : > { %v2252_v7 = vpop.xlane.xlu1 %2251 }
 0xa40   : > { %v2265_v52 = vsub.f32 %v2237_v41, %v2252_v7  ;;  %v2859_v41 = vpop.f32.mrf.mxu2 }
 0xa41   : > { %v8176_v56 = vadd.f32 %v6866_v12, %v2859_v41 }
 0xa42   : > { %v8161_v28 = vpop.eup %6956  ;;  %v2275_v43 = vmul.f32 1.442695, %v2265_v52 }
 0xa43   : > { %v2289_v32 = vsel %vm1315_vm7, %v8161_v28, 0.0 }
 0xa44   : > { %6958 = vpow2.f32 %v2275_v43  ;;  %2290 = vadd.xlane.f32.xlu0 %v2289_v32 }
 0xa48   : > { %v2862_v62 = vpop.f32.mrf.mxu2 }
 0xa49   : > { %v8184_v30 = vadd.f32 %v6866_v12, %v2862_v62 }
 0xa4a   : > { %v8168_v3 = vpop.eup %6958 }
 0xa4b   : > { %v2292_v49 = vsel %vm1315_vm7, %v8168_v3, 0.0 }
 0xa4c   : > { %2880 = vrot.lane.b32.xlu2 %v8170_v29, %s7233_s6  ;;  %2293 = vadd.xlane.f32.xlu1 %v2292_v49 }
 0xa4f   : > { %v2258_v18 = vpop.xlane.xlu0 %2257 }
 0xa50   : > { %v2267_v63 = vsub.f32 %v8122_v38, %v2258_v18 }
 0xa52   : > { %v2279_v46 = vmul.f32 1.442695, %v2267_v63 }
 0xa57   : > { %v6795_v20 = vpop.permute.xlu1 %6794 }
 0xa58   : > { %v6796_v21 = vunpack.i.l.bf16 %v6795_v20  ;;  %2882 = vrot.lane.b32.xlu0 %v8176_v56, %s7233_s6  ;;  %v6797_v58 = vunpack.i.h.bf16 %v6795_v20 }
 0xa5a   : > { %2464 = vmatpush.msra.mxu1 %v6796_v21 }
 0xa5c   : > { %2465 = vmatpush.msra.mxu1 %v6797_v58 }
 0xa5e   : > { %2466 = vmatpush.msra.mxu1 %v2410_v23 }
 0xa60   : > { %2878 = vrot.lane.b32.xlu0 %v8180_v26, %s7233_s6 }
 0xa65   : > { %2884 = vrot.lane.b32.xlu1 %v8184_v30, %s7233_s6 }
 0xa6d   : > { %2876 = vrot.lane.b32.xlu1 %v8188_v33, %s7233_s6 }
 0xa70   : > { %v2255_v35 = vpop.xlane.xlu2 %2254 }
 0xa71   : > { %v2266_v37 = vsub.f32 %v8135_v5, %v2255_v35 }
 0xa73   : > { %v2277_v2 = vmul.f32 1.442695, %v2266_v37 }
 0xa75   : > { %6960 = vpow2.f32 %v2277_v2 }
 0xa76   : > { %6962 = vpow2.f32 %v2279_v46 }
 0xa7b   : > { %v8194_v48 = vpop.eup %6960 }
 0xa7c   : > { %v2295_v55 = vsel %vm1315_vm7, %v8194_v48, 0.0  ;;  %v8199_v31 = vpop.eup %6962 }
 0xa7d   : > { %2296 = vadd.xlane.f32.xlu2 %v2295_v55  ;;  %v2298_v5 = vsel %vm1315_vm7, %v8199_v31, 0.0 }
 0xa82   : > { %v2261_v53 = vpop.xlane.xlu1 %2260 }
 0xa83   : > { %v2268_v54 = vsub.f32 %v8145_v40, %v2261_v53  ;;  %v8213_v40 = vadd.f32 %v6866_v12, %v8149_v44 }
 0xa85   : > { %v2281_v39 = vmul.f32 1.442695, %v2268_v54 }
 0xa87   : > { %6964 = vpow2.f32 %v2281_v39 }
 0xa8a   : > { %2299 = vadd.xlane.f32.xlu0 %v2298_v5 }
 0xa8d   : > { %v8203_v38 = vpop.eup %6964 }
 0xa8e   : > { %v2301_v42 = vsel %vm1315_vm7, %v8203_v38, 0.0 }
 0xa92   : > { %2302 = vadd.xlane.f32.xlu0 %v2301_v42 }
 0xa95   : > { %2874 = vrot.lane.b32.xlu2 %v8208_v0, %s7233_s6 }
 0xaa6   : > { %2872 = vrot.lane.b32.xlu0 %v8213_v40, %s7233_s6 }
 0xaa7   : > { %v2285_v4 = vpop.xlane.xlu2 %2284 }
 0xaa8   : > { %6966 = vrcp.f32 %v2285_v4  ;;  %v2315_v36 = vand.u32 2147483648, %v2285_v4  ;;  %v2313_v47 = vand.u32 2147483647, %v2285_v4  ;;  %vm2309_vm10 = vweird.f32 %v2285_v4 }
 0xaaa   : > { %v2316_v44 = vor.u32 1.1754944e-38, %v2315_v36  ;;  %vm2314_vm12 = vcmp.eq.f32.partialorder %v2313_v47, 8.507059e+37 }
 0xaae   : > { %v6967_v7 = vpop.eup %6966 }
 0xaaf   : > { %v2305_v52 = vmul.f32 %v6967_v7, %v2285_v4  ;;  %v2288_v43 = vpop.xlane.xlu1 %2287  ;;  %vm2310_vm9 = vweird.f32 %v6967_v7 }
 0xab0   : > { %6968 = vrcp.f32 %v2288_v43  ;;  %vm2311_vm11 = vmor %vm2309_vm10, %vm2310_vm9  ;;  %v2330_v37 = vand.u32 2147483648, %v2288_v43  ;;  %v2328_v18 = vand.u32 2147483647, %v2288_v43  ;;  %vm2324_vm14 = vweird.f32 %v2288_v43 }
 0xab1   : > { %v2306_v32 = vsub.f32 1.0, %v2305_v52 }
 0xab2   : > { %v2331_v55 = vor.u32 1.1754944e-38, %v2330_v37  ;;  %vm2329_vm0 = vcmp.eq.f32.partialorder %v2328_v18, 8.507059e+37  ;;  %v2881_v18 = vpop.permute.xlu2 %2880 }
 0xab3   : > { %v2307_v49 = vmul.f32 %v6967_v7, %v2306_v32 }
 0xab5   : > { %v2308_v41 = vadd.f32 %v6967_v7, %v2307_v49 }
 0xab6   : > { %v6969_v20 = vpop.eup %6968 }
 0xab7   : > { %v2312_v12 = vsel %vm2311_vm11, %v6967_v7, %v2308_v41  ;;  %v2320_v21 = vmul.f32 %v6969_v20, %v2288_v43  ;;  %v2291_v58 = vpop.xlane.xlu0 %2290  ;;  %vm2325_vm13 = vweird.f32 %v6969_v20 }
 0xab8   : > { %6970 = vrcp.f32 %v2291_v58  ;;  %v2317_v23 = vsel %vm2314_vm12, %v2316_v44, %v2312_v12  ;;  %vm2326_vm15 = vmor %vm2324_vm14, %vm2325_vm13  ;;  %v2345_v4 = vand.u32 2147483648, %v2291_v58  ;;  %v2343_v52 = vand.u32 2147483647, %v2291_v58 }
 0xab9   : > { %v2321_v62 = vsub.f32 1.0, %v2320_v21  ;;  %v2318_v35 = vmul.f32 %v8153_v51, %v2317_v23  ;;  %vm2339_vm2 = vweird.f32 %v2291_v58 }
 0xaba   : > { %v2346_v36 = vor.u32 1.1754944e-38, %v2345_v4  ;;  %vm2344_vm4 = vcmp.eq.f32.partialorder %v2343_v52, 8.507059e+37 }
 0xabb   : > { %6454 = vmatmul.msk.f32.vlgmr.msra.gmra.mxu1 %vm1315_vm7, %v2318_v35  ;;  %v2322_v2 = vmul.f32 %v6969_v20, %v2321_v62 }
 0xabd   : > { %v2323_v63 = vadd.f32 %v6969_v20, %v2322_v2 }
 0xabe   : > { %v6971_v46 = vpop.eup %6970 }
 0xabf   : > { %v2335_v53 = vmul.f32 %v6971_v46, %v2291_v58  ;;  %v2294_v54 = vpop.xlane.xlu1 %2293  ;;  %v2327_v39 = vsel %vm2326_vm15, %v6969_v20, %v2323_v63  ;;  %vm2340_vm1 = vweird.f32 %v6971_v46 }
 0xac0   : > { %6972 = vrcp.f32 %v2294_v54  ;;  %v2332_v5 = vsel %vm2329_vm0, %v2331_v55, %v2327_v39  ;;  %vm2341_vm3 = vmor %vm2339_vm2, %vm2340_vm1  ;;  %v2360_v12 = vand.u32 2147483648, %v2294_v54  ;;  %v2358_v21 = vand.u32 2147483647, %v2294_v54 }
 0xac1   : > { %v2336_v42 = vsub.f32 1.0, %v2335_v53  ;;  %v2333_v51 = vmul.f32 %v8157_v57, %v2332_v5  ;;  %vm2354_vm8 = vweird.f32 %v2294_v54 }
 0xac2   : > { %v2361_v58 = vor.u32 1.1754944e-38, %v2360_v12  ;;  %vm2359_vm10 = vcmp.eq.f32.partialorder %v2358_v21, 8.507059e+37 }
 0xac3   : > { %6455 = vmatmul.msk.f32.gmra.mxu1 %vm1315_vm7, %v2333_v51  ;;  %v2337_v7 = vmul.f32 %v6971_v46, %v2336_v42 }
 0xac5   : > { %v2338_v32 = vadd.f32 %v6971_v46, %v2337_v7 }
 0xac6   : > { %v6973_v43 = vpop.eup %6972 }
 0xac7   : > { %v2350_v49 = vmul.f32 %v6973_v43, %v2294_v54  ;;  %v2342_v47 = vsel %vm2341_vm3, %v6971_v46, %v2338_v32  ;;  %vm2355_vm5 = vweird.f32 %v6973_v43 }
 0xac8   : > { %v2347_v41 = vsel %vm2344_vm4, %v2346_v36, %v2342_v47  ;;  %vm2356_vm9 = vmor %vm2354_vm8, %vm2355_vm5 }
 0xac9   : > { %v2351_v20 = vsub.f32 1.0, %v2350_v49  ;;  %v2348_v44 = vmul.f32 %v8161_v28, %v2347_v41 }
 0xaca   : > { %v2883_v28 = vpop.permute.xlu0 %2882 }
 0xacb   : > { %6456 = vmatmul.msk.f32.gmra.mxu1 %vm1315_vm7, %v2348_v44  ;;  %v2352_v57 = vmul.f32 %v6973_v43, %v2351_v20 }
 0xacd   : > { %v2353_v23 = vadd.f32 %v6973_v43, %v2352_v57 }
 0xacf   : > { %v2357_v62 = vsel %vm2356_vm9, %v6973_v43, %v2353_v23 }
 0xad0   : > { %v2362_v35 = vsel %vm2359_vm10, %v2361_v58, %v2357_v62 }
 0xad1   : > { %v2363_v37 = vmul.f32 %v8168_v3, %v2362_v35 }
 0xad2   : > { %v2879_v63 = vpop.permute.xlu0 %2878 }
 0xad3   : > { %6457 = vmatmul.msk.f32.gmra.mxu1 %vm1315_vm7, %v2363_v37 }
 0xad7   : > { %v2885_v2 = vpop.permute.xlu1 %2884 }
 0xad8   : > { %6504 = vmatpush.xpose.msk.msrb.mxu1 %vm1154_vm6, %v2885_v2 }
 0xadc   : > { %6505 = vmatpush.xpose.msk.msrb.mxu1 %vm1154_vm6, %v2883_v28 }
 0xadf   : > { %v2877_v46 = vpop.permute.xlu1 %2876 }
 0xae0   : > { %6506 = vmatpush.xpose.msk.msrb.mxu1 %vm1154_vm6, %v2881_v18 }
 0xae4   : > { %6507 = vmatpush.xpose.msk.msrb.mxu1 %vm1154_vm6, %v2879_v63 }
 0xae8   : > { %6508 = vmatpush.xpose.msk.msrb.mxu1 %vm1154_vm6, %v2877_v46 }
 0xaf0   : > { %v2297_v55 = vpop.xlane.xlu2 %2296 }
 0xaf1   : > { %6974 = vrcp.f32 %v2297_v55  ;;  %v2375_v5 = vand.u32 2147483648, %v2297_v55  ;;  %v2373_v51 = vand.u32 2147483647, %v2297_v55  ;;  %vm2369_vm12 = vweird.f32 %v2297_v55 }
 0xaf3   : > { %v2376_v52 = vor.u32 1.1754944e-38, %v2375_v5  ;;  %vm2374_vm14 = vcmp.eq.f32.partialorder %v2373_v51, 8.507059e+37 }
 0xaf7   : > { %v6975_v3 = vpop.eup %6974 }
 0xaf8   : > { %v2365_v53 = vmul.f32 %v6975_v3, %v2297_v55  ;;  %v2875_v54 = vpop.permute.xlu2 %2874  ;;  %vm2370_vm11 = vweird.f32 %v6975_v3 }
 0xaf9   : > { %6509 = vmatpush.xpose.msk.msrb.mxu1 %vm1154_vm6, %v2875_v54  ;;  %vm2371_vm13 = vmor %vm2369_vm12, %vm2370_vm11 }
 0xafa   : > { %v2366_v39 = vsub.f32 1.0, %v2365_v53 }
 0xafc   : > { %v2367_v42 = vmul.f32 %v6975_v3, %v2366_v39 }
 0xafd   : > { %v2300_v4 = vpop.xlane.xlu0 %2299 }
 0xafe   : > { %6976 = vrcp.f32 %v2300_v4  ;;  %v2368_v7 = vadd.f32 %v6975_v3, %v2367_v42  ;;  %v2390_v44 = vand.u32 2147483648, %v2300_v4  ;;  %v2388_v57 = vand.u32 2147483647, %v2300_v4 }
 0xaff   : > { %vm2384_vm0 = vweird.f32 %v2300_v4 }
 0xb00   : > { %v2372_v32 = vsel %vm2371_vm13, %v6975_v3, %v2368_v7  ;;  %v2391_v58 = vor.u32 1.1754944e-38, %v2390_v44  ;;  %vm2389_vm2 = vcmp.eq.f32.partialorder %v2388_v57, 8.507059e+37 }
 0xb01   : > { %v2377_v43 = vsel %vm2374_vm14, %v2376_v52, %v2372_v32 }
 0xb02   : > { %v2378_v36 = vmul.f32 %v8194_v48, %v2377_v43 }
 0xb04   : > { %v6977_v49 = vpop.eup %6976  ;;  %6458 = vmatmul.msk.f32.gmra.mxu1 %vm1315_vm7, %v2378_v36 }
 0xb05   : > { %v2380_v47 = vmul.f32 %v6977_v49, %v2300_v4  ;;  %v2303_v41 = vpop.xlane.xlu0 %2302  ;;  %vm2385_vm15 = vweird.f32 %v6977_v49 }
 0xb06   : > { %6978 = vrcp.f32 %v2303_v41  ;;  %vm2386_vm1 = vmor %vm2384_vm0, %vm2385_vm15  ;;  %v2405_v28 = vand.u32 2147483648, %v2303_v41  ;;  %v2403_v63 = vand.u32 2147483647, %v2303_v41  ;;  %vm2399_vm4 = vweird.f32 %v2303_v41 }
 0xb07   : > { %v2381_v20 = vsub.f32 1.0, %v2380_v47 }
 0xb08   : > { %v2406_v55 = vor.u32 1.1754944e-38, %v2405_v28  ;;  %vm2404_vm8 = vcmp.eq.f32.partialorder %v2403_v63, 8.507059e+37 }
 0xb09   : > { %v2382_v12 = vmul.f32 %v6977_v49, %v2381_v20 }
 0xb0b   : > { %v2383_v21 = vadd.f32 %v6977_v49, %v2382_v12 }
 0xb0c   : > { %v6979_v23 = vpop.eup %6978 }
 0xb0d   : > { %v2395_v62 = vmul.f32 %v6979_v23, %v2303_v41  ;;  %v2387_v35 = vsel %vm2386_vm1, %v6977_v49, %v2383_v21  ;;  %vm2400_vm3 = vweird.f32 %v6979_v23 }
 0xb0e   : > { %v2392_v48 = vsel %vm2389_vm2, %v2391_v58, %v2387_v35  ;;  %vm2401_vm5 = vmor %vm2399_vm4, %vm2400_vm3 }
 0xb0f   : > { %v2396_v37 = vsub.f32 1.0, %v2395_v62  ;;  %v2393_v2 = vmul.f32 %v8199_v31, %v2392_v48 }
 0xb11   : > { %v2397_v18 = vmul.f32 %v6979_v23, %v2396_v37  ;;  %6459 = vmatmul.msk.f32.gmra.mxu1 %vm1315_vm7, %v2393_v2 }
 0xb13   : > { %v2398_v46 = vadd.f32 %v6979_v23, %v2397_v18 }
 0xb15   : > { %v2402_v3 = vsel %vm2401_vm5, %v6979_v23, %v2398_v46 }
 0xb16   : > { %v2407_v53 = vsel %vm2404_vm8, %v2406_v55, %v2402_v3 }
 0xb17   : > { %v2408_v54 = vmul.f32 %v8203_v38, %v2407_v53 }
 0xb18   : > { %v2873_v39 = vpop.permute.xlu0 %2872 }
 0xb19   : > { %6460 = vmatmul.msk.f32.gmra.mxu1 %vm1315_vm7, %v2408_v54 }
 0xb1a   : > { %6510 = vmatpush.xpose.msk.msrb.mxu1 %vm1154_vm6, %v2873_v39 }
 0xb21   : > { %6511 = vmatmul.msk.f32.vlgmr.msrb.gmra.mxu1 %vm1154_vm6, %v8213_v40 }
 0xb29   : > { %6512 = vmatmul.msk.f32.gmra.mxu1 %vm1154_vm6, %v8208_v0 }
 0xb31   : > { %6513 = vmatmul.msk.f32.gmra.mxu1 %vm1154_vm6, %v8188_v33 }
 0xb38   : > { %v2468_v31 = vpop.f32.mrf.mxu1 }
 0xb39   : > { %v8245_v5 = vadd.f32 %v2468_v31, %v7882_v25  ;;  %6514 = vmatmul.msk.f32.gmra.mxu1 %vm1154_vm6, %v8180_v26 }
 0xb3b   : > { %v2500_v38 = vsel %vm1154_vm6, %v8245_v5, 0.0 }
 0xb3c   : > { %2501 = vadd.xlane.f32.xlu1 %v2500_v38 }
 0xb40   : > { %v2471_v42 = vpop.f32.mrf.mxu1 }
 0xb41   : > { %v8252_v51 = vadd.f32 %v2471_v42, %v7887_v60  ;;  %6515 = vmatmul.msk.f32.gmra.mxu1 %vm1154_vm6, %v8170_v29 }
 0xb43   : > { %v2503_v4 = vsel %vm1154_vm6, %v8252_v51, 0.0 }
 0xb44   : > { %2504 = vadd.xlane.f32.xlu2 %v2503_v4 }
 0xb48   : > { %v2474_v25 = vpop.f32.mrf.mxu1 }
 0xb49   : > { %v8259_v7 = vadd.f32 %v2474_v25, %v7892_v8  ;;  %6516 = vmatmul.msk.f32.gmra.mxu1 %vm1154_vm6, %v8176_v56 }
 0xb4b   : > { %v2506_v52 = vsel %vm1154_vm6, %v8259_v7, 0.0 }
 0xb4c   : > { %2507 = vadd.xlane.f32.xlu0 %v2506_v52 }
 0xb50   : > { %v2477_v60 = vpop.f32.mrf.mxu1 }
 0xb51   : > { %v8266_v32 = vadd.f32 %v2477_v60, %v7897_v9  ;;  %6517 = vmatmul.msk.f32.gmra.mxu1 %vm1154_vm6, %v8184_v30 }
 0xb53   : > { %v2509_v43 = vsel %vm1154_vm6, %v8266_v32, 0.0 }
 0xb54   : > { %2510 = vadd.xlane.f32.xlu2 %v2509_v43 }
 0xb81   : > { %v2480_v8 = vpop.f32.mrf.mxu1 }
 0xb82   : > { %v8273_v36 = vadd.f32 %v2480_v8, %v7902_v13 }
 0xb84   : > { %v2512_v49 = vsel %vm1154_vm6, %v8273_v36, 0.0 }
 0xb85   : > { %2513 = vadd.xlane.f32.xlu1 %v2512_v49 }
 0xb8e   : > { %v2483_v47 = vpop.f32.mrf.mxu1 }
 0xb8f   : > { %v8278_v41 = vadd.f32 %v2483_v47, %v7907_v17 }
 0xb91   : > { %v2515_v9 = vsel %vm1154_vm6, %v8278_v41, 0.0 }
 0xb92   : > { %2516 = vadd.xlane.f32.xlu0 %v2515_v9 }
 0xb96   : > { %v2486_v20 = vpop.f32.mrf.mxu1 }
 0xb97   : > { %v8283_v44 = vadd.f32 %v2486_v20, %v7912_v22 }
 0xb99   : > { %v2518_v13 = vsel %vm1154_vm6, %v8283_v44, 0.0 }
 0xb9a   : > { %2519 = vadd.xlane.f32.xlu1 %v2518_v13 }
 0xb9e   : > { %v2931_v12 = vpop.f32.mrf.mxu1 }
 0xb9f   : > { %v2952_v57 = vmul.f32 0.17677669, %v2931_v12 }
 0xba1   : > { %v8288_v21 = vadd.f32 %v8089_v45, %v2952_v57 }
 0xba3   : > { %v2966_v17 = vsel %vm1315_vm7, %v8288_v21, -inf }
 0xba4   : > { %2967 = vmax.xlane.f32.xlu2 %v2966_v17 }
 0xba6   : > { %v2934_v23 = vpop.f32.mrf.mxu1 }
 0xba7   : > { %v2953_v58 = vmul.f32 0.17677669, %v2934_v23 }
 0xba9   : > { %v8293_v62 = vadd.f32 %v8096_v50, %v2953_v58 }
 0xbab   : > { %v2969_v22 = vsel %vm1315_vm7, %v8293_v62, -inf }
 0xbac   : > { %2970 = vmax.xlane.f32.xlu0 %v2969_v22 }
 0xbae   : > { %v2937_v35 = vpop.f32.mrf.mxu1 }
 0xbaf   : > { %v2954_v48 = vmul.f32 0.17677669, %v2937_v35  ;;  %v2502_v2 = vpop.xlane.xlu1 %2501 }
 0xbb0   : > { %v2521_v18 = vmul.f32 %v2502_v2, %v7719_v15 }
 0xbb1   : > { %v8298_v37 = vadd.f32 %v8103_v11, %v2954_v48  ;;  %v6803_v48 = vpack.i.bf16 %v8180_v26, %v8170_v29 }
 0xbb2   : > { %v8307_v46 = vsub.f32 %v8245_v5, %v2521_v18 }
 0xbb3   : > { %v2972_v45 = vsel %vm1315_vm7, %v8298_v37, -inf }
 0xbb4   : > { %2973 = vmax.xlane.f32.xlu1 %v2972_v45  ;;  %v2535_v39 = vmul.f32 %v8307_v46, %v8307_v46 }
 0xbb6   : > { %v2940_v28 = vpop.f32.mrf.mxu1  ;;  %v2542_v38 = vsel %vm1154_vm6, %v2535_v39, 0.0 }
 0xbb7   : > { %v2955_v63 = vmul.f32 0.17677669, %v2940_v28  ;;  %v2505_v11 = vpop.xlane.xlu2 %2504 }
 0xbb8   : > { %v2522_v53 = vmul.f32 %v2505_v11, %v7719_v15 }
 0xbb9   : > { %v8304_v50 = vadd.f32 %v8110_v16, %v2955_v63 }
 0xbba   : > { %v8318_v16 = vsub.f32 %v8252_v51, %v2522_v53 }
 0xbbb   : > { %v2975_v55 = vsel %vm1315_vm7, %v8304_v50, -inf }
 0xbbc   : > { %2976 = vmax.xlane.f32.xlu2 %v2975_v55 }
 0xbbe   : > { %v2943_v3 = vpop.f32.mrf.mxu1 }
 0xbbf   : > { %v2956_v54 = vmul.f32 0.17677669, %v2943_v3  ;;  %v2508_v4 = vpop.xlane.xlu0 %2507 }
 0xbc0   : > { %v2523_v52 = vmul.f32 %v2508_v4, %v7719_v15 }
 0xbc1   : > { %v8315_v31 = vadd.f32 %v8132_v27, %v2956_v54  ;;  %v2536_v27 = vmul.f32 %v8318_v16, %v8318_v16 }
 0xbc2   : > { %v8334_v9 = vsub.f32 %v8259_v7, %v2523_v52 }
 0xbc3   : > { %v2978_v42 = vsel %vm1315_vm7, %v8315_v31, -inf  ;;  %v2545_v20 = vsel %vm1154_vm6, %v2536_v27, 0.0 }
 0xbc4   : > { %2543 = vadd.xlane.f32.xlu2 %v2542_v38  ;;  %2979 = vmax.xlane.f32.xlu0 %v2978_v42  ;;  %v2537_v23 = vmul.f32 %v8334_v9, %v8334_v9 }
 0xbc6   : > { %v2946_v25 = vpop.f32.mrf.mxu1  ;;  %v2548_v35 = vsel %vm1154_vm6, %v2537_v23, 0.0 }
 0xbc7   : > { %v2957_v60 = vmul.f32 0.17677669, %v2946_v25  ;;  %v2511_v43 = vpop.xlane.xlu2 %2510 }
 0xbc8   : > { %v2524_v8 = vmul.f32 %v2511_v43, %v7719_v15 }
 0xbc9   : > { %v8328_v49 = vadd.f32 %v8119_v34, %v2957_v60 }
 0xbca   : > { %v8331_v47 = vsub.f32 %v8266_v32, %v2524_v8 }
 0xbcb   : > { %v2981_v13 = vsel %vm1315_vm7, %v8328_v49, -inf }
 0xbcc   : > { %2546 = vadd.xlane.f32.xlu0 %v2545_v20  ;;  %2982 = vmax.xlane.f32.xlu1 %v2981_v13  ;;  %v2538_v12 = vmul.f32 %v8331_v47, %v8331_v47  ;;  %v6798_v20 = vpack.i.bf16 %v8176_v56, %v8184_v30  ;;  %v6464_v56 = vld [vmem:[%s10254_s14 + $0x28] sm:$0xff]  ;;  %v6463_v30 = vld [vmem:[%s10254_s14 + $0x20] sm:$0xff] }
 0xbce   : > { %v2949_v57 = vpop.f32.mrf.mxu1  ;;  %v2551_v34 = vsel %vm1154_vm6, %v2538_v12, 0.0 }
 0xbcf   : > { %v2958_v17 = vmul.f32 0.17677669, %v2949_v57  ;;  %2552 = vadd.xlane.f32.xlu2 %v2551_v34  ;;  %v6465_v57 = vld [vmem:[%s10254_s14 + $0x30] sm:$0xff] }
 0xbd1   : > { %v8345_v58 = vadd.f32 %v8142_v59, %v2958_v17 }
 0xbd3   : > { %v2984_v22 = vsel %vm1315_vm7, %v8345_v58, -inf }
 0xbd4   : > { %2985 = vmax.xlane.f32.xlu0 %v2984_v22  ;;  %2549 = vadd.xlane.f32.xlu1 %v2548_v35 }
 0xbe7   : > { %6804 = vrot.lane.b32.xlu2 %v6803_v48, %s7234_s22 }
 0xbf8   : > { %v2514_v45 = vpop.xlane.xlu1 %2513 }
 0xbf9   : > { %v2525_v2 = vmul.f32 %v2514_v45, %v7719_v15  ;;  %v6808_v45 = vpack.i.bf16 %v8208_v0, %v8188_v33 }
 0xbfb   : > { %v8355_v28 = vsub.f32 %v8273_v36, %v2525_v2 }
 0xbfd   : > { %v2539_v59 = vmul.f32 %v8355_v28, %v8355_v28 }
 0xbff   : > { %v2554_v18 = vsel %vm1154_vm6, %v2539_v59, 0.0 }
 0xc00   : > { %2555 = vadd.xlane.f32.xlu0 %v2554_v18 }
 0xc05   : > { %v2517_v63 = vpop.xlane.xlu0 %2516 }
 0xc06   : > { %v2526_v55 = vmul.f32 %v2517_v63, %v7719_v15 }
 0xc08   : > { %v8362_v11 = vsub.f32 %v8278_v41, %v2526_v55 }
 0xc0a   : > { %v2540_v29 = vmul.f32 %v8362_v11, %v8362_v11 }
 0xc0c   : > { %v2557_v26 = vsel %vm1154_vm6, %v2540_v29, 0.0 }
 0xc0d   : > { %2558 = vadd.xlane.f32.xlu1 %v2557_v26  ;;  %v2520_v3 = vpop.xlane.xlu1 %2519 }
 0xc0e   : > { %v2527_v53 = vmul.f32 %v2520_v3, %v7719_v15 }
 0xc10   : > { %v8369_v54 = vsub.f32 %v8283_v44, %v2527_v53 }
 0xc12   : > { %v2541_v39 = vmul.f32 %v8369_v54, %v8369_v54 }
 0xc14   : > { %v2560_v38 = vsel %vm1154_vm6, %v2541_v39, 0.0 }
 0xc15   : > { %2561 = vadd.xlane.f32.xlu2 %v2560_v38 }
 0xc17   : > { %v2968_v42 = vpop.xlane.xlu2 %2967 }
 0xc18   : > { %v2987_v4 = vsub.f32 %v8288_v21, %v2968_v42 }
 0xc1a   : > { %v2994_v25 = vmul.f32 1.442695, %v2987_v4 }
 0xc1c   : > { %6980 = vpow2.f32 %v2994_v25 }
 0xc1f   : > { %v2971_v52 = vpop.xlane.xlu0 %2970 }
 0xc20   : > { %v2988_v60 = vsub.f32 %v8293_v62, %v2971_v52  ;;  %v6466_v62 = vld [vmem:[%s10254_s14 + $0x38] sm:$0xff] }
 0xc21   : > { %2717 = vmatpush.msrb.mxu0 %v6466_v62 }
 0xc22   : > { %v8376_v43 = vpop.eup %6980  ;;  %v2996_v27 = vmul.f32 1.442695, %v2988_v60 }
 0xc23   : > { %v3008_v8 = vsel %vm1315_vm7, %v8376_v43, 0.0  ;;  %2718 = vmatpush.msrb.mxu0 %v6465_v57 }
 0xc24   : > { %6982 = vpow2.f32 %v2996_v27  ;;  %3009 = vadd.xlane.f32.xlu2 %v3008_v8 }
 0xc25   : > { %2719 = vmatpush.msrb.mxu0 %v6464_v56 }
 0xc26   : > { %6799 = vrot.lane.b32.xlu1 %v6798_v20, %s7234_s22 }
 0xc27   : > { %2720 = vmatpush.msrb.mxu0 %v6463_v30  ;;  %v2974_v34 = vpop.xlane.xlu1 %2973  ;;  %v8429_v30 = vld [vmem:[%s10261_s21 + $0x1] ss:$0 sm:$0xff] }
 0xc28   : > { %v2989_v48 = vsub.f32 %v8298_v37, %v2974_v34 }
 0xc2a   : > { %v8383_v13 = vpop.eup %6982  ;;  %v2998_v55 = vmul.f32 1.442695, %v2989_v48 }
 0xc2b   : > { %v3011_v21 = vsel %vm1315_vm7, %v8383_v13, 0.0 }
 0xc2c   : > { %3012 = vadd.xlane.f32.xlu0 %v3011_v21 }
 0xc2f   : > { %v8390_v12 = vpop.xlane.xlu2 %2976 }
 0xc37   : > { %v2544_v17 = vpop.xlane.xlu2 %2543  ;;  %v8401_v23 = vpop.xlane.xlu0 %2979 }
 0xc38   : > { %v2563_v22 = vmul.f32 %v2544_v17, %v7719_v15 }
 0xc3a   : > { %v2570_v35 = vadd.f32 1e-05, %v2563_v22 }
 0xc3c   : > { %6984 = vrsqrt.f32 %v2570_v35  ;;  %3134 = vrot.lane.b32.xlu2 %v8213_v40, %s7234_s22  ;;  %vm2583_vm10 = vweird.f32 %v2570_v35 }
 0xc3f   : > { %v2547_v2 = vpop.xlane.xlu0 %2546  ;;  %v2983_v59 = vpop.xlane.xlu1 %2982 }
 0xc40   : > { %v2564_v18 = vmul.f32 %v2547_v2, %v7719_v15  ;;  %6809 = vrot.lane.b32.xlu0 %v6808_v45, %s7234_s22  ;;  %v2992_v33 = vsub.f32 %v8328_v49, %v2983_v59  ;;  %v8422_v49 = vld [vmem:[%s10260_s20 + $0x1] ss:$0 sm:$0xff]  ;;  %v2991_v2 = vsub.f32 %v8315_v31, %v8401_v23 }
 0xc42   : > { %v6985_v63 = vpop.eup %6984  ;;  %v2571_v29 = vadd.f32 1e-05, %v2564_v18  ;;  %v2553_v26 = vpop.xlane.xlu2 %2552  ;;  %v3004_v25 = vmul.f32 1.442695, %v2992_v33  ;;  %v3002_v33 = vmul.f32 1.442695, %v2991_v2 }
 0xc43   : > { %v2578_v3 = vmul.f32 %v6985_v63, %v2570_v35  ;;  %v2566_v53 = vmul.f32 %v2553_v26, %v7719_v15  ;;  %vm2584_vm9 = vweird.f32 %v6985_v63 }
 0xc44   : > { %6986 = vrsqrt.f32 %v2571_v29  ;;  %vm2585_vm11 = vmor %vm2583_vm10, %vm2584_vm9  ;;  %vm2593_vm13 = vweird.f32 %v2571_v29 }
 0xc45   : > { %v2579_v40 = vmul.f32 %v6985_v63, %v2578_v3  ;;  %v8412_v39 = vadd.f32 1e-05, %v2566_v53  ;;  %6988 = vpow2.f32 %v2998_v55 }
 0xc47   : > { %v2580_v0 = vmul.f32 0.5, %v2579_v40  ;;  %6990 = vrsqrt.f32 %v8412_v39  ;;  %v2550_v37 = vpop.xlane.xlu1 %2549  ;;  %v2990_v40 = vsub.f32 %v8304_v50, %v8390_v12  ;;  %v2986_v50 = vpop.xlane.xlu0 %2985  ;;  %vm2613_vm3 = vweird.f32 %v8412_v39 }
 0xc48   : > { %v2565_v38 = vmul.f32 %v2550_v37, %v7719_v15 }
 0xc49   : > { %v2581_v42 = vsub.f32 1.5, %v2580_v0 }
 0xc4a   : > { %v6987_v4 = vpop.eup %6986  ;;  %v2572_v52 = vadd.f32 1e-05, %v2565_v38  ;;  %v8471_v2 = vpop.permute.xlu2 %6804 }
 0xc4b   : > { %v2582_v60 = vmul.f32 %v6985_v63, %v2581_v42  ;;  %v2588_v27 = vmul.f32 %v6987_v4, %v2571_v29  ;;  %v8417_v8 = vpop.eup %6988  ;;  %vm2594_vm12 = vweird.f32 %v6987_v4  ;;  %v3000_v42 = vmul.f32 1.442695, %v2990_v40 }
 0xc4c   : > { %6992 = vrsqrt.f32 %v2572_v52  ;;  %v3014_v17 = vsel %vm1315_vm7, %v8417_v8, 0.0  ;;  %vm2595_vm14 = vmor %vm2593_vm13, %vm2594_vm12  ;;  %vm2603_vm1 = vweird.f32 %v2572_v52 }
 0xc4d   : > { %v6991_v20 = vpop.eup %6990  ;;  %v2586_v21 = vsel %vm2585_vm11, %v6985_v63, %v2582_v60  ;;  %v2589_v62 = vmul.f32 %v6987_v4, %v2588_v27  ;;  %6994 = vpow2.f32 %v3004_v25  ;;  %v2993_v60 = vsub.f32 %v8345_v58, %v2986_v50 }
 0xc4e   : > { %v2647_v57 = vmul.f32 %v2586_v21, %v8307_v46  ;;  %v2608_v56 = vmul.f32 %v6991_v20, %v8412_v39  ;;  %6996 = vpow2.f32 %v3002_v33  ;;  %vm2614_vm0 = vweird.f32 %v6991_v20 }
 0xc4f   : > { %v2590_v34 = vmul.f32 0.5, %v2589_v62  ;;  %vm2615_vm4 = vmor %vm2613_vm3, %vm2614_vm0  ;;  %6998 = vpow2.f32 %v3000_v42 }
 0xc50   : > { %v2657_v22 = vmul.f32 %v8422_v49, %v2647_v57  ;;  %v2609_v35 = vmul.f32 %v6991_v20, %v2608_v56  ;;  %3015 = vadd.xlane.f32.xlu1 %v3014_v17  ;;  %v3006_v56 = vmul.f32 1.442695, %v2993_v60 }
 0xc51   : > { %v2591_v48 = vsub.f32 1.5, %v2590_v34 }
 0xc52   : > { %v2667_v46 = vadd.f32 %v8429_v30, %v2657_v22  ;;  %v6993_v45 = vpop.eup %6992  ;;  %v2610_v63 = vmul.f32 0.5, %v2609_v35  ;;  %7000 = vpow2.f32 %v3006_v56 }
 0xc53   : > { %v2592_v59 = vmul.f32 %v6987_v4, %v2591_v48  ;;  %v8437_v18 = vpop.eup %6994  ;;  %v2598_v55 = vmul.f32 %v6993_v45, %v2572_v52  ;;  %vm2604_vm15 = vweird.f32 %v6993_v45 }
 0xc54   : > { %6468 = vmatmul.msk.f32.vlgmr.msrb.gmra.mxu0 %vm1154_vm6, %v2667_v46  ;;  %v3023_v31 = vsel %vm1315_vm7, %v8437_v18, 0.0  ;;  %v2611_v23 = vsub.f32 1.5, %v2610_v63  ;;  %vm2605_vm2 = vmor %vm2603_vm1, %vm2604_vm15  ;;  %v8451_v21 = vpop.eup %6996 }
 0xc55   : > { %v2596_v26 = vsel %vm2595_vm14, %v6987_v4, %v2592_v59  ;;  %v2599_v3 = vmul.f32 %v6993_v45, %v2598_v55  ;;  %v3020_v39 = vsel %vm1315_vm7, %v8451_v21, 0.0 }
 0xc56   : > { %v2648_v53 = vmul.f32 %v2596_v26, %v8318_v16  ;;  %v2612_v4 = vmul.f32 %v6991_v20, %v2611_v23 }
 0xc57   : > { %v2600_v29 = vmul.f32 0.5, %v2599_v3 }
 0xc58   : > { %3024 = vadd.xlane.f32.xlu1 %v3023_v31  ;;  %v2658_v0 = vmul.f32 %v8422_v49, %v2648_v53  ;;  %v2616_v27 = vsel %vm2615_vm4, %v6991_v20, %v2612_v4 }
 0xc59   : > { %v2601_v37 = vsub.f32 1.5, %v2600_v29  ;;  %v2650_v57 = vmul.f32 %v2616_v27, %v8331_v47 }
 0xc5a   : > { %v2668_v38 = vadd.f32 %v8429_v30, %v2658_v0 }
 0xc5b   : > { %v2602_v16 = vmul.f32 %v6993_v45, %v2601_v37  ;;  %v2660_v58 = vmul.f32 %v8422_v49, %v2650_v57 }
 0xc5c   : > { %6469 = vmatmul.msk.f32.gmra.mxu0 %vm1154_vm6, %v2668_v38 }
 0xc5d   : > { %v2606_v12 = vsel %vm2605_vm2, %v6993_v45, %v2602_v16  ;;  %v2670_v34 = vadd.f32 %v8429_v30, %v2660_v58 }
 0xc5e   : > { %v2649_v25 = vmul.f32 %v2606_v12, %v8334_v9  ;;  %v8459_v9 = vpop.eup %6998 }
 0xc5f   : > { %v3017_v20 = vsel %vm1315_vm7, %v8459_v9, 0.0  ;;  %v8466_v47 = vpop.eup %7000 }
 0xc60   : > { %v2659_v62 = vmul.f32 %v8422_v49, %v2649_v25  ;;  %v3026_v17 = vsel %vm1315_vm7, %v8466_v47, 0.0 }
 0xc62   : > { %v2669_v52 = vadd.f32 %v8429_v30, %v2659_v62 }
 0xc64   : > { %6470 = vmatmul.msk.f32.gmra.mxu0 %vm1154_vm6, %v2669_v52 }
 0xc65   : > { %3021 = vadd.xlane.f32.xlu2 %v3020_v39  ;;  %v6489_v39 = vld [vmem:[%s10256_s16 + $0xf0] sm:$0xff] }
 0xc6a   : > { %3018 = vadd.xlane.f32.xlu0 %v3017_v20 }
 0xc6c   : > { %6471 = vmatmul.msk.f32.gmra.mxu0 %vm1154_vm6, %v2670_v34 }
 0xc72   : > { %3027 = vadd.xlane.f32.xlu0 %v3026_v17 }
 0xc73   : > { %v2556_v22 = vpop.xlane.xlu0 %2555 }
 0xc74   : > { %v2567_v35 = vmul.f32 %v2556_v22, %v7719_v15 }
 0xc76   : > { %v2574_v48 = vadd.f32 1e-05, %v2567_v35  ;;  %v6488_v35 = vld [vmem:[%s10256_s16 + $0xe8] sm:$0xff] }
 0xc78   : > { %7002 = vrsqrt.f32 %v2574_v48  ;;  %vm2623_vm8 = vweird.f32 %v2574_v48 }
 0xc7e   : > { %v7003_v46 = vpop.eup %7002 }
 0xc7f   : > { %v2618_v45 = vmul.f32 %v7003_v46, %v2574_v48  ;;  %vm2624_vm5 = vweird.f32 %v7003_v46 }
 0xc80   : > { %v2559_v59 = vpop.xlane.xlu1 %2558  ;;  %vm2625_vm9 = vmor %vm2623_vm8, %vm2624_vm5 }
 0xc81   : > { %v2619_v63 = vmul.f32 %v7003_v46, %v2618_v45  ;;  %v2568_v55 = vmul.f32 %v2559_v59, %v7719_v15  ;;  %v6486_v59 = vld [vmem:[%s10256_s16 + $0xd8] sm:$0xff] }
 0xc83   : > { %v2620_v26 = vmul.f32 0.5, %v2619_v63  ;;  %v2575_v3 = vadd.f32 1e-05, %v2568_v55  ;;  %v6806_v63 = vunpack.i.l.bf16 %v8471_v2 }
 0xc85   : > { %v2621_v53 = vsub.f32 1.5, %v2620_v26  ;;  %7004 = vrsqrt.f32 %v2575_v3  ;;  %vm2633_vm11 = vweird.f32 %v2575_v3  ;;  %v6485_v26 = vld [vmem:[%s10256_s16 + $0xd0] sm:$0xff] }
 0xc87   : > { %v2622_v40 = vmul.f32 %v7003_v46, %v2621_v53 }
 0xc88   : > { %v2562_v33 = vpop.xlane.xlu2 %2561 }
 0xc89   : > { %v2569_v31 = vmul.f32 %v2562_v33, %v7719_v15  ;;  %v2626_v23 = vsel %vm2625_vm9, %v7003_v46, %v2622_v40  ;;  %v6807_v33 = vunpack.i.h.bf16 %v8471_v2  ;;  %v6483_v2 = vld [vmem:[%s10256_s16 + $0xc0] sm:$0xff] }
 0xc8a   : > { %v2651_v29 = vmul.f32 %v2626_v23, %v8355_v28  ;;  %v6490_v28 = vld [vmem:[%s10256_s16 + $0xf8] sm:$0xff] }
 0xc8b   : > { %v7005_v0 = vpop.eup %7004  ;;  %v2576_v37 = vadd.f32 1e-05, %v2569_v31  ;;  %2772 = vmatpush.msrb.mxu3 %v6490_v28  ;;  %v6477_v28 = vld [vmem:[%s10256_s16 + $0x90] sm:$0xff] }
 0xc8c   : > { %v2628_v38 = vmul.f32 %v7005_v0, %v2575_v3  ;;  %v2661_v42 = vmul.f32 %v8422_v49, %v2651_v29  ;;  %vm2634_vm10 = vweird.f32 %v7005_v0  ;;  %v6484_v29 = vld [vmem:[%s10256_s16 + $0xc8] sm:$0xff] }
 0xc8d   : > { %7006 = vrsqrt.f32 %v2576_v37  ;;  %vm2635_vm12 = vmor %vm2633_vm11, %vm2634_vm10  ;;  %2773 = vmatpush.msrb.mxu3 %v6489_v39  ;;  %vm2643_vm14 = vweird.f32 %v2576_v37 }
 0xc8e   : > { %v2629_v4 = vmul.f32 %v7005_v0, %v2628_v38  ;;  %v2671_v16 = vadd.f32 %v8429_v30, %v2661_v42  ;;  %v6481_v38 = vld [vmem:[%s10256_s16 + $0xb0] sm:$0xff] }
 0xc8f   : > { %2774 = vmatpush.msrb.mxu3 %v6488_v35 }
 0xc90   : > { %v2630_v50 = vmul.f32 0.5, %v2629_v4  ;;  %6472 = vmatmul.msk.f32.gmra.mxu0 %vm1154_vm6, %v2671_v16  ;;  %v6480_v4 = vld [vmem:[%s10256_s16 + $0xa8] sm:$0xff]  ;;  %v6479_v16 = vld [vmem:[%s10256_s16 + $0xa0] sm:$0xff] }
 0xc92   : > { %v2631_v12 = vsub.f32 1.5, %v2630_v50 }
 0xc93   : > { %v7007_v25 = vpop.eup %7006 }
 0xc94   : > { %v2632_v60 = vmul.f32 %v7005_v0, %v2631_v12  ;;  %v2638_v27 = vmul.f32 %v7007_v25, %v2576_v37  ;;  %vm2644_vm13 = vweird.f32 %v7007_v25  ;;  %v6482_v37 = vld [vmem:[%s10256_s16 + $0xb8] sm:$0xff] }
 0xc95   : > { %vm2645_vm15 = vmor %vm2643_vm14, %vm2644_vm13 }
 0xc96   : > { %v2639_v62 = vmul.f32 %v7007_v25, %v2638_v27  ;;  %v2636_v52 = vsel %vm2635_vm12, %v7005_v0, %v2632_v60  ;;  %v6478_v60 = vld [vmem:[%s10256_s16 + $0x98] sm:$0xff] }
 0xc97   : > { %v8482_v57 = vpop.xlane.xlu2 %3009  ;;  %v2652_v56 = vmul.f32 %v2636_v52, %v8362_v11  ;;  %v6487_v11 = vld [vmem:[%s10256_s16 + $0xe0] sm:$0xff] }
 0xc98   : > { %v2640_v58 = vmul.f32 0.5, %v2639_v62  ;;  %v6800_v20 = vpop.permute.xlu1 %6799  ;;  %7008 = vrcp.f32 %v8482_v57  ;;  %2775 = vmatpush.msrb.mxu3 %v6487_v11  ;;  %vm3034_vm1 = vweird.f32 %v8482_v57  ;;  %v3038_v27 = vand.u32 2147483647, %v8482_v57 }
 0xc99   : > { %v6801_v34 = vunpack.i.l.bf16 %v6800_v20  ;;  %v2662_v17 = vmul.f32 %v8422_v49, %v2652_v56  ;;  %v6802_v45 = vunpack.i.h.bf16 %v6800_v20  ;;  %v6476_v20 = vld [vmem:[%s10256_s16 + $0x88] sm:$0xff] }
 0xc9a   : > { %v2641_v22 = vsub.f32 1.5, %v2640_v58  ;;  %2776 = vmatpush.msrb.mxu3 %v6486_v59  ;;  %vm3039_vm3 = vcmp.eq.f32.partialorder %v3038_v27, 8.507059e+37 }
 0xc9b   : > { %3185 = vmatpush.msra.mxu0 %v6801_v34  ;;  %v2672_v48 = vadd.f32 %v8429_v30, %v2662_v17  ;;  %v6475_v17 = vld [vmem:[%s10256_s16 + $0x80] sm:$0xff] }
 0xc9c   : > { %v2642_v46 = vmul.f32 %v7007_v25, %v2641_v22  ;;  %2777 = vmatpush.msrb.mxu3 %v6485_v26 }
 0xc9d   : > { %6473 = vmatmul.msk.f32.gmra.mxu0 %vm1154_vm6, %v2672_v48 }
 0xc9e   : > { %v2646_v55 = vsel %vm2645_vm15, %v7007_v25, %v2642_v46  ;;  %3186 = vmatpush.msra.mxu0 %v6802_v45  ;;  %v7009_v3 = vpop.eup %7008  ;;  %2778 = vmatpush.msrb.mxu3 %v6484_v29  ;;  %v3040_v25 = vand.u32 2147483648, %v8482_v57 }
 0xc9f   : > { %v2653_v53 = vmul.f32 %v2646_v55, %v8369_v54  ;;  %v8506_v40 = vpop.xlane.xlu0 %3012  ;;  %v3030_v23 = vmul.f32 %v7009_v3, %v8482_v57  ;;  %vm3035_vm0 = vweird.f32 %v7009_v3  ;;  %v3135_v48 = vpop.permute.xlu2 %3134 }
 0xca0   : > { %3187 = vmatpush.msra.mxu0 %v6806_v63  ;;  %7010 = vrcp.f32 %v8506_v40  ;;  %2779 = vmatpush.msrb.mxu3 %v6483_v2  ;;  %vm3036_vm2 = vmor %vm3034_vm1, %vm3035_vm0  ;;  %v3041_v39 = vor.u32 1.1754944e-38, %v3040_v25  ;;  %v3055_v35 = vand.u32 2147483648, %v8506_v40  ;;  %vm3049_vm5 = vweird.f32 %v8506_v40 }
 0xca1   : > { %v2663_v31 = vmul.f32 %v8422_v49, %v2653_v53  ;;  %v3031_v0 = vsub.f32 1.0, %v3030_v23  ;;  %v3053_v46 = vand.u32 2147483647, %v8506_v40 }
 0xca2   : > { %3188 = vmatpush.msra.mxu0 %v6807_v33  ;;  %2780 = vmatpush.msrb.mxu3 %v6482_v37  ;;  %v3056_v59 = vor.u32 1.1754944e-38, %v3055_v35 }
 0xca3   : > { %v2673_v54 = vadd.f32 %v8429_v30, %v2663_v31  ;;  %v3032_v30 = vmul.f32 %v7009_v3, %v3031_v0  ;;  %vm3054_vm9 = vcmp.eq.f32.partialorder %v3053_v46, 8.507059e+37 }
 0xca4   : > { %2781 = vmatpush.msrb.mxu3 %v6481_v38 }
 0xca5   : > { %6474 = vmatmul.msk.f32.gmra.mxu0 %vm1154_vm6, %v2673_v54  ;;  %v3033_v50 = vadd.f32 %v7009_v3, %v3032_v30 }
 0xca6   : > { %v7011_v49 = vpop.eup %7010  ;;  %2782 = vmatpush.msrb.mxu3 %v6480_v4 }
 0xca7   : > { %v3045_v42 = vmul.f32 %v7011_v49, %v8506_v40  ;;  %v3037_v62 = vsel %vm3036_vm2, %v7009_v3, %v3033_v50  ;;  %vm3050_vm4 = vweird.f32 %v7011_v49  ;;  %v8558_v40 = vld [vmem:[%s10255_s15 + $0x1] ss:$0 sm:$0xff] }
 0xca8   : > { %2783 = vmatpush.msrb.mxu3 %v6479_v16  ;;  %v3042_v34 = vsel %vm3039_vm3, %v3041_v39, %v3037_v62  ;;  %vm3051_vm8 = vmor %vm3049_vm5, %vm3050_vm4 }
 0xca9   : > { %v3046_v12 = vsub.f32 1.0, %v3045_v42  ;;  %v3043_v11 = vmul.f32 %v8376_v43, %v3042_v34 }
 0xcaa   : > { %2784 = vmatpush.msrb.mxu3 %v6478_v60 }
 0xcab   : > { %v3047_v52 = vmul.f32 %v7011_v49, %v3046_v12 }
 0xcac   : > { %2785 = vmatpush.msrb.mxu3 %v6477_v28 }
 0xcad   : > { %v3048_v22 = vadd.f32 %v7011_v49, %v3047_v52 }
 0xcae   : > { %2786 = vmatpush.msrb.mxu3 %v6476_v20 }
 0xcaf   : > { %v3052_v45 = vsel %vm3051_vm8, %v7011_v49, %v3048_v22 }
 0xcb0   : > { %2787 = vmatpush.msrb.mxu3 %v6475_v17  ;;  %v3057_v63 = vsel %vm3054_vm9, %v3056_v59, %v3052_v45 }
 0xcb1   : > { %v3058_v55 = vmul.f32 %v8383_v13, %v3057_v63 }
 0xcb2   : > { %v6810_v56 = vpop.permute.xlu0 %6809 }
 0xcb3   : > { %v6811_v58 = vunpack.i.l.bf16 %v6810_v56  ;;  %v6812_v57 = vunpack.i.h.bf16 %v6810_v56 }
 0xcb5   : > { %3189 = vmatpush.msra.mxu0 %v6811_v58 }
 0xcb7   : > { %3190 = vmatpush.msra.mxu0 %v6812_v57 }
 0xcb9   : > { %3191 = vmatpush.msra.mxu0 %v3135_v48 }
 0xcba   : > { %6518 = vmatmul.msk.f32.vlgmr.msra.gmra.mxu0 %vm1315_vm7, %v3043_v11 }
 0xcc2   : > { %6519 = vmatmul.msk.f32.gmra.mxu0 %vm1315_vm7, %v3058_v55 }
 0xcc3   : > { %v3016_v26 = vpop.xlane.xlu1 %3015 }
 0xcc4   : > { %7012 = vrcp.f32 %v3016_v26  ;;  %v3070_v33 = vand.u32 2147483648, %v3016_v26  ;;  %v3068_v23 = vand.u32 2147483647, %v3016_v26  ;;  %vm3064_vm11 = vweird.f32 %v3016_v26 }
 0xcc6   : > { %v3071_v13 = vor.u32 1.1754944e-38, %v3070_v33  ;;  %vm3069_vm13 = vcmp.eq.f32.partialorder %v3068_v23, 8.507059e+37 }
 0xcca   : > { %v7013_v43 = vpop.eup %7012 }
 0xccb   : > { %v3060_v3 = vmul.f32 %v7013_v43, %v3016_v26  ;;  %vm3065_vm10 = vweird.f32 %v7013_v43  ;;  %v8564_v16 = vpop.xlane.xlu1 %3024 }
 0xccc   : > { %vm3066_vm12 = vmor %vm3064_vm11, %vm3065_vm10  ;;  %vm3109_vm9 = vweird.f32 %v8564_v16 }
 0xccd   : > { %v3061_v53 = vsub.f32 1.0, %v3060_v3 }
 0xccf   : > { %v3062_v31 = vmul.f32 %v7013_v43, %v3061_v53 }
 0xcd1   : > { %v2722_v29 = vpop.f32.mrf.mxu0  ;;  %v3063_v54 = vadd.f32 %v7013_v43, %v3062_v31 }
 0xcd2   : > { %v2723_v2 = vadd.f32 %v8558_v40, %v2722_v29 }
 0xcd3   : > { %v3067_v0 = vsel %vm3066_vm12, %v7013_v43, %v3063_v54 }
 0xcd4   : > { %v2743_v49 = vmax.f32 %v2723_v2, 0.0  ;;  %v3072_v37 = vsel %vm3069_vm13, %v3071_v13, %v3067_v0 }
 0xcd5   : > { %v3073_v38 = vmul.f32 %v8417_v8, %v3072_v37  ;;  %v3115_v37 = vand.u32 2147483648, %v8564_v16 }
 0xcd6   : > { %2788 = vmatmul.f32.vlgmr.msrb.gmra.mxu3 %v2743_v49 }
 0xcd7   : > { %6520 = vmatmul.msk.f32.gmra.mxu0 %vm1315_vm7, %v3073_v38 }
 0xcd8   : > { %v3022_v30 = vpop.xlane.xlu2 %3021 }
 0xcd9   : > { %7014 = vrcp.f32 %v3022_v30  ;;  %v2725_v42 = vpop.f32.mrf.mxu0  ;;  %v3100_v3 = vand.u32 2147483648, %v3022_v30  ;;  %vm3094_vm3 = vweird.f32 %v3022_v30  ;;  %v3098_v31 = vand.u32 2147483647, %v3022_v30 }
 0xcda   : > { %v2726_v4 = vadd.f32 %v8558_v40, %v2725_v42 }
 0xcdb   : > { %v3101_v13 = vor.u32 1.1754944e-38, %v3100_v3  ;;  %vm3099_vm5 = vcmp.eq.f32.partialorder %v3098_v31, 8.507059e+37 }
 0xcdc   : > { %v2744_v50 = vmax.f32 %v2726_v4, 0.0  ;;  %v3116_v4 = vor.u32 1.1754944e-38, %v3115_v37 }
 0xcdd   : > { %v3019_v12 = vpop.xlane.xlu0 %3018 }
 0xcde   : > { %7016 = vrcp.f32 %v3019_v12  ;;  %2791 = vmatmul.f32.gmra.mxu3 %v2744_v50  ;;  %v3085_v57 = vand.u32 2147483648, %v3019_v12  ;;  %v3083_v35 = vand.u32 2147483647, %v3019_v12  ;;  %vm3079_vm15 = vweird.f32 %v3019_v12 }
 0xcdf   : > { %v7015_v25 = vpop.eup %7014  ;;  %7018 = vrcp.f32 %v8564_v16 }
 0xce0   : > { %v3090_v60 = vmul.f32 %v7015_v25, %v3022_v30  ;;  %vm3095_vm0 = vweird.f32 %v7015_v25  ;;  %v3086_v59 = vor.u32 1.1754944e-38, %v3085_v57  ;;  %vm3084_vm2 = vcmp.eq.f32.partialorder %v3083_v35, 8.507059e+37 }
 0xce1   : > { %v2728_v27 = vpop.f32.mrf.mxu0  ;;  %vm3096_vm4 = vmor %vm3094_vm3, %vm3095_vm0 }
 0xce2   : > { %v2729_v8 = vadd.f32 %v8558_v40, %v2728_v27  ;;  %v3091_v52 = vsub.f32 1.0, %v3090_v60 }
 0xce4   : > { %v7017_v28 = vpop.eup %7016  ;;  %v2745_v58 = vmax.f32 %v2729_v8, 0.0  ;;  %v3092_v17 = vmul.f32 %v7015_v25, %v3091_v52 }
 0xce5   : > { %v7019_v62 = vpop.eup %7018  ;;  %v3075_v56 = vmul.f32 %v7017_v28, %v3019_v12  ;;  %v3028_v39 = vpop.xlane.xlu0 %3027  ;;  %vm3080_vm14 = vweird.f32 %v7017_v28 }
 0xce6   : > { %2794 = vmatmul.f32.gmra.mxu3 %v2745_v58  ;;  %v3105_v34 = vmul.f32 %v7019_v62, %v8564_v16  ;;  %7020 = vrcp.f32 %v3028_v39  ;;  %vm3081_vm1 = vmor %vm3079_vm15, %vm3080_vm14  ;;  %v3093_v26 = vadd.f32 %v7015_v25, %v3092_v17  ;;  %vm3110_vm8 = vweird.f32 %v7019_v62 }
 0xce7   : > { %v3076_v20 = vsub.f32 1.0, %v3075_v56  ;;  %vm3111_vm10 = vmor %vm3109_vm9, %vm3110_vm8  ;;  %vm3124_vm13 = vweird.f32 %v3028_v39  ;;  %v3128_v27 = vand.u32 2147483647, %v3028_v39 }
 0xce8   : > { %v3106_v45 = vsub.f32 1.0, %v3105_v34  ;;  %v3097_v54 = vsel %vm3096_vm4, %v7015_v25, %v3093_v26  ;;  %v3130_v25 = vand.u32 2147483648, %v3028_v39 }
 0xce9   : > { %v3077_v22 = vmul.f32 %v7017_v28, %v3076_v20  ;;  %v2731_v11 = vpop.f32.mrf.mxu0  ;;  %v3102_v2 = vsel %vm3099_vm5, %v3101_v13, %v3097_v54  ;;  %vm3129_vm15 = vcmp.eq.f32.partialorder %v3128_v27, 8.507059e+37 }
 0xcea   : > { %v2732_v48 = vadd.f32 %v8558_v40, %v2731_v11  ;;  %v3107_v23 = vmul.f32 %v7019_v62, %v3106_v45  ;;  %v3103_v38 = vmul.f32 %v8451_v21, %v3102_v2 }
 0xceb   : > { %v3078_v46 = vadd.f32 %v7017_v28, %v3077_v22 }
 0xcec   : > { %v2746_v63 = vmax.f32 %v2732_v48, 0.0  ;;  %v7021_v43 = vpop.eup %7020  ;;  %v3108_v49 = vadd.f32 %v7019_v62, %v3107_v23 }
 0xced   : > { %v3082_v55 = vsel %vm3081_vm1, %v7017_v28, %v3078_v46  ;;  %v3120_v29 = vmul.f32 %v7021_v43, %v3028_v39  ;;  %vm3125_vm12 = vweird.f32 %v7021_v43 }
 0xcee   : > { %v3087_v53 = vsel %vm3084_vm2, %v3086_v59, %v3082_v55  ;;  %2797 = vmatmul.f32.gmra.mxu3 %v2746_v63  ;;  %v3112_v42 = vsel %vm3111_vm10, %v7019_v62, %v3108_v49  ;;  %vm3126_vm14 = vmor %vm3124_vm13, %vm3125_vm12 }
 0xcef   : > { %v3088_v33 = vmul.f32 %v8459_v9, %v3087_v53  ;;  %v3121_v0 = vsub.f32 1.0, %v3120_v29  ;;  %v3113_v9 = vand.u32 2147483647, %v8564_v16  ;;  %v3131_v16 = vor.u32 1.1754944e-38, %v3130_v25 }
 0xcf1   : > { %6521 = vmatmul.msk.f32.gmra.mxu0 %vm1315_vm7, %v3088_v33  ;;  %v3122_v30 = vmul.f32 %v7021_v43, %v3121_v0  ;;  %vm3114_vm11 = vcmp.eq.f32.partialorder %v3113_v9, 8.507059e+37 }
 0xcf2   : > { %v3117_v50 = vsel %vm3114_vm11, %v3116_v4, %v3112_v42 }
 0xcf3   : > { %v3123_v12 = vadd.f32 %v7021_v43, %v3122_v30  ;;  %v3118_v60 = vmul.f32 %v8437_v18, %v3117_v50 }
 0xcf5   : > { %v3127_v21 = vsel %vm3126_vm14, %v7021_v43, %v3123_v12 }
 0xcf6   : > { %v3132_v8 = vsel %vm3129_vm15, %v3131_v16, %v3127_v21 }
 0xcf7   : > { %v3133_v28 = vmul.f32 %v8466_v47, %v3132_v8 }
 0xcf9   : > { %6522 = vmatmul.msk.f32.gmra.mxu0 %vm1315_vm7, %v3103_v38 }
 0xd01   : > { %6523 = vmatmul.msk.f32.gmra.mxu0 %vm1315_vm7, %v3118_v60 }
 0xd09   : > { %6524 = vmatmul.msk.f32.gmra.mxu0 %vm1315_vm7, %v3133_v28 }
 0xd0d   : > { %v2734_v62 = vpop.f32.mrf.mxu0 }
 0xd0e   : > { %v2735_v52 = vadd.f32 %v8558_v40, %v2734_v62 }
 0xd10   : > { %v2747_v56 = vmax.f32 %v2735_v52, 0.0 }
 0xd12   : > { %2800 = vmatmul.f32.gmra.mxu3 %v2747_v56 }
 0xd1a   : > { %v2737_v58 = vpop.f32.mrf.mxu0 }
 0xd1b   : > { %v2738_v18 = vadd.f32 %v8558_v40, %v2737_v58 }
 0xd1d   : > { %v2748_v39 = vmax.f32 %v2738_v18, 0.0 }
 0xd1f   : > { %2803 = vmatmul.f32.gmra.mxu3 %v2748_v39 }
 0xd22   : > { %v2740_v20 = vpop.f32.mrf.mxu0 }
 0xd23   : > { %v2741_v34 = vadd.f32 %v8558_v40, %v2740_v20 }
 0xd25   : > { %v2749_v57 = vmax.f32 %v2741_v34, 0.0 }
 0xd27   : > { %2806 = vmatmul.f32.gmra.mxu3 %v2749_v57 }
 0xd37   : > { %v3193_v17 = vpop.f32.mrf.mxu0 }
 0xd38   : > { %v8585_v47 = vadd.f32 %v3193_v17, %v7515_v61  ;;  %v6870_v61 = vld [vmem:[%s10257_s17 + $0x1] ss:$0 sm:$0xff] }
 0xd3a   : > { %v3225_v22 = vsel %vm1154_vm6, %v8585_v47, 0.0 }
 0xd3b   : > { %3226 = vadd.xlane.f32.xlu1 %v3225_v22 }
 0xd3f   : > { %v3196_v35 = vpop.f32.mrf.mxu0 }
 0xd40   : > { %v8590_v11 = vadd.f32 %v3196_v35, %v7519_v1 }
 0xd42   : > { %v3228_v48 = vsel %vm1154_vm6, %v8590_v11, 0.0 }
 0xd43   : > { %3229 = vadd.xlane.f32.xlu2 %v3228_v48 }
 0xd54   : > { %v3199_v40 = vpop.f32.mrf.mxu0 }
 0xd55   : > { %v8596_v46 = vadd.f32 %v3199_v40, %v7523_v6 }
 0xd57   : > { %v3231_v45 = vsel %vm1154_vm6, %v8596_v46, 0.0 }
 0xd58   : > { %3232 = vadd.xlane.f32.xlu0 %v3231_v45 }
 0xd59   : > { %v2789_v1 = vpop.f32.mrf.mxu3 }
 0xd5a   : > { %v2790_v59 = vadd.f32 %v6870_v61, %v2789_v1 }
 0xd5c   : > { %v8612_v6 = vadd.f32 %v2790_v59, %v8245_v5 }
 0xd5e   : > { %6185 = vst.msk [vmem:[%s8609_s29] sm:$0xff] %vm1154_vm6, %v8612_v6 }
 0xd61   : > { %v2792_v63 = vpop.f32.mrf.mxu3 }
 0xd62   : > { %v2793_v55 = vadd.f32 %v6870_v61, %v2792_v63 }
 0xd64   : > { %v8618_v26 = vadd.f32 %v2793_v55, %v8252_v51 }
 0xd66   : > { %6186 = vst.msk [vmem:[%s8609_s29 + $0x8] sm:$0xff] %vm1154_vm6, %v8618_v26 }
 0xd69   : > { %v2795_v43 = vpop.f32.mrf.mxu3 }
 0xd6a   : > { %v2796_v3 = vadd.f32 %v6870_v61, %v2795_v43 }
 0xd6c   : > { %v8624_v53 = vadd.f32 %v2796_v3, %v8259_v7 }
 0xd6e   : > { %v3202_v33 = vpop.f32.mrf.mxu0  ;;  %6187 = vst.msk [vmem:[%s8609_s29 + $0x10] sm:$0xff] %vm1154_vm6, %v8624_v53 }
 0xd6f   : > { %v8630_v5 = vadd.f32 %v3202_v33, %v7527_v10 }
 0xd71   : > { %v3234_v31 = vsel %vm1154_vm6, %v8630_v5, 0.0  ;;  %v2798_v51 = vpop.f32.mrf.mxu3 }
 0xd72   : > { %3235 = vadd.xlane.f32.xlu1 %v3234_v31  ;;  %v2799_v23 = vadd.f32 %v6870_v61, %v2798_v51  ;;  %v6530_v51 = vld [vmem:[%s10254_s14 + $0x58] sm:$0xff] }
 0xd73   : > { %3442 = vmatpush.msra.mxu3 %v6530_v51 }
 0xd74   : > { %v8635_v29 = vadd.f32 %v2799_v23, %v8266_v32  ;;  %v6529_v23 = vld [vmem:[%s10254_s14 + $0x50] sm:$0xff] }
 0xd75   : > { %3443 = vmatpush.msra.mxu3 %v6529_v23 }
 0xd76   : > { %v3205_v54 = vpop.f32.mrf.mxu0  ;;  %6188 = vst.msk [vmem:[%s8609_s29 + $0x18] sm:$0xff] %vm1154_vm6, %v8635_v29 }
 0xd77   : > { %v8641_v7 = vadd.f32 %v3205_v54, %v7531_v14  ;;  %v6528_v54 = vld [vmem:[%s10254_s14 + $0x48] sm:$0xff] }
 0xd78   : > { %3444 = vmatpush.msra.mxu3 %v6528_v54 }
 0xd79   : > { %v3237_v10 = vsel %vm1154_vm6, %v8641_v7, 0.0 }
 0xd7a   : > { %3238 = vadd.xlane.f32.xlu2 %v3237_v10  ;;  %v6527_v10 = vld [vmem:[%s10254_s14 + $0x40] sm:$0xff] }
 0xd7b   : > { %3445 = vmatpush.msra.mxu3 %v6527_v10 }
 0xd7e   : > { %v3208_v13 = vpop.f32.mrf.mxu0 }
 0xd7f   : > { %v8646_v2 = vadd.f32 %v3208_v13, %v7535_v19 }
 0xd81   : > { %v3240_v32 = vsel %vm1154_vm6, %v8646_v2, 0.0 }
 0xd82   : > { %3241 = vadd.xlane.f32.xlu0 %v3240_v32 }
 0xd86   : > { %v3211_v0 = vpop.f32.mrf.mxu0 }
 0xd87   : > { %v8651_v49 = vadd.f32 %v3211_v0, %v7539_v24 }
 0xd89   : > { %v3243_v14 = vsel %vm1154_vm6, %v8651_v49, 0.0 }
 0xd8a   : > { %3244 = vadd.xlane.f32.xlu2 %v3243_v14 }
 0xd95   : > { %v2801_v37 = vpop.f32.mrf.mxu3 }
 0xd96   : > { %v2802_v38 = vadd.f32 %v6870_v61, %v2801_v37 }
 0xd98   : > { %v8656_v9 = vadd.f32 %v2802_v38, %v8273_v36 }
 0xd9a   : > { %6189 = vst.msk [vmem:[%s8609_s29 + $0x20] sm:$0xff] %vm1154_vm6, %v8656_v9 }
 0xda2   : > { %v2804_v19 = vpop.f32.mrf.mxu3 }
 0xda3   : > { %v2805_v30 = vadd.f32 %v6870_v61, %v2804_v19 }
 0xda5   : > { %v8662_v42 = vadd.f32 %v2805_v30, %v8278_v41 }
 0xda7   : > { %6190 = vst.msk [vmem:[%s8609_s29 + $0x28] sm:$0xff] %vm1154_vm6, %v8662_v42 }
 0xdaa   : > { %v2807_v24 = vpop.f32.mrf.mxu3 }
 0xdab   : > { %v2808_v4 = vadd.f32 %v6870_v61, %v2807_v24 }
 0xdad   : > { %v8668_v50 = vadd.f32 %v2808_v4, %v8283_v44 }
 0xdae   : > { %v3227_v12 = vpop.xlane.xlu1 %3226 }
 0xdaf   : > { %6191 = vst.msk [vmem:[%s8609_s29 + $0x30] sm:$0xff] %vm1154_vm6, %v8668_v50  ;;  %v3246_v36 = vmul.f32 %v3227_v12, %v7719_v15  ;;  %s9339_s29 = scalar_lea.vmem %s10295_s28, %s8603_s1 }
 0xdb1   : > { %v8675_v25 = vsub.f32 %v8585_v47, %v3246_v36 }
 0xdb3   : > { %v3260_v41 = vmul.f32 %v8675_v25, %v8675_v25 }
 0xdb5   : > { %v3267_v60 = vsel %vm1154_vm6, %v3260_v41, 0.0 }
 0xdb6   : > { %v3230_v27 = vpop.xlane.xlu2 %3229  ;;  %3268 = vadd.xlane.f32.xlu1 %v3267_v60 }
 0xdb7   : > { %v3247_v21 = vmul.f32 %v3230_v27, %v7719_v15  ;;  %v8739_v27 = vld [vmem:[%s10260_s20 + $0x2] ss:$0 sm:$0xff] }
 0xdb9   : > { %v8682_v44 = vsub.f32 %v8590_v11, %v3247_v21 }
 0xdbb   : > { %v3261_v16 = vmul.f32 %v8682_v44, %v8682_v44 }
 0xdbd   : > { %v3270_v8 = vsel %vm1154_vm6, %v3261_v16, 0.0 }
 0xdbe   : > { %3271 = vadd.xlane.f32.xlu0 %v3270_v8  ;;  %v8744_v8 = vld [vmem:[%s10261_s21 + $0x2] ss:$0 sm:$0xff] }
 0xdcb   : > { %v3233_v28 = vpop.xlane.xlu0 %3232 }
 0xdcc   : > { %v3248_v62 = vmul.f32 %v3233_v28, %v7719_v15 }
 0xdce   : > { %v8689_v52 = vsub.f32 %v8596_v46, %v3248_v62 }
 0xdd0   : > { %v3262_v56 = vmul.f32 %v8689_v52, %v8689_v52 }
 0xdd2   : > { %v3273_v58 = vsel %vm1154_vm6, %v3262_v56, 0.0 }
 0xdd3   : > { %3274 = vadd.xlane.f32.xlu1 %v3273_v58 }
 0xde5   : > { %v3236_v18 = vpop.xlane.xlu1 %3235 }
 0xde6   : > { %v3249_v39 = vmul.f32 %v3236_v18, %v7719_v15 }
 0xde8   : > { %v8696_v20 = vsub.f32 %v8630_v5, %v3249_v39 }
 0xdea   : > { %v3263_v34 = vmul.f32 %v8696_v20, %v8696_v20 }
 0xdec   : > { %v3276_v57 = vsel %vm1154_vm6, %v3263_v34, 0.0 }
 0xded   : > { %v3239_v17 = vpop.xlane.xlu2 %3238  ;;  %3277 = vadd.xlane.f32.xlu2 %v3276_v57 }
 0xdee   : > { %v3250_v22 = vmul.f32 %v3239_v17, %v7719_v15 }
 0xdf0   : > { %v8703_v35 = vsub.f32 %v8641_v7, %v3250_v22 }
 0xdf2   : > { %v3264_v48 = vmul.f32 %v8703_v35, %v8703_v35 }
 0xdf4   : > { %v3279_v40 = vsel %vm1154_vm6, %v3264_v48, 0.0 }
 0xdf5   : > { %3280 = vadd.xlane.f32.xlu0 %v3279_v40  ;;  %v3242_v61 = vpop.xlane.xlu0 %3241 }
 0xdf6   : > { %v3251_v45 = vmul.f32 %v3242_v61, %v7719_v15 }
 0xdf8   : > { %v8710_v1 = vsub.f32 %v8646_v2, %v3251_v45 }
 0xdfa   : > { %v3265_v59 = vmul.f32 %v8710_v1, %v8710_v1 }
 0xdfc   : > { %v3282_v63 = vsel %vm1154_vm6, %v3265_v59, 0.0 }
 0xdfd   : > { %3283 = vadd.xlane.f32.xlu1 %v3282_v63  ;;  %v3245_v55 = vpop.xlane.xlu2 %3244 }
 0xdfe   : > { %v3252_v43 = vmul.f32 %v3245_v55, %v7719_v15 }
 0xe00   : > { %v8717_v3 = vsub.f32 %v8651_v49, %v3252_v43 }
 0xe02   : > { %v3266_v33 = vmul.f32 %v8717_v3, %v8717_v3 }
 0xe04   : > { %v3285_v31 = vsel %vm1154_vm6, %v3266_v33, 0.0 }
 0xe05   : > { %3286 = vadd.xlane.f32.xlu2 %v3285_v31 }
 0xe29   : > { %v3269_v13 = vpop.xlane.xlu1 %3268 }
 0xe2a   : > { %v3288_v32 = vmul.f32 %v3269_v13, %v7719_v15 }
 0xe2c   : > { %v3295_v0 = vadd.f32 1e-05, %v3288_v32 }
 0xe2e   : > { %7022 = vrsqrt.f32 %v3295_v0  ;;  %vm3308_vm1 = vweird.f32 %v3295_v0 }
 0xe31   : > { %v3272_v14 = vpop.xlane.xlu0 %3271 }
 0xe32   : > { %v3289_v37 = vmul.f32 %v3272_v14, %v7719_v15 }
 0xe34   : > { %v7023_v38 = vpop.eup %7022  ;;  %v3296_v19 = vadd.f32 1e-05, %v3289_v37 }
 0xe35   : > { %v3303_v30 = vmul.f32 %v7023_v38, %v3295_v0  ;;  %vm3309_vm0 = vweird.f32 %v7023_v38 }
 0xe36   : > { %7024 = vrsqrt.f32 %v3296_v19  ;;  %vm3310_vm2 = vmor %vm3308_vm1, %vm3309_vm0  ;;  %vm3318_vm4 = vweird.f32 %v3296_v19 }
 0xe37   : > { %v3304_v24 = vmul.f32 %v7023_v38, %v3303_v30 }
 0xe39   : > { %v3305_v4 = vmul.f32 0.5, %v3304_v24 }
 0xe3b   : > { %v3306_v12 = vsub.f32 1.5, %v3305_v4 }
 0xe3c   : > { %v7025_v36 = vpop.eup %7024 }
 0xe3d   : > { %v3307_v41 = vmul.f32 %v7023_v38, %v3306_v12  ;;  %v3313_v60 = vmul.f32 %v7025_v36, %v3296_v19  ;;  %vm3319_vm3 = vweird.f32 %v7025_v36 }
 0xe3e   : > { %vm3320_vm5 = vmor %vm3318_vm4, %vm3319_vm3 }
 0xe3f   : > { %v3311_v21 = vsel %vm3310_vm2, %v7023_v38, %v3307_v41  ;;  %v3314_v16 = vmul.f32 %v7025_v36, %v3313_v60  ;;  %v6554_v60 = vld [vmem:[%s10256_s16 + $0x178] sm:$0xff] }
 0xe40   : > { %v3372_v28 = vmul.f32 %v3311_v21, %v8675_v25  ;;  %v6553_v21 = vld [vmem:[%s10256_s16 + $0x170] sm:$0xff]  ;;  %3497 = vmatpush.msra.mxu2 %v6554_v60 }
 0xe41   : > { %v3315_v62 = vmul.f32 0.5, %v3314_v16 }
 0xe42   : > { %v3382_v56 = vmul.f32 %v8739_v27, %v3372_v28  ;;  %3498 = vmatpush.msra.mxu2 %v6553_v21 }
 0xe43   : > { %v3316_v58 = vsub.f32 1.5, %v3315_v62 }
 0xe44   : > { %v3392_v18 = vadd.f32 %v8744_v8, %v3382_v56  ;;  %v6552_v56 = vld [vmem:[%s10256_s16 + $0x168] sm:$0xff] }
 0xe45   : > { %v3317_v39 = vmul.f32 %v7025_v36, %v3316_v58  ;;  %3499 = vmatpush.msra.mxu2 %v6552_v56 }
 0xe46   : > { %6532 = vmatmul.msk.f32.vlgmr.msra.gmra.mxu3 %vm1154_vm6, %v3392_v18  ;;  %v3275_v34 = vpop.xlane.xlu1 %3274 }
 0xe47   : > { %v3321_v57 = vsel %vm3320_vm5, %v7025_v36, %v3317_v39  ;;  %v3290_v17 = vmul.f32 %v3275_v34, %v7719_v15 }
 0xe48   : > { %v3373_v22 = vmul.f32 %v3321_v57, %v8682_v44  ;;  %v6551_v57 = vld [vmem:[%s10256_s16 + $0x160] sm:$0xff] }
 0xe49   : > { %v3297_v48 = vadd.f32 1e-05, %v3290_v17  ;;  %3500 = vmatpush.msra.mxu2 %v6551_v57 }
 0xe4a   : > { %v3383_v25 = vmul.f32 %v8739_v27, %v3373_v22 }
 0xe4b   : > { %7026 = vrsqrt.f32 %v3297_v48  ;;  %vm3328_vm9 = vweird.f32 %v3297_v48 }
 0xe4c   : > { %v3393_v40 = vadd.f32 %v8744_v8, %v3383_v25  ;;  %v6550_v25 = vld [vmem:[%s10256_s16 + $0x158] sm:$0xff] }
 0xe4d   : > { %3501 = vmatpush.msra.mxu2 %v6550_v25 }
 0xe4e   : > { %6533 = vmatmul.msk.f32.gmra.mxu3 %vm1154_vm6, %v3393_v40 }
 0xe51   : > { %v7027_v61 = vpop.eup %7026 }
 0xe52   : > { %v3323_v45 = vmul.f32 %v7027_v61, %v3297_v48  ;;  %vm3329_vm8 = vweird.f32 %v7027_v61 }
 0xe53   : > { %vm3330_vm10 = vmor %vm3328_vm9, %vm3329_vm8 }
 0xe54   : > { %v3324_v59 = vmul.f32 %v7027_v61, %v3323_v45  ;;  %v6549_v45 = vld [vmem:[%s10256_s16 + $0x150] sm:$0xff] }
 0xe55   : > { %3502 = vmatpush.msra.mxu2 %v6549_v45 }
 0xe56   : > { %v3325_v63 = vmul.f32 0.5, %v3324_v59 }
 0xe58   : > { %v3326_v55 = vsub.f32 1.5, %v3325_v63 }
 0xe5a   : > { %v3327_v43 = vmul.f32 %v7027_v61, %v3326_v55 }
 0xe5c   : > { %v3331_v33 = vsel %vm3330_vm10, %v7027_v61, %v3327_v43  ;;  %v6548_v43 = vld [vmem:[%s10256_s16 + $0x148] sm:$0xff] }
 0xe5d   : > { %v3374_v44 = vmul.f32 %v3331_v33, %v8689_v52  ;;  %3503 = vmatpush.msra.mxu2 %v6548_v43 }
 0xe5f   : > { %v3384_v31 = vmul.f32 %v8739_v27, %v3374_v44 }
 0xe60   : > { %v3278_v51 = vpop.xlane.xlu2 %3277 }
 0xe61   : > { %v3291_v23 = vmul.f32 %v3278_v51, %v7719_v15  ;;  %v3394_v54 = vadd.f32 %v8744_v8, %v3384_v31  ;;  %v6547_v31 = vld [vmem:[%s10256_s16 + $0x140] sm:$0xff] }
 0xe62   : > { %3504 = vmatpush.msra.mxu2 %v6547_v31 }
 0xe63   : > { %v3298_v10 = vadd.f32 1e-05, %v3291_v23  ;;  %6534 = vmatmul.msk.f32.gmra.mxu3 %vm1154_vm6, %v3394_v54 }
 0xe65   : > { %7028 = vrsqrt.f32 %v3298_v10  ;;  %vm3338_vm12 = vweird.f32 %v3298_v10 }
 0xe68   : > { %v3281_v13 = vpop.xlane.xlu0 %3280 }
 0xe69   : > { %v3292_v32 = vmul.f32 %v3281_v13, %v7719_v15 }
 0xe6b   : > { %v7029_v0 = vpop.eup %7028  ;;  %v3299_v14 = vadd.f32 1e-05, %v3292_v32  ;;  %v6545_v32 = vld [vmem:[%s10256_s16 + $0x130] sm:$0xff] }
 0xe6c   : > { %v3333_v37 = vmul.f32 %v7029_v0, %v3298_v10  ;;  %vm3339_vm11 = vweird.f32 %v7029_v0 }
 0xe6d   : > { %7030 = vrsqrt.f32 %v3299_v14  ;;  %vm3340_vm13 = vmor %vm3338_vm12, %vm3339_vm11  ;;  %vm3348_vm15 = vweird.f32 %v3299_v14 }
 0xe6e   : > { %v3334_v38 = vmul.f32 %v7029_v0, %v3333_v37 }
 0xe70   : > { %v3335_v52 = vmul.f32 0.5, %v3334_v38  ;;  %v3284_v19 = vpop.xlane.xlu1 %3283  ;;  %v6544_v38 = vld [vmem:[%s10256_s16 + $0x128] sm:$0xff] }
 0xe71   : > { %v3293_v30 = vmul.f32 %v3284_v19, %v7719_v15 }
 0xe72   : > { %v3336_v24 = vsub.f32 1.5, %v3335_v52 }
 0xe73   : > { %v7031_v4 = vpop.eup %7030  ;;  %v3300_v12 = vadd.f32 1e-05, %v3293_v30  ;;  %v6543_v30 = vld [vmem:[%s10256_s16 + $0x120] sm:$0xff] }
 0xe74   : > { %v3337_v36 = vmul.f32 %v7029_v0, %v3336_v24  ;;  %v3343_v41 = vmul.f32 %v7031_v4, %v3299_v14  ;;  %vm3349_vm14 = vweird.f32 %v7031_v4 }
 0xe75   : > { %7032 = vrsqrt.f32 %v3300_v12  ;;  %vm3350_vm0 = vmor %vm3348_vm15, %vm3349_vm14  ;;  %vm3358_vm2 = vweird.f32 %v3300_v12 }
 0xe76   : > { %v3341_v16 = vsel %vm3340_vm13, %v7029_v0, %v3337_v36  ;;  %v3344_v28 = vmul.f32 %v7031_v4, %v3343_v41 }
 0xe77   : > { %v3375_v62 = vmul.f32 %v3341_v16, %v8696_v20  ;;  %v6541_v16 = vld [vmem:[%s10256_s16 + $0x110] sm:$0xff] }
 0xe78   : > { %v3345_v58 = vmul.f32 0.5, %v3344_v28  ;;  %v3287_v18 = vpop.xlane.xlu2 %3286  ;;  %v6540_v28 = vld [vmem:[%s10256_s16 + $0x108] sm:$0xff] }
 0xe79   : > { %v3294_v39 = vmul.f32 %v3287_v18, %v7719_v15  ;;  %v3385_v34 = vmul.f32 %v8739_v27, %v3375_v62  ;;  %v6539_v62 = vld [vmem:[%s10256_s16 + $0x100] sm:$0xff] }
 0xe7a   : > { %v3346_v17 = vsub.f32 1.5, %v3345_v58 }
 0xe7b   : > { %v7033_v22 = vpop.eup %7032  ;;  %v3301_v20 = vadd.f32 1e-05, %v3294_v39  ;;  %v3395_v48 = vadd.f32 %v8744_v8, %v3385_v34 }
 0xe7c   : > { %v3347_v40 = vmul.f32 %v7031_v4, %v3346_v17  ;;  %v3353_v61 = vmul.f32 %v7033_v22, %v3300_v12  ;;  %vm3359_vm1 = vweird.f32 %v7033_v22 }
 0xe7d   : > { %7034 = vrsqrt.f32 %v3301_v20  ;;  %6535 = vmatmul.msk.f32.gmra.mxu3 %vm1154_vm6, %v3395_v48  ;;  %vm3360_vm3 = vmor %vm3358_vm2, %vm3359_vm1  ;;  %vm3368_vm5 = vweird.f32 %v3301_v20 }
 0xe7e   : > { %v3351_v59 = vsel %vm3350_vm0, %v7031_v4, %v3347_v40  ;;  %v3354_v63 = vmul.f32 %v7033_v22, %v3353_v61 }
 0xe7f   : > { %v3376_v55 = vmul.f32 %v3351_v59, %v8703_v35  ;;  %v6546_v35 = vld [vmem:[%s10256_s16 + $0x138] sm:$0xff] }
 0xe80   : > { %v3355_v33 = vmul.f32 0.5, %v3354_v63  ;;  %3505 = vmatpush.msra.mxu2 %v6546_v35 }
 0xe81   : > { %v3386_v44 = vmul.f32 %v8739_v27, %v3376_v55 }
 0xe82   : > { %v3356_v51 = vsub.f32 1.5, %v3355_v33  ;;  %3506 = vmatpush.msra.mxu2 %v6545_v32 }
 0xe83   : > { %v7035_v23 = vpop.eup %7034  ;;  %v3396_v54 = vadd.f32 %v8744_v8, %v3386_v44  ;;  %v6874_v44 = vld [vmem:[%s10257_s17 + $0x2] ss:$0 sm:$0xff] }
 0xe84   : > { %v3357_v10 = vmul.f32 %v7033_v22, %v3356_v51  ;;  %v3363_v13 = vmul.f32 %v7035_v23, %v3301_v20  ;;  %vm3369_vm4 = vweird.f32 %v7035_v23  ;;  %3507 = vmatpush.msra.mxu2 %v6544_v38 }
 0xe85   : > { %6536 = vmatmul.msk.f32.gmra.mxu3 %vm1154_vm6, %v3396_v54  ;;  %vm3370_vm8 = vmor %vm3368_vm5, %vm3369_vm4 }
 0xe86   : > { %v3361_v0 = vsel %vm3360_vm3, %v7033_v22, %v3357_v10  ;;  %v3364_v14 = vmul.f32 %v7035_v23, %v3363_v13  ;;  %3508 = vmatpush.msra.mxu2 %v6543_v30 }
 0xe87   : > { %v3377_v37 = vmul.f32 %v3361_v0, %v8710_v1  ;;  %v6542_v1 = vld [vmem:[%s10256_s16 + $0x118] sm:$0xff] }
 0xe88   : > { %v3365_v52 = vmul.f32 0.5, %v3364_v14  ;;  %3509 = vmatpush.msra.mxu2 %v6542_v1 }
 0xe89   : > { %v3387_v19 = vmul.f32 %v8739_v27, %v3377_v37 }
 0xe8a   : > { %v3366_v24 = vsub.f32 1.5, %v3365_v52  ;;  %3510 = vmatpush.msra.mxu2 %v6541_v16 }
 0xe8b   : > { %v3397_v4 = vadd.f32 %v8744_v8, %v3387_v19 }
 0xe8c   : > { %v3367_v12 = vmul.f32 %v7035_v23, %v3366_v24  ;;  %3511 = vmatpush.msra.mxu2 %v6540_v28 }
 0xe8d   : > { %6537 = vmatmul.msk.f32.gmra.mxu3 %vm1154_vm6, %v3397_v4 }
 0xe8e   : > { %v3371_v36 = vsel %vm3370_vm8, %v7035_v23, %v3367_v12  ;;  %3512 = vmatpush.msra.mxu2 %v6539_v62 }
 0xe8f   : > { %v3378_v41 = vmul.f32 %v3371_v36, %v8717_v3  ;;  %v6873_v3 = vld [vmem:[%s10255_s15 + $0x2] ss:$0 sm:$0xff] }
 0xe91   : > { %v3388_v60 = vmul.f32 %v8739_v27, %v3378_v41 }
 0xe93   : > { %v3398_v21 = vadd.f32 %v8744_v8, %v3388_v60 }
 0xe95   : > { %6538 = vmatmul.msk.f32.gmra.mxu3 %vm1154_vm6, %v3398_v21 }
 0xec9   : > { %v3447_v27 = vpop.f32.mrf.mxu3 }
 0xeca   : > { %v3448_v8 = vadd.f32 %v6873_v3, %v3447_v27 }
 0xecc   : > { %v3468_v56 = vmax.f32 %v3448_v8, 0.0 }
 0xece   : > { %3513 = vmatmul.f32.vlgmr.msra.gmra.mxu2 %v3468_v56 }
 0xed1   : > { %v3450_v58 = vpop.f32.mrf.mxu3 }
 0xed2   : > { %v3451_v18 = vadd.f32 %v6873_v3, %v3450_v58 }
 0xed4   : > { %v3469_v39 = vmax.f32 %v3451_v18, 0.0 }
 0xed6   : > { %3516 = vmatmul.f32.gmra.mxu2 %v3469_v39 }
 0xee6   : > { %v3453_v34 = vpop.f32.mrf.mxu3 }
 0xee7   : > { %v3454_v57 = vadd.f32 %v6873_v3, %v3453_v34 }
 0xee9   : > { %v3470_v17 = vmax.f32 %v3454_v57, 0.0 }
 0xeeb   : > { %3519 = vmatmul.f32.gmra.mxu2 %v3470_v17 }
 0xf00   : > { %v3456_v22 = vpop.f32.mrf.mxu3 }
 0xf01   : > { %v3457_v20 = vadd.f32 %v6873_v3, %v3456_v22 }
 0xf03   : > { %v3471_v48 = vmax.f32 %v3457_v20, 0.0 }
 0xf05   : > { %3522 = vmatmul.f32.gmra.mxu2 %v3471_v48 }
 0xf08   : > { %v3459_v25 = vpop.f32.mrf.mxu3 }
 0xf09   : > { %v3460_v40 = vadd.f32 %v6873_v3, %v3459_v25 }
 0xf0b   : > { %v3472_v61 = vmax.f32 %v3460_v40, 0.0 }
 0xf0d   : > { %3525 = vmatmul.f32.gmra.mxu2 %v3472_v61 }
 0xf10   : > { %v3462_v45 = vpop.f32.mrf.mxu3 }
 0xf11   : > { %v3463_v59 = vadd.f32 %v6873_v3, %v3462_v45 }
 0xf13   : > { %v3473_v63 = vmax.f32 %v3463_v59, 0.0 }
 0xf15   : > { %3528 = vmatmul.f32.gmra.mxu2 %v3473_v63 }
 0xf18   : > { %v3465_v55 = vpop.f32.mrf.mxu3 }
 0xf19   : > { %v3466_v43 = vadd.f32 %v6873_v3, %v3465_v55 }
 0xf1b   : > { %v3474_v33 = vmax.f32 %v3466_v43, 0.0 }
 0xf1d   : > { %3531 = vmatmul.f32.gmra.mxu2 %v3474_v33 }
 0xf51   : > { %v3514_v31 = vpop.f32.mrf.mxu2 }
 0xf52   : > { %v3515_v51 = vadd.f32 %v6874_v44, %v3514_v31 }
 0xf54   : > { %v8834_v23 = vadd.f32 %v3515_v51, %v8585_v47 }
 0xf56   : > { %v3546_v54 = vsel %vm1154_vm6, %v8834_v23, 0.0 }
 0xf57   : > { %3547 = vadd.xlane.f32.xlu0 %v3546_v54 }
 0xf59   : > { %v3517_v35 = vpop.f32.mrf.mxu2 }
 0xf5a   : > { %v3518_v10 = vadd.f32 %v6874_v44, %v3517_v35 }
 0xf5c   : > { %v8839_v13 = vadd.f32 %v3518_v10, %v8590_v11 }
 0xf5e   : > { %v3549_v32 = vsel %vm1154_vm6, %v8839_v13, 0.0 }
 0xf5f   : > { %3550 = vadd.xlane.f32.xlu1 %v3549_v32 }
 0xf6e   : > { %v3520_v0 = vpop.f32.mrf.mxu2 }
 0xf6f   : > { %v3521_v14 = vadd.f32 %v6874_v44, %v3520_v0 }
 0xf71   : > { %v8844_v37 = vadd.f32 %v3521_v14, %v8596_v46  ;;  %v6561_v14 = vld [vmem:[%s10252_s12 + $0x78] sm:$0xff] }
 0xf72   : > { %3763 = vmatpush.msra.mxu1 %v6561_v14 }
 0xf73   : > { %v3552_v47 = vsel %vm1154_vm6, %v8844_v37, 0.0 }
 0xf74   : > { %3553 = vadd.xlane.f32.xlu2 %v3552_v47  ;;  %v6560_v47 = vld [vmem:[%s10252_s12 + $0x70] sm:$0xff] }
 0xf75   : > { %3764 = vmatpush.msra.mxu1 %v6560_v47 }
 0xf88   : > { %v3523_v38 = vpop.f32.mrf.mxu2 }
 0xf89   : > { %v3524_v52 = vadd.f32 %v6874_v44, %v3523_v38  ;;  %v6559_v38 = vld [vmem:[%s10252_s12 + $0x68] sm:$0xff] }
 0xf8a   : > { %3765 = vmatpush.msra.mxu1 %v6559_v38 }
 0xf8b   : > { %v8849_v19 = vadd.f32 %v3524_v52, %v8630_v5  ;;  %v6558_v52 = vld [vmem:[%s10252_s12 + $0x60] sm:$0xff] }
 0xf8c   : > { %3766 = vmatpush.msra.mxu1 %v6558_v52 }
 0xf8d   : > { %v3555_v11 = vsel %vm1154_vm6, %v8849_v19, 0.0 }
 0xf8e   : > { %3556 = vadd.xlane.f32.xlu0 %v3555_v11 }
 0xf90   : > { %v3526_v30 = vpop.f32.mrf.mxu2 }
 0xf91   : > { %v3527_v24 = vadd.f32 %v6874_v44, %v3526_v30 }
 0xf93   : > { %v8854_v4 = vadd.f32 %v3527_v24, %v8641_v7 }
 0xf95   : > { %v3558_v46 = vsel %vm1154_vm6, %v8854_v4, 0.0 }
 0xf96   : > { %3559 = vadd.xlane.f32.xlu1 %v3558_v46 }
 0xf98   : > { %v3529_v1 = vpop.f32.mrf.mxu2 }
 0xf99   : > { %v3530_v12 = vadd.f32 %v6874_v44, %v3529_v1 }
 0xf9b   : > { %v8859_v36 = vadd.f32 %v3530_v12, %v8646_v2 }
 0xf9d   : > { %v3561_v5 = vsel %vm1154_vm6, %v8859_v36, 0.0 }
 0xf9e   : > { %3562 = vadd.xlane.f32.xlu2 %v3561_v5 }
 0xfa0   : > { %v3532_v41 = vpop.f32.mrf.mxu2 }
 0xfa1   : > { %v3533_v60 = vadd.f32 %v6874_v44, %v3532_v41 }
 0xfa3   : > { %v8864_v21 = vadd.f32 %v3533_v60, %v8651_v49 }
 0xfa5   : > { %v3564_v7 = vsel %vm1154_vm6, %v8864_v21, 0.0 }
 0xfa6   : > { %3565 = vadd.xlane.f32.xlu1 %v3564_v7 }
 0xfca   : > { %v3548_v16 = vpop.xlane.xlu0 %3547 }
 0xfcb   : > { %v3567_v28 = vmul.f32 %v3548_v16, %v7719_v15 }
 0xfcd   : > { %v8870_v62 = vsub.f32 %v8834_v23, %v3567_v28 }
 0xfcf   : > { %v3581_v2 = vmul.f32 %v8870_v62, %v8870_v62 }
 0xfd1   : > { %v3588_v3 = vsel %vm1154_vm6, %v3581_v2, 0.0 }
 0xfd2   : > { %v3551_v27 = vpop.xlane.xlu1 %3550  ;;  %3589 = vadd.xlane.f32.xlu0 %v3588_v3 }
 0xfd3   : > { %v3568_v49 = vmul.f32 %v3551_v27, %v7719_v15  ;;  %v8934_v27 = vld [vmem:[%s10258_s18 + $0x3] ss:$0 sm:$0xff] }
 0xfd5   : > { %v8877_v8 = vsub.f32 %v8839_v13, %v3568_v49 }
 0xfd7   : > { %v3582_v56 = vmul.f32 %v8877_v8, %v8877_v8 }
 0xfd9   : > { %v3591_v58 = vsel %vm1154_vm6, %v3582_v56, 0.0 }
 0xfda   : > { %3592 = vadd.xlane.f32.xlu2 %v3591_v58  ;;  %v8939_v58 = vld [vmem:[%s10259_s19 + $0x3] ss:$0 sm:$0xff] }
 0xfe7   : > { %v3554_v18 = vpop.xlane.xlu2 %3553 }
 0xfe8   : > { %v3569_v39 = vmul.f32 %v3554_v18, %v7719_v15 }
 0xfea   : > { %v8884_v34 = vsub.f32 %v8844_v37, %v3569_v39 }
 0xfec   : > { %v3583_v57 = vmul.f32 %v8884_v34, %v8884_v34 }
 0xfee   : > { %v3594_v17 = vsel %vm1154_vm6, %v3583_v57, 0.0 }
 0xfef   : > { %3595 = vadd.xlane.f32.xlu0 %v3594_v17 }
0x1001   : > { %v3557_v22 = vpop.xlane.xlu0 %3556 }
0x1002   : > { %v3570_v20 = vmul.f32 %v3557_v22, %v7719_v15 }
0x1004   : > { %v8891_v48 = vsub.f32 %v8849_v19, %v3570_v20 }
0x1006   : > { %v3584_v25 = vmul.f32 %v8891_v48, %v8891_v48 }
0x1008   : > { %v3597_v40 = vsel %vm1154_vm6, %v3584_v25, 0.0 }
0x1009   : > { %v3560_v61 = vpop.xlane.xlu1 %3559  ;;  %3598 = vadd.xlane.f32.xlu1 %v3597_v40 }
0x100a   : > { %v3571_v45 = vmul.f32 %v3560_v61, %v7719_v15 }
0x100c   : > { %v8898_v59 = vsub.f32 %v8854_v4, %v3571_v45 }
0x100e   : > { %v3585_v63 = vmul.f32 %v8898_v59, %v8898_v59 }
0x1010   : > { %v3600_v55 = vsel %vm1154_vm6, %v3585_v63, 0.0 }
0x1011   : > { %3601 = vadd.xlane.f32.xlu2 %v3600_v55  ;;  %v3563_v43 = vpop.xlane.xlu2 %3562 }
0x1012   : > { %v3572_v33 = vmul.f32 %v3563_v43, %v7719_v15 }
0x1014   : > { %v8905_v44 = vsub.f32 %v8859_v36, %v3572_v33 }
0x1016   : > { %v3586_v31 = vmul.f32 %v8905_v44, %v8905_v44 }
0x1018   : > { %v3603_v51 = vsel %vm1154_vm6, %v3586_v31, 0.0 }
0x1019   : > { %v3566_v54 = vpop.xlane.xlu1 %3565  ;;  %3604 = vadd.xlane.f32.xlu0 %v3603_v51 }
0x101a   : > { %v3573_v35 = vmul.f32 %v3566_v54, %v7719_v15 }
0x101c   : > { %v8912_v10 = vsub.f32 %v8864_v21, %v3573_v35 }
0x101e   : > { %v3587_v32 = vmul.f32 %v8912_v10, %v8912_v10 }
0x1020   : > { %v3606_v0 = vsel %vm1154_vm6, %v3587_v32, 0.0 }
0x1021   : > { %3607 = vadd.xlane.f32.xlu1 %v3606_v0 }
0x1045   : > { %v3590_v11 = vpop.xlane.xlu0 %3589 }
0x1046   : > { %v3609_v30 = vmul.f32 %v3590_v11, %v7719_v15 }
0x1048   : > { %v3616_v24 = vadd.f32 1e-05, %v3609_v30 }
0x104a   : > { %7036 = vrsqrt.f32 %v3616_v24  ;;  %vm3629_vm10 = vweird.f32 %v3616_v24 }
0x104d   : > { %v3593_v46 = vpop.xlane.xlu2 %3592 }
0x104e   : > { %v3610_v1 = vmul.f32 %v3593_v46, %v7719_v15 }
0x1050   : > { %v7037_v12 = vpop.eup %7036  ;;  %v3617_v5 = vadd.f32 1e-05, %v3610_v1 }
0x1051   : > { %v3624_v41 = vmul.f32 %v7037_v12, %v3616_v24  ;;  %vm3630_vm9 = vweird.f32 %v7037_v12 }
0x1052   : > { %7038 = vrsqrt.f32 %v3617_v5  ;;  %vm3631_vm11 = vmor %vm3629_vm10, %vm3630_vm9  ;;  %vm3639_vm13 = vweird.f32 %v3617_v5 }
0x1053   : > { %v3625_v60 = vmul.f32 %v7037_v12, %v3624_v41 }
0x1055   : > { %v3626_v7 = vmul.f32 0.5, %v3625_v60 }
0x1057   : > { %v3627_v16 = vsub.f32 1.5, %v3626_v7 }
0x1058   : > { %v7039_v28 = vpop.eup %7038 }
0x1059   : > { %v3628_v2 = vmul.f32 %v7037_v12, %v3627_v16  ;;  %v3634_v3 = vmul.f32 %v7039_v28, %v3617_v5  ;;  %vm3640_vm12 = vweird.f32 %v7039_v28 }
0x105a   : > { %vm3641_vm14 = vmor %vm3639_vm13, %vm3640_vm12 }
0x105b   : > { %v3632_v49 = vsel %vm3631_vm11, %v7037_v12, %v3628_v2  ;;  %v3635_v56 = vmul.f32 %v7039_v28, %v3634_v3 }
0x105c   : > { %v3693_v18 = vmul.f32 %v3632_v49, %v8870_v62 }
0x105d   : > { %v3636_v39 = vmul.f32 0.5, %v3635_v56 }
0x105e   : > { %v3703_v57 = vmul.f32 %v8934_v27, %v3693_v18 }
0x105f   : > { %v3637_v17 = vsub.f32 1.5, %v3636_v39 }
0x1060   : > { %v3713_v22 = vadd.f32 %v8939_v58, %v3703_v57 }
0x1061   : > { %v3638_v20 = vmul.f32 %v7039_v28, %v3637_v17 }
0x1062   : > { %6563 = vmatmul.msk.f32.vlgmr.msra.gmra.mxu1 %vm1154_vm6, %v3713_v22  ;;  %v3596_v25 = vpop.xlane.xlu0 %3595 }
0x1063   : > { %v3642_v40 = vsel %vm3641_vm14, %v7039_v28, %v3638_v20  ;;  %v3611_v61 = vmul.f32 %v3596_v25, %v7719_v15 }
0x1064   : > { %v3694_v45 = vmul.f32 %v3642_v40, %v8877_v8 }
0x1065   : > { %v3618_v63 = vadd.f32 1e-05, %v3611_v61 }
0x1066   : > { %v3704_v62 = vmul.f32 %v8934_v27, %v3694_v45 }
0x1067   : > { %7040 = vrsqrt.f32 %v3618_v63  ;;  %vm3649_vm0 = vweird.f32 %v3618_v63 }
0x1068   : > { %v3714_v55 = vadd.f32 %v8939_v58, %v3704_v62 }
0x106a   : > { %6564 = vmatmul.msk.f32.gmra.mxu1 %vm1154_vm6, %v3714_v55 }
0x106d   : > { %v7041_v43 = vpop.eup %7040 }
0x106e   : > { %v3644_v33 = vmul.f32 %v7041_v43, %v3618_v63  ;;  %vm3650_vm15 = vweird.f32 %v7041_v43 }
0x106f   : > { %vm3651_vm1 = vmor %vm3649_vm0, %vm3650_vm15 }
0x1070   : > { %v3645_v31 = vmul.f32 %v7041_v43, %v3644_v33 }
0x1072   : > { %v3646_v51 = vmul.f32 0.5, %v3645_v31 }
0x1074   : > { %v3647_v54 = vsub.f32 1.5, %v3646_v51 }
0x1076   : > { %v3648_v35 = vmul.f32 %v7041_v43, %v3647_v54 }
0x1078   : > { %v3652_v32 = vsel %vm3651_vm1, %v7041_v43, %v3648_v35 }
0x1079   : > { %v3695_v8 = vmul.f32 %v3652_v32, %v8884_v34 }
0x107b   : > { %v3705_v0 = vmul.f32 %v8934_v27, %v3695_v8 }
0x107c   : > { %v3599_v14 = vpop.xlane.xlu1 %3598 }
0x107d   : > { %v3612_v47 = vmul.f32 %v3599_v14, %v7719_v15  ;;  %v3715_v38 = vadd.f32 %v8939_v58, %v3705_v0 }
0x107f   : > { %v3619_v52 = vadd.f32 1e-05, %v3612_v47  ;;  %6565 = vmatmul.msk.f32.gmra.mxu1 %vm1154_vm6, %v3715_v38 }
0x1081   : > { %7042 = vrsqrt.f32 %v3619_v52  ;;  %vm3659_vm3 = vweird.f32 %v3619_v52 }
0x1084   : > { %v3602_v11 = vpop.xlane.xlu2 %3601 }
0x1085   : > { %v3613_v30 = vmul.f32 %v3602_v11, %v7719_v15 }
0x1087   : > { %v7043_v24 = vpop.eup %7042  ;;  %v3620_v46 = vadd.f32 1e-05, %v3613_v30 }
0x1088   : > { %v3654_v1 = vmul.f32 %v7043_v24, %v3619_v52  ;;  %vm3660_vm2 = vweird.f32 %v7043_v24 }
0x1089   : > { %7044 = vrsqrt.f32 %v3620_v46  ;;  %vm3661_vm4 = vmor %vm3659_vm3, %vm3660_vm2  ;;  %vm3669_vm8 = vweird.f32 %v3620_v46 }
0x108a   : > { %v3655_v12 = vmul.f32 %v7043_v24, %v3654_v1 }
0x108c   : > { %v3656_v34 = vmul.f32 0.5, %v3655_v12  ;;  %v3605_v5 = vpop.xlane.xlu0 %3604 }
0x108d   : > { %v3614_v41 = vmul.f32 %v3605_v5, %v7719_v15  ;;  %v6877_v5 = vld [vmem:[%s10253_s13 + $0x3] ss:$0 sm:$0xff] }
0x108e   : > { %v3657_v60 = vsub.f32 1.5, %v3656_v34 }
0x108f   : > { %v7045_v7 = vpop.eup %7044  ;;  %v3621_v16 = vadd.f32 1e-05, %v3614_v41 }
0x1090   : > { %v3658_v28 = vmul.f32 %v7043_v24, %v3657_v60  ;;  %v3664_v2 = vmul.f32 %v7045_v7, %v3620_v46  ;;  %vm3670_vm5 = vweird.f32 %v7045_v7 }
0x1091   : > { %7046 = vrsqrt.f32 %v3621_v16  ;;  %vm3671_vm9 = vmor %vm3669_vm8, %vm3670_vm5  ;;  %vm3679_vm11 = vweird.f32 %v3621_v16 }
0x1092   : > { %v3662_v3 = vsel %vm3661_vm4, %v7043_v24, %v3658_v28  ;;  %v3665_v49 = vmul.f32 %v7045_v7, %v3664_v2 }
0x1093   : > { %v3696_v56 = vmul.f32 %v3662_v3, %v8891_v48 }
0x1094   : > { %v3666_v18 = vmul.f32 0.5, %v3665_v49  ;;  %v3608_v39 = vpop.xlane.xlu1 %3607 }
0x1095   : > { %v3615_v57 = vmul.f32 %v3608_v39, %v7719_v15  ;;  %v3706_v17 = vmul.f32 %v8934_v27, %v3696_v56 }
0x1096   : > { %v3667_v22 = vsub.f32 1.5, %v3666_v18 }
0x1097   : > { %v7047_v20 = vpop.eup %7046  ;;  %v3622_v25 = vadd.f32 1e-05, %v3615_v57  ;;  %v3716_v40 = vadd.f32 %v8939_v58, %v3706_v17 }
0x1098   : > { %v3668_v61 = vmul.f32 %v7045_v7, %v3667_v22  ;;  %v3674_v45 = vmul.f32 %v7047_v20, %v3621_v16  ;;  %vm3680_vm10 = vweird.f32 %v7047_v20 }
0x1099   : > { %7048 = vrsqrt.f32 %v3622_v25  ;;  %6566 = vmatmul.msk.f32.gmra.mxu1 %vm1154_vm6, %v3716_v40  ;;  %vm3681_vm12 = vmor %vm3679_vm11, %vm3680_vm10  ;;  %vm3689_vm14 = vweird.f32 %v3622_v25  ;;  %v7211_v40 = vld [vmem:[%s10293_s27] sm:$0xff] }
0x109a   : > { %v3672_v48 = vsel %vm3671_vm9, %v7045_v7, %v3668_v61  ;;  %v3675_v63 = vmul.f32 %v7047_v20, %v3674_v45 }
0x109b   : > { %v3697_v62 = vmul.f32 %v3672_v48, %v8898_v59 }
0x109c   : > { %v3676_v55 = vmul.f32 0.5, %v3675_v63 }
0x109d   : > { %v3707_v43 = vmul.f32 %v8934_v27, %v3697_v62  ;;  %v7212_v62 = vld [vmem:[%s10293_s27 + $0x8] sm:$0xff] }
0x109e   : > { %v3677_v33 = vsub.f32 1.5, %v3676_v55 }
0x109f   : > { %v7049_v31 = vpop.eup %7048  ;;  %v3717_v51 = vadd.f32 %v8939_v58, %v3707_v43 }
0x10a0   : > { %v3678_v54 = vmul.f32 %v7047_v20, %v3677_v33  ;;  %v3684_v35 = vmul.f32 %v7049_v31, %v3622_v25  ;;  %vm3690_vm13 = vweird.f32 %v7049_v31 }
0x10a1   : > { %6567 = vmatmul.msk.f32.gmra.mxu1 %vm1154_vm6, %v3717_v51  ;;  %vm3691_vm15 = vmor %vm3689_vm14, %vm3690_vm13  ;;  %v7213_v51 = vld [vmem:[%s10293_s27 + $0x10] sm:$0xff] }
0x10a2   : > { %v3682_v32 = vsel %vm3681_vm12, %v7047_v20, %v3678_v54  ;;  %v3685_v8 = vmul.f32 %v7049_v31, %v3684_v35 }
0x10a3   : > { %v3698_v0 = vmul.f32 %v3682_v32, %v8905_v44 }
0x10a4   : > { %v3686_v14 = vmul.f32 0.5, %v3685_v8 }
0x10a5   : > { %v3708_v59 = vmul.f32 %v8934_v27, %v3698_v0  ;;  %v7214_v0 = vld [vmem:[%s10293_s27 + $0x18] sm:$0xff] }
0x10a6   : > { %v3687_v47 = vsub.f32 1.5, %v3686_v14 }
0x10a7   : > { %v3718_v38 = vadd.f32 %v8939_v58, %v3708_v59 }
0x10a8   : > { %v3688_v52 = vmul.f32 %v7049_v31, %v3687_v47 }
0x10a9   : > { %6568 = vmatmul.msk.f32.gmra.mxu1 %vm1154_vm6, %v3718_v38 }
0x10aa   : > { %v3692_v11 = vsel %vm3691_vm15, %v7049_v31, %v3688_v52  ;;  %v7215_v52 = vld [vmem:[%s10293_s27 + $0x20] sm:$0xff] }
0x10ab   : > { %v3699_v30 = vmul.f32 %v3692_v11, %v8912_v10 }
0x10ad   : > { %v3709_v24 = vmul.f32 %v8934_v27, %v3699_v30 }
0x10af   : > { %v3719_v46 = vadd.f32 %v8939_v58, %v3709_v24 }
0x10b1   : > { %6569 = vmatmul.msk.f32.gmra.mxu1 %vm1154_vm6, %v3719_v46 }
0x10df   : > { %v3768_v44 = vpop.f32.mrf.mxu1 }
0x10e0   : > { %v8997_v2 = vadd.f32 %v6877_v5, %v3768_v44  ;;  %v7216_v44 = vld [vmem:[%s10293_s27 + $0x28] sm:$0xff] }
0x10e7   : > { %v3771_v1 = vpop.f32.mrf.mxu1 }
0x10e8   : > { %v8981_v27 = vadd.f32 %v6877_v5, %v3771_v1 }
0x10fc   : > { %v3774_v12 = vpop.f32.mrf.mxu1 }
0x10fd   : > { %v8999_v3 = vadd.f32 %v6877_v5, %v3774_v12 }
0x1116   : > { %v3777_v34 = vpop.f32.mrf.mxu1 }
0x1117   : > { %v8989_v16 = vadd.f32 %v6877_v5, %v3777_v34 }
0x111e   : > { %v3780_v41 = vpop.f32.mrf.mxu1 }
0x111f   : > { %v8977_v60 = vadd.f32 %v6877_v5, %v3780_v41  ;;  %v7217_v41 = vld [vmem:[%s10293_s27 + $0x30] sm:$0xff] }
0x1121   : > { %3804 = vrot.lane.b32.xlu1 %v8977_v60, %s7233_s6 }
0x1126   : > { %v3783_v10 = vpop.f32.mrf.mxu1 }
0x1127   : > { %v8983_v58 = vadd.f32 %v6877_v5, %v3783_v10 }
0x1129   : > { %3806 = vrot.lane.b32.xlu0 %v8983_v58, %s7233_s6  ;;  %3798 = vrot.lane.b32.xlu1 %v8981_v27, %s7233_s6 }
0x112e   : > { %v3786_v7 = vpop.f32.mrf.mxu1 }
0x112f   : > { %v8991_v28 = vadd.f32 %v6877_v5, %v3786_v7 }
0x1131   : > { %3808 = vrot.lane.b32.xlu2 %v8991_v28, %s7233_s6  ;;  %3802 = vrot.lane.b32.xlu0 %v8989_v16, %s7233_s6 }
0x1139   : > { %3800 = vrot.lane.b32.xlu2 %v8999_v3, %s7233_s6  ;;  %3796 = vrot.lane.b32.xlu0 %v8997_v2, %s7233_s6 }
0x118b   : > { %v3809_v49 = vpop.permute.xlu2 %3808 }
0x118c   : > { %6570 = vmatpush.xpose.msk.msrb.mxu0 %vm1154_vm6, %v3809_v49  ;;  %v6818_v49 = vpack.i.bf16 %v8989_v16, %v8977_v60 }
0x1193   : > { %v3805_v18 = vpop.permute.xlu1 %3804  ;;  %v3801_v57 = vpop.permute.xlu2 %3800 }
0x119b   : > { %v3807_v56 = vpop.permute.xlu0 %3806  ;;  %v3799_v17 = vpop.permute.xlu1 %3798 }
0x119c   : > { %6571 = vmatpush.xpose.msk.msrb.mxu0 %vm1154_vm6, %v3807_v56  ;;  %v6813_v56 = vpack.i.bf16 %v8983_v58, %v8991_v28 }
0x11a0   : > { %6572 = vmatpush.xpose.msk.msrb.mxu0 %vm1154_vm6, %v3805_v18 }
0x11a3   : > { %v3803_v39 = vpop.permute.xlu0 %3802 }
0x11a4   : > { %6573 = vmatpush.xpose.msk.msrb.mxu0 %vm1154_vm6, %v3803_v39 }
0x11a8   : > { %6574 = vmatpush.xpose.msk.msrb.mxu0 %vm1154_vm6, %v3801_v57 }
0x11ab   : > { %v3797_v22 = vpop.permute.xlu0 %3796 }
0x11ac   : > { %6575 = vmatpush.xpose.msk.msrb.mxu0 %vm1154_vm6, %v3799_v17 }
0x11b0   : > { %6576 = vmatpush.xpose.msk.msrb.mxu0 %vm1154_vm6, %v3797_v22 }
0x11b3   : > { %6577 = vmatmul.msk.f32.vlgmr.msrb.gmra.mxu0 %vm1154_vm6, %v8997_v2 }
0x11bb   : > { %6578 = vmatmul.msk.f32.gmra.mxu0 %vm1154_vm6, %v8981_v27 }
0x11c3   : > { %6579 = vmatmul.msk.f32.gmra.mxu0 %vm1154_vm6, %v8999_v3 }
0x11cb   : > { %6580 = vmatmul.msk.f32.gmra.mxu0 %vm1154_vm6, %v8989_v16 }
0x11d3   : > { %6581 = vmatmul.msk.f32.gmra.mxu0 %vm1154_vm6, %v8977_v60 }
0x11db   : > { %6582 = vmatmul.msk.f32.gmra.mxu0 %vm1154_vm6, %v8983_v58 }
0x11e3   : > { %6583 = vmatmul.msk.f32.gmra.mxu0 %vm1154_vm6, %v8991_v28 }
0x1230   : > { %v3855_v20 = vpop.f32.mrf.mxu0 }
0x1231   : > { %v3876_v25 = vmul.f32 0.17677669, %v3855_v20 }
0x1233   : > { %v3883_v61 = vadd.f32 %v7211_v40, %v3876_v25 }
0x1235   : > { %v3890_v45 = vsel %vm1315_vm7, %v3883_v61, -inf }
0x1236   : > { %3891 = vmax.xlane.f32.xlu2 %v3890_v45 }
0x1238   : > { %v3858_v48 = vpop.f32.mrf.mxu0 }
0x1239   : > { %v3877_v63 = vmul.f32 0.17677669, %v3858_v48 }
0x123b   : > { %v3884_v55 = vadd.f32 %v7212_v62, %v3877_v63 }
0x123d   : > { %v3893_v43 = vsel %vm1315_vm7, %v3884_v55, -inf }
0x123e   : > { %3894 = vmax.xlane.f32.xlu1 %v3893_v43  ;;  %v6823_v43 = vpack.i.bf16 %v8981_v27, %v8999_v3 }
0x1240   : > { %v3861_v33 = vpop.f32.mrf.mxu0 }
0x1241   : > { %v3878_v31 = vmul.f32 0.17677669, %v3861_v33 }
0x1243   : > { %v3885_v54 = vadd.f32 %v7213_v51, %v3878_v31 }
0x1245   : > { %v3896_v35 = vsel %vm1315_vm7, %v3885_v54, -inf }
0x1246   : > { %3897 = vmax.xlane.f32.xlu0 %v3896_v35 }
0x1248   : > { %v3864_v32 = vpop.f32.mrf.mxu0 }
0x1249   : > { %v3879_v8 = vmul.f32 0.17677669, %v3864_v32 }
0x124b   : > { %v9041_v14 = vadd.f32 %v7214_v0, %v3879_v8 }
0x124d   : > { %v3899_v59 = vsel %vm1315_vm7, %v9041_v14, -inf }
0x124e   : > { %3900 = vmax.xlane.f32.xlu2 %v3899_v59 }
0x1250   : > { %v3867_v47 = vpop.f32.mrf.mxu0 }
0x1251   : > { %v3880_v38 = vmul.f32 0.17677669, %v3867_v47 }
0x1253   : > { %v9048_v11 = vadd.f32 %v7215_v52, %v3880_v38 }
0x1255   : > { %v3902_v30 = vsel %vm1315_vm7, %v9048_v11, -inf }
0x1256   : > { %3903 = vmax.xlane.f32.xlu1 %v3902_v30 }
0x1258   : > { %v3870_v24 = vpop.f32.mrf.mxu0 }
0x1259   : > { %v3881_v46 = vmul.f32 0.17677669, %v3870_v24 }
0x125b   : > { %v3888_v1 = vadd.f32 %v7216_v44, %v3881_v46 }
0x125d   : > { %v3905_v12 = vsel %vm1315_vm7, %v3888_v1, -inf }
0x125e   : > { %3906 = vmax.xlane.f32.xlu0 %v3905_v12 }
0x1260   : > { %v3873_v34 = vpop.f32.mrf.mxu0 }
0x1261   : > { %v3882_v5 = vmul.f32 0.17677669, %v3873_v34 }
0x1263   : > { %v3889_v10 = vadd.f32 %v7217_v41, %v3882_v5 }
0x1265   : > { %v3908_v7 = vsel %vm1315_vm7, %v3889_v10, -inf }
0x1266   : > { %3909 = vmax.xlane.f32.xlu2 %v3908_v7 }
0x126f   : > { %6819 = vrot.lane.b32.xlu1 %v6818_v49, %s7234_s22 }
0x1272   : > { %6814 = vrot.lane.b32.xlu0 %v6813_v56, %s7234_s22 }
0x12a9   : > { %v3892_v18 = vpop.xlane.xlu2 %3891 }
0x12aa   : > { %v3911_v39 = vsub.f32 %v3883_v61, %v3892_v18 }
0x12ac   : > { %v3918_v57 = vmul.f32 1.442695, %v3911_v39 }
0x12ae   : > { %7050 = vpow2.f32 %v3918_v57 }
0x12b1   : > { %v3895_v17 = vpop.xlane.xlu1 %3894 }
0x12b2   : > { %v3912_v22 = vsub.f32 %v3884_v55, %v3895_v17 }
0x12b4   : > { %v9066_v20 = vpop.eup %7050  ;;  %v3920_v25 = vmul.f32 1.442695, %v3912_v22 }
0x12b5   : > { %v3932_v40 = vsel %vm1315_vm7, %v9066_v20, 0.0 }
0x12b6   : > { %7052 = vpow2.f32 %v3920_v25  ;;  %3933 = vadd.xlane.f32.xlu1 %v3932_v40 }
0x12b9   : > { %v3898_v60 = vpop.xlane.xlu0 %3897 }
0x12ba   : > { %v3913_v16 = vsub.f32 %v3885_v54, %v3898_v60 }
0x12bc   : > { %v9070_v45 = vpop.eup %7052  ;;  %v3922_v58 = vmul.f32 1.442695, %v3913_v16 }
0x12bd   : > { %v3935_v28 = vsel %vm1315_vm7, %v9070_v45, 0.0 }
0x12be   : > { %7054 = vpow2.f32 %v3922_v58  ;;  %3936 = vadd.xlane.f32.xlu2 %v3935_v28 }
0x12c1   : > { %v3901_v63 = vpop.xlane.xlu2 %3900 }
0x12c2   : > { %v3914_v46 = vsub.f32 %v9041_v14, %v3901_v63 }
0x12c4   : > { %v9074_v61 = vpop.eup %7054  ;;  %v3924_v44 = vmul.f32 1.442695, %v3914_v46 }
0x12c5   : > { %v3938_v48 = vsel %vm1315_vm7, %v9074_v61, 0.0 }
0x12c6   : > { %3939 = vadd.xlane.f32.xlu0 %v3938_v48 }
0x12c9   : > { %v3904_v8 = vpop.xlane.xlu1 %3903 }
0x12ca   : > { %v3915_v47 = vsub.f32 %v9048_v11, %v3904_v8 }
0x12cc   : > { %v3926_v30 = vmul.f32 1.442695, %v3915_v47 }
0x12cf   : > { %4058 = vrot.lane.b32.xlu1 %v8997_v2, %s7234_s22 }
0x12d1   : > { %v3907_v62 = vpop.xlane.xlu0 %3906 }
0x12d2   : > { %v3916_v55 = vsub.f32 %v3888_v1, %v3907_v62 }
0x12d4   : > { %v3928_v33 = vmul.f32 1.442695, %v3916_v55 }
0x12d6   : > { %7056 = vpow2.f32 %v3928_v33  ;;  %6824 = vrot.lane.b32.xlu2 %v6823_v43, %s7234_s22 }
0x12d9   : > { %v3910_v31 = vpop.xlane.xlu2 %3909 }
0x12da   : > { %v3917_v51 = vsub.f32 %v3889_v10, %v3910_v31 }
0x12dc   : > { %v9083_v54 = vpop.eup %7056  ;;  %v3930_v35 = vmul.f32 1.442695, %v3917_v51 }
0x12dd   : > { %v3947_v32 = vsel %vm1315_vm7, %v9083_v54, 0.0 }
0x12de   : > { %7058 = vpow2.f32 %v3930_v35  ;;  %3948 = vadd.xlane.f32.xlu0 %v3947_v32 }
0x12df   : > { %7060 = vpow2.f32 %v3926_v30 }
0x12e0   : > { %7062 = vpow2.f32 %v3924_v44 }
0x12e1   : > { %v6820_v3 = vpop.permute.xlu1 %6819 }
0x12e2   : > { %v6821_v52 = vunpack.i.l.bf16 %v6820_v3  ;;  %v6822_v24 = vunpack.i.h.bf16 %v6820_v3 }
0x12e4   : > { %v9087_v2 = vpop.eup %7058  ;;  %v6815_v0 = vpop.permute.xlu0 %6814 }
0x12e5   : > { %v6816_v59 = vunpack.i.l.bf16 %v6815_v0  ;;  %v3950_v27 = vsel %vm1315_vm7, %v9087_v2, 0.0  ;;  %v6817_v38 = vunpack.i.h.bf16 %v6815_v0  ;;  %v9093_v1 = vpop.eup %7060 }
0x12e6   : > { %3951 = vadd.xlane.f32.xlu0 %v3950_v27  ;;  %v3944_v12 = vsel %vm1315_vm7, %v9093_v1, 0.0  ;;  %v9097_v11 = vpop.eup %7062 }
0x12e7   : > { %4109 = vmatpush.msrb.mxu3 %v6816_v59  ;;  %v3941_v34 = vsel %vm1315_vm7, %v9097_v11, 0.0 }
0x12e9   : > { %4110 = vmatpush.msrb.mxu3 %v6817_v38 }
0x12eb   : > { %4111 = vmatpush.msrb.mxu3 %v6821_v52 }
0x12ed   : > { %4112 = vmatpush.msrb.mxu3 %v6822_v24 }
0x12f9   : > { %3945 = vadd.xlane.f32.xlu1 %v3944_v12 }
0x12ff   : > { %3942 = vadd.xlane.f32.xlu2 %v3941_v34 }
0x1329   : > { %v3934_v5 = vpop.xlane.xlu1 %3933 }
0x132a   : > { %7064 = vrcp.f32 %v3934_v5  ;;  %v3964_v39 = vand.u32 2147483648, %v3934_v5  ;;  %vm3958_vm1 = vweird.f32 %v3934_v5  ;;  %v3962_v57 = vand.u32 2147483647, %v3934_v5 }
0x132c   : > { %v3965_v16 = vor.u32 1.1754944e-38, %v3964_v39  ;;  %vm3963_vm3 = vcmp.eq.f32.partialorder %v3962_v57, 8.507059e+37 }
0x1330   : > { %v7065_v41 = vpop.eup %7064 }
0x1331   : > { %v3954_v14 = vmul.f32 %v7065_v41, %v3934_v5  ;;  %v3937_v10 = vpop.xlane.xlu2 %3936  ;;  %vm3959_vm0 = vweird.f32 %v7065_v41 }
0x1332   : > { %7066 = vrcp.f32 %v3937_v10  ;;  %vm3960_vm2 = vmor %vm3958_vm1, %vm3959_vm0  ;;  %v3979_v43 = vand.u32 2147483648, %v3937_v10  ;;  %vm3973_vm5 = vweird.f32 %v3937_v10  ;;  %v3977_v31 = vand.u32 2147483647, %v3937_v10 }
0x1333   : > { %v3955_v7 = vsub.f32 1.0, %v3954_v14 }
0x1334   : > { %v3980_v0 = vor.u32 1.1754944e-38, %v3979_v43  ;;  %vm3978_vm9 = vcmp.eq.f32.partialorder %v3977_v31, 8.507059e+37 }
0x1335   : > { %v3956_v49 = vmul.f32 %v7065_v41, %v3955_v7 }
0x1337   : > { %v3957_v56 = vadd.f32 %v7065_v41, %v3956_v49 }
0x1338   : > { %v7067_v18 = vpop.eup %7066 }
0x1339   : > { %v3969_v17 = vmul.f32 %v7067_v18, %v3937_v10  ;;  %v3940_v22 = vpop.xlane.xlu0 %3939  ;;  %v6825_v25 = vpop.permute.xlu2 %6824  ;;  %v3961_v40 = vsel %vm3960_vm2, %v7065_v41, %v3957_v56  ;;  %vm3974_vm4 = vweird.f32 %v7067_v18 }
0x133a   : > { %7068 = vrcp.f32 %v3940_v22  ;;  %v6826_v58 = vunpack.i.l.bf16 %v6825_v25  ;;  %v3966_v48 = vsel %vm3963_vm3, %v3965_v16, %v3961_v40  ;;  %v6827_v63 = vunpack.i.h.bf16 %v6825_v25  ;;  %vm3975_vm8 = vmor %vm3973_vm5, %vm3974_vm4 }
0x133b   : > { %v3970_v60 = vsub.f32 1.0, %v3969_v17  ;;  %v3967_v33 = vmul.f32 %v9066_v20, %v3966_v48  ;;  %v3994_v47 = vand.u32 2147483648, %v3940_v22  ;;  %vm3988_vm11 = vweird.f32 %v3940_v22 }
0x133c   : > { %4113 = vmatpush.msrb.mxu3 %v6826_v58  ;;  %v3992_v38 = vand.u32 2147483647, %v3940_v22 }
0x133d   : > { %v3971_v28 = vmul.f32 %v7067_v18, %v3970_v60  ;;  %v3995_v30 = vor.u32 1.1754944e-38, %v3994_v47 }
0x133e   : > { %4114 = vmatpush.msrb.mxu3 %v6827_v63  ;;  %vm3993_vm13 = vcmp.eq.f32.partialorder %v3992_v38, 8.507059e+37 }
0x133f   : > { %v3972_v62 = vadd.f32 %v7067_v18, %v3971_v28 }
0x1340   : > { %v7069_v55 = vpop.eup %7068 }
0x1341   : > { %v3984_v51 = vmul.f32 %v7069_v55, %v3940_v22  ;;  %v4059_v35 = vpop.permute.xlu1 %4058  ;;  %v3976_v8 = vsel %vm3975_vm8, %v7067_v18, %v3972_v62  ;;  %vm3989_vm10 = vweird.f32 %v7069_v55 }
0x1342   : > { %4115 = vmatpush.msrb.mxu3 %v4059_v35  ;;  %v3981_v27 = vsel %vm3978_vm9, %v3980_v0, %v3976_v8  ;;  %vm3990_vm12 = vmor %vm3988_vm11, %vm3989_vm10 }
0x1343   : > { %v3985_v32 = vsub.f32 1.0, %v3984_v51  ;;  %6584 = vmatmul.msk.f32.vlgmr.msrb.gmra.mxu3 %vm1315_vm7, %v3967_v33  ;;  %v3982_v20 = vmul.f32 %v9070_v45, %v3981_v27 }
0x1345   : > { %v3986_v59 = vmul.f32 %v7069_v55, %v3985_v32 }
0x1347   : > { %v3987_v3 = vadd.f32 %v7069_v55, %v3986_v59 }
0x1349   : > { %v3991_v52 = vsel %vm3990_vm12, %v7069_v55, %v3987_v3 }
0x134a   : > { %v3996_v24 = vsel %vm3993_vm13, %v3995_v30, %v3991_v52 }
0x134b   : > { %6585 = vmatmul.msk.f32.gmra.mxu3 %vm1315_vm7, %v3982_v20  ;;  %v3997_v46 = vmul.f32 %v9074_v61, %v3996_v24 }
0x1351   : > { %v3949_v12 = vpop.xlane.xlu0 %3948 }
0x1352   : > { %v4039_v8 = vand.u32 2147483648, %v3949_v12  ;;  %vm4033_vm9 = vweird.f32 %v3949_v12  ;;  %v4037_v0 = vand.u32 2147483647, %v3949_v12 }
0x1353   : > { %6586 = vmatmul.msk.f32.gmra.mxu3 %vm1315_vm7, %v3997_v46 }
0x1354   : > { %v4040_v3 = vor.u32 1.1754944e-38, %v4039_v8  ;;  %vm4038_vm11 = vcmp.eq.f32.partialorder %v4037_v0, 8.507059e+37 }
0x1359   : > { %v3952_v10 = vpop.xlane.xlu0 %3951 }
0x135a   : > { %v4054_v20 = vand.u32 2147483648, %v3952_v10  ;;  %vm4048_vm13 = vweird.f32 %v3952_v10  ;;  %v4052_v52 = vand.u32 2147483647, %v3952_v10 }
0x136c   : > { %v3946_v44 = vpop.xlane.xlu1 %3945 }
0x136d   : > { %7070 = vrcp.f32 %v3946_v44  ;;  %v4024_v28 = vand.u32 2147483648, %v3946_v44  ;;  %vm4018_vm3 = vweird.f32 %v3946_v44  ;;  %v4022_v63 = vand.u32 2147483647, %v3946_v44 }
0x136f   : > { %v4025_v31 = vor.u32 1.1754944e-38, %v4024_v28  ;;  %vm4023_vm5 = vcmp.eq.f32.partialorder %v4022_v63, 8.507059e+37 }
0x1372   : > { %v3943_v34 = vpop.xlane.xlu2 %3942 }
0x1373   : > { %v7071_v5 = vpop.eup %7070  ;;  %7072 = vrcp.f32 %v3943_v34  ;;  %v4009_v39 = vand.u32 2147483648, %v3943_v34  ;;  %v4007_v17 = vand.u32 2147483647, %v3943_v34  ;;  %vm4003_vm15 = vweird.f32 %v3943_v34 }
0x1374   : > { %7074 = vrcp.f32 %v3949_v12  ;;  %v4014_v41 = vmul.f32 %v7071_v5, %v3946_v44  ;;  %vm4019_vm1 = vweird.f32 %v7071_v5 }
0x1375   : > { %7076 = vrcp.f32 %v3952_v10  ;;  %v4010_v40 = vor.u32 1.1754944e-38, %v4009_v39  ;;  %vm4008_vm2 = vcmp.eq.f32.partialorder %v4007_v17, 8.507059e+37  ;;  %vm4020_vm4 = vmor %vm4018_vm3, %vm4019_vm1 }
0x1376   : > { %v4015_v7 = vsub.f32 1.0, %v4014_v41 }
0x1378   : > { %v4016_v61 = vmul.f32 %v7071_v5, %v4015_v7 }
0x1379   : > { %v7073_v45 = vpop.eup %7072 }
0x137a   : > { %v7075_v14 = vpop.eup %7074  ;;  %v3999_v49 = vmul.f32 %v7073_v45, %v3943_v34  ;;  %vm4004_vm14 = vweird.f32 %v7073_v45  ;;  %v4017_v60 = vadd.f32 %v7071_v5, %v4016_v61 }
0x137b   : > { %v4029_v18 = vmul.f32 %v7075_v14, %v3949_v12  ;;  %vm4005_vm0 = vmor %vm4003_vm15, %vm4004_vm14  ;;  %v7077_v58 = vpop.eup %7076  ;;  %vm4034_vm8 = vweird.f32 %v7075_v14  ;;  %vm4053_vm15 = vcmp.eq.f32.partialorder %v4052_v52, 8.507059e+37 }
0x137c   : > { %v4000_v56 = vsub.f32 1.0, %v3999_v49  ;;  %v4044_v43 = vmul.f32 %v7077_v58, %v3952_v10  ;;  %v4021_v33 = vsel %vm4020_vm4, %v7071_v5, %v4017_v60  ;;  %vm4035_vm10 = vmor %vm4033_vm9, %vm4034_vm8  ;;  %vm4049_vm12 = vweird.f32 %v7077_v58 }
0x137d   : > { %v4030_v25 = vsub.f32 1.0, %v4029_v18  ;;  %v4026_v51 = vsel %vm4023_vm5, %v4025_v31, %v4021_v33  ;;  %vm4050_vm14 = vmor %vm4048_vm13, %vm4049_vm12 }
0x137e   : > { %v4001_v57 = vmul.f32 %v7073_v45, %v4000_v56  ;;  %v4045_v32 = vsub.f32 1.0, %v4044_v43  ;;  %v4027_v59 = vmul.f32 %v9093_v1, %v4026_v51  ;;  %v4055_v1 = vor.u32 1.1754944e-38, %v4054_v20 }
0x137f   : > { %v4031_v55 = vmul.f32 %v7075_v14, %v4030_v25 }
0x1380   : > { %v4002_v22 = vadd.f32 %v7073_v45, %v4001_v57  ;;  %v4046_v27 = vmul.f32 %v7077_v58, %v4045_v32 }
0x1381   : > { %v4032_v35 = vadd.f32 %v7075_v14, %v4031_v55 }
0x1382   : > { %v4006_v16 = vsel %vm4005_vm0, %v7073_v45, %v4002_v22  ;;  %v4047_v38 = vadd.f32 %v7077_v58, %v4046_v27 }
0x1383   : > { %v4011_v48 = vsel %vm4008_vm2, %v4010_v40, %v4006_v16 }
0x1384   : > { %v4012_v62 = vmul.f32 %v9097_v11, %v4011_v48  ;;  %v4036_v11 = vsel %vm4035_vm10, %v7075_v14, %v4032_v35  ;;  %v4051_v24 = vsel %vm4050_vm14, %v7077_v58, %v4047_v38 }
0x1385   : > { %v4041_v47 = vsel %vm4038_vm11, %v4040_v3, %v4036_v11  ;;  %v4056_v46 = vsel %vm4053_vm15, %v4055_v1, %v4051_v24 }
0x1386   : > { %6587 = vmatmul.msk.f32.gmra.mxu3 %vm1315_vm7, %v4012_v62  ;;  %v4042_v30 = vmul.f32 %v9083_v54, %v4041_v47  ;;  %v4057_v44 = vmul.f32 %v9087_v2, %v4056_v46 }
0x138e   : > { %6588 = vmatmul.msk.f32.gmra.mxu3 %vm1315_vm7, %v4027_v59 }
0x1396   : > { %6589 = vmatmul.msk.f32.gmra.mxu3 %vm1315_vm7, %v4042_v30 }
0x139e   : > { %6590 = vmatmul.msk.f32.gmra.mxu3 %vm1315_vm7, %v4057_v44 }
0x13c6   : > { %v4117_v12 = vpop.f32.mrf.mxu3 }
0x13c7   : > { %v9116_v34 = vadd.f32 %v4117_v12, %v8834_v23  ;;  %v6596_v12 = vld [vmem:[%s10254_s14 + $0x78] sm:$0xff] }
0x13c8   : > { %4366 = vmatpush.msrb.mxu2 %v6596_v12 }
0x13c9   : > { %v4149_v5 = vsel %vm1154_vm6, %v9116_v34, 0.0 }
0x13ca   : > { %4150 = vadd.xlane.f32.xlu2 %v4149_v5  ;;  %v6595_v5 = vld [vmem:[%s10254_s14 + $0x70] sm:$0xff] }
0x13cb   : > { %4367 = vmatpush.msrb.mxu2 %v6595_v5 }
0x13ce   : > { %v4120_v54 = vpop.f32.mrf.mxu3 }
0x13cf   : > { %v9121_v41 = vadd.f32 %v4120_v54, %v8839_v13  ;;  %v6594_v54 = vld [vmem:[%s10254_s14 + $0x68] sm:$0xff] }
0x13d0   : > { %4368 = vmatpush.msrb.mxu2 %v6594_v54 }
0x13d1   : > { %v4152_v45 = vsel %vm1154_vm6, %v9121_v41, 0.0 }
0x13d2   : > { %4153 = vadd.xlane.f32.xlu0 %v4152_v45  ;;  %v6593_v45 = vld [vmem:[%s10254_s14 + $0x60] sm:$0xff] }
0x13d3   : > { %4369 = vmatpush.msrb.mxu2 %v6593_v45 }
0x13d6   : > { %v4123_v14 = vpop.f32.mrf.mxu3 }
0x13d7   : > { %v9126_v2 = vadd.f32 %v4123_v14, %v8844_v37 }
0x13d9   : > { %v4155_v23 = vsel %vm1154_vm6, %v9126_v2, 0.0 }
0x13da   : > { %4156 = vadd.xlane.f32.xlu1 %v4155_v23 }
0x1409   : > { %v4126_v10 = vpop.f32.mrf.mxu3 }
0x140a   : > { %v9131_v7 = vadd.f32 %v4126_v10, %v8849_v19 }
0x140c   : > { %v4158_v13 = vsel %vm1154_vm6, %v9131_v7, 0.0 }
0x140d   : > { %4159 = vadd.xlane.f32.xlu2 %v4158_v13 }
0x1411   : > { %v4129_v49 = vpop.f32.mrf.mxu3 }
0x1412   : > { %v9136_v56 = vadd.f32 %v4129_v49, %v8854_v4 }
0x1414   : > { %v4161_v37 = vsel %vm1154_vm6, %v9136_v56, 0.0 }
0x1415   : > { %4162 = vadd.xlane.f32.xlu0 %v4161_v37 }
0x1419   : > { %v4132_v18 = vpop.f32.mrf.mxu3 }
0x141a   : > { %v9141_v39 = vadd.f32 %v4132_v18, %v8859_v36 }
0x141c   : > { %v4164_v19 = vsel %vm1154_vm6, %v9141_v39, 0.0 }
0x141d   : > { %4165 = vadd.xlane.f32.xlu1 %v4164_v19 }
0x1421   : > { %v4135_v61 = vpop.f32.mrf.mxu3 }
0x1422   : > { %v9146_v57 = vadd.f32 %v4135_v61, %v8864_v21 }
0x1424   : > { %v4167_v4 = vsel %vm1154_vm6, %v9146_v57, 0.0 }
0x1425   : > { %4168 = vadd.xlane.f32.xlu0 %v4167_v4 }
0x143d   : > { %v4151_v17 = vpop.xlane.xlu2 %4150 }
0x143e   : > { %v4170_v22 = vmul.f32 %v4151_v17, %v7719_v15 }
0x1440   : > { %v9152_v25 = vsub.f32 %v9116_v34, %v4170_v22 }
0x1442   : > { %v4184_v36 = vmul.f32 %v9152_v25, %v9152_v25 }
0x1444   : > { %v4191_v40 = vsel %vm1154_vm6, %v4184_v36, 0.0 }
0x1445   : > { %v4154_v60 = vpop.xlane.xlu0 %4153  ;;  %4192 = vadd.xlane.f32.xlu2 %v4191_v40 }
0x1446   : > { %v4171_v21 = vmul.f32 %v4154_v60, %v7719_v15 }
0x1448   : > { %v9159_v16 = vsub.f32 %v9121_v41, %v4171_v21 }
0x144a   : > { %v4185_v58 = vmul.f32 %v9159_v16, %v9159_v16 }
0x144c   : > { %v4194_v28 = vsel %vm1154_vm6, %v4185_v58, 0.0 }
0x144d   : > { %v4157_v48 = vpop.xlane.xlu1 %4156  ;;  %4195 = vadd.xlane.f32.xlu1 %v4194_v28  ;;  %v9217_v28 = vld [vmem:[%s10260_s20 + $0x3] ss:$0 sm:$0xff] }
0x144e   : > { %v4172_v63 = vmul.f32 %v4157_v48, %v7719_v15 }
0x1450   : > { %v9166_v62 = vsub.f32 %v9126_v2, %v4172_v63 }
0x1452   : > { %v4186_v55 = vmul.f32 %v9166_v62, %v9166_v62 }
0x1454   : > { %v4197_v43 = vsel %vm1154_vm6, %v4186_v55, 0.0  ;;  %v9222_v55 = vld [vmem:[%s10261_s21 + $0x3] ss:$0 sm:$0xff] }
0x1455   : > { %4198 = vadd.xlane.f32.xlu2 %v4197_v43 }
0x1480   : > { %v4160_v33 = vpop.xlane.xlu2 %4159 }
0x1481   : > { %v4173_v31 = vmul.f32 %v4160_v33, %v7719_v15 }
0x1483   : > { %v9173_v51 = vsub.f32 %v9131_v7, %v4173_v31 }
0x1485   : > { %v4187_v35 = vmul.f32 %v9173_v51, %v9173_v51 }
0x1487   : > { %v4200_v32 = vsel %vm1154_vm6, %v4187_v35, 0.0 }
0x1488   : > { %v4163_v8 = vpop.xlane.xlu0 %4162  ;;  %4201 = vadd.xlane.f32.xlu0 %v4200_v32 }
0x1489   : > { %v4174_v0 = vmul.f32 %v4163_v8, %v7719_v15 }
0x148b   : > { %v9180_v59 = vsub.f32 %v9136_v56, %v4174_v0 }
0x148d   : > { %v4188_v27 = vmul.f32 %v9180_v59, %v9180_v59 }
0x148f   : > { %v4203_v11 = vsel %vm1154_vm6, %v4188_v27, 0.0 }
0x1490   : > { %4204 = vadd.xlane.f32.xlu1 %v4203_v11  ;;  %v4166_v3 = vpop.xlane.xlu1 %4165 }
0x1491   : > { %v4175_v47 = vmul.f32 %v4166_v3, %v7719_v15 }
0x1493   : > { %v9187_v38 = vsub.f32 %v9141_v39, %v4175_v47 }
0x1495   : > { %v4189_v20 = vmul.f32 %v9187_v38, %v9187_v38 }
0x1497   : > { %v4206_v52 = vsel %vm1154_vm6, %v4189_v20, 0.0 }
0x1498   : > { %4207 = vadd.xlane.f32.xlu2 %v4206_v52  ;;  %v4169_v30 = vpop.xlane.xlu0 %4168 }
0x1499   : > { %v4176_v24 = vmul.f32 %v4169_v30, %v7719_v15 }
0x149b   : > { %v9194_v1 = vsub.f32 %v9146_v57, %v4176_v24 }
0x149d   : > { %v4190_v46 = vmul.f32 %v9194_v1, %v9194_v1 }
0x149f   : > { %v4209_v44 = vsel %vm1154_vm6, %v4190_v46, 0.0 }
0x14a0   : > { %4210 = vadd.xlane.f32.xlu0 %v4209_v44 }
0x14b8   : > { %v4193_v14 = vpop.xlane.xlu2 %4192 }
0x14b9   : > { %v4212_v23 = vmul.f32 %v4193_v14, %v7719_v15 }
0x14bb   : > { %v4219_v10 = vadd.f32 1e-05, %v4212_v23 }
0x14bd   : > { %7078 = vrsqrt.f32 %v4219_v10  ;;  %vm4232_vm1 = vweird.f32 %v4219_v10 }
0x14c0   : > { %v4196_v13 = vpop.xlane.xlu1 %4195 }
0x14c1   : > { %v4213_v49 = vmul.f32 %v4196_v13, %v7719_v15 }
0x14c3   : > { %v7079_v37 = vpop.eup %7078  ;;  %v4220_v18 = vadd.f32 1e-05, %v4213_v49 }
0x14c4   : > { %v4227_v19 = vmul.f32 %v7079_v37, %v4219_v10  ;;  %vm4233_vm0 = vweird.f32 %v7079_v37 }
0x14c5   : > { %7080 = vrsqrt.f32 %v4220_v18  ;;  %vm4234_vm2 = vmor %vm4232_vm1, %vm4233_vm0  ;;  %vm4242_vm4 = vweird.f32 %v4220_v18 }
0x14c6   : > { %v4228_v61 = vmul.f32 %v7079_v37, %v4227_v19 }
0x14c8   : > { %v4229_v4 = vmul.f32 0.5, %v4228_v61  ;;  %v4199_v17 = vpop.xlane.xlu2 %4198 }
0x14c9   : > { %v4214_v22 = vmul.f32 %v4199_v17, %v7719_v15 }
0x14ca   : > { %v4230_v36 = vsub.f32 1.5, %v4229_v4 }
0x14cb   : > { %v7081_v40 = vpop.eup %7080  ;;  %v4221_v60 = vadd.f32 1e-05, %v4214_v22 }
0x14cc   : > { %v4231_v21 = vmul.f32 %v7079_v37, %v4230_v36  ;;  %v4237_v58 = vmul.f32 %v7081_v40, %v4220_v18  ;;  %vm4243_vm3 = vweird.f32 %v7081_v40 }
0x14cd   : > { %7082 = vrsqrt.f32 %v4221_v60  ;;  %vm4244_vm5 = vmor %vm4242_vm4, %vm4243_vm3  ;;  %vm4252_vm9 = vweird.f32 %v4221_v60 }
0x14ce   : > { %v4235_v48 = vsel %vm4234_vm2, %v7079_v37, %v4231_v21  ;;  %v4238_v63 = vmul.f32 %v7081_v40, %v4237_v58 }
0x14cf   : > { %v4296_v43 = vmul.f32 %v4235_v48, %v9152_v25 }
0x14d0   : > { %v4239_v33 = vmul.f32 0.5, %v4238_v63  ;;  %v6618_v63 = vld [vmem:[%s10256_s16 + $0x1e8] sm:$0xff] }
0x14d1   : > { %v4306_v31 = vmul.f32 %v9217_v28, %v4296_v43 }
0x14d2   : > { %v4240_v35 = vsub.f32 1.5, %v4239_v33 }
0x14d3   : > { %v7083_v32 = vpop.eup %7082  ;;  %v4316_v8 = vadd.f32 %v9222_v55, %v4306_v31 }
0x14d4   : > { %v4241_v0 = vmul.f32 %v7081_v40, %v4240_v35  ;;  %v4247_v27 = vmul.f32 %v7083_v32, %v4221_v60  ;;  %vm4253_vm8 = vweird.f32 %v7083_v32  ;;  %v6619_v60 = vld [vmem:[%s10256_s16 + $0x1f0] sm:$0xff] }
0x14d5   : > { %6598 = vmatmul.msk.f32.vlgmr.msrb.gmra.mxu2 %vm1154_vm6, %v4316_v8  ;;  %vm4254_vm10 = vmor %vm4252_vm9, %vm4253_vm8 }
0x14d6   : > { %v4245_v11 = vsel %vm4244_vm5, %v7081_v40, %v4241_v0  ;;  %v4248_v3 = vmul.f32 %v7083_v32, %v4247_v27  ;;  %v6620_v40 = vld [vmem:[%s10256_s16 + $0x1f8] sm:$0xff] }
0x14d7   : > { %v4297_v47 = vmul.f32 %v4245_v11, %v9159_v16  ;;  %4421 = vmatpush.msrb.mxu1 %v6620_v40  ;;  %v6616_v11 = vld [vmem:[%s10256_s16 + $0x1d8] sm:$0xff] }
0x14d8   : > { %v4249_v20 = vmul.f32 0.5, %v4248_v3 }
0x14d9   : > { %v4307_v25 = vmul.f32 %v9217_v28, %v4297_v47  ;;  %4422 = vmatpush.msrb.mxu1 %v6619_v60 }
0x14da   : > { %v4250_v52 = vsub.f32 1.5, %v4249_v20  ;;  %v6615_v20 = vld [vmem:[%s10256_s16 + $0x1d0] sm:$0xff] }
0x14db   : > { %v4317_v30 = vadd.f32 %v9222_v55, %v4307_v25  ;;  %4423 = vmatpush.msrb.mxu1 %v6618_v63 }
0x14dc   : > { %v4251_v24 = vmul.f32 %v7083_v32, %v4250_v52 }
0x14dd   : > { %6599 = vmatmul.msk.f32.gmra.mxu2 %vm1154_vm6, %v4317_v30 }
0x14de   : > { %v4255_v46 = vsel %vm4254_vm10, %v7083_v32, %v4251_v24  ;;  %v6617_v32 = vld [vmem:[%s10256_s16 + $0x1e0] sm:$0xff]  ;;  %v6614_v24 = vld [vmem:[%s10256_s16 + $0x1c8] sm:$0xff] }
0x14df   : > { %v4298_v44 = vmul.f32 %v4255_v46, %v9166_v62  ;;  %4424 = vmatpush.msrb.mxu1 %v6617_v32 }
0x14e1   : > { %v4308_v12 = vmul.f32 %v9217_v28, %v4298_v44  ;;  %4425 = vmatpush.msrb.mxu1 %v6616_v11 }
0x14e3   : > { %v4318_v5 = vadd.f32 %v9222_v55, %v4308_v12  ;;  %4426 = vmatpush.msrb.mxu1 %v6615_v20  ;;  %v6613_v12 = vld [vmem:[%s10256_s16 + $0x1c0] sm:$0xff] }
0x14e5   : > { %6600 = vmatmul.msk.f32.gmra.mxu2 %vm1154_vm6, %v4318_v5  ;;  %4427 = vmatpush.msrb.mxu1 %v6614_v24 }
0x14e7   : > { %4428 = vmatpush.msrb.mxu1 %v6613_v12  ;;  %v6624_v12 = vld [vmem:[%s10252_s12 + $0x90] sm:$0xff] }
0x14fb   : > { %v4202_v16 = vpop.xlane.xlu0 %4201 }
0x14fc   : > { %v4215_v54 = vmul.f32 %v4202_v16, %v7719_v15 }
0x14fe   : > { %v4222_v45 = vadd.f32 1e-05, %v4215_v54 }
0x1500   : > { %7084 = vrsqrt.f32 %v4222_v45  ;;  %vm4262_vm12 = vweird.f32 %v4222_v45 }
0x1503   : > { %v4205_v14 = vpop.xlane.xlu1 %4204 }
0x1504   : > { %v4216_v23 = vmul.f32 %v4205_v14, %v7719_v15 }
0x1506   : > { %v7085_v10 = vpop.eup %7084  ;;  %v4223_v13 = vadd.f32 1e-05, %v4216_v23  ;;  %v6611_v23 = vld [vmem:[%s10256_s16 + $0x1b0] sm:$0xff] }
0x1507   : > { %v4257_v49 = vmul.f32 %v7085_v10, %v4222_v45  ;;  %vm4263_vm11 = vweird.f32 %v7085_v10 }
0x1508   : > { %7086 = vrsqrt.f32 %v4223_v13  ;;  %vm4264_vm13 = vmor %vm4262_vm12, %vm4263_vm11  ;;  %vm4272_vm15 = vweird.f32 %v4223_v13 }
0x1509   : > { %v4258_v37 = vmul.f32 %v7085_v10, %v4257_v49 }
0x150b   : > { %v4259_v62 = vmul.f32 0.5, %v4258_v37  ;;  %v4208_v18 = vpop.xlane.xlu2 %4207  ;;  %v6610_v37 = vld [vmem:[%s10256_s16 + $0x1a8] sm:$0xff] }
0x150c   : > { %v4217_v19 = vmul.f32 %v4208_v18, %v7719_v15 }
0x150d   : > { %v4260_v61 = vsub.f32 1.5, %v4259_v62 }
0x150e   : > { %v7087_v4 = vpop.eup %7086  ;;  %v4224_v17 = vadd.f32 1e-05, %v4217_v19  ;;  %v6609_v19 = vld [vmem:[%s10256_s16 + $0x1a0] sm:$0xff] }
0x150f   : > { %v4261_v22 = vmul.f32 %v7085_v10, %v4260_v61  ;;  %v4267_v36 = vmul.f32 %v7087_v4, %v4223_v13  ;;  %vm4273_vm14 = vweird.f32 %v7087_v4 }
0x1510   : > { %7088 = vrsqrt.f32 %v4224_v17  ;;  %vm4274_vm0 = vmor %vm4272_vm15, %vm4273_vm14  ;;  %vm4282_vm2 = vweird.f32 %v4224_v17 }
0x1511   : > { %v4265_v21 = vsel %vm4264_vm13, %v7085_v10, %v4261_v22  ;;  %v4268_v58 = vmul.f32 %v7087_v4, %v4267_v36 }
0x1512   : > { %v4299_v48 = vmul.f32 %v4265_v21, %v9173_v51  ;;  %v6607_v21 = vld [vmem:[%s10256_s16 + $0x190] sm:$0xff] }
0x1513   : > { %v4269_v43 = vmul.f32 0.5, %v4268_v58  ;;  %v4211_v33 = vpop.xlane.xlu0 %4210  ;;  %v6606_v58 = vld [vmem:[%s10256_s16 + $0x188] sm:$0xff] }
0x1514   : > { %v4218_v31 = vmul.f32 %v4211_v33, %v7719_v15  ;;  %v4309_v35 = vmul.f32 %v9217_v28, %v4299_v48  ;;  %v6605_v48 = vld [vmem:[%s10256_s16 + $0x180] sm:$0xff] }
0x1515   : > { %v4270_v8 = vsub.f32 1.5, %v4269_v43 }
0x1516   : > { %v7089_v0 = vpop.eup %7088  ;;  %v4225_v51 = vadd.f32 1e-05, %v4218_v31  ;;  %v4319_v27 = vadd.f32 %v9222_v55, %v4309_v35 }
0x1517   : > { %v4271_v3 = vmul.f32 %v7087_v4, %v4270_v8  ;;  %v4277_v47 = vmul.f32 %v7089_v0, %v4224_v17  ;;  %vm4283_vm1 = vweird.f32 %v7089_v0 }
0x1518   : > { %7090 = vrsqrt.f32 %v4225_v51  ;;  %6601 = vmatmul.msk.f32.gmra.mxu2 %vm1154_vm6, %v4319_v27  ;;  %vm4284_vm3 = vmor %vm4282_vm2, %vm4283_vm1  ;;  %vm4292_vm5 = vweird.f32 %v4225_v51 }
0x1519   : > { %v4275_v25 = vsel %vm4274_vm0, %v7087_v4, %v4271_v3  ;;  %v4278_v52 = vmul.f32 %v7089_v0, %v4277_v47 }
0x151a   : > { %v4300_v30 = vmul.f32 %v4275_v25, %v9180_v59  ;;  %v6612_v59 = vld [vmem:[%s10256_s16 + $0x1b8] sm:$0xff] }
0x151b   : > { %v4279_v46 = vmul.f32 0.5, %v4278_v52  ;;  %4429 = vmatpush.msrb.mxu1 %v6612_v59 }
0x151c   : > { %v4310_v44 = vmul.f32 %v9217_v28, %v4300_v30 }
0x151d   : > { %v4280_v5 = vsub.f32 1.5, %v4279_v46  ;;  %4430 = vmatpush.msrb.mxu1 %v6611_v23 }
0x151e   : > { %v7091_v16 = vpop.eup %7090  ;;  %v4320_v54 = vadd.f32 %v9222_v55, %v4310_v44  ;;  %v6625_v44 = vld [vmem:[%s10252_s12 + $0x98] sm:$0xff] }
0x151f   : > { %v4281_v45 = vmul.f32 %v7089_v0, %v4280_v5  ;;  %v4287_v14 = vmul.f32 %v7091_v16, %v4225_v51  ;;  %vm4293_vm4 = vweird.f32 %v7091_v16  ;;  %4431 = vmatpush.msrb.mxu1 %v6610_v37  ;;  %4551 = vmatpush.msra.mxu0 %v6625_v44  ;;  %v6623_v5 = vld [vmem:[%s10252_s12 + $0x88] sm:$0xff] }
0x1520   : > { %6602 = vmatmul.msk.f32.gmra.mxu2 %vm1154_vm6, %v4320_v54  ;;  %vm4294_vm8 = vmor %vm4292_vm5, %vm4293_vm4  ;;  %v9322_v54 = vld [vmem:[%s10257_s17 + $0x3] ss:$0 sm:$0xff]  ;;  %v4471_v44 = vld [vmem:[%s9339_s29 + $0x28] sm:$0xff] }
0x1521   : > { %v4285_v10 = vsel %vm4284_vm3, %v7089_v0, %v4281_v45  ;;  %v4288_v13 = vmul.f32 %v7091_v16, %v4287_v14  ;;  %4432 = vmatpush.msrb.mxu1 %v6609_v19  ;;  %4552 = vmatpush.msra.mxu0 %v6624_v12 }
0x1522   : > { %v4301_v49 = vmul.f32 %v4285_v10, %v9187_v38  ;;  %v6608_v38 = vld [vmem:[%s10256_s16 + $0x198] sm:$0xff] }
0x1523   : > { %v4289_v62 = vmul.f32 0.5, %v4288_v13  ;;  %4433 = vmatpush.msrb.mxu1 %v6608_v38  ;;  %4553 = vmatpush.msra.mxu0 %v6623_v5 }
0x1524   : > { %v4311_v18 = vmul.f32 %v9217_v28, %v4301_v49 }
0x1525   : > { %v4290_v61 = vsub.f32 1.5, %v4289_v62  ;;  %4434 = vmatpush.msrb.mxu1 %v6607_v21  ;;  %v4466_v62 = vld [vmem:[%s9339_s29] sm:$0xff] }
0x1526   : > { %v4321_v4 = vadd.f32 %v9222_v55, %v4311_v18 }
0x1527   : > { %v4291_v17 = vmul.f32 %v7091_v16, %v4290_v61  ;;  %4435 = vmatpush.msrb.mxu1 %v6606_v58 }
0x1528   : > { %6603 = vmatmul.msk.f32.gmra.mxu2 %vm1154_vm6, %v4321_v4 }
0x1529   : > { %v4295_v22 = vsel %vm4294_vm8, %v7091_v16, %v4291_v17  ;;  %4436 = vmatpush.msrb.mxu1 %v6605_v48  ;;  %v6622_v16 = vld [vmem:[%s10252_s12 + $0x80] sm:$0xff] }
0x152a   : > { %v4302_v36 = vmul.f32 %v4295_v22, %v9194_v1  ;;  %v6880_v1 = vld [vmem:[%s10255_s15 + $0x3] ss:$0 sm:$0xff]  ;;  %4554 = vmatpush.msra.mxu0 %v6622_v16 }
0x152c   : > { %v4312_v40 = vmul.f32 %v9217_v28, %v4302_v36  ;;  %v4467_v36 = vld [vmem:[%s9339_s29 + $0x8] sm:$0xff] }
0x152e   : > { %v4322_v60 = vadd.f32 %v9222_v55, %v4312_v40 }
0x1530   : > { %6604 = vmatmul.msk.f32.gmra.mxu2 %vm1154_vm6, %v4322_v60 }
0x1558   : > { %v4371_v28 = vpop.f32.mrf.mxu2 }
0x1559   : > { %v4372_v55 = vadd.f32 %v6880_v1, %v4371_v28 }
0x155b   : > { %v4392_v63 = vmax.f32 %v4372_v55, 0.0 }
0x155d   : > { %4437 = vmatmul.f32.vlgmr.msrb.gmra.mxu1 %v4392_v63 }
0x1560   : > { %v4374_v43 = vpop.f32.mrf.mxu2 }
0x1561   : > { %v4375_v33 = vadd.f32 %v6880_v1, %v4374_v43 }
0x1563   : > { %v4393_v31 = vmax.f32 %v4375_v33, 0.0 }
0x1565   : > { %4440 = vmatmul.f32.gmra.mxu1 %v4393_v31 }
0x1568   : > { %v4377_v35 = vpop.f32.mrf.mxu2 }
0x1569   : > { %v4378_v32 = vadd.f32 %v6880_v1, %v4377_v35 }
0x156b   : > { %v4394_v8 = vmax.f32 %v4378_v32, 0.0  ;;  %v4469_v32 = vld [vmem:[%s9339_s29 + $0x18] sm:$0xff] }
0x156d   : > { %4443 = vmatmul.f32.gmra.mxu1 %v4394_v8 }
0x159b   : > { %v4380_v0 = vpop.f32.mrf.mxu2 }
0x159c   : > { %v4381_v51 = vadd.f32 %v6880_v1, %v4380_v0 }
0x159e   : > { %v4395_v27 = vmax.f32 %v4381_v51, 0.0 }
0x15a0   : > { %4446 = vmatmul.f32.gmra.mxu1 %v4395_v27 }
0x15a3   : > { %v4383_v11 = vpop.f32.mrf.mxu2 }
0x15a4   : > { %v4384_v3 = vadd.f32 %v6880_v1, %v4383_v11 }
0x15a6   : > { %v4396_v47 = vmax.f32 %v4384_v3, 0.0 }
0x15a8   : > { %4449 = vmatmul.f32.gmra.mxu1 %v4396_v47  ;;  %v4470_v47 = vld [vmem:[%s9339_s29 + $0x20] sm:$0xff] }
0x15ab   : > { %v4386_v20 = vpop.f32.mrf.mxu2 }
0x15ac   : > { %v4387_v25 = vadd.f32 %v6880_v1, %v4386_v20 }
0x15ae   : > { %v4397_v52 = vmax.f32 %v4387_v25, 0.0 }
0x15b0   : > { %4452 = vmatmul.f32.gmra.mxu1 %v4397_v52 }
0x15b3   : > { %v4389_v30 = vpop.f32.mrf.mxu2 }
0x15b4   : > { %v4390_v24 = vadd.f32 %v6880_v1, %v4389_v30 }
0x15b6   : > { %v4398_v46 = vmax.f32 %v4390_v24, 0.0 }
0x15b8   : > { %4455 = vmatmul.f32.gmra.mxu1 %v4398_v46 }
0x15da   : > { %v4438_v59 = vpop.f32.mrf.mxu1 }
0x15db   : > { %v4439_v45 = vadd.f32 %v9322_v54, %v4438_v59 }
0x15dd   : > { %v4459_v14 = vadd.f32 %v4439_v45, %v9116_v34 }
0x15df   : > { %v4473_v23 = vmul.f32 0.5, %v4459_v14  ;;  %6192 = vst.msk [vmem:[%s9329_s8] sm:$0xff] %vm1154_vm6, %v4459_v14 }
0x15e1   : > { %v4480_v10 = vmul.f32 1.442695, %v4473_v23 }
0x15e2   : > { %v4441_v13 = vpop.f32.mrf.mxu1 }
0x15e3   : > { %7092 = vpow2.f32 %v4480_v10  ;;  %v4442_v49 = vadd.f32 %v9322_v54, %v4441_v13 }
0x15e5   : > { %v4460_v37 = vadd.f32 %v4442_v49, %v9121_v41 }
0x15e7   : > { %v4474_v34 = vmul.f32 0.5, %v4460_v37  ;;  %6193 = vst.msk [vmem:[%s9329_s8 + $0x8] sm:$0xff] %vm1154_vm6, %v4460_v37 }
0x15e9   : > { %v7093_v18 = vpop.eup %7092  ;;  %v4482_v19 = vmul.f32 1.442695, %v4474_v34 }
0x15ea   : > { %v4494_v61 = vmul.f32 %v7093_v18, %v4466_v62  ;;  %v4444_v4 = vpop.f32.mrf.mxu1 }
0x15eb   : > { %7094 = vpow2.f32 %v4482_v19  ;;  %v4445_v38 = vadd.f32 %v9322_v54, %v4444_v4 }
0x15ec   : > { %v9347_v17 = vadd.f32 %v4494_v61, %v8612_v6  ;;  %v4468_v6 = vld [vmem:[%s9339_s29 + $0x10] sm:$0xff] }
0x15ed   : > { %v4461_v22 = vadd.f32 %v4445_v38, %v9126_v2 }
0x15ee   : > { %6627 = vmatmul.msk.f32.vlgmr.msra.gmra.mxu0 %vm1154_vm6, %v9347_v17 }
0x15ef   : > { %v4475_v41 = vmul.f32 0.5, %v4461_v22  ;;  %6194 = vst.msk [vmem:[%s9329_s8 + $0x10] sm:$0xff] %vm1154_vm6, %v4461_v22 }
0x15f1   : > { %v7095_v40 = vpop.eup %7094  ;;  %v4484_v60 = vmul.f32 1.442695, %v4475_v41 }
0x15f2   : > { %v4495_v21 = vmul.f32 %v7095_v40, %v4467_v36 }
0x15f3   : > { %7096 = vpow2.f32 %v4484_v60 }
0x15f4   : > { %v9356_v58 = vadd.f32 %v4495_v21, %v8618_v26 }
0x15f6   : > { %6628 = vmatmul.msk.f32.gmra.mxu0 %vm1154_vm6, %v9356_v58 }
0x15f9   : > { %v7097_v2 = vpop.eup %7096 }
0x15fa   : > { %v4496_v48 = vmul.f32 %v7097_v2, %v4468_v6  ;;  %v1139_v2 = vld [vmem:[%s10296_s3] sm:$0xff] }
0x15fc   : > { %v9362_v1 = vadd.f32 %v4496_v48, %v8624_v53 }
0x15fe   : > { %6629 = vmatmul.msk.f32.gmra.mxu0 %vm1154_vm6, %v9362_v1 }
0x161d   : > { %v4447_v28 = vpop.f32.mrf.mxu1 }
0x161e   : > { %v4448_v55 = vadd.f32 %v9322_v54, %v4447_v28 }
0x1620   : > { %v4462_v26 = vadd.f32 %v4448_v55, %v9131_v7 }
0x1622   : > { %v4476_v63 = vmul.f32 0.5, %v4462_v26  ;;  %6195 = vst.msk [vmem:[%s9329_s8 + $0x18] sm:$0xff] %vm1154_vm6, %v4462_v26 }
0x1624   : > { %v4486_v43 = vmul.f32 1.442695, %v4476_v63  ;;  %v1140_v63 = vld [vmem:[%s10296_s3 + $0x8] sm:$0xff] }
0x1625   : > { %v4450_v33 = vpop.f32.mrf.mxu1 }
0x1626   : > { %7098 = vpow2.f32 %v4486_v43  ;;  %v4451_v31 = vadd.f32 %v9322_v54, %v4450_v33 }
0x1628   : > { %v4463_v53 = vadd.f32 %v4451_v31, %v9136_v56 }
0x162a   : > { %v4477_v35 = vmul.f32 0.5, %v4463_v53  ;;  %6196 = vst.msk [vmem:[%s9329_s8 + $0x20] sm:$0xff] %vm1154_vm6, %v4463_v53 }
0x162c   : > { %v7099_v8 = vpop.eup %7098  ;;  %v4488_v0 = vmul.f32 1.442695, %v4477_v35  ;;  %v1141_v35 = vld [vmem:[%s10296_s3 + $0x10] sm:$0xff] }
0x162d   : > { %v4453_v51 = vpop.f32.mrf.mxu1  ;;  %v4497_v7 = vmul.f32 %v7099_v8, %v4469_v32 }
0x162e   : > { %7100 = vpow2.f32 %v4488_v0  ;;  %v4454_v27 = vadd.f32 %v9322_v54, %v4453_v51 }
0x162f   : > { %v9377_v11 = vadd.f32 %v4497_v7, %v8635_v29  ;;  %v1142_v7 = vld [vmem:[%s10296_s3 + $0x18] sm:$0xff] }
0x1630   : > { %v4464_v3 = vadd.f32 %v4454_v27, %v9141_v39 }
0x1631   : > { %6630 = vmatmul.msk.f32.gmra.mxu0 %vm1154_vm6, %v9377_v11 }
0x1632   : > { %v4478_v56 = vmul.f32 0.5, %v4464_v3  ;;  %6197 = vst.msk [vmem:[%s9329_s8 + $0x28] sm:$0xff] %vm1154_vm6, %v4464_v3 }
0x1634   : > { %v7101_v20 = vpop.eup %7100  ;;  %v4490_v25 = vmul.f32 1.442695, %v4478_v56 }
0x1635   : > { %v4456_v52 = vpop.f32.mrf.mxu1  ;;  %v4498_v30 = vmul.f32 %v7101_v20, %v4470_v47  ;;  %v1143_v20 = vld [vmem:[%s10296_s3 + $0x20] sm:$0xff] }
0x1636   : > { %7102 = vpow2.f32 %v4490_v25  ;;  %v4457_v29 = vadd.f32 %v9322_v54, %v4456_v52 }
0x1637   : > { %v9387_v24 = vadd.f32 %v4498_v30, %v8656_v9  ;;  %v4472_v9 = vld [vmem:[%s9339_s29 + $0x30] sm:$0xff] }
0x1638   : > { %v4465_v39 = vadd.f32 %v4457_v29, %v9146_v57 }
0x1639   : > { %6631 = vmatmul.msk.f32.gmra.mxu0 %vm1154_vm6, %v9387_v24 }
0x163a   : > { %v4479_v46 = vmul.f32 0.5, %v4465_v39  ;;  %6198 = vst.msk [vmem:[%s9329_s8 + $0x30] sm:$0xff] %vm1154_vm6, %v4465_v39  ;;  %v1144_v39 = vld [vmem:[%s10296_s3 + $0x28] sm:$0xff] }
0x163c   : > { %v7103_v12 = vpop.eup %7102  ;;  %v4492_v5 = vmul.f32 1.442695, %v4479_v46 }
0x163d   : > { %v4499_v16 = vmul.f32 %v7103_v12, %v4471_v44 }
0x163e   : > { %7104 = vpow2.f32 %v4492_v5 }
0x163f   : > { %v9396_v59 = vadd.f32 %v4499_v16, %v8662_v42  ;;  %v6882_v42 = vld [vmem:[%s10253_s13 + $0x4] ss:$0 sm:$0xff]  ;;  %v1145_v16 = vld [vmem:[%s10296_s3 + $0x30] sm:$0xff] }
0x1641   : > { %6632 = vmatmul.msk.f32.gmra.mxu0 %vm1154_vm6, %v9396_v59 }
0x1644   : > { %v7105_v54 = vpop.eup %7104 }
0x1645   : > { %v4500_v57 = vmul.f32 %v7105_v54, %v4472_v9 }
0x1647   : > { %v9402_v45 = vadd.f32 %v4500_v57, %v8668_v50 }
0x1649   : > { %6633 = vmatmul.msk.f32.gmra.mxu0 %vm1154_vm6, %v9402_v45 }
0x166b   : > { %v4556_v14 = vpop.f32.mrf.mxu0 }
0x166c   : > { %v9421_v19 = vadd.f32 %v6882_v42, %v4556_v14 }
0x1673   : > { %v4559_v23 = vpop.f32.mrf.mxu0 }
0x1674   : > { %v9423_v61 = vadd.f32 %v6882_v42, %v4559_v23 }
0x167b   : > { %v4562_v10 = vpop.f32.mrf.mxu0 }
0x167c   : > { %v9433_v38 = vadd.f32 %v6882_v42, %v4562_v10 }
0x16ae   : > { %v4565_v13 = vpop.f32.mrf.mxu0 }
0x16af   : > { %v9413_v50 = vadd.f32 %v6882_v42, %v4565_v13 }
0x16b6   : > { %v4568_v49 = vpop.f32.mrf.mxu0 }
0x16b7   : > { %v9409_v37 = vadd.f32 %v6882_v42, %v4568_v49 }
0x16b9   : > { %4592 = vrot.lane.b32.xlu0 %v9409_v37, %s7233_s6  ;;  %v6833_v23 = vpack.i.bf16 %v9413_v50, %v9409_v37 }
0x16be   : > { %v4571_v62 = vpop.f32.mrf.mxu0 }
0x16bf   : > { %v9415_v34 = vadd.f32 %v6882_v42, %v4571_v62 }
0x16c1   : > { %4594 = vrot.lane.b32.xlu2 %v9415_v34, %s7233_s6  ;;  %4590 = vrot.lane.b32.xlu0 %v9413_v50, %s7233_s6 }
0x16c6   : > { %v4574_v18 = vpop.f32.mrf.mxu0 }
0x16c7   : > { %v9425_v4 = vadd.f32 %v6882_v42, %v4574_v18 }
0x16c9   : > { %4586 = vrot.lane.b32.xlu2 %v9423_v61, %s7233_s6  ;;  %4584 = vrot.lane.b32.xlu0 %v9421_v19, %s7233_s6  ;;  %v6828_v10 = vpack.i.bf16 %v9415_v34, %v9425_v4 }
0x16ca   : > { %4596 = vrot.lane.b32.xlu1 %v9425_v4, %s7233_s6 }
0x16d2   : > { %4588 = vrot.lane.b32.xlu1 %v9433_v38, %s7233_s6 }
0x171b   : > { %v4595_v36 = vpop.permute.xlu2 %4594 }
0x1723   : > { %v4587_v21 = vpop.permute.xlu2 %4586 }
0x172b   : > { %v4593_v41 = vpop.permute.xlu0 %4592 }
0x1733   : > { %v4591_v40 = vpop.permute.xlu0 %4590 }
0x173b   : > { %v4585_v6 = vpop.permute.xlu0 %4584 }
0x173c   : > { %v4597_v22 = vpop.permute.xlu1 %4596 }
0x173d   : > { %6634 = vmatpush.xpose.msk.msra.mxu3 %vm1154_vm6, %v4597_v22 }
0x1741   : > { %6635 = vmatpush.xpose.msk.msra.mxu3 %vm1154_vm6, %v4595_v36 }
0x1744   : > { %v4589_v60 = vpop.permute.xlu1 %4588 }
0x1745   : > { %6636 = vmatpush.xpose.msk.msra.mxu3 %vm1154_vm6, %v4593_v41 }
0x1749   : > { %6637 = vmatpush.xpose.msk.msra.mxu3 %vm1154_vm6, %v4591_v40 }
0x174d   : > { %6638 = vmatpush.xpose.msk.msra.mxu3 %vm1154_vm6, %v4589_v60 }
0x1751   : > { %6639 = vmatpush.xpose.msk.msra.mxu3 %vm1154_vm6, %v4587_v21 }
0x1755   : > { %6640 = vmatpush.xpose.msk.msra.mxu3 %vm1154_vm6, %v4585_v6 }
0x1758   : > { %6641 = vmatmul.msk.f32.vlgmr.msra.gmra.mxu3 %vm1154_vm6, %v9421_v19 }
0x1760   : > { %6642 = vmatmul.msk.f32.gmra.mxu3 %vm1154_vm6, %v9423_v61 }
0x1768   : > { %6643 = vmatmul.msk.f32.gmra.mxu3 %vm1154_vm6, %v9433_v38 }
0x1770   : > { %6644 = vmatmul.msk.f32.gmra.mxu3 %vm1154_vm6, %v9413_v50 }
0x1778   : > { %6645 = vmatmul.msk.f32.gmra.mxu3 %vm1154_vm6, %v9409_v37 }
0x1780   : > { %6646 = vmatmul.msk.f32.gmra.mxu3 %vm1154_vm6, %v9415_v34 }
0x1788   : > { %6647 = vmatmul.msk.f32.gmra.mxu3 %vm1154_vm6, %v9425_v4 }
0x17db   : > { %v4643_v48 = vpop.f32.mrf.mxu3 }
0x17dc   : > { %v4664_v28 = vmul.f32 0.17677669, %v4643_v48 }
0x17de   : > { %v4671_v55 = vadd.f32 %v4664_v28, %v1139_v2  ;;  %v6838_v2 = vpack.i.bf16 %v9423_v61, %v9433_v38 }
0x17e0   : > { %v4678_v26 = vsel %vm1315_vm7, %v4671_v55, -inf }
0x17e1   : > { %4679 = vmax.xlane.f32.xlu1 %v4678_v26 }
0x17e3   : > { %v4646_v43 = vpop.f32.mrf.mxu3 }
0x17e4   : > { %v4665_v33 = vmul.f32 0.17677669, %v4646_v43 }
0x17e6   : > { %v4672_v31 = vadd.f32 %v4665_v33, %v1140_v63 }
0x17e8   : > { %v4681_v53 = vsel %vm1315_vm7, %v4672_v31, -inf }
0x17e9   : > { %4682 = vmax.xlane.f32.xlu2 %v4681_v53 }
0x17eb   : > { %v4649_v32 = vpop.f32.mrf.mxu3 }
0x17ec   : > { %v4666_v8 = vmul.f32 0.17677669, %v4649_v32 }
0x17ee   : > { %v4673_v0 = vadd.f32 %v4666_v8, %v1141_v35 }
0x17f0   : > { %v4684_v51 = vsel %vm1315_vm7, %v4673_v0, -inf }
0x17f1   : > { %4685 = vmax.xlane.f32.xlu0 %v4684_v51 }
0x17f3   : > { %v4652_v27 = vpop.f32.mrf.mxu3 }
0x17f4   : > { %v4667_v3 = vmul.f32 0.17677669, %v4652_v27 }
0x17f6   : > { %v9473_v56 = vadd.f32 %v4667_v3, %v1142_v7 }
0x17f8   : > { %v4687_v47 = vsel %vm1315_vm7, %v9473_v56, -inf }
0x17f9   : > { %4688 = vmax.xlane.f32.xlu2 %v4687_v47 }
0x17fb   : > { %v4655_v25 = vpop.f32.mrf.mxu3 }
0x17fc   : > { %v4668_v52 = vmul.f32 0.17677669, %v4655_v25 }
0x17fe   : > { %v9480_v30 = vadd.f32 %v4668_v52, %v1143_v20 }
0x1800   : > { %v4690_v29 = vsel %vm1315_vm7, %v9480_v30, -inf }
0x1801   : > { %4691 = vmax.xlane.f32.xlu1 %v4690_v29 }
0x1803   : > { %v4658_v46 = vpop.f32.mrf.mxu3 }
0x1804   : > { %v4669_v44 = vmul.f32 0.17677669, %v4658_v46 }
0x1806   : > { %v4676_v12 = vadd.f32 %v4669_v44, %v1144_v39 }
0x1808   : > { %v4693_v5 = vsel %vm1315_vm7, %v4676_v12, -inf }
0x1809   : > { %4694 = vmax.xlane.f32.xlu2 %v4693_v5 }
0x180b   : > { %v4661_v9 = vpop.f32.mrf.mxu3 }
0x180c   : > { %v4670_v54 = vmul.f32 0.17677669, %v4661_v9 }
0x180e   : > { %v4677_v57 = vadd.f32 %v4670_v54, %v1145_v16 }
0x1810   : > { %v4696_v14 = vsel %vm1315_vm7, %v4677_v57, -inf }
0x1811   : > { %4697 = vmax.xlane.f32.xlu0 %v4696_v14 }
0x181a   : > { %6834 = vrot.lane.b32.xlu1 %v6833_v23, %s7234_s22 }
0x1821   : > { %6829 = vrot.lane.b32.xlu2 %v6828_v10, %s7234_s22 }
0x1854   : > { %v4680_v13 = vpop.xlane.xlu1 %4679 }
0x1855   : > { %v4699_v42 = vsub.f32 %v4671_v55, %v4680_v13 }
0x1857   : > { %v4706_v49 = vmul.f32 1.442695, %v4699_v42 }
0x1859   : > { %7106 = vpow2.f32 %v4706_v49 }
0x185c   : > { %v4683_v62 = vpop.xlane.xlu2 %4682 }
0x185d   : > { %v4700_v18 = vsub.f32 %v4672_v31, %v4683_v62 }
0x185f   : > { %v9498_v22 = vpop.eup %7106  ;;  %v4708_v41 = vmul.f32 1.442695, %v4700_v18 }
0x1860   : > { %v4720_v36 = vsel %vm1315_vm7, %v9498_v22, 0.0 }
0x1861   : > { %7108 = vpow2.f32 %v4708_v41  ;;  %4721 = vadd.xlane.f32.xlu1 %v4720_v36 }
0x1864   : > { %v4686_v37 = vpop.xlane.xlu0 %4685 }
0x1865   : > { %v4701_v50 = vsub.f32 %v4673_v0, %v4686_v37 }
0x1867   : > { %v9502_v40 = vpop.eup %7108  ;;  %v4710_v34 = vmul.f32 1.442695, %v4701_v50 }
0x1868   : > { %v4723_v4 = vsel %vm1315_vm7, %v9502_v40, 0.0 }
0x1869   : > { %7110 = vpow2.f32 %v4710_v34  ;;  %4724 = vadd.xlane.f32.xlu0 %v4723_v4 }
0x186c   : > { %v4689_v6 = vpop.xlane.xlu2 %4688 }
0x186d   : > { %v4702_v32 = vsub.f32 %v9473_v56, %v4689_v6 }
0x186f   : > { %v9506_v60 = vpop.eup %7110  ;;  %v4712_v0 = vmul.f32 1.442695, %v4702_v32 }
0x1870   : > { %v4726_v21 = vsel %vm1315_vm7, %v9506_v60, 0.0 }
0x1871   : > { %4727 = vadd.xlane.f32.xlu2 %v4726_v21 }
0x1874   : > { %v4692_v26 = vpop.xlane.xlu1 %4691 }
0x1875   : > { %v4703_v35 = vsub.f32 %v9480_v30, %v4692_v26 }
0x1877   : > { %v4714_v8 = vmul.f32 1.442695, %v4703_v35 }
0x187a   : > { %4846 = vrot.lane.b32.xlu1 %v9421_v19, %s7234_s22 }
0x187c   : > { %v4695_v48 = vpop.xlane.xlu2 %4694 }
0x187d   : > { %v4704_v28 = vsub.f32 %v4676_v12, %v4695_v48  ;;  %6839 = vrot.lane.b32.xlu0 %v6838_v2, %s7234_s22 }
0x187f   : > { %v4716_v55 = vmul.f32 1.442695, %v4704_v28 }
0x1881   : > { %7112 = vpow2.f32 %v4716_v55 }
0x1882   : > { %7114 = vpow2.f32 %v4714_v8 }
0x1883   : > { %7116 = vpow2.f32 %v4712_v0 }
0x1884   : > { %v6830_v63 = vpop.permute.xlu2 %6829  ;;  %v4698_v51 = vpop.xlane.xlu0 %4697 }
0x1885   : > { %v6831_v43 = vunpack.i.l.bf16 %v6830_v63  ;;  %v6832_v31 = vunpack.i.h.bf16 %v6830_v63  ;;  %v4705_v7 = vsub.f32 %v4677_v57, %v4698_v51 }
0x1887   : > { %v9515_v33 = vpop.eup %7112  ;;  %4897 = vmatpush.msra.mxu2 %v6831_v43  ;;  %v4718_v3 = vmul.f32 1.442695, %v4705_v7 }
0x1888   : > { %v4735_v53 = vsel %vm1315_vm7, %v9515_v33, 0.0  ;;  %v9521_v27 = vpop.eup %7114 }
0x1889   : > { %4736 = vadd.xlane.f32.xlu2 %v4735_v53  ;;  %4898 = vmatpush.msra.mxu2 %v6832_v31  ;;  %v9523_v47 = vpop.eup %7116  ;;  %v4732_v20 = vsel %vm1315_vm7, %v9521_v27, 0.0  ;;  %7118 = vpow2.f32 %v4718_v3 }
0x188a   : > { %v4729_v25 = vsel %vm1315_vm7, %v9523_v47, 0.0 }
0x188c   : > { %v6835_v19 = vpop.permute.xlu1 %6834 }
0x188d   : > { %v6836_v61 = vunpack.i.l.bf16 %v6835_v19  ;;  %v6837_v38 = vunpack.i.h.bf16 %v6835_v19 }
0x188f   : > { %4899 = vmatpush.msra.mxu2 %v6836_v61  ;;  %v9529_v56 = vpop.eup %7118 }
0x1890   : > { %v4738_v52 = vsel %vm1315_vm7, %v9529_v56, 0.0 }
0x1891   : > { %4900 = vmatpush.msra.mxu2 %v6837_v38 }
0x18a4   : > { %4733 = vadd.xlane.f32.xlu1 %v4732_v20 }
0x18a7   : > { %4730 = vadd.xlane.f32.xlu0 %v4729_v25 }
0x18af   : > { %4739 = vadd.xlane.f32.xlu0 %v4738_v52 }
0x18d4   : > { %v4722_v30 = vpop.xlane.xlu1 %4721 }
0x18d5   : > { %7120 = vrcp.f32 %v4722_v30  ;;  %v4752_v23 = vand.u32 2147483648, %v4722_v30  ;;  %vm4746_vm10 = vweird.f32 %v4722_v30  ;;  %v4750_v10 = vand.u32 2147483647, %v4722_v30 }
0x18d7   : > { %v4753_v18 = vor.u32 1.1754944e-38, %v4752_v23  ;;  %vm4751_vm12 = vcmp.eq.f32.partialorder %v4750_v10, 8.507059e+37 }
0x18db   : > { %v7121_v29 = vpop.eup %7120 }
0x18dc   : > { %v4725_v39 = vpop.xlane.xlu0 %4724  ;;  %v4742_v46 = vmul.f32 %v7121_v29, %v4722_v30  ;;  %vm4747_vm9 = vweird.f32 %v7121_v29 }
0x18dd   : > { %7122 = vrcp.f32 %v4725_v39  ;;  %vm4748_vm11 = vmor %vm4746_vm10, %vm4747_vm9  ;;  %v4767_v4 = vand.u32 2147483648, %v4725_v39  ;;  %vm4761_vm14 = vweird.f32 %v4725_v39  ;;  %v4765_v6 = vand.u32 2147483647, %v4725_v39 }
0x18de   : > { %v4743_v44 = vsub.f32 1.0, %v4742_v46 }
0x18df   : > { %v4768_v55 = vor.u32 1.1754944e-38, %v4767_v4  ;;  %vm4766_vm0 = vcmp.eq.f32.partialorder %v4765_v6, 8.507059e+37 }
0x18e0   : > { %v4744_v16 = vmul.f32 %v7121_v29, %v4743_v44 }
0x18e2   : > { %v4745_v54 = vadd.f32 %v7121_v29, %v4744_v16 }
0x18e3   : > { %v7123_v12 = vpop.eup %7122 }
0x18e4   : > { %v4728_v5 = vpop.xlane.xlu2 %4727  ;;  %v4757_v9 = vmul.f32 %v7123_v12, %v4725_v39  ;;  %v4749_v13 = vsel %vm4748_vm11, %v7121_v29, %v4745_v54  ;;  %vm4762_vm13 = vweird.f32 %v7123_v12 }
0x18e5   : > { %7124 = vrcp.f32 %v4728_v5  ;;  %v4754_v36 = vsel %vm4751_vm12, %v4753_v18, %v4749_v13  ;;  %vm4763_vm15 = vmor %vm4761_vm14, %vm4762_vm13  ;;  %v4782_v43 = vand.u32 2147483648, %v4728_v5  ;;  %vm4776_vm2 = vweird.f32 %v4728_v5 }
0x18e6   : > { %v4758_v57 = vsub.f32 1.0, %v4757_v9  ;;  %v4755_v21 = vmul.f32 %v9498_v22, %v4754_v36  ;;  %v4780_v31 = vand.u32 2147483647, %v4728_v5 }
0x18e7   : > { %v4783_v19 = vor.u32 1.1754944e-38, %v4782_v43 }
0x18e8   : > { %v4759_v42 = vmul.f32 %v7123_v12, %v4758_v57  ;;  %vm4781_vm4 = vcmp.eq.f32.partialorder %v4780_v31, 8.507059e+37 }
0x18ea   : > { %v4760_v50 = vadd.f32 %v7123_v12, %v4759_v42 }
0x18eb   : > { %v7125_v14 = vpop.eup %7124 }
0x18ec   : > { %v4772_v49 = vmul.f32 %v7125_v14, %v4728_v5  ;;  %v4847_v2 = vpop.permute.xlu1 %4846  ;;  %v4764_v28 = vsel %vm4763_vm15, %v7123_v12, %v4760_v50  ;;  %vm4777_vm1 = vweird.f32 %v7125_v14 }
0x18ed   : > { %v4769_v26 = vsel %vm4766_vm0, %v4768_v55, %v4764_v28  ;;  %vm4778_vm3 = vmor %vm4776_vm2, %vm4777_vm1 }
0x18ee   : > { %v4773_v34 = vsub.f32 1.0, %v4772_v49  ;;  %v4770_v53 = vmul.f32 %v9502_v40, %v4769_v26 }
0x18ef   : > { %v6840_v62 = vpop.permute.xlu0 %6839 }
0x18f0   : > { %v6841_v41 = vunpack.i.l.bf16 %v6840_v62  ;;  %v6842_v37 = vunpack.i.h.bf16 %v6840_v62  ;;  %v4774_v48 = vmul.f32 %v7125_v14, %v4773_v34 }
0x18f2   : > { %4901 = vmatpush.msra.mxu2 %v6841_v41  ;;  %v4775_v63 = vadd.f32 %v7125_v14, %v4774_v48 }
0x18f4   : > { %4902 = vmatpush.msra.mxu2 %v6842_v37  ;;  %v4779_v22 = vsel %vm4778_vm3, %v7125_v14, %v4775_v63 }
0x18f5   : > { %v4784_v61 = vsel %vm4781_vm4, %v4783_v19, %v4779_v22 }
0x18f6   : > { %4903 = vmatpush.msra.mxu2 %v4847_v2  ;;  %v4785_v38 = vmul.f32 %v9506_v60, %v4784_v61 }
0x18f7   : > { %6648 = vmatmul.msk.f32.vlgmr.msra.gmra.mxu2 %vm1315_vm7, %v4755_v21 }
0x18fc   : > { %v4737_v32 = vpop.xlane.xlu2 %4736 }
0x18fd   : > { %v4827_v37 = vand.u32 2147483648, %v4737_v32  ;;  %vm4821_vm0 = vweird.f32 %v4737_v32  ;;  %v4825_v50 = vand.u32 2147483647, %v4737_v32 }
0x18ff   : > { %6649 = vmatmul.msk.f32.gmra.mxu2 %vm1315_vm7, %v4770_v53  ;;  %v4828_v21 = vor.u32 1.1754944e-38, %v4827_v37  ;;  %vm4826_vm2 = vcmp.eq.f32.partialorder %v4825_v50, 8.507059e+37 }
0x1907   : > { %6650 = vmatmul.msk.f32.gmra.mxu2 %vm1315_vm7, %v4785_v38 }
0x1917   : > { %v4734_v35 = vpop.xlane.xlu1 %4733 }
0x1918   : > { %7126 = vrcp.f32 %v4734_v35  ;;  %v4812_v57 = vand.u32 2147483648, %v4734_v35  ;;  %vm4806_vm12 = vweird.f32 %v4734_v35  ;;  %v4810_v23 = vand.u32 2147483647, %v4734_v35 }
0x191a   : > { %v4731_v8 = vpop.xlane.xlu0 %4730  ;;  %v4813_v62 = vor.u32 1.1754944e-38, %v4812_v57  ;;  %vm4811_vm14 = vcmp.eq.f32.partialorder %v4810_v23, 8.507059e+37 }
0x191b   : > { %7128 = vrcp.f32 %v4731_v8  ;;  %v4797_v29 = vand.u32 2147483648, %v4731_v8  ;;  %v4795_v46 = vand.u32 2147483647, %v4731_v8  ;;  %vm4791_vm8 = vweird.f32 %v4731_v8 }
0x191c   : > { %7130 = vrcp.f32 %v4737_v32 }
0x191d   : > { %v4798_v5 = vor.u32 1.1754944e-38, %v4797_v29  ;;  %vm4796_vm11 = vcmp.eq.f32.partialorder %v4795_v46, 8.507059e+37 }
0x191e   : > { %v7127_v0 = vpop.eup %7126 }
0x191f   : > { %v4802_v51 = vmul.f32 %v7127_v0, %v4734_v35  ;;  %vm4807_vm10 = vweird.f32 %v7127_v0 }
0x1920   : > { %vm4808_vm13 = vmor %vm4806_vm12, %vm4807_vm10 }
0x1921   : > { %v7129_v40 = vpop.eup %7128  ;;  %v4803_v3 = vsub.f32 1.0, %v4802_v51 }
0x1922   : > { %v7131_v7 = vpop.eup %7130  ;;  %v4787_v20 = vmul.f32 %v7129_v40, %v4731_v8  ;;  %v4740_v25 = vpop.xlane.xlu0 %4739  ;;  %vm4792_vm5 = vweird.f32 %v7129_v40 }
0x1923   : > { %v4817_v30 = vmul.f32 %v7131_v7, %v4737_v32  ;;  %7132 = vrcp.f32 %v4740_v25  ;;  %v4804_v60 = vmul.f32 %v7127_v0, %v4803_v3  ;;  %vm4793_vm9 = vmor %vm4791_vm8, %vm4792_vm5  ;;  %vm4822_vm15 = vweird.f32 %v7131_v7 }
0x1924   : > { %v4788_v52 = vsub.f32 1.0, %v4787_v20  ;;  %vm4823_vm1 = vmor %vm4821_vm0, %vm4822_vm15  ;;  %v4842_v48 = vand.u32 2147483648, %v4740_v25  ;;  %vm4836_vm4 = vweird.f32 %v4740_v25  ;;  %v4840_v28 = vand.u32 2147483647, %v4740_v25 }
0x1925   : > { %v4818_v12 = vsub.f32 1.0, %v4817_v30  ;;  %v4805_v16 = vadd.f32 %v7127_v0, %v4804_v60 }
0x1926   : > { %v4789_v39 = vmul.f32 %v7129_v40, %v4788_v52  ;;  %vm4841_vm8 = vcmp.eq.f32.partialorder %v4840_v28, 8.507059e+37  ;;  %v6659_v28 = vld [vmem:[%s10254_s14 + $0x90] sm:$0xff] }
0x1927   : > { %v4819_v13 = vmul.f32 %v7131_v7, %v4818_v12  ;;  %v4809_v49 = vsel %vm4808_vm13, %v7127_v0, %v4805_v16 }
0x1928   : > { %v4790_v44 = vadd.f32 %v7129_v40, %v4789_v39  ;;  %v4814_v18 = vsel %vm4811_vm14, %v4813_v62, %v4809_v49 }
0x1929   : > { %v7133_v54 = vpop.eup %7132  ;;  %v4820_v41 = vadd.f32 %v7131_v7, %v4819_v13  ;;  %v4815_v34 = vmul.f32 %v9521_v27, %v4814_v18  ;;  %v4843_v27 = vor.u32 1.1754944e-38, %v4842_v48  ;;  %v6660_v48 = vld [vmem:[%s10254_s14 + $0x98] sm:$0xff] }
0x192a   : > { %v4794_v9 = vsel %vm4793_vm9, %v7129_v40, %v4790_v44  ;;  %v4832_v42 = vmul.f32 %v7133_v54, %v4740_v25  ;;  %vm4837_vm3 = vweird.f32 %v7133_v54  ;;  %5154 = vmatpush.msra.mxu1 %v6660_v48 }
0x192b   : > { %v4799_v14 = vsel %vm4796_vm11, %v4798_v5, %v4794_v9  ;;  %vm4838_vm5 = vmor %vm4836_vm4, %vm4837_vm3 }
0x192c   : > { %v4800_v10 = vmul.f32 %v9523_v47, %v4799_v14  ;;  %v4833_v36 = vsub.f32 1.0, %v4832_v42  ;;  %v4824_v47 = vsel %vm4823_vm1, %v7131_v7, %v4820_v41  ;;  %5155 = vmatpush.msra.mxu1 %v6659_v28 }
0x192d   : > { %v4829_v6 = vsel %vm4826_vm2, %v4828_v21, %v4824_v47 }
0x192e   : > { %6651 = vmatmul.msk.f32.gmra.mxu2 %vm1315_vm7, %v4800_v10  ;;  %v4834_v4 = vmul.f32 %v7133_v54, %v4833_v36  ;;  %v4830_v55 = vmul.f32 %v9515_v33, %v4829_v6 }
0x1930   : > { %v4835_v2 = vadd.f32 %v7133_v54, %v4834_v4 }
0x1932   : > { %v4839_v26 = vsel %vm4838_vm5, %v7133_v54, %v4835_v2 }
0x1933   : > { %v4844_v63 = vsel %vm4841_vm8, %v4843_v27, %v4839_v26  ;;  %v6657_v26 = vld [vmem:[%s10254_s14 + $0x80] sm:$0xff] }
0x1934   : > { %v4845_v43 = vmul.f32 %v9529_v56, %v4844_v63 }
0x1936   : > { %6652 = vmatmul.msk.f32.gmra.mxu2 %vm1315_vm7, %v4815_v34 }
0x193e   : > { %6653 = vmatmul.msk.f32.gmra.mxu2 %vm1315_vm7, %v4830_v55  ;;  %v6658_v55 = vld [vmem:[%s10254_s14 + $0x88] sm:$0xff] }
0x193f   : > { %5156 = vmatpush.msra.mxu1 %v6658_v55 }
0x1941   : > { %5157 = vmatpush.msra.mxu1 %v6657_v26 }
0x1946   : > { %6654 = vmatmul.msk.f32.gmra.mxu2 %vm1315_vm7, %v4845_v43 }
0x197a   : > { %v4905_v31 = vpop.f32.mrf.mxu2 }
0x197b   : > { %v9548_v53 = vadd.f32 %v4905_v31, %v9347_v17 }
0x197d   : > { %v4937_v22 = vsel %vm1154_vm6, %v9548_v53, 0.0 }
0x197e   : > { %4938 = vadd.xlane.f32.xlu2 %v4937_v22 }
0x1982   : > { %v4908_v33 = vpop.f32.mrf.mxu2 }
0x1983   : > { %v9553_v19 = vadd.f32 %v4908_v33, %v9356_v58 }
0x1985   : > { %v4940_v61 = vsel %vm1154_vm6, %v9553_v19, 0.0 }
0x1986   : > { %4941 = vadd.xlane.f32.xlu1 %v4940_v61 }
0x198a   : > { %v4911_v38 = vpop.f32.mrf.mxu2 }
0x198b   : > { %v9558_v56 = vadd.f32 %v4911_v38, %v9362_v1 }
0x198d   : > { %v4943_v17 = vsel %vm1154_vm6, %v9558_v56, 0.0 }
0x198e   : > { %4944 = vadd.xlane.f32.xlu0 %v4943_v17 }
0x19b1   : > { %v4914_v35 = vpop.f32.mrf.mxu2 }
0x19b2   : > { %v9563_v32 = vadd.f32 %v4914_v35, %v9377_v11 }
0x19b4   : > { %v4946_v58 = vsel %vm1154_vm6, %v9563_v32, 0.0 }
0x19b5   : > { %4947 = vadd.xlane.f32.xlu2 %v4946_v58 }
0x19b9   : > { %v4917_v8 = vpop.f32.mrf.mxu2 }
0x19ba   : > { %v9568_v0 = vadd.f32 %v4917_v8, %v9387_v24 }
0x19bc   : > { %v4949_v1 = vsel %vm1154_vm6, %v9568_v0, 0.0 }
0x19bd   : > { %4950 = vadd.xlane.f32.xlu1 %v4949_v1 }
0x19c1   : > { %v4920_v51 = vpop.f32.mrf.mxu2 }
0x19c2   : > { %v9573_v40 = vadd.f32 %v4920_v51, %v9396_v59 }
0x19c4   : > { %v4952_v11 = vsel %vm1154_vm6, %v9573_v40, 0.0 }
0x19c5   : > { %4953 = vadd.xlane.f32.xlu0 %v4952_v11 }
0x19c9   : > { %v4923_v7 = vpop.f32.mrf.mxu2 }
0x19ca   : > { %v9578_v3 = vadd.f32 %v4923_v7, %v9402_v45 }
0x19cc   : > { %v4955_v24 = vsel %vm1154_vm6, %v9578_v3, 0.0 }
0x19cd   : > { %4956 = vadd.xlane.f32.xlu1 %v4955_v24 }
0x19f1   : > { %v4939_v20 = vpop.xlane.xlu2 %4938 }
0x19f2   : > { %v4958_v25 = vmul.f32 %v4939_v20, %v7719_v15  ;;  %v9649_v20 = vld [vmem:[%s10260_s20 + $0x4] ss:$0 sm:$0xff] }
0x19f4   : > { %v9584_v52 = vsub.f32 %v9548_v53, %v4958_v25 }
0x19f6   : > { %v4972_v59 = vmul.f32 %v9584_v52, %v9584_v52 }
0x19f8   : > { %v4979_v30 = vsel %vm1154_vm6, %v4972_v59, 0.0 }
0x19f9   : > { %v4942_v29 = vpop.xlane.xlu1 %4941  ;;  %4980 = vadd.xlane.f32.xlu2 %v4979_v30  ;;  %v9654_v30 = vld [vmem:[%s10261_s21 + $0x4] ss:$0 sm:$0xff] }
0x19fa   : > { %v4959_v45 = vmul.f32 %v4942_v29, %v7719_v15 }
0x19fc   : > { %v9591_v60 = vsub.f32 %v9553_v19, %v4959_v45 }
0x19fe   : > { %v4973_v39 = vmul.f32 %v9591_v60, %v9591_v60 }
0x1a00   : > { %v4982_v46 = vsel %vm1154_vm6, %v4973_v39, 0.0 }
0x1a01   : > { %v4945_v44 = vpop.xlane.xlu0 %4944  ;;  %4983 = vadd.xlane.f32.xlu0 %v4982_v46 }
0x1a02   : > { %v4960_v12 = vmul.f32 %v4945_v44, %v7719_v15 }
0x1a04   : > { %v9598_v5 = vsub.f32 %v9558_v56, %v4960_v12 }
0x1a06   : > { %v4974_v16 = vmul.f32 %v9598_v5, %v9598_v5 }
0x1a08   : > { %v4985_v9 = vsel %vm1154_vm6, %v4974_v16, 0.0 }
0x1a09   : > { %4986 = vadd.xlane.f32.xlu2 %v4985_v9 }
0x1a28   : > { %v4948_v54 = vpop.xlane.xlu2 %4947 }
0x1a29   : > { %v4961_v57 = vmul.f32 %v4948_v54, %v7719_v15 }
0x1a2b   : > { %v9605_v14 = vsub.f32 %v9563_v32, %v4961_v57 }
0x1a2d   : > { %v4975_v23 = vmul.f32 %v9605_v14, %v9605_v14 }
0x1a2f   : > { %v4988_v10 = vsel %vm1154_vm6, %v4975_v23, 0.0 }
0x1a30   : > { %v4951_v13 = vpop.xlane.xlu1 %4950  ;;  %4989 = vadd.xlane.f32.xlu1 %v4988_v10 }
0x1a31   : > { %v4962_v42 = vmul.f32 %v4951_v13, %v7719_v15 }
0x1a33   : > { %v9612_v49 = vsub.f32 %v9568_v0, %v4962_v42 }
0x1a35   : > { %v4976_v62 = vmul.f32 %v9612_v49, %v9612_v49 }
0x1a37   : > { %v4991_v18 = vsel %vm1154_vm6, %v4976_v62, 0.0 }
0x1a38   : > { %4992 = vadd.xlane.f32.xlu0 %v4991_v18  ;;  %v4954_v41 = vpop.xlane.xlu0 %4953 }
0x1a39   : > { %v4963_v36 = vmul.f32 %v4954_v41, %v7719_v15 }
0x1a3b   : > { %v9619_v37 = vsub.f32 %v9573_v40, %v4963_v36 }
0x1a3d   : > { %v4977_v50 = vmul.f32 %v9619_v37, %v9619_v37 }
0x1a3f   : > { %v4994_v34 = vsel %vm1154_vm6, %v4977_v50, 0.0 }
0x1a40   : > { %4995 = vadd.xlane.f32.xlu2 %v4994_v34  ;;  %v4957_v4 = vpop.xlane.xlu1 %4956 }
0x1a41   : > { %v4964_v47 = vmul.f32 %v4957_v4, %v7719_v15 }
0x1a43   : > { %v9626_v21 = vsub.f32 %v9578_v3, %v4964_v47 }
0x1a45   : > { %v4978_v6 = vmul.f32 %v9626_v21, %v9626_v21 }
0x1a47   : > { %v4997_v2 = vsel %vm1154_vm6, %v4978_v6, 0.0 }
0x1a48   : > { %4998 = vadd.xlane.f32.xlu1 %v4997_v2 }
0x1a6c   : > { %v4981_v27 = vpop.xlane.xlu2 %4980 }
0x1a6d   : > { %v5000_v63 = vmul.f32 %v4981_v27, %v7719_v15 }
0x1a6f   : > { %v5007_v43 = vadd.f32 1e-05, %v5000_v63 }
0x1a71   : > { %7134 = vrsqrt.f32 %v5007_v43  ;;  %vm5020_vm10 = vweird.f32 %v5007_v43 }
0x1a74   : > { %v4984_v31 = vpop.xlane.xlu0 %4983 }
0x1a75   : > { %v5001_v22 = vmul.f32 %v4984_v31, %v7719_v15 }
0x1a77   : > { %v7135_v33 = vpop.eup %7134  ;;  %v5008_v61 = vadd.f32 1e-05, %v5001_v22 }
0x1a78   : > { %v5015_v38 = vmul.f32 %v7135_v33, %v5007_v43  ;;  %vm5021_vm9 = vweird.f32 %v7135_v33 }
0x1a79   : > { %7136 = vrsqrt.f32 %v5008_v61  ;;  %vm5022_vm11 = vmor %vm5020_vm10, %vm5021_vm9  ;;  %vm5030_vm13 = vweird.f32 %v5008_v61 }
0x1a7a   : > { %v5016_v17 = vmul.f32 %v7135_v33, %v5015_v38  ;;  %v6683_v38 = vld [vmem:[%s10256_s16 + $0x270] sm:$0xff] }
0x1a7c   : > { %v5017_v35 = vmul.f32 0.5, %v5016_v17  ;;  %v4987_v58 = vpop.xlane.xlu2 %4986 }
0x1a7d   : > { %v5002_v8 = vmul.f32 %v4987_v58, %v7719_v15 }
0x1a7e   : > { %v5018_v1 = vsub.f32 1.5, %v5017_v35 }
0x1a7f   : > { %v7137_v51 = vpop.eup %7136  ;;  %v5009_v11 = vadd.f32 1e-05, %v5002_v8  ;;  %v6682_v8 = vld [vmem:[%s10256_s16 + $0x268] sm:$0xff] }
0x1a80   : > { %v5019_v7 = vmul.f32 %v7135_v33, %v5018_v1  ;;  %v5025_v24 = vmul.f32 %v7137_v51, %v5008_v61  ;;  %vm5031_vm12 = vweird.f32 %v7137_v51  ;;  %v6684_v61 = vld [vmem:[%s10256_s16 + $0x278] sm:$0xff] }
0x1a81   : > { %7138 = vrsqrt.f32 %v5009_v11  ;;  %vm5032_vm14 = vmor %vm5030_vm13, %vm5031_vm12  ;;  %vm5040_vm0 = vweird.f32 %v5009_v11  ;;  %5209 = vmatpush.msrb.mxu0 %v6684_v61 }
0x1a82   : > { %v5023_v25 = vsel %vm5022_vm11, %v7135_v33, %v5019_v7  ;;  %v5026_v59 = vmul.f32 %v7137_v51, %v5025_v24  ;;  %v6681_v24 = vld [vmem:[%s10256_s16 + $0x260] sm:$0xff] }
0x1a83   : > { %v5084_v29 = vmul.f32 %v5023_v25, %v9584_v52  ;;  %5210 = vmatpush.msrb.mxu0 %v6683_v38 }
0x1a84   : > { %v5027_v45 = vmul.f32 0.5, %v5026_v59 }
0x1a85   : > { %v5094_v39 = vmul.f32 %v9649_v20, %v5084_v29  ;;  %5211 = vmatpush.msrb.mxu0 %v6682_v8 }
0x1a86   : > { %v5028_v46 = vsub.f32 1.5, %v5027_v45  ;;  %v6680_v45 = vld [vmem:[%s10256_s16 + $0x258] sm:$0xff] }
0x1a87   : > { %v7139_v44 = vpop.eup %7138  ;;  %v5104_v12 = vadd.f32 %v9654_v30, %v5094_v39  ;;  %5212 = vmatpush.msrb.mxu0 %v6681_v24 }
0x1a88   : > { %v5029_v16 = vmul.f32 %v7137_v51, %v5028_v46  ;;  %v5035_v9 = vmul.f32 %v7139_v44, %v5009_v11  ;;  %vm5041_vm15 = vweird.f32 %v7139_v44 }
0x1a89   : > { %6662 = vmatmul.msk.f32.vlgmr.msra.gmra.mxu1 %vm1154_vm6, %v5104_v12  ;;  %vm5042_vm1 = vmor %vm5040_vm0, %vm5041_vm15  ;;  %5213 = vmatpush.msrb.mxu0 %v6680_v45 }
0x1a8a   : > { %v5033_v54 = vsel %vm5032_vm14, %v7137_v51, %v5029_v16  ;;  %v5036_v57 = vmul.f32 %v7139_v44, %v5035_v9 }
0x1a8b   : > { %v5085_v23 = vmul.f32 %v5033_v54, %v9591_v60  ;;  %v6678_v54 = vld [vmem:[%s10256_s16 + $0x248] sm:$0xff] }
0x1a8c   : > { %v5037_v10 = vmul.f32 0.5, %v5036_v57 }
0x1a8d   : > { %v5095_v52 = vmul.f32 %v9649_v20, %v5085_v23 }
0x1a8e   : > { %v5038_v13 = vsub.f32 1.5, %v5037_v10  ;;  %v6677_v10 = vld [vmem:[%s10256_s16 + $0x240] sm:$0xff] }
0x1a8f   : > { %v5105_v42 = vadd.f32 %v9654_v30, %v5095_v52 }
0x1a90   : > { %v5039_v62 = vmul.f32 %v7139_v44, %v5038_v13 }
0x1a91   : > { %6663 = vmatmul.msk.f32.gmra.mxu1 %vm1154_vm6, %v5105_v42 }
0x1a92   : > { %v5043_v18 = vsel %vm5042_vm1, %v7139_v44, %v5039_v62  ;;  %v6679_v44 = vld [vmem:[%s10256_s16 + $0x250] sm:$0xff] }
0x1a93   : > { %v5086_v41 = vmul.f32 %v5043_v18, %v9598_v5  ;;  %5214 = vmatpush.msrb.mxu0 %v6679_v44 }
0x1a95   : > { %v5096_v36 = vmul.f32 %v9649_v20, %v5086_v41  ;;  %5215 = vmatpush.msrb.mxu0 %v6678_v54  ;;  %v6675_v41 = vld [vmem:[%s10256_s16 + $0x230] sm:$0xff] }
0x1a97   : > { %v5106_v50 = vadd.f32 %v9654_v30, %v5096_v36  ;;  %5216 = vmatpush.msrb.mxu0 %v6677_v10 }
0x1a99   : > { %6664 = vmatmul.msk.f32.gmra.mxu1 %vm1154_vm6, %v5106_v50 }
0x1aa3   : > { %v4990_v60 = vpop.xlane.xlu1 %4989 }
0x1aa4   : > { %v5003_v34 = vmul.f32 %v4990_v60, %v7719_v15 }
0x1aa6   : > { %v5010_v4 = vadd.f32 1e-05, %v5003_v34  ;;  %v6674_v34 = vld [vmem:[%s10256_s16 + $0x228] sm:$0xff] }
0x1aa8   : > { %7140 = vrsqrt.f32 %v5010_v4  ;;  %vm5050_vm3 = vweird.f32 %v5010_v4 }
0x1aab   : > { %v4993_v47 = vpop.xlane.xlu0 %4992 }
0x1aac   : > { %v5004_v6 = vmul.f32 %v4993_v47, %v7719_v15 }
0x1aae   : > { %v7141_v2 = vpop.eup %7140  ;;  %v5011_v48 = vadd.f32 1e-05, %v5004_v6  ;;  %v6673_v6 = vld [vmem:[%s10256_s16 + $0x220] sm:$0xff] }
0x1aaf   : > { %v5045_v28 = vmul.f32 %v7141_v2, %v5010_v4  ;;  %vm5051_vm2 = vweird.f32 %v7141_v2 }
0x1ab0   : > { %7142 = vrsqrt.f32 %v5011_v48  ;;  %vm5052_vm4 = vmor %vm5050_vm3, %vm5051_vm2  ;;  %vm5060_vm8 = vweird.f32 %v5011_v48 }
0x1ab1   : > { %v5046_v55 = vmul.f32 %v7141_v2, %v5045_v28 }
0x1ab3   : > { %v5047_v5 = vmul.f32 0.5, %v5046_v55  ;;  %v4996_v26 = vpop.xlane.xlu2 %4995 }
0x1ab4   : > { %v5005_v27 = vmul.f32 %v4996_v26, %v7719_v15 }
0x1ab5   : > { %v5048_v63 = vsub.f32 1.5, %v5047_v5 }
0x1ab6   : > { %v7143_v43 = vpop.eup %7142  ;;  %v5012_v31 = vadd.f32 1e-05, %v5005_v27 }
0x1ab7   : > { %v5049_v22 = vmul.f32 %v7141_v2, %v5048_v63  ;;  %v5055_v33 = vmul.f32 %v7143_v43, %v5011_v48  ;;  %vm5061_vm5 = vweird.f32 %v7143_v43  ;;  %v6671_v63 = vld [vmem:[%s10256_s16 + $0x210] sm:$0xff] }
0x1ab8   : > { %7144 = vrsqrt.f32 %v5012_v31  ;;  %vm5062_vm9 = vmor %vm5060_vm8, %vm5061_vm5  ;;  %vm5070_vm11 = vweird.f32 %v5012_v31 }
0x1ab9   : > { %v5053_v17 = vsel %vm5052_vm4, %v7141_v2, %v5049_v22  ;;  %v5056_v35 = vmul.f32 %v7143_v43, %v5055_v33 }
0x1aba   : > { %v5087_v58 = vmul.f32 %v5053_v17, %v9605_v14 }
0x1abb   : > { %v5057_v1 = vmul.f32 0.5, %v5056_v35  ;;  %v4999_v51 = vpop.xlane.xlu1 %4998 }
0x1abc   : > { %v5006_v11 = vmul.f32 %v4999_v51, %v7719_v15  ;;  %v5097_v7 = vmul.f32 %v9649_v20, %v5087_v58 }
0x1abd   : > { %v5058_v25 = vsub.f32 1.5, %v5057_v1 }
0x1abe   : > { %v7145_v59 = vpop.eup %7144  ;;  %v5013_v14 = vadd.f32 1e-05, %v5006_v11  ;;  %v5107_v29 = vadd.f32 %v9654_v30, %v5097_v7 }
0x1abf   : > { %v5059_v39 = vmul.f32 %v7143_v43, %v5058_v25  ;;  %v5065_v46 = vmul.f32 %v7145_v59, %v5012_v31  ;;  %vm5071_vm10 = vweird.f32 %v7145_v59 }
0x1ac0   : > { %7146 = vrsqrt.f32 %v5013_v14  ;;  %6665 = vmatmul.msk.f32.gmra.mxu1 %vm1154_vm6, %v5107_v29  ;;  %vm5072_vm12 = vmor %vm5070_vm11, %vm5071_vm10  ;;  %vm5080_vm14 = vweird.f32 %v5013_v14 }
0x1ac1   : > { %v5063_v12 = vsel %vm5062_vm9, %v7143_v43, %v5059_v39  ;;  %v5066_v16 = vmul.f32 %v7145_v59, %v5065_v46  ;;  %v6670_v43 = vld [vmem:[%s10256_s16 + $0x208] sm:$0xff]  ;;  %v6886_v46 = vld [vmem:[%s10257_s17 + $0x4] ss:$0 sm:$0xff] }
0x1ac2   : > { %v5088_v9 = vmul.f32 %v5063_v12, %v9612_v49  ;;  %v6676_v49 = vld [vmem:[%s10256_s16 + $0x238] sm:$0xff] }
0x1ac3   : > { %v5067_v57 = vmul.f32 0.5, %v5066_v16  ;;  %5217 = vmatpush.msrb.mxu0 %v6676_v49 }
0x1ac4   : > { %v5098_v23 = vmul.f32 %v9649_v20, %v5088_v9 }
0x1ac5   : > { %v5068_v52 = vsub.f32 1.5, %v5067_v57  ;;  %5218 = vmatpush.msrb.mxu0 %v6675_v41 }
0x1ac6   : > { %v7147_v13 = vpop.eup %7146  ;;  %v5108_v42 = vadd.f32 %v9654_v30, %v5098_v23 }
0x1ac7   : > { %v5069_v62 = vmul.f32 %v7145_v59, %v5068_v52  ;;  %v5075_v18 = vmul.f32 %v7147_v13, %v5013_v14  ;;  %vm5081_vm13 = vweird.f32 %v7147_v13  ;;  %5219 = vmatpush.msrb.mxu0 %v6674_v34 }
0x1ac8   : > { %6666 = vmatmul.msk.f32.gmra.mxu1 %vm1154_vm6, %v5108_v42  ;;  %vm5082_vm15 = vmor %vm5080_vm14, %vm5081_vm13 }
0x1ac9   : > { %v5073_v36 = vsel %vm5072_vm12, %v7145_v59, %v5069_v62  ;;  %v5076_v50 = vmul.f32 %v7147_v13, %v5075_v18  ;;  %5220 = vmatpush.msrb.mxu0 %v6673_v6 }
0x1aca   : > { %v5089_v60 = vmul.f32 %v5073_v36, %v9619_v37  ;;  %v6672_v37 = vld [vmem:[%s10256_s16 + $0x218] sm:$0xff] }
0x1acb   : > { %v5077_v4 = vmul.f32 0.5, %v5076_v50  ;;  %5221 = vmatpush.msrb.mxu0 %v6672_v37 }
0x1acc   : > { %v5099_v47 = vmul.f32 %v9649_v20, %v5089_v60 }
0x1acd   : > { %v5078_v2 = vsub.f32 1.5, %v5077_v4  ;;  %5222 = vmatpush.msrb.mxu0 %v6671_v63 }
0x1ace   : > { %v5109_v48 = vadd.f32 %v9654_v30, %v5099_v47 }
0x1acf   : > { %v5079_v28 = vmul.f32 %v7147_v13, %v5078_v2  ;;  %5223 = vmatpush.msrb.mxu0 %v6670_v43 }
0x1ad0   : > { %6667 = vmatmul.msk.f32.gmra.mxu1 %vm1154_vm6, %v5109_v48 }
0x1ad1   : > { %v5083_v55 = vsel %vm5082_vm15, %v7147_v13, %v5079_v28 }
0x1ad2   : > { %v5090_v5 = vmul.f32 %v5083_v55, %v9626_v21  ;;  %v6669_v21 = vld [vmem:[%s10256_s16 + $0x200] sm:$0xff] }
0x1ad3   : > { %5224 = vmatpush.msrb.mxu0 %v6669_v21 }
0x1ad4   : > { %v5100_v26 = vmul.f32 %v9649_v20, %v5090_v5  ;;  %v6885_v20 = vld [vmem:[%s10255_s15 + $0x4] ss:$0 sm:$0xff] }
0x1ad6   : > { %v5110_v27 = vadd.f32 %v9654_v30, %v5100_v26 }
0x1ad8   : > { %6668 = vmatmul.msk.f32.gmra.mxu1 %vm1154_vm6, %v5110_v27 }
0x1b06   : > { %v5159_v30 = vpop.f32.mrf.mxu1 }
0x1b07   : > { %v5160_v31 = vadd.f32 %v6885_v20, %v5159_v30 }
0x1b09   : > { %v5180_v22 = vmax.f32 %v5160_v31, 0.0 }
0x1b0b   : > { %5225 = vmatmul.f32.vlgmr.msrb.gmra.mxu0 %v5180_v22 }
0x1b0e   : > { %v5162_v33 = vpop.f32.mrf.mxu1 }
0x1b0f   : > { %v5163_v61 = vadd.f32 %v6885_v20, %v5162_v33 }
0x1b11   : > { %v5181_v38 = vmax.f32 %v5163_v61, 0.0 }
0x1b13   : > { %5228 = vmatmul.f32.gmra.mxu0 %v5181_v38 }
0x1b16   : > { %v5165_v17 = vpop.f32.mrf.mxu1 }
0x1b17   : > { %v5166_v35 = vadd.f32 %v6885_v20, %v5165_v17 }
0x1b19   : > { %v5182_v58 = vmax.f32 %v5166_v35, 0.0 }
0x1b1b   : > { %5231 = vmatmul.f32.gmra.mxu0 %v5182_v58 }
0x1b3d   : > { %v5168_v8 = vpop.f32.mrf.mxu1 }
0x1b3e   : > { %v5169_v1 = vadd.f32 %v6885_v20, %v5168_v8 }
0x1b40   : > { %v5183_v51 = vmax.f32 %v5169_v1, 0.0 }
0x1b42   : > { %5234 = vmatmul.f32.gmra.mxu0 %v5183_v51 }
0x1b45   : > { %v5171_v11 = vpop.f32.mrf.mxu1 }
0x1b46   : > { %v5172_v7 = vadd.f32 %v6885_v20, %v5171_v11 }
0x1b48   : > { %v5184_v24 = vmax.f32 %v5172_v7, 0.0 }
0x1b4a   : > { %5237 = vmatmul.f32.gmra.mxu0 %v5184_v24 }
0x1b4d   : > { %v5174_v25 = vpop.f32.mrf.mxu1 }
0x1b4e   : > { %v5175_v59 = vadd.f32 %v6885_v20, %v5174_v25 }
0x1b50   : > { %v5185_v14 = vmax.f32 %v5175_v59, 0.0 }
0x1b52   : > { %5240 = vmatmul.f32.gmra.mxu0 %v5185_v14 }
0x1b55   : > { %v5177_v29 = vpop.f32.mrf.mxu1 }
0x1b56   : > { %v5178_v45 = vadd.f32 %v6885_v20, %v5177_v29 }
0x1b58   : > { %v5186_v39 = vmax.f32 %v5178_v45, 0.0 }
0x1b5a   : > { %5243 = vmatmul.f32.gmra.mxu0 %v5186_v39 }
0x1b88   : > { %v5226_v44 = vpop.f32.mrf.mxu0 }
0x1b89   : > { %v5227_v12 = vadd.f32 %v6886_v46, %v5226_v44  ;;  %v6691_v44 = vld [vmem:[%s10252_s12 + $0xb8] sm:$0xff] }
0x1b8a   : > { %5475 = vmatpush.msrb.mxu3 %v6691_v44 }
0x1b8b   : > { %v9743_v16 = vadd.f32 %v5227_v12, %v9548_v53  ;;  %v6690_v12 = vld [vmem:[%s10252_s12 + $0xb0] sm:$0xff] }
0x1b8c   : > { %5476 = vmatpush.msrb.mxu3 %v6690_v12 }
0x1b8d   : > { %v5258_v9 = vsel %vm1154_vm6, %v9743_v16, 0.0 }
0x1b8e   : > { %5259 = vadd.xlane.f32.xlu0 %v5258_v9  ;;  %v6689_v9 = vld [vmem:[%s10252_s12 + $0xa8] sm:$0xff] }
0x1b8f   : > { %5477 = vmatpush.msrb.mxu3 %v6689_v9 }
0x1b90   : > { %v5229_v54 = vpop.f32.mrf.mxu0 }
0x1b91   : > { %v5230_v57 = vadd.f32 %v6886_v46, %v5229_v54  ;;  %v6688_v54 = vld [vmem:[%s10252_s12 + $0xa0] sm:$0xff] }
0x1b92   : > { %5478 = vmatpush.msrb.mxu3 %v6688_v54 }
0x1b93   : > { %v9748_v23 = vadd.f32 %v5230_v57, %v9553_v19 }
0x1b95   : > { %v5261_v10 = vsel %vm1154_vm6, %v9748_v23, 0.0 }
0x1b96   : > { %5262 = vadd.xlane.f32.xlu2 %v5261_v10 }
0x1b98   : > { %v5232_v52 = vpop.f32.mrf.mxu0 }
0x1b99   : > { %v5233_v13 = vadd.f32 %v6886_v46, %v5232_v52 }
0x1b9b   : > { %v9753_v42 = vadd.f32 %v5233_v13, %v9558_v56 }
0x1b9d   : > { %v5264_v53 = vsel %vm1154_vm6, %v9753_v42, 0.0 }
0x1b9e   : > { %5265 = vadd.xlane.f32.xlu1 %v5264_v53 }
0x1bbf   : > { %v5235_v49 = vpop.f32.mrf.mxu0 }
0x1bc0   : > { %v5236_v62 = vadd.f32 %v6886_v46, %v5235_v49 }
0x1bc2   : > { %v9758_v18 = vadd.f32 %v5236_v62, %v9563_v32 }
0x1bc4   : > { %v5267_v19 = vsel %vm1154_vm6, %v9758_v18, 0.0 }
0x1bc5   : > { %5268 = vadd.xlane.f32.xlu0 %v5267_v19 }
0x1bc7   : > { %v5238_v41 = vpop.f32.mrf.mxu0 }
0x1bc8   : > { %v5239_v36 = vadd.f32 %v6886_v46, %v5238_v41 }
0x1bca   : > { %v9763_v50 = vadd.f32 %v5239_v36, %v9568_v0 }
0x1bcc   : > { %v5270_v56 = vsel %vm1154_vm6, %v9763_v50, 0.0 }
0x1bcd   : > { %5271 = vadd.xlane.f32.xlu2 %v5270_v56 }
0x1bcf   : > { %v5241_v60 = vpop.f32.mrf.mxu0 }
0x1bd0   : > { %v5242_v34 = vadd.f32 %v6886_v46, %v5241_v60 }
0x1bd2   : > { %v9768_v4 = vadd.f32 %v5242_v34, %v9573_v40 }
0x1bd4   : > { %v5273_v32 = vsel %vm1154_vm6, %v9768_v4, 0.0 }
0x1bd5   : > { %5274 = vadd.xlane.f32.xlu1 %v5273_v32 }
0x1bd7   : > { %v5244_v47 = vpop.f32.mrf.mxu0 }
0x1bd8   : > { %v5245_v6 = vadd.f32 %v6886_v46, %v5244_v47 }
0x1bda   : > { %v9773_v2 = vadd.f32 %v5245_v6, %v9578_v3 }
0x1bdc   : > { %v5276_v0 = vsel %vm1154_vm6, %v9773_v2, 0.0 }
0x1bdd   : > { %5277 = vadd.xlane.f32.xlu2 %v5276_v0 }
0x1c01   : > { %v5260_v48 = vpop.xlane.xlu0 %5259 }
0x1c02   : > { %v5279_v37 = vmul.f32 %v5260_v48, %v7719_v15  ;;  %v9844_v48 = vld [vmem:[%s10258_s18 + $0x5] ss:$0 sm:$0xff] }
0x1c04   : > { %v9779_v28 = vsub.f32 %v9743_v16, %v5279_v37 }
0x1c06   : > { %v5293_v40 = vmul.f32 %v9779_v28, %v9779_v28 }
0x1c08   : > { %v5300_v55 = vsel %vm1154_vm6, %v5293_v40, 0.0 }
0x1c09   : > { %v5263_v5 = vpop.xlane.xlu2 %5262  ;;  %5301 = vadd.xlane.f32.xlu0 %v5300_v55  ;;  %v9849_v55 = vld [vmem:[%s10259_s19 + $0x5] ss:$0 sm:$0xff] }
0x1c0a   : > { %v5280_v3 = vmul.f32 %v5263_v5, %v7719_v15 }
0x1c0c   : > { %v9786_v26 = vsub.f32 %v9748_v23, %v5280_v3 }
0x1c0e   : > { %v5294_v27 = vmul.f32 %v9786_v26, %v9786_v26 }
0x1c10   : > { %v5303_v63 = vsel %vm1154_vm6, %v5294_v27, 0.0 }
0x1c11   : > { %5304 = vadd.xlane.f32.xlu1 %v5303_v63  ;;  %v5266_v43 = vpop.xlane.xlu1 %5265 }
0x1c12   : > { %v5281_v21 = vmul.f32 %v5266_v43, %v7719_v15 }
0x1c14   : > { %v9793_v20 = vsub.f32 %v9753_v42, %v5281_v21 }
0x1c16   : > { %v5295_v30 = vmul.f32 %v9793_v20, %v9793_v20 }
0x1c18   : > { %v5306_v31 = vsel %vm1154_vm6, %v5295_v30, 0.0 }
0x1c19   : > { %5307 = vadd.xlane.f32.xlu0 %v5306_v31 }
0x1c38   : > { %v5269_v22 = vpop.xlane.xlu0 %5268 }
0x1c39   : > { %v5282_v33 = vmul.f32 %v5269_v22, %v7719_v15 }
0x1c3b   : > { %v9800_v61 = vsub.f32 %v9758_v18, %v5282_v33 }
0x1c3d   : > { %v5296_v38 = vmul.f32 %v9800_v61, %v9800_v61 }
0x1c3f   : > { %v5309_v17 = vsel %vm1154_vm6, %v5296_v38, 0.0 }
0x1c40   : > { %v5272_v35 = vpop.xlane.xlu2 %5271  ;;  %5310 = vadd.xlane.f32.xlu2 %v5309_v17 }
0x1c41   : > { %v5283_v58 = vmul.f32 %v5272_v35, %v7719_v15 }
0x1c43   : > { %v9807_v8 = vsub.f32 %v9763_v50, %v5283_v58 }
0x1c45   : > { %v5297_v1 = vmul.f32 %v9807_v8, %v9807_v8 }
0x1c47   : > { %v5312_v51 = vsel %vm1154_vm6, %v5297_v1, 0.0 }
0x1c48   : > { %5313 = vadd.xlane.f32.xlu1 %v5312_v51  ;;  %v5275_v11 = vpop.xlane.xlu1 %5274 }
0x1c49   : > { %v5284_v7 = vmul.f32 %v5275_v11, %v7719_v15 }
0x1c4b   : > { %v9814_v24 = vsub.f32 %v9768_v4, %v5284_v7 }
0x1c4d   : > { %v5298_v25 = vmul.f32 %v9814_v24, %v9814_v24 }
0x1c4f   : > { %v5315_v59 = vsel %vm1154_vm6, %v5298_v25, 0.0 }
0x1c50   : > { %v5278_v14 = vpop.xlane.xlu2 %5277  ;;  %5316 = vadd.xlane.f32.xlu0 %v5315_v59 }
0x1c51   : > { %v5285_v29 = vmul.f32 %v5278_v14, %v7719_v15 }
0x1c53   : > { %v9821_v45 = vsub.f32 %v9773_v2, %v5285_v29 }
0x1c55   : > { %v5299_v39 = vmul.f32 %v9821_v45, %v9821_v45 }
0x1c57   : > { %v5318_v46 = vsel %vm1154_vm6, %v5299_v39, 0.0 }
0x1c58   : > { %5319 = vadd.xlane.f32.xlu2 %v5318_v46 }
0x1c7c   : > { %v5302_v57 = vpop.xlane.xlu0 %5301 }
0x1c7d   : > { %v5321_v10 = vmul.f32 %v5302_v57, %v7719_v15 }
0x1c7f   : > { %v5328_v52 = vadd.f32 1e-05, %v5321_v10 }
0x1c81   : > { %7148 = vrsqrt.f32 %v5328_v52  ;;  %vm5341_vm1 = vweird.f32 %v5328_v52 }
0x1c84   : > { %v5305_v13 = vpop.xlane.xlu1 %5304 }
0x1c85   : > { %v5322_v53 = vmul.f32 %v5305_v13, %v7719_v15 }
0x1c87   : > { %v7149_v49 = vpop.eup %7148  ;;  %v5329_v62 = vadd.f32 1e-05, %v5322_v53 }
0x1c88   : > { %v5336_v19 = vmul.f32 %v7149_v49, %v5328_v52  ;;  %vm5342_vm0 = vweird.f32 %v7149_v49 }
0x1c89   : > { %7150 = vrsqrt.f32 %v5329_v62  ;;  %vm5343_vm2 = vmor %vm5341_vm1, %vm5342_vm0  ;;  %vm5351_vm4 = vweird.f32 %v5329_v62 }
0x1c8a   : > { %v5337_v41 = vmul.f32 %v7149_v49, %v5336_v19 }
0x1c8c   : > { %v5338_v36 = vmul.f32 0.5, %v5337_v41  ;;  %v5308_v56 = vpop.xlane.xlu0 %5307 }
0x1c8d   : > { %v5323_v60 = vmul.f32 %v5308_v56, %v7719_v15 }
0x1c8e   : > { %v5339_v34 = vsub.f32 1.5, %v5338_v36 }
0x1c8f   : > { %v7151_v32 = vpop.eup %7150  ;;  %v5330_v47 = vadd.f32 1e-05, %v5323_v60 }
0x1c90   : > { %v5340_v6 = vmul.f32 %v7149_v49, %v5339_v34  ;;  %v5346_v0 = vmul.f32 %v7151_v32, %v5329_v62  ;;  %vm5352_vm3 = vweird.f32 %v7151_v32 }
0x1c91   : > { %7152 = vrsqrt.f32 %v5330_v47  ;;  %vm5353_vm5 = vmor %vm5351_vm4, %vm5352_vm3  ;;  %vm5361_vm9 = vweird.f32 %v5330_v47 }
0x1c92   : > { %v5344_v37 = vsel %vm5343_vm2, %v7149_v49, %v5340_v6  ;;  %v5347_v40 = vmul.f32 %v7151_v32, %v5346_v0 }
0x1c93   : > { %v5405_v5 = vmul.f32 %v5344_v37, %v9779_v28 }
0x1c94   : > { %v5348_v3 = vmul.f32 0.5, %v5347_v40 }
0x1c95   : > { %v5415_v27 = vmul.f32 %v9844_v48, %v5405_v5 }
0x1c96   : > { %v5349_v63 = vsub.f32 1.5, %v5348_v3 }
0x1c97   : > { %v7153_v43 = vpop.eup %7152  ;;  %v5425_v21 = vadd.f32 %v9849_v55, %v5415_v27 }
0x1c98   : > { %v5350_v30 = vmul.f32 %v7151_v32, %v5349_v63  ;;  %v5356_v31 = vmul.f32 %v7153_v43, %v5330_v47  ;;  %vm5362_vm8 = vweird.f32 %v7153_v43 }
0x1c99   : > { %6693 = vmatmul.msk.f32.vlgmr.msrb.gmra.mxu3 %vm1154_vm6, %v5425_v21  ;;  %vm5363_vm10 = vmor %vm5361_vm9, %vm5362_vm8 }
0x1c9a   : > { %v5354_v22 = vsel %vm5353_vm5, %v7151_v32, %v5350_v30  ;;  %v5357_v33 = vmul.f32 %v7153_v43, %v5356_v31 }
0x1c9b   : > { %v5406_v38 = vmul.f32 %v5354_v22, %v9786_v26 }
0x1c9c   : > { %v5358_v17 = vmul.f32 0.5, %v5357_v33 }
0x1c9d   : > { %v5416_v28 = vmul.f32 %v9844_v48, %v5406_v38 }
0x1c9e   : > { %v5359_v35 = vsub.f32 1.5, %v5358_v17 }
0x1c9f   : > { %v5426_v58 = vadd.f32 %v9849_v55, %v5416_v28 }
0x1ca0   : > { %v5360_v1 = vmul.f32 %v7153_v43, %v5359_v35 }
0x1ca1   : > { %6694 = vmatmul.msk.f32.gmra.mxu3 %vm1154_vm6, %v5426_v58 }
0x1ca2   : > { %v5364_v51 = vsel %vm5363_vm10, %v7153_v43, %v5360_v1 }
0x1ca3   : > { %v5407_v11 = vmul.f32 %v5364_v51, %v9793_v20 }
0x1ca5   : > { %v5417_v7 = vmul.f32 %v9844_v48, %v5407_v11 }
0x1ca7   : > { %v5427_v25 = vadd.f32 %v9849_v55, %v5417_v7 }
0x1ca9   : > { %6695 = vmatmul.msk.f32.gmra.mxu3 %vm1154_vm6, %v5427_v25 }
0x1cb3   : > { %v5311_v26 = vpop.xlane.xlu2 %5310 }
0x1cb4   : > { %v5324_v59 = vmul.f32 %v5311_v26, %v7719_v15 }
0x1cb6   : > { %v5331_v14 = vadd.f32 1e-05, %v5324_v59 }
0x1cb8   : > { %7154 = vrsqrt.f32 %v5331_v14  ;;  %vm5371_vm12 = vweird.f32 %v5331_v14 }
0x1cbb   : > { %v5314_v29 = vpop.xlane.xlu1 %5313 }
0x1cbc   : > { %v5325_v39 = vmul.f32 %v5314_v29, %v7719_v15  ;;  %v6889_v29 = vld [vmem:[%s10253_s13 + $0x5] ss:$0 sm:$0xff] }
0x1cbe   : > { %v7155_v46 = vpop.eup %7154  ;;  %v5332_v44 = vadd.f32 1e-05, %v5325_v39 }
0x1cbf   : > { %v5366_v12 = vmul.f32 %v7155_v46, %v5331_v14  ;;  %vm5372_vm11 = vweird.f32 %v7155_v46 }
0x1cc0   : > { %7156 = vrsqrt.f32 %v5332_v44  ;;  %vm5373_vm13 = vmor %vm5371_vm12, %vm5372_vm11  ;;  %vm5381_vm15 = vweird.f32 %v5332_v44 }
0x1cc1   : > { %v5367_v9 = vmul.f32 %v7155_v46, %v5366_v12 }
0x1cc3   : > { %v5368_v20 = vmul.f32 0.5, %v5367_v9  ;;  %v5317_v54 = vpop.xlane.xlu0 %5316 }
0x1cc4   : > { %v5326_v57 = vmul.f32 %v5317_v54, %v7719_v15 }
0x1cc5   : > { %v5369_v10 = vsub.f32 1.5, %v5368_v20 }
0x1cc6   : > { %v7157_v52 = vpop.eup %7156  ;;  %v5333_v13 = vadd.f32 1e-05, %v5326_v57 }
0x1cc7   : > { %v5370_v53 = vmul.f32 %v7155_v46, %v5369_v10  ;;  %v5376_v49 = vmul.f32 %v7157_v52, %v5332_v44  ;;  %vm5382_vm14 = vweird.f32 %v7157_v52 }
0x1cc8   : > { %7158 = vrsqrt.f32 %v5333_v13  ;;  %vm5383_vm0 = vmor %vm5381_vm15, %vm5382_vm14  ;;  %vm5391_vm2 = vweird.f32 %v5333_v13 }
0x1cc9   : > { %v5374_v62 = vsel %vm5373_vm13, %v7155_v46, %v5370_v53  ;;  %v5377_v19 = vmul.f32 %v7157_v52, %v5376_v49 }
0x1cca   : > { %v5408_v41 = vmul.f32 %v5374_v62, %v9800_v61 }
0x1ccb   : > { %v5378_v36 = vmul.f32 0.5, %v5377_v19  ;;  %v5320_v56 = vpop.xlane.xlu2 %5319 }
0x1ccc   : > { %v5327_v60 = vmul.f32 %v5320_v56, %v7719_v15  ;;  %v5418_v34 = vmul.f32 %v9844_v48, %v5408_v41 }
0x1ccd   : > { %v5379_v32 = vsub.f32 1.5, %v5378_v36  ;;  %v7218_v36 = vld [vmem:[%s10296_s3] sm:$0xff] }
0x1cce   : > { %v7159_v47 = vpop.eup %7158  ;;  %v5334_v6 = vadd.f32 1e-05, %v5327_v60  ;;  %v5428_v0 = vadd.f32 %v9849_v55, %v5418_v34 }
0x1ccf   : > { %v5380_v37 = vmul.f32 %v7157_v52, %v5379_v32  ;;  %v5386_v40 = vmul.f32 %v7159_v47, %v5333_v13  ;;  %vm5392_vm1 = vweird.f32 %v7159_v47 }
0x1cd0   : > { %7160 = vrsqrt.f32 %v5334_v6  ;;  %6696 = vmatmul.msk.f32.gmra.mxu3 %vm1154_vm6, %v5428_v0  ;;  %vm5393_vm3 = vmor %vm5391_vm2, %vm5392_vm1  ;;  %vm5401_vm5 = vweird.f32 %v5334_v6 }
0x1cd1   : > { %v5384_v61 = vsel %vm5383_vm0, %v7157_v52, %v5380_v37  ;;  %v5387_v5 = vmul.f32 %v7159_v47, %v5386_v40 }
0x1cd2   : > { %v5409_v3 = vmul.f32 %v5384_v61, %v9807_v8  ;;  %v7220_v61 = vld [vmem:[%s10296_s3 + $0x10] sm:$0xff] }
0x1cd3   : > { %v5388_v27 = vmul.f32 0.5, %v5387_v5 }
0x1cd4   : > { %v5419_v63 = vmul.f32 %v9844_v48, %v5409_v3 }
0x1cd5   : > { %v5389_v43 = vsub.f32 1.5, %v5388_v27 }
0x1cd6   : > { %v7161_v21 = vpop.eup %7160  ;;  %v5429_v30 = vadd.f32 %v9849_v55, %v5419_v63 }
0x1cd7   : > { %v5390_v31 = vmul.f32 %v7159_v47, %v5389_v43  ;;  %v5396_v22 = vmul.f32 %v7161_v21, %v5334_v6  ;;  %vm5402_vm4 = vweird.f32 %v7161_v21  ;;  %v7221_v43 = vld [vmem:[%s10296_s3 + $0x18] sm:$0xff] }
0x1cd8   : > { %6697 = vmatmul.msk.f32.gmra.mxu3 %vm1154_vm6, %v5429_v30  ;;  %vm5403_vm8 = vmor %vm5401_vm5, %vm5402_vm4 }
0x1cd9   : > { %v5394_v33 = vsel %vm5393_vm3, %v7159_v47, %v5390_v31  ;;  %v5397_v38 = vmul.f32 %v7161_v21, %v5396_v22  ;;  %v7219_v47 = vld [vmem:[%s10296_s3 + $0x8] sm:$0xff] }
0x1cda   : > { %v5410_v17 = vmul.f32 %v5394_v33, %v9814_v24  ;;  %v7222_v33 = vld [vmem:[%s10296_s3 + $0x20] sm:$0xff] }
0x1cdb   : > { %v5398_v28 = vmul.f32 0.5, %v5397_v38 }
0x1cdc   : > { %v5420_v8 = vmul.f32 %v9844_v48, %v5410_v17 }
0x1cdd   : > { %v5399_v35 = vsub.f32 1.5, %v5398_v28 }
0x1cde   : > { %v5430_v58 = vadd.f32 %v9849_v55, %v5420_v8 }
0x1cdf   : > { %v5400_v1 = vmul.f32 %v7161_v21, %v5399_v35  ;;  %v7223_v35 = vld [vmem:[%s10296_s3 + $0x28] sm:$0xff] }
0x1ce0   : > { %6698 = vmatmul.msk.f32.gmra.mxu3 %vm1154_vm6, %v5430_v58 }
0x1ce1   : > { %v5404_v51 = vsel %vm5403_vm8, %v7161_v21, %v5400_v1 }
0x1ce2   : > { %v5411_v11 = vmul.f32 %v5404_v51, %v9821_v45 }
0x1ce4   : > { %v5421_v7 = vmul.f32 %v9844_v48, %v5411_v11 }
0x1ce6   : > { %v5431_v25 = vadd.f32 %v9849_v55, %v5421_v7  ;;  %v7224_v7 = vld [vmem:[%s10296_s3 + $0x30] sm:$0xff] }
0x1ce8   : > { %6699 = vmatmul.msk.f32.gmra.mxu3 %vm1154_vm6, %v5431_v25 }
0x1d1c   : > { %v5480_v24 = vpop.f32.mrf.mxu3 }
0x1d1d   : > { %v9906_v20 = vadd.f32 %v6889_v29, %v5480_v24 }
0x1d24   : > { %v5483_v26 = vpop.f32.mrf.mxu3 }
0x1d25   : > { %v9890_v48 = vadd.f32 %v6889_v29, %v5483_v26 }
0x1d2c   : > { %v5486_v59 = vpop.f32.mrf.mxu3 }
0x1d2d   : > { %v9908_v54 = vadd.f32 %v6889_v29, %v5486_v59 }
0x1d53   : > { %v5489_v14 = vpop.f32.mrf.mxu3 }
0x1d54   : > { %v9898_v12 = vadd.f32 %v6889_v29, %v5489_v14 }
0x1d5b   : > { %v5492_v39 = vpop.f32.mrf.mxu3 }
0x1d5c   : > { %v9886_v46 = vadd.f32 %v6889_v29, %v5492_v39 }
0x1d5e   : > { %5516 = vrot.lane.b32.xlu2 %v9886_v46, %s7233_s6  ;;  %v6848_v26 = vpack.i.bf16 %v9898_v12, %v9886_v46 }
0x1d63   : > { %v5495_v45 = vpop.f32.mrf.mxu3 }
0x1d64   : > { %v9892_v55 = vadd.f32 %v6889_v29, %v5495_v45 }
0x1d66   : > { %5518 = vrot.lane.b32.xlu0 %v9892_v55, %s7233_s6  ;;  %5510 = vrot.lane.b32.xlu2 %v9890_v48, %s7233_s6 }
0x1d6b   : > { %v5498_v44 = vpop.f32.mrf.mxu3 }
0x1d6c   : > { %v9900_v9 = vadd.f32 %v6889_v29, %v5498_v44 }
0x1d6e   : > { %5520 = vrot.lane.b32.xlu1 %v9900_v9, %s7233_s6  ;;  %5514 = vrot.lane.b32.xlu0 %v9898_v12, %s7233_s6  ;;  %v6843_v59 = vpack.i.bf16 %v9892_v55, %v9900_v9 }
0x1d76   : > { %5512 = vrot.lane.b32.xlu1 %v9908_v54, %s7233_s6  ;;  %5508 = vrot.lane.b32.xlu0 %v9906_v20, %s7233_s6  ;;  %s793_s6 = scalar_lea.vmem %s10297_s4, %s8603_s1 }
0x1db8   : > { %v5517_v52 = vpop.permute.xlu2 %5516 }
0x1dc0   : > { %v5511_v49 = vpop.permute.xlu2 %5510 }
0x1dd8   : > { %v5519_v10 = vpop.permute.xlu0 %5518 }
0x1de0   : > { %v5521_v57 = vpop.permute.xlu1 %5520  ;;  %v5515_v13 = vpop.permute.xlu0 %5514 }
0x1de1   : > { %6700 = vmatpush.xpose.msk.msrb.mxu2 %vm1154_vm6, %v5521_v57 }
0x1de5   : > { %6701 = vmatpush.xpose.msk.msrb.mxu2 %vm1154_vm6, %v5519_v10 }
0x1de8   : > { %v5513_v53 = vpop.permute.xlu1 %5512  ;;  %v5509_v62 = vpop.permute.xlu0 %5508 }
0x1de9   : > { %6702 = vmatpush.xpose.msk.msrb.mxu2 %vm1154_vm6, %v5517_v52 }
0x1ded   : > { %6703 = vmatpush.xpose.msk.msrb.mxu2 %vm1154_vm6, %v5515_v13 }
0x1df1   : > { %6704 = vmatpush.xpose.msk.msrb.mxu2 %vm1154_vm6, %v5513_v53 }
0x1df5   : > { %6705 = vmatpush.xpose.msk.msrb.mxu2 %vm1154_vm6, %v5511_v49 }
0x1df9   : > { %6706 = vmatpush.xpose.msk.msrb.mxu2 %vm1154_vm6, %v5509_v62 }
0x1dfc   : > { %6707 = vmatmul.msk.f32.vlgmr.msrb.gmra.mxu2 %vm1154_vm6, %v9906_v20 }
0x1e04   : > { %6708 = vmatmul.msk.f32.gmra.mxu2 %vm1154_vm6, %v9890_v48 }
0x1e0c   : > { %6709 = vmatmul.msk.f32.gmra.mxu2 %vm1154_vm6, %v9908_v54 }
0x1e14   : > { %6710 = vmatmul.msk.f32.gmra.mxu2 %vm1154_vm6, %v9898_v12 }
0x1e1c   : > { %6711 = vmatmul.msk.f32.gmra.mxu2 %vm1154_vm6, %v9886_v46 }
0x1e24   : > { %6712 = vmatmul.msk.f32.gmra.mxu2 %vm1154_vm6, %v9892_v55 }
0x1e2c   : > { %6713 = vmatmul.msk.f32.gmra.mxu2 %vm1154_vm6, %v9900_v9 }
0x1e7f   : > { %v5567_v19 = vpop.f32.mrf.mxu2 }
0x1e80   : > { %v5588_v41 = vmul.f32 0.17677669, %v5567_v19 }
0x1e82   : > { %v5595_v56 = vadd.f32 %v7218_v36, %v5588_v41 }
0x1e84   : > { %v5602_v60 = vsel %vm1315_vm7, %v5595_v56, -inf }
0x1e85   : > { %5603 = vmax.xlane.f32.xlu1 %v5602_v60 }
0x1e87   : > { %v5570_v34 = vpop.f32.mrf.mxu2 }
0x1e88   : > { %v5589_v32 = vmul.f32 0.17677669, %v5570_v34 }
0x1e8a   : > { %v5596_v6 = vadd.f32 %v7219_v47, %v5589_v32 }
0x1e8c   : > { %v5605_v0 = vsel %vm1315_vm7, %v5596_v6, -inf }
0x1e8d   : > { %5606 = vmax.xlane.f32.xlu2 %v5605_v0 }
0x1e8f   : > { %v5573_v37 = vpop.f32.mrf.mxu2 }
0x1e90   : > { %v5590_v40 = vmul.f32 0.17677669, %v5573_v37 }
0x1e92   : > { %v5597_v5 = vadd.f32 %v7220_v61, %v5590_v40 }
0x1e94   : > { %v5608_v3 = vsel %vm1315_vm7, %v5597_v5, -inf }
0x1e95   : > { %5609 = vmax.xlane.f32.xlu0 %v5608_v3 }
0x1e97   : > { %v5576_v27 = vpop.f32.mrf.mxu2 }
0x1e98   : > { %v5591_v63 = vmul.f32 0.17677669, %v5576_v27 }
0x1e9a   : > { %v9950_v21 = vadd.f32 %v7221_v43, %v5591_v63 }
0x1e9c   : > { %v5611_v30 = vsel %vm1315_vm7, %v9950_v21, -inf }
0x1e9d   : > { %5612 = vmax.xlane.f32.xlu1 %v5611_v30 }
0x1e9f   : > { %v5579_v31 = vpop.f32.mrf.mxu2 }
0x1ea0   : > { %v5592_v22 = vmul.f32 0.17677669, %v5579_v31 }
0x1ea2   : > { %v9957_v38 = vadd.f32 %v7222_v33, %v5592_v22 }
0x1ea4   : > { %v5614_v17 = vsel %vm1315_vm7, %v9957_v38, -inf }
0x1ea5   : > { %5615 = vmax.xlane.f32.xlu2 %v5614_v17 }
0x1ea7   : > { %v5582_v28 = vpop.f32.mrf.mxu2 }
0x1ea8   : > { %v5593_v8 = vmul.f32 0.17677669, %v5582_v28 }
0x1eaa   : > { %v5600_v58 = vadd.f32 %v7223_v35, %v5593_v8 }
0x1eac   : > { %v5617_v1 = vsel %vm1315_vm7, %v5600_v58, -inf }
0x1ead   : > { %5618 = vmax.xlane.f32.xlu0 %v5617_v1 }
0x1eaf   : > { %v5585_v51 = vpop.f32.mrf.mxu2 }
0x1eb0   : > { %v5594_v11 = vmul.f32 0.17677669, %v5585_v51 }
0x1eb2   : > { %v5601_v25 = vadd.f32 %v7224_v7, %v5594_v11 }
0x1eb4   : > { %v5620_v24 = vsel %vm1315_vm7, %v5601_v25, -inf }
0x1eb5   : > { %5621 = vmax.xlane.f32.xlu1 %v5620_v24 }
0x1ebd   : > { %6849 = vrot.lane.b32.xlu2 %v6848_v26, %s7234_s22 }
0x1ec1   : > { %6844 = vrot.lane.b32.xlu0 %v6843_v59, %s7234_s22 }
0x1ef8   : > { %v5604_v14 = vpop.xlane.xlu1 %5603 }
0x1ef9   : > { %v5623_v29 = vsub.f32 %v5595_v56, %v5604_v14  ;;  %v6853_v56 = vpack.i.bf16 %v9890_v48, %v9908_v54 }
0x1efb   : > { %v5630_v39 = vmul.f32 1.442695, %v5623_v29 }
0x1efd   : > { %7162 = vpow2.f32 %v5630_v39 }
0x1f00   : > { %v5607_v45 = vpop.xlane.xlu2 %5606 }
0x1f01   : > { %v5624_v44 = vsub.f32 %v5596_v6, %v5607_v45 }
0x1f03   : > { %v9975_v57 = vpop.eup %7162  ;;  %v5632_v10 = vmul.f32 1.442695, %v5624_v44 }
0x1f04   : > { %v5644_v52 = vsel %vm1315_vm7, %v9975_v57, 0.0 }
0x1f05   : > { %7164 = vpow2.f32 %v5632_v10  ;;  %5645 = vadd.xlane.f32.xlu2 %v5644_v52 }
0x1f08   : > { %v5610_v46 = vpop.xlane.xlu0 %5609 }
0x1f09   : > { %v5625_v12 = vsub.f32 %v5597_v5, %v5610_v46 }
0x1f0b   : > { %v9979_v13 = vpop.eup %7164  ;;  %v5634_v55 = vmul.f32 1.442695, %v5625_v12 }
0x1f0c   : > { %v5647_v9 = vsel %vm1315_vm7, %v9979_v13, 0.0 }
0x1f0d   : > { %7166 = vpow2.f32 %v5634_v55  ;;  %5648 = vadd.xlane.f32.xlu1 %v5647_v9 }
0x1f10   : > { %v5613_v62 = vpop.xlane.xlu1 %5612 }
0x1f11   : > { %v5626_v43 = vsub.f32 %v9950_v21, %v5613_v62 }
0x1f13   : > { %v9983_v53 = vpop.eup %7166  ;;  %v5636_v31 = vmul.f32 1.442695, %v5626_v43 }
0x1f14   : > { %v5650_v49 = vsel %vm1315_vm7, %v9983_v53, 0.0 }
0x1f15   : > { %5651 = vadd.xlane.f32.xlu0 %v5650_v49 }
0x1f18   : > { %v5616_v47 = vpop.xlane.xlu2 %5615 }
0x1f19   : > { %v5627_v40 = vsub.f32 %v9957_v38, %v5616_v47 }
0x1f1b   : > { %v5638_v3 = vmul.f32 1.442695, %v5627_v40 }
0x1f1d   : > { %5770 = vrot.lane.b32.xlu2 %v9906_v20, %s7234_s22 }
0x1f20   : > { %v5619_v19 = vpop.xlane.xlu0 %5618  ;;  %v6850_v61 = vpop.permute.xlu2 %6849 }
0x1f21   : > { %v5628_v41 = vsub.f32 %v5600_v58, %v5619_v19  ;;  %v6851_v27 = vunpack.i.l.bf16 %v6850_v61  ;;  %v6852_v63 = vunpack.i.h.bf16 %v6850_v61 }
0x1f23   : > { %v5640_v36 = vmul.f32 1.442695, %v5628_v41 }
0x1f25   : > { %7168 = vpow2.f32 %v5640_v36 }
0x1f26   : > { %6854 = vrot.lane.b32.xlu1 %v6853_v56, %s7234_s22 }
0x1f28   : > { %v5622_v60 = vpop.xlane.xlu1 %5621 }
0x1f29   : > { %v5629_v34 = vsub.f32 %v5601_v25, %v5622_v60 }
0x1f2b   : > { %v9992_v32 = vpop.eup %7168  ;;  %v5642_v6 = vmul.f32 1.442695, %v5629_v34 }
0x1f2c   : > { %v5659_v0 = vsel %vm1315_vm7, %v9992_v32, 0.0 }
0x1f2d   : > { %7170 = vpow2.f32 %v5642_v6  ;;  %5660 = vadd.xlane.f32.xlu0 %v5659_v0 }
0x1f2e   : > { %7172 = vpow2.f32 %v5638_v3 }
0x1f2f   : > { %7174 = vpow2.f32 %v5636_v31 }
0x1f33   : > { %v9996_v20 = vpop.eup %7170  ;;  %v6845_v37 = vpop.permute.xlu0 %6844 }
0x1f34   : > { %v6846_v48 = vunpack.i.l.bf16 %v6845_v37  ;;  %v5662_v54 = vsel %vm1315_vm7, %v9996_v20, 0.0  ;;  %v6847_v5 = vunpack.i.h.bf16 %v6845_v37  ;;  %v10002_v30 = vpop.eup %7172 }
0x1f35   : > { %5663 = vadd.xlane.f32.xlu0 %v5662_v54  ;;  %v5656_v22 = vsel %vm1315_vm7, %v10002_v30, 0.0  ;;  %v10006_v33 = vpop.eup %7174 }
0x1f36   : > { %5821 = vmatpush.msrb.mxu1 %v6846_v48  ;;  %v5653_v38 = vsel %vm1315_vm7, %v10006_v33, 0.0 }
0x1f38   : > { %5822 = vmatpush.msrb.mxu1 %v6847_v5 }
0x1f3a   : > { %5823 = vmatpush.msrb.mxu1 %v6851_v27 }
0x1f3c   : > { %5824 = vmatpush.msrb.mxu1 %v6852_v63 }
0x1f46   : > { %5657 = vadd.xlane.f32.xlu2 %v5656_v22 }
0x1f50   : > { %5654 = vadd.xlane.f32.xlu1 %v5653_v38 }
0x1f78   : > { %v5646_v17 = vpop.xlane.xlu2 %5645 }
0x1f79   : > { %7176 = vrcp.f32 %v5646_v17  ;;  %v5676_v26 = vand.u32 2147483648, %v5646_v17  ;;  %vm5670_vm10 = vweird.f32 %v5646_v17  ;;  %v5674_v59 = vand.u32 2147483647, %v5646_v17 }
0x1f7b   : > { %v5677_v44 = vor.u32 1.1754944e-38, %v5676_v26  ;;  %vm5675_vm12 = vcmp.eq.f32.partialorder %v5674_v59, 8.507059e+37 }
0x1f7f   : > { %v7177_v8 = vpop.eup %7176 }
0x1f80   : > { %v5649_v28 = vpop.xlane.xlu1 %5648  ;;  %v5666_v21 = vmul.f32 %v7177_v8, %v5646_v17  ;;  %vm5671_vm9 = vweird.f32 %v7177_v8  ;;  %v5771_v62 = vpop.permute.xlu2 %5770 }
0x1f81   : > { %7178 = vrcp.f32 %v5649_v28  ;;  %vm5672_vm11 = vmor %vm5670_vm10, %vm5671_vm9  ;;  %v5691_v9 = vand.u32 2147483648, %v5649_v28  ;;  %vm5685_vm14 = vweird.f32 %v5649_v28  ;;  %v5689_v19 = vand.u32 2147483647, %v5649_v28 }
0x1f82   : > { %v5667_v35 = vsub.f32 1.0, %v5666_v21 }
0x1f83   : > { %v5692_v56 = vor.u32 1.1754944e-38, %v5691_v9  ;;  %vm5690_vm0 = vcmp.eq.f32.partialorder %v5689_v19, 8.507059e+37 }
0x1f84   : > { %v5668_v51 = vmul.f32 %v7177_v8, %v5667_v35 }
0x1f86   : > { %v5669_v7 = vadd.f32 %v7177_v8, %v5668_v51 }
0x1f87   : > { %v7179_v1 = vpop.eup %7178 }
0x1f88   : > { %v5652_v58 = vpop.xlane.xlu0 %5651  ;;  %v5681_v11 = vmul.f32 %v7179_v1, %v5649_v28  ;;  %v5673_v14 = vsel %vm5672_vm11, %v7177_v8, %v5669_v7  ;;  %vm5686_vm13 = vweird.f32 %v7179_v1 }
0x1f89   : > { %7180 = vrcp.f32 %v5652_v58  ;;  %v5678_v52 = vsel %vm5675_vm12, %v5677_v44, %v5673_v14  ;;  %vm5687_vm15 = vmor %vm5685_vm14, %vm5686_vm13  ;;  %v5706_v47 = vand.u32 2147483648, %v5652_v58  ;;  %vm5700_vm2 = vweird.f32 %v5652_v58 }
0x1f8a   : > { %v5682_v25 = vsub.f32 1.0, %v5681_v11  ;;  %v5679_v49 = vmul.f32 %v9975_v57, %v5678_v52  ;;  %v5704_v6 = vand.u32 2147483647, %v5652_v58 }
0x1f8b   : > { %v5707_v37 = vor.u32 1.1754944e-38, %v5706_v47 }
0x1f8c   : > { %v5683_v29 = vmul.f32 %v7179_v1, %v5682_v25  ;;  %vm5705_vm4 = vcmp.eq.f32.partialorder %v5704_v6, 8.507059e+37 }
0x1f8e   : > { %v5684_v12 = vadd.f32 %v7179_v1, %v5683_v29 }
0x1f8f   : > { %v7181_v24 = vpop.eup %7180 }
0x1f90   : > { %v5696_v39 = vmul.f32 %v7181_v24, %v5652_v58  ;;  %v5688_v36 = vsel %vm5687_vm15, %v7179_v1, %v5684_v12  ;;  %vm5701_vm1 = vweird.f32 %v7181_v24 }
0x1f91   : > { %v5693_v60 = vsel %vm5690_vm0, %v5692_v56, %v5688_v36  ;;  %vm5702_vm3 = vmor %vm5700_vm2, %vm5701_vm1 }
0x1f92   : > { %v5697_v55 = vsub.f32 1.0, %v5696_v39  ;;  %v5694_v0 = vmul.f32 %v9979_v13, %v5693_v60 }
0x1f94   : > { %v5698_v41 = vmul.f32 %v7181_v24, %v5697_v55 }
0x1f96   : > { %v5699_v34 = vadd.f32 %v7181_v24, %v5698_v41 }
0x1f98   : > { %v6855_v45 = vpop.permute.xlu1 %6854  ;;  %v5703_v57 = vsel %vm5702_vm3, %v7181_v24, %v5699_v34 }
0x1f99   : > { %v6856_v10 = vunpack.i.l.bf16 %v6855_v45  ;;  %v6857_v46 = vunpack.i.h.bf16 %v6855_v45  ;;  %v5708_v40 = vsel %vm5705_vm4, %v5707_v37, %v5703_v57 }
0x1f9a   : > { %v5709_v48 = vmul.f32 %v9983_v53, %v5708_v40 }
0x1f9b   : > { %5825 = vmatpush.msrb.mxu1 %v6856_v10 }
0x1f9d   : > { %5826 = vmatpush.msrb.mxu1 %v6857_v46 }
0x1f9f   : > { %5827 = vmatpush.msrb.mxu1 %v5771_v62 }
0x1fa0   : > { %6714 = vmatmul.msk.f32.vlgmr.msrb.gmra.mxu1 %vm1315_vm7, %v5679_v49  ;;  %v5661_v61 = vpop.xlane.xlu0 %5660 }
0x1fa1   : > { %v5751_v46 = vand.u32 2147483648, %v5661_v61  ;;  %vm5745_vm0 = vweird.f32 %v5661_v61  ;;  %v5749_v12 = vand.u32 2147483647, %v5661_v61 }
0x1fa3   : > { %v5752_v49 = vor.u32 1.1754944e-38, %v5751_v46  ;;  %vm5750_vm2 = vcmp.eq.f32.partialorder %v5749_v12, 8.507059e+37 }
0x1fa8   : > { %6715 = vmatmul.msk.f32.gmra.mxu1 %vm1315_vm7, %v5694_v0  ;;  %v5664_v43 = vpop.xlane.xlu0 %5663 }
0x1fa9   : > { %v5766_v41 = vand.u32 2147483648, %v5664_v43  ;;  %vm5760_vm4 = vweird.f32 %v5664_v43  ;;  %v5764_v36 = vand.u32 2147483647, %v5664_v43 }
0x1fb0   : > { %6716 = vmatmul.msk.f32.gmra.mxu1 %vm1315_vm7, %v5709_v48 }
0x1fb9   : > { %v5658_v54 = vpop.xlane.xlu2 %5657 }
0x1fba   : > { %7182 = vrcp.f32 %v5658_v54  ;;  %v5736_v25 = vand.u32 2147483648, %v5658_v54  ;;  %vm5730_vm12 = vweird.f32 %v5658_v54  ;;  %v5734_v26 = vand.u32 2147483647, %v5658_v54 }
0x1fbc   : > { %v5737_v45 = vor.u32 1.1754944e-38, %v5736_v25  ;;  %vm5735_vm14 = vcmp.eq.f32.partialorder %v5734_v26, 8.507059e+37 }
0x1fc0   : > { %v7183_v3 = vpop.eup %7182 }
0x1fc1   : > { %v5726_v27 = vmul.f32 %v7183_v3, %v5658_v54  ;;  %vm5731_vm10 = vweird.f32 %v7183_v3 }
0x1fc2   : > { %vm5732_vm13 = vmor %vm5730_vm12, %vm5731_vm10 }
0x1fc3   : > { %v5655_v5 = vpop.xlane.xlu1 %5654  ;;  %v5727_v31 = vsub.f32 1.0, %v5726_v27 }
0x1fc4   : > { %7184 = vrcp.f32 %v5655_v5  ;;  %v5721_v28 = vand.u32 2147483648, %v5655_v5  ;;  %v5719_v21 = vand.u32 2147483647, %v5655_v5  ;;  %vm5715_vm8 = vweird.f32 %v5655_v5 }
0x1fc5   : > { %7186 = vrcp.f32 %v5661_v61  ;;  %v5728_v53 = vmul.f32 %v7183_v3, %v5727_v31 }
0x1fc6   : > { %7188 = vrcp.f32 %v5664_v43  ;;  %v5722_v1 = vor.u32 1.1754944e-38, %v5721_v28  ;;  %vm5720_vm11 = vcmp.eq.f32.partialorder %v5719_v21, 8.507059e+37 }
0x1fc7   : > { %v5729_v51 = vadd.f32 %v7183_v3, %v5728_v53 }
0x1fc9   : > { %v5733_v39 = vsel %vm5732_vm13, %v7183_v3, %v5729_v51 }
0x1fca   : > { %v7185_v13 = vpop.eup %7184  ;;  %v5738_v44 = vsel %vm5735_vm14, %v5737_v45, %v5733_v39 }
0x1fcb   : > { %v7187_v63 = vpop.eup %7186  ;;  %v5711_v22 = vmul.f32 %v7185_v13, %v5655_v5  ;;  %vm5716_vm5 = vweird.f32 %v7185_v13  ;;  %v5739_v55 = vmul.f32 %v10002_v30, %v5738_v44  ;;  %v5767_v30 = vor.u32 1.1754944e-38, %v5766_v41  ;;  %v6726_v41 = vld [vmem:[%s10254_s14 + $0xb8] sm:$0xff] }
0x1fcc   : > { %v5741_v17 = vmul.f32 %v7187_v63, %v5661_v61  ;;  %vm5717_vm9 = vmor %vm5715_vm8, %vm5716_vm5  ;;  %v7189_v7 = vpop.eup %7188  ;;  %vm5746_vm15 = vweird.f32 %v7187_v63  ;;  %vm5765_vm8 = vcmp.eq.f32.partialorder %v5764_v36, 8.507059e+37  ;;  %6078 = vmatpush.msra.mxu0 %v6726_v41  ;;  %v6725_v36 = vld [vmem:[%s10254_s14 + $0xb0] sm:$0xff] }
0x1fcd   : > { %v5712_v38 = vsub.f32 1.0, %v5711_v22  ;;  %v5756_v29 = vmul.f32 %v7189_v7, %v5664_v43  ;;  %vm5747_vm1 = vmor %vm5745_vm0, %vm5746_vm15  ;;  %vm5761_vm3 = vweird.f32 %v7189_v7 }
0x1fce   : > { %v5742_v58 = vsub.f32 1.0, %v5741_v17  ;;  %vm5762_vm5 = vmor %vm5760_vm4, %vm5761_vm3  ;;  %6079 = vmatpush.msra.mxu0 %v6725_v36 }
0x1fcf   : > { %v5713_v8 = vmul.f32 %v7185_v13, %v5712_v38  ;;  %v5757_v52 = vsub.f32 1.0, %v5756_v29 }
0x1fd0   : > { %v5743_v14 = vmul.f32 %v7187_v63, %v5742_v58 }
0x1fd1   : > { %v5714_v35 = vadd.f32 %v7185_v13, %v5713_v8  ;;  %v5758_v9 = vmul.f32 %v7189_v7, %v5757_v52 }
0x1fd2   : > { %v5744_v10 = vadd.f32 %v7187_v63, %v5743_v14 }
0x1fd3   : > { %v5718_v11 = vsel %vm5717_vm9, %v7185_v13, %v5714_v35  ;;  %v5759_v19 = vadd.f32 %v7189_v7, %v5758_v9 }
0x1fd4   : > { %v5723_v24 = vsel %vm5720_vm11, %v5722_v1, %v5718_v11 }
0x1fd5   : > { %v5724_v59 = vmul.f32 %v10006_v33, %v5723_v24  ;;  %v5748_v33 = vsel %vm5747_vm1, %v7187_v63, %v5744_v10  ;;  %v5763_v60 = vsel %vm5762_vm5, %v7189_v7, %v5759_v19 }
0x1fd6   : > { %v5753_v62 = vsel %vm5750_vm2, %v5752_v49, %v5748_v33  ;;  %v5768_v34 = vsel %vm5765_vm8, %v5767_v30, %v5763_v60  ;;  %v6723_v60 = vld [vmem:[%s10254_s14 + $0xa0] sm:$0xff] }
0x1fd7   : > { %6717 = vmatmul.msk.f32.gmra.mxu1 %vm1315_vm7, %v5724_v59  ;;  %v5754_v56 = vmul.f32 %v9992_v32, %v5753_v62  ;;  %v5769_v47 = vmul.f32 %v9996_v20, %v5768_v34 }
0x1fdf   : > { %6718 = vmatmul.msk.f32.gmra.mxu1 %vm1315_vm7, %v5739_v55 }
0x1fe7   : > { %6719 = vmatmul.msk.f32.gmra.mxu1 %vm1315_vm7, %v5754_v56  ;;  %v6724_v56 = vld [vmem:[%s10254_s14 + $0xa8] sm:$0xff] }
0x1fe8   : > { %6080 = vmatpush.msra.mxu0 %v6724_v56 }
0x1fea   : > { %6081 = vmatpush.msra.mxu0 %v6723_v60 }
0x1fef   : > { %6720 = vmatmul.msk.f32.gmra.mxu1 %vm1315_vm7, %v5769_v47 }
0x201d   : > { %v5829_v6 = vpop.f32.mrf.mxu1 }
0x201e   : > { %v10025_v0 = vadd.f32 %v5829_v6, %v9743_v16 }
0x2020   : > { %v5861_v57 = vsel %vm1154_vm6, %v10025_v0, 0.0 }
0x2021   : > { %5862 = vadd.xlane.f32.xlu1 %v5861_v57 }
0x2025   : > { %v5832_v32 = vpop.f32.mrf.mxu1 }
0x2026   : > { %v10030_v37 = vadd.f32 %v5832_v32, %v9748_v23 }
0x2028   : > { %v5864_v40 = vsel %vm1154_vm6, %v10030_v37, 0.0 }
0x2029   : > { %5865 = vadd.xlane.f32.xlu0 %v5864_v40 }
0x202d   : > { %v5835_v48 = vpop.f32.mrf.mxu1 }
0x202e   : > { %v10035_v20 = vadd.f32 %v5835_v48, %v9753_v42 }
0x2030   : > { %v5867_v16 = vsel %vm1154_vm6, %v10035_v20, 0.0 }
0x2031   : > { %5868 = vadd.xlane.f32.xlu2 %v5867_v16 }
0x2054   : > { %v5838_v54 = vpop.f32.mrf.mxu1 }
0x2055   : > { %v10040_v61 = vadd.f32 %v5838_v54, %v9758_v18 }
0x2057   : > { %v5870_v23 = vsel %vm1154_vm6, %v10040_v61, 0.0 }
0x2058   : > { %5871 = vadd.xlane.f32.xlu1 %v5870_v23 }
0x205c   : > { %v5841_v5 = vpop.f32.mrf.mxu1 }
0x205d   : > { %v10045_v3 = vadd.f32 %v5841_v5, %v9763_v50 }
0x205f   : > { %v5873_v42 = vsel %vm1154_vm6, %v10045_v3, 0.0 }
0x2060   : > { %5874 = vadd.xlane.f32.xlu0 %v5873_v42 }
0x2064   : > { %v5844_v27 = vpop.f32.mrf.mxu1 }
0x2065   : > { %v10050_v13 = vadd.f32 %v5844_v27, %v9768_v4 }
0x2067   : > { %v5876_v18 = vsel %vm1154_vm6, %v10050_v13, 0.0 }
0x2068   : > { %5877 = vadd.xlane.f32.xlu2 %v5876_v18 }
0x206c   : > { %v5847_v63 = vpop.f32.mrf.mxu1 }
0x206d   : > { %v10055_v43 = vadd.f32 %v5847_v63, %v9773_v2 }
0x206f   : > { %v5879_v50 = vsel %vm1154_vm6, %v10055_v43, 0.0 }
0x2070   : > { %5880 = vadd.xlane.f32.xlu0 %v5879_v50 }
0x2094   : > { %v5863_v31 = vpop.xlane.xlu1 %5862 }
0x2095   : > { %v5882_v22 = vmul.f32 %v5863_v31, %v7719_v15  ;;  %v10126_v31 = vld [vmem:[%s10260_s20 + $0x5] ss:$0 sm:$0xff] }
0x2097   : > { %v10061_v38 = vsub.f32 %v10025_v0, %v5882_v22 }
0x2099   : > { %v5896_v4 = vmul.f32 %v10061_v38, %v10061_v38 }
0x209b   : > { %v5903_v17 = vsel %vm1154_vm6, %v5896_v4, 0.0 }
0x209c   : > { %v5866_v28 = vpop.xlane.xlu0 %5865  ;;  %5904 = vadd.xlane.f32.xlu1 %v5903_v17  ;;  %v10131_v17 = vld [vmem:[%s10261_s21 + $0x5] ss:$0 sm:$0xff] }
0x209d   : > { %v5883_v2 = vmul.f32 %v5866_v28, %v7719_v15 }
0x209f   : > { %v10068_v53 = vsub.f32 %v10030_v37, %v5883_v2 }
0x20a1   : > { %v5897_v8 = vmul.f32 %v10068_v53, %v10068_v53 }
0x20a3   : > { %v5906_v21 = vsel %vm1154_vm6, %v5897_v8, 0.0 }
0x20a4   : > { %v5869_v35 = vpop.xlane.xlu2 %5868  ;;  %5907 = vadd.xlane.f32.xlu2 %v5906_v21 }
0x20a5   : > { %v5884_v58 = vmul.f32 %v5869_v35, %v7719_v15 }
0x20a7   : > { %v10075_v1 = vsub.f32 %v10035_v20, %v5884_v58 }
0x20a9   : > { %v5898_v51 = vmul.f32 %v10075_v1, %v10075_v1 }
0x20ab   : > { %v5909_v11 = vsel %vm1154_vm6, %v5898_v51, 0.0 }
0x20ac   : > { %5910 = vadd.xlane.f32.xlu1 %v5909_v11 }
0x20cb   : > { %v5872_v7 = vpop.xlane.xlu1 %5871 }
0x20cc   : > { %v5885_v25 = vmul.f32 %v5872_v7, %v7719_v15 }
0x20ce   : > { %v10082_v24 = vsub.f32 %v10040_v61, %v5885_v25 }
0x20d0   : > { %v5899_v26 = vmul.f32 %v10082_v24, %v10082_v24 }
0x20d2   : > { %v5912_v59 = vsel %vm1154_vm6, %v5899_v26, 0.0 }
0x20d3   : > { %v5875_v14 = vpop.xlane.xlu0 %5874  ;;  %5913 = vadd.xlane.f32.xlu0 %v5912_v59 }
0x20d4   : > { %v5886_v29 = vmul.f32 %v5875_v14, %v7719_v15 }
0x20d6   : > { %v10089_v39 = vsub.f32 %v10045_v3, %v5886_v29 }
0x20d8   : > { %v5900_v45 = vmul.f32 %v10089_v39, %v10089_v39 }
0x20da   : > { %v5915_v44 = vsel %vm1154_vm6, %v5900_v45, 0.0 }
0x20db   : > { %5916 = vadd.xlane.f32.xlu2 %v5915_v44  ;;  %v5878_v10 = vpop.xlane.xlu2 %5877 }
0x20dc   : > { %v5887_v52 = vmul.f32 %v5878_v10, %v7719_v15 }
0x20de   : > { %v10096_v46 = vsub.f32 %v10050_v13, %v5887_v52 }
0x20e0   : > { %v5901_v12 = vmul.f32 %v10096_v46, %v10096_v46 }
0x20e2   : > { %v5918_v55 = vsel %vm1154_vm6, %v5901_v12, 0.0 }
0x20e3   : > { %5919 = vadd.xlane.f32.xlu1 %v5918_v55  ;;  %v5881_v9 = vpop.xlane.xlu0 %5880 }
0x20e4   : > { %v5888_v33 = vmul.f32 %v5881_v9, %v7719_v15 }
0x20e6   : > { %v10103_v49 = vsub.f32 %v10055_v43, %v5888_v33 }
0x20e8   : > { %v5902_v62 = vmul.f32 %v10103_v49, %v10103_v49 }
0x20ea   : > { %v5921_v19 = vsel %vm1154_vm6, %v5902_v62, 0.0 }
0x20eb   : > { %5922 = vadd.xlane.f32.xlu0 %v5921_v19 }
0x210f   : > { %v5905_v30 = vpop.xlane.xlu1 %5904 }
0x2110   : > { %v5924_v34 = vmul.f32 %v5905_v30, %v7719_v15 }
0x2112   : > { %v5931_v47 = vadd.f32 1e-05, %v5924_v34 }
0x2114   : > { %7190 = vrsqrt.f32 %v5931_v47  ;;  %vm5944_vm9 = vweird.f32 %v5931_v47 }
0x2117   : > { %v5908_v6 = vpop.xlane.xlu2 %5907 }
0x2118   : > { %v5925_v57 = vmul.f32 %v5908_v6, %v7719_v15 }
0x211a   : > { %v7191_v32 = vpop.eup %7190  ;;  %v5932_v40 = vadd.f32 1e-05, %v5925_v57 }
0x211b   : > { %v5939_v48 = vmul.f32 %v7191_v32, %v5931_v47  ;;  %vm5945_vm7 = vweird.f32 %v7191_v32 }
0x211c   : > { %7192 = vrsqrt.f32 %v5932_v40  ;;  %vm5946_vm10 = vmor %vm5944_vm9, %vm5945_vm7  ;;  %vm5954_vm12 = vweird.f32 %v5932_v40 }
0x211d   : > { %v5940_v16 = vmul.f32 %v7191_v32, %v5939_v48  ;;  %v6749_v48 = vld [vmem:[%s10256_s16 + $0x2f0] sm:$0xff] }
0x211f   : > { %v5941_v54 = vmul.f32 0.5, %v5940_v16  ;;  %v5911_v23 = vpop.xlane.xlu1 %5910 }
0x2120   : > { %v5926_v5 = vmul.f32 %v5911_v23, %v7719_v15 }
0x2121   : > { %v5942_v42 = vsub.f32 1.5, %v5941_v54 }
0x2122   : > { %v7193_v27 = vpop.eup %7192  ;;  %v5933_v18 = vadd.f32 1e-05, %v5926_v5  ;;  %v6748_v5 = vld [vmem:[%s10256_s16 + $0x2e8] sm:$0xff] }
0x2123   : > { %v5943_v63 = vmul.f32 %v7191_v32, %v5942_v42  ;;  %v5949_v50 = vmul.f32 %v7193_v27, %v5932_v40  ;;  %vm5955_vm11 = vweird.f32 %v7193_v27  ;;  %v6750_v40 = vld [vmem:[%s10256_s16 + $0x2f8] sm:$0xff] }
0x2124   : > { %7194 = vrsqrt.f32 %v5933_v18  ;;  %vm5956_vm13 = vmor %vm5954_vm12, %vm5955_vm11  ;;  %vm5964_vm15 = vweird.f32 %v5933_v18  ;;  %6133 = vmatpush.msra.mxu3 %v6750_v40 }
0x2125   : > { %v5947_v22 = vsel %vm5946_vm10, %v7191_v32, %v5943_v63  ;;  %v5950_v4 = vmul.f32 %v7193_v27, %v5949_v50  ;;  %v6747_v50 = vld [vmem:[%s10256_s16 + $0x2e0] sm:$0xff] }
0x2126   : > { %v6008_v28 = vmul.f32 %v5947_v22, %v10061_v38  ;;  %6134 = vmatpush.msra.mxu3 %v6749_v48 }
0x2127   : > { %v5951_v2 = vmul.f32 0.5, %v5950_v4 }
0x2128   : > { %v6018_v8 = vmul.f32 %v10126_v31, %v6008_v28  ;;  %6135 = vmatpush.msra.mxu3 %v6748_v5 }
0x2129   : > { %v5952_v21 = vsub.f32 1.5, %v5951_v2  ;;  %v6746_v2 = vld [vmem:[%s10256_s16 + $0x2d8] sm:$0xff] }
0x212a   : > { %v7195_v35 = vpop.eup %7194  ;;  %v6028_v58 = vadd.f32 %v10131_v17, %v6018_v8  ;;  %6136 = vmatpush.msra.mxu3 %v6747_v50 }
0x212b   : > { %v5953_v51 = vmul.f32 %v7193_v27, %v5952_v21  ;;  %v5959_v11 = vmul.f32 %v7195_v35, %v5933_v18  ;;  %vm5965_vm14 = vweird.f32 %v7195_v35  ;;  %v6745_v21 = vld [vmem:[%s10256_s16 + $0x2d0] sm:$0xff] }
0x212c   : > { %6728 = vmatmul.msk.f32.vlgmr.msra.gmra.mxu0 %vm1154_vm6, %v6028_v58  ;;  %vm5966_vm0 = vmor %vm5964_vm15, %vm5965_vm14  ;;  %6137 = vmatpush.msra.mxu3 %v6746_v2 }
0x212d   : > { %v5957_v7 = vsel %vm5956_vm13, %v7193_v27, %v5953_v51  ;;  %v5960_v25 = vmul.f32 %v7195_v35, %v5959_v11  ;;  %v6744_v11 = vld [vmem:[%s10256_s16 + $0x2c8] sm:$0xff] }
0x212e   : > { %v6009_v26 = vmul.f32 %v5957_v7, %v10068_v53  ;;  %6138 = vmatpush.msra.mxu3 %v6745_v21 }
0x212f   : > { %v5961_v59 = vmul.f32 0.5, %v5960_v25 }
0x2130   : > { %v6019_v38 = vmul.f32 %v10126_v31, %v6009_v26  ;;  %v6743_v26 = vld [vmem:[%s10256_s16 + $0x2c0] sm:$0xff]  ;;  %6139 = vmatpush.msra.mxu3 %v6744_v11 }
0x2131   : > { %v5962_v14 = vsub.f32 1.5, %v5961_v59 }
0x2132   : > { %v6029_v29 = vadd.f32 %v10131_v17, %v6019_v38  ;;  %6140 = vmatpush.msra.mxu3 %v6743_v26 }
0x2133   : > { %v5963_v45 = vmul.f32 %v7195_v35, %v5962_v14 }
0x2134   : > { %6729 = vmatmul.msk.f32.gmra.mxu0 %vm1154_vm6, %v6029_v29 }
0x2135   : > { %v5967_v44 = vsel %vm5966_vm0, %v7195_v35, %v5963_v45 }
0x2136   : > { %v6010_v10 = vmul.f32 %v5967_v44, %v10075_v1  ;;  %v6741_v44 = vld [vmem:[%s10256_s16 + $0x2b0] sm:$0xff] }
0x2138   : > { %v6020_v52 = vmul.f32 %v10126_v31, %v6010_v10 }
0x213a   : > { %v6030_v12 = vadd.f32 %v10131_v17, %v6020_v52 }
0x213c   : > { %6730 = vmatmul.msk.f32.gmra.mxu0 %vm1154_vm6, %v6030_v12 }
0x2146   : > { %v5914_v53 = vpop.xlane.xlu0 %5913 }
0x2147   : > { %v5927_v55 = vmul.f32 %v5914_v53, %v7719_v15  ;;  %v6740_v53 = vld [vmem:[%s10256_s16 + $0x2a8] sm:$0xff] }
0x2149   : > { %v5934_v9 = vadd.f32 1e-05, %v5927_v55 }
0x214b   : > { %7196 = vrsqrt.f32 %v5934_v9  ;;  %vm5974_vm2 = vweird.f32 %v5934_v9 }
0x214e   : > { %v5917_v33 = vpop.xlane.xlu2 %5916 }
0x214f   : > { %v5928_v62 = vmul.f32 %v5917_v33, %v7719_v15  ;;  %v6739_v33 = vld [vmem:[%s10256_s16 + $0x2a0] sm:$0xff] }
0x2151   : > { %v7197_v19 = vpop.eup %7196  ;;  %v5935_v41 = vadd.f32 1e-05, %v5928_v62 }
0x2152   : > { %v5969_v36 = vmul.f32 %v7197_v19, %v5934_v9  ;;  %vm5975_vm1 = vweird.f32 %v7197_v19 }
0x2153   : > { %7198 = vrsqrt.f32 %v5935_v41  ;;  %vm5976_vm3 = vmor %vm5974_vm2, %vm5975_vm1  ;;  %vm5984_vm5 = vweird.f32 %v5935_v41 }
0x2154   : > { %v5970_v56 = vmul.f32 %v7197_v19, %v5969_v36 }
0x2156   : > { %v5971_v1 = vmul.f32 0.5, %v5970_v56  ;;  %v5920_v60 = vpop.xlane.xlu1 %5919 }
0x2157   : > { %v5929_v30 = vmul.f32 %v5920_v60, %v7719_v15 }
0x2158   : > { %v5972_v34 = vsub.f32 1.5, %v5971_v1 }
0x2159   : > { %v7199_v47 = vpop.eup %7198  ;;  %v5936_v6 = vadd.f32 1e-05, %v5929_v30  ;;  %v6737_v30 = vld [vmem:[%s10256_s16 + $0x290] sm:$0xff] }
0x215a   : > { %v5973_v57 = vmul.f32 %v7197_v19, %v5972_v34  ;;  %v5979_v32 = vmul.f32 %v7199_v47, %v5935_v41  ;;  %vm5985_vm4 = vweird.f32 %v7199_v47  ;;  %v6736_v34 = vld [vmem:[%s10256_s16 + $0x288] sm:$0xff] }
0x215b   : > { %7200 = vrsqrt.f32 %v5936_v6  ;;  %vm5986_vm8 = vmor %vm5984_vm5, %vm5985_vm4  ;;  %vm5994_vm9 = vweird.f32 %v5936_v6 }
0x215c   : > { %v5977_v16 = vsel %vm5976_vm3, %v7197_v19, %v5973_v57  ;;  %v5980_v54 = vmul.f32 %v7199_v47, %v5979_v32 }
0x215d   : > { %v6011_v23 = vmul.f32 %v5977_v16, %v10082_v24 }
0x215e   : > { %v5981_v42 = vmul.f32 0.5, %v5980_v54  ;;  %v5923_v27 = vpop.xlane.xlu0 %5922 }
0x215f   : > { %v5930_v18 = vmul.f32 %v5923_v27, %v7719_v15  ;;  %v6021_v63 = vmul.f32 %v10126_v31, %v6011_v23 }
0x2160   : > { %v5982_v22 = vsub.f32 1.5, %v5981_v42 }
0x2161   : > { %v7201_v4 = vpop.eup %7200  ;;  %v5937_v24 = vadd.f32 1e-05, %v5930_v18  ;;  %v6031_v28 = vadd.f32 %v10131_v17, %v6021_v63 }
0x2162   : > { %v5983_v8 = vmul.f32 %v7199_v47, %v5982_v22  ;;  %v5989_v15 = vmul.f32 %v7201_v4, %v5936_v6  ;;  %vm5995_vm7 = vweird.f32 %v7201_v4 }
0x2163   : > { %7202 = vrsqrt.f32 %v5937_v24  ;;  %6731 = vmatmul.msk.f32.gmra.mxu0 %vm1154_vm6, %v6031_v28  ;;  %vm5996_vm10 = vmor %vm5994_vm9, %vm5995_vm7  ;;  %vm6004_vm12 = vweird.f32 %v5937_v24 }
0x2164   : > { %v5987_v35 = vsel %vm5986_vm8, %v7199_v47, %v5983_v8  ;;  %v5990_v58 = vmul.f32 %v7201_v4, %v5989_v15  ;;  %v6893_v8 = vld [vmem:[%s10257_s17 + $0x5] ss:$0 sm:$0xff] }
0x2165   : > { %v6012_v51 = vmul.f32 %v5987_v35, %v10089_v39  ;;  %v6742_v39 = vld [vmem:[%s10256_s16 + $0x2b8] sm:$0xff] }
0x2166   : > { %v5991_v7 = vmul.f32 0.5, %v5990_v58  ;;  %6141 = vmatpush.msra.mxu3 %v6742_v39 }
0x2167   : > { %v6022_v25 = vmul.f32 %v10126_v31, %v6012_v51 }
0x2168   : > { %v5992_v59 = vsub.f32 1.5, %v5991_v7  ;;  %6142 = vmatpush.msra.mxu3 %v6741_v44 }
0x2169   : > { %v7203_v38 = vpop.eup %7202  ;;  %v6032_v14 = vadd.f32 %v10131_v17, %v6022_v25 }
0x216a   : > { %v5993_v29 = vmul.f32 %v7201_v4, %v5992_v59  ;;  %v5999_v45 = vmul.f32 %v7203_v38, %v5937_v24  ;;  %vm6005_vm11 = vweird.f32 %v7203_v38  ;;  %6143 = vmatpush.msra.mxu3 %v6740_v53 }
0x216b   : > { %6732 = vmatmul.msk.f32.gmra.mxu0 %vm1154_vm6, %v6032_v14  ;;  %vm6006_vm13 = vmor %vm6004_vm12, %vm6005_vm11 }
0x216c   : > { %v5997_v10 = vsel %vm5996_vm10, %v7201_v4, %v5993_v29  ;;  %v6000_v52 = vmul.f32 %v7203_v38, %v5999_v45  ;;  %6144 = vmatpush.msra.mxu3 %v6739_v33 }
0x216d   : > { %v6013_v12 = vmul.f32 %v5997_v10, %v10096_v46  ;;  %v6738_v46 = vld [vmem:[%s10256_s16 + $0x298] sm:$0xff] }
0x216e   : > { %v6001_v55 = vmul.f32 0.5, %v6000_v52  ;;  %6145 = vmatpush.msra.mxu3 %v6738_v46 }
0x216f   : > { %v6023_v9 = vmul.f32 %v10126_v31, %v6013_v12 }
0x2170   : > { %v6002_v62 = vsub.f32 1.5, %v6001_v55  ;;  %6146 = vmatpush.msra.mxu3 %v6737_v30 }
0x2171   : > { %v6033_v19 = vadd.f32 %v10131_v17, %v6023_v9 }
0x2172   : > { %v6003_v41 = vmul.f32 %v7203_v38, %v6002_v62  ;;  %6147 = vmatpush.msra.mxu3 %v6736_v34 }
0x2173   : > { %6733 = vmatmul.msk.f32.gmra.mxu0 %vm1154_vm6, %v6033_v19 }
0x2174   : > { %v6007_v36 = vsel %vm6006_vm13, %v7203_v38, %v6003_v41 }
0x2175   : > { %v6014_v56 = vmul.f32 %v6007_v36, %v10103_v49  ;;  %v6735_v49 = vld [vmem:[%s10256_s16 + $0x280] sm:$0xff] }
0x2176   : > { %6148 = vmatpush.msra.mxu3 %v6735_v49 }
0x2177   : > { %v6024_v1 = vmul.f32 %v10126_v31, %v6014_v56  ;;  %v6892_v31 = vld [vmem:[%s10255_s15 + $0x5] ss:$0 sm:$0xff] }
0x2179   : > { %v6034_v60 = vadd.f32 %v10131_v17, %v6024_v1 }
0x217b   : > { %6734 = vmatmul.msk.f32.gmra.mxu0 %vm1154_vm6, %v6034_v60 }
0x21a9   : > { %v6083_v17 = vpop.f32.mrf.mxu0 }
0x21aa   : > { %v6084_v47 = vadd.f32 %v6892_v31, %v6083_v17 }
0x21ac   : > { %v6104_v6 = vmax.f32 %v6084_v47, 0.0 }
0x21ae   : > { %6149 = vmatmul.f32.vlgmr.msra.gmra.mxu3 %v6104_v6 }
0x21b1   : > { %v6086_v57 = vpop.f32.mrf.mxu0 }
0x21b2   : > { %v6087_v32 = vadd.f32 %v6892_v31, %v6086_v57 }
0x21b4   : > { %v6105_v40 = vmax.f32 %v6087_v32, 0.0 }
0x21b6   : > { %6152 = vmatmul.f32.gmra.mxu3 %v6105_v40 }
0x21b9   : > { %v6089_v48 = vpop.f32.mrf.mxu0 }
0x21ba   : > { %v6090_v16 = vadd.f32 %v6892_v31, %v6089_v48 }
0x21bc   : > { %v6106_v54 = vmax.f32 %v6090_v16, 0.0 }
0x21be   : > { %6155 = vmatmul.f32.gmra.mxu3 %v6106_v54 }
0x21e0   : > { %v6092_v23 = vpop.f32.mrf.mxu0 }
0x21e1   : > { %v6093_v5 = vadd.f32 %v6892_v31, %v6092_v23 }
0x21e3   : > { %v6107_v42 = vmax.f32 %v6093_v5, 0.0 }
0x21e5   : > { %6158 = vmatmul.f32.gmra.mxu3 %v6107_v42 }
0x21e8   : > { %v6095_v27 = vpop.f32.mrf.mxu0 }
0x21e9   : > { %v6096_v18 = vadd.f32 %v6892_v31, %v6095_v27 }
0x21eb   : > { %v6108_v63 = vmax.f32 %v6096_v18, 0.0 }
0x21ed   : > { %6161 = vmatmul.f32.gmra.mxu3 %v6108_v63 }
0x21f0   : > { %v6098_v50 = vpop.f32.mrf.mxu0 }
0x21f1   : > { %v6099_v22 = vadd.f32 %v6892_v31, %v6098_v50 }
0x21f3   : > { %v6109_v4 = vmax.f32 %v6099_v22, 0.0 }
0x21f5   : > { %6164 = vmatmul.f32.gmra.mxu3 %v6109_v4 }
0x21f8   : > { %v6101_v24 = vpop.f32.mrf.mxu0 }
0x21f9   : > { %v6102_v28 = vadd.f32 %v6892_v31, %v6101_v24 }
0x21fb   : > { %v6110_v2 = vmax.f32 %v6102_v28, 0.0 }
0x21fd   : > { %6167 = vmatmul.f32.gmra.mxu3 %v6110_v2 }
0x2231   : > { %v6150_v15 = vpop.f32.mrf.mxu3 }
0x2232   : > { %v6151_v21 = vadd.f32 %v6893_v8, %v6150_v15 }
0x2234   : > { %v6171_v35 = vadd.f32 %v6151_v21, %v10025_v0 }
0x2236   : > { %6178 = vst.msk [vmem:[%s793_s6] sm:$0xff] %vm1154_vm6, %v6171_v35 }
0x2239   : > { %v6153_v58 = vpop.f32.mrf.mxu3 }
0x223a   : > { %v6154_v51 = vadd.f32 %v6893_v8, %v6153_v58 }
0x223c   : > { %v6172_v11 = vadd.f32 %v6154_v51, %v10030_v37 }
0x223e   : > { %6179 = vst.msk [vmem:[%s793_s6 + $0x8] sm:$0xff] %vm1154_vm6, %v6172_v11 }
0x2241   : > { %v6156_v7 = vpop.f32.mrf.mxu3 }
0x2242   : > { %v6157_v25 = vadd.f32 %v6893_v8, %v6156_v7 }
0x2244   : > { %v6173_v26 = vadd.f32 %v6157_v25, %v10035_v20 }
0x2246   : > { %6180 = vst.msk [vmem:[%s793_s6 + $0x10] sm:$0xff] %vm1154_vm6, %v6173_v26 }
0x2268   : > { %v6159_v59 = vpop.f32.mrf.mxu3 }
0x2269   : > { %v6160_v38 = vadd.f32 %v6893_v8, %v6159_v59 }
0x226b   : > { %v6174_v14 = vadd.f32 %v6160_v38, %v10040_v61 }
0x226d   : > { %6181 = vst.msk [vmem:[%s793_s6 + $0x18] sm:$0xff] %vm1154_vm6, %v6174_v14 }
0x2270   : > { %v6162_v0 = vpop.f32.mrf.mxu3 }
0x2271   : > { %v6163_v39 = vadd.f32 %v6893_v8, %v6162_v0 }
0x2273   : > { %v6175_v29 = vadd.f32 %v6163_v39, %v10045_v3 }
0x2275   : > { %6182 = vst.msk [vmem:[%s793_s6 + $0x20] sm:$0xff] %vm1154_vm6, %v6175_v29 }
0x2278   : > { %v6165_v37 = vpop.f32.mrf.mxu3 }
0x2279   : > { %v6166_v45 = vadd.f32 %v6893_v8, %v6165_v37 }
0x227b   : > { %v6176_v44 = vadd.f32 %v6166_v45, %v10050_v13 }
0x227d   : > { %6183 = vst.msk [vmem:[%s793_s6 + $0x28] sm:$0xff] %vm1154_vm6, %v6176_v44 }
0x2280   : > { %v6168_v20 = vpop.f32.mrf.mxu3 }
0x2281   : > { %v6169_v10 = vadd.f32 %v6893_v8, %v6168_v20 }
0x2283   : > { %v6177_v52 = vadd.f32 %v6169_v10, %v10055_v43 }
0x2285   : > { %6184 = vst.msk [vmem:[%s793_s6 + $0x30] sm:$0xff] %vm1154_vm6, %v6177_v52 }
0x2286 PF: > { %s10298_s1 = sld [smem:[#allocation2_spill]] }
0x228c   : > { %s35_s5 = sadd.s32 1, %s10298_s1  }
0x228d   : > { %p32_p6 = scmp.ge.s32.totalorder %s35_s5, 4  }
0x228f   :  { %34 = sbr.rel (!%p32_p6) target bundleno = 13 (0xd), region = 214 }

</bundles_post_ra>
